<compile_context>
chip_gen: v6e
topology: v6e:2x2x1
jax: 0.10.0
libtpu: 0.0.40
codegen_flags: <defaults>
</compile_context>

<pallas_src>
import jax
import jax.numpy as jnp
from jax.experimental import pallas as pl
from jax.experimental.pallas import tpu as pltpu
import numpy as np

INPUT_SIZE = 5
HIDDEN = 100
OUTPUT = 1
SEQ_LEN = 8

HP = 128                       # hidden padded to lane width
IN_PAD = 8                     # input padded to sublane width

_HIGHEST = jax.lax.Precision.HIGHEST


def lstm_kernel(x_ref, w_ih_ref, w_hh_ref, b_ref, w_out_ref, b_out_ref, out_ref):
    """Single-batch LSTM forward + linear head, fused gates, hidden padded to 128 lanes.

    x_ref     : (seq, IN_PAD)    time-major input, zero-padded feature columns
    w_ih_ref  : (IN_PAD, 4*HP)   fused input weights; gate g in lanes [g*HP, (g+1)*HP);
                                 i/f/o columns pre-scaled by 0.5 (sigmoid-as-tanh)
    w_hh_ref  : (HP, 4*HP)       fused recurrent weights, same layout / same pre-scale
    b_ref     : (1, 4*HP)        combined b_ih + b_hh, same pre-scale, zero on padded lanes
    w_out_ref : (1, HP)          output head row vector (zero on padded lanes)
    b_out_ref : (1, 1)
    out_ref   : (1, 1)           prediction at the last timestep
    """
    seq_len = x_ref.shape[0]

    # Hoisted input projection: one (seq, 4*HP) matmul + bias add, off the serial path.
    x_pre = (jnp.dot(x_ref[...], w_ih_ref[...],
                     preferred_element_type=jnp.float32, precision=_HIGHEST)
             + b_ref[...])

    h = jnp.zeros((1, HP), jnp.float32)
    c = jnp.zeros((1, HP), jnp.float32)

    # Statically unrolled recurrence: exactly one fused MXU matmul + one tanh row per step.
    for t in range(seq_len):
        gates = x_pre[t:t + 1, :] + jnp.dot(
            h, w_hh_ref[...],
            preferred_element_type=jnp.float32, precision=_HIGHEST)   # (1, 4*HP)

        # Single EUP tanh over the whole fused gate row; i/f/o were pre-scaled by 0.5
        # at pack time, so sigmoid(x) == 0.5 * tanh(0.5*x) + 0.5 == 0.5 * tg + 0.5.
        tg = jnp.tanh(gates)
        i = 0.5 * tg[:, 0 * HP:1 * HP] + 0.5
        f = 0.5 * tg[:, 1 * HP:2 * HP] + 0.5
        g = tg[:, 2 * HP:3 * HP]
        o = 0.5 * tg[:, 3 * HP:4 * HP] + 0.5

        c = f * c + i * g
        h = o * jnp.tanh(c)

    # Output head: VPU multiply + cross-lane reduce (XLU) instead of an N=1 MXU matmul.
    out_ref[...] = (jnp.sum(h * w_out_ref[...], axis=-1, keepdims=True)
                    + b_out_ref[...])


def pack_params(params):
    """One-time construction of fused / padded / pre-scaled kernel operands.

    Done once at init — NOT on the per-call path. PyTorch packs gates along the 4H axis
    in order (i, f, g, o); each gate gets its own 128-lane slab here. The 0.5 sigmoid-as-tanh
    pre-scale is folded into the i, f, o slabs of W_ih, W_hh and b exactly once.
    """
    w_ih, w_hh, b_ih, b_hh, w_lin, b_lin = params
    H = HIDDEN

    # Per-gate pre-scale: sigmoid gates (i, f, o) get 0.5; the tanh gate (g) stays 1.0.
    gate_scale = jnp.array([0.5, 0.5, 1.0, 0.5], jnp.float32)

    w_ih_g = w_ih.reshape(4, H, INPUT_SIZE).transpose(0, 2, 1)            # (4, in, H)
    w_ih_g = jnp.pad(w_ih_g, ((0, 0), (0, IN_PAD - INPUT_SIZE), (0, HP - H)))
    w_ih_g = w_ih_g * gate_scale.reshape(4, 1, 1)
    w_ih_f = w_ih_g.transpose(1, 0, 2).reshape(IN_PAD, 4 * HP)            # (IN_PAD, 4*HP)

    w_hh_g = w_hh.reshape(4, H, H).transpose(0, 2, 1)                     # (4, H_in, H_out)
    w_hh_g = jnp.pad(w_hh_g, ((0, 0), (0, HP - H), (0, HP - H)))
    w_hh_g = w_hh_g * gate_scale.reshape(4, 1, 1)
    w_hh_f = w_hh_g.transpose(1, 0, 2).reshape(HP, 4 * HP)                # (HP, 4*HP)

    b_g = (b_ih + b_hh).reshape(4, H)
    b_g = jnp.pad(b_g, ((0, 0), (0, HP - H))) * gate_scale.reshape(4, 1)
    b_f = b_g.reshape(1, 4 * HP)                                          # (1, 4*HP)

    w_out = jnp.pad(w_lin.reshape(1, H), ((0, 0), (0, HP - H)))           # (1, HP)
    b_out = b_lin.reshape(1, OUTPUT)                                      # (1, 1)

    return (w_ih_f, w_hh_f, b_f, w_out, b_out)


@jax.jit
def lstm_model_forward(input_seq, w_ih_f, w_hh_f, b_f, w_out, b_out):
    """Equivalent of LSTMModel.forward(input_seq) with zero initial hidden/cell state.

    Takes the pre-packed operands from pack_params(); the only per-call wrapper work is
    the tiny input pad, fused by jit with the pallas_call dispatch.
    """
    x_pad = jnp.pad(input_seq, ((0, 0), (0, IN_PAD - INPUT_SIZE)))        # (seq, IN_PAD)

    vmem_spec = pl.BlockSpec(memory_space=pltpu.MemorySpace.VMEM)
    out = pl.pallas_call(
        lstm_kernel,
        out_shape=jax.ShapeDtypeStruct((1, OUTPUT), jnp.float32),
        in_specs=[vmem_spec] * 6,
        out_specs=vmem_spec,
    )(x_pad, w_ih_f, w_hh_f, b_f, w_out, b_out)
    # PyTorch returns predictions[-1] with shape (output_size,)
    return out.reshape(OUTPUT)


def init_params(key):
    """Deterministic init matching PyTorch shapes: uniform(-1/sqrt(H), 1/sqrt(H))."""
    ks = jax.random.split(key, 6)
    bound = 1.0 / np.sqrt(HIDDEN)
    u = lambda k, shape: jax.random.uniform(k, shape, jnp.float32, -bound, bound)
    w_ih = u(ks[0], (4 * HIDDEN, INPUT_SIZE))   # weight_ih_l0
    w_hh = u(ks[1], (4 * HIDDEN, HIDDEN))       # weight_hh_l0
    b_ih = u(ks[2], (4 * HIDDEN,))              # bias_ih_l0
    b_hh = u(ks[3], (4 * HIDDEN,))              # bias_hh_l0
    w_lin = u(ks[4], (OUTPUT, HIDDEN))          # linear.weight
    b_lin = u(ks[5], (OUTPUT,))                 # linear.bias
    return (w_ih, w_hh, b_ih, b_hh, w_lin, b_lin)


def reference_forward(input_seq, params):
    """Pure-JAX reference mirroring torch.nn.LSTM semantics (for a correctness check)."""
    w_ih, w_hh, b_ih, b_hh, w_lin, b_lin = params
    H = HIDDEN
    h = jnp.zeros((H,), jnp.float32)
    c = jnp.zeros((H,), jnp.float32)
    for t in range(input_seq.shape[0]):
        gates = (jnp.dot(w_ih, input_seq[t], precision=_HIGHEST) + b_ih
                 + jnp.dot(w_hh, h, precision=_HIGHEST) + b_hh)
        i = jax.nn.sigmoid(gates[0 * H:1 * H])
        f = jax.nn.sigmoid(gates[1 * H:2 * H])
        g = jnp.tanh(gates[2 * H:3 * H])
        o = jax.nn.sigmoid(gates[3 * H:4 * H])
        c = f * c + i * g
        h = o * jnp.tanh(c)
    return jnp.dot(w_lin, h, precision=_HIGHEST) + b_lin


if __name__ == "__main__":
    key = jax.random.PRNGKey(0)
    k_param, k_data = jax.random.split(key)
    params = init_params(k_param)

    # One-time operand packing (off the per-call path).
    packed = jax.block_until_ready(pack_params(params))

    # input_seq: (seq_len, input_size) — matches input_seq.view(len(input_seq), 1, -1)
    input_seq = jax.random.normal(k_data, (SEQ_LEN, INPUT_SIZE), jnp.float32)

    pred = jax.block_until_ready(lstm_model_forward(input_seq, *packed))
    ref = jax.block_until_ready(reference_forward(input_seq, params))

    assert pred.shape == (OUTPUT,)
    np.testing.assert_allclose(np.asarray(pred), np.asarray(ref), rtol=1e-4, atol=1e-5)
    print("KERNEL_OK")
</pallas_src>

<mosaic_0001>
module attributes {stable_mosaic.version = 11 : i64} {
  func.func @lstm_kernel(%arg0: memref<8x8xf32, #tpu.memory_space<vmem>>, %arg1: memref<8x512xf32, #tpu.memory_space<vmem>>, %arg2: memref<128x512xf32, #tpu.memory_space<vmem>>, %arg3: memref<1x512xf32, #tpu.memory_space<vmem>>, %arg4: memref<1x128xf32, #tpu.memory_space<vmem>>, %arg5: memref<1x1xf32, #tpu.memory_space<vmem>>, %arg6: memref<1x1xf32, #tpu.memory_space<vmem>>) attributes {dimension_semantics = [], scalar_prefetch = 0 : i64, scratch_operands = 0 : i64, tpu.core_type = #tpu.core_type<tc>} {
    %c0 = arith.constant 0 : index
    %c0_0 = arith.constant 0 : index
    %0 = vector.load %arg0[%c0, %c0_0] : memref<8x8xf32, #tpu.memory_space<vmem>>, vector<8x8xf32>
    %c0_1 = arith.constant 0 : index
    %c0_2 = arith.constant 0 : index
    %1 = vector.load %arg1[%c0_1, %c0_2] : memref<8x512xf32, #tpu.memory_space<vmem>>, vector<8x512xf32>
    %cst = arith.constant dense<0.000000e+00> : vector<8x512xf32>
    %2 = tpu.matmul %0, %1, %cst {dimension_numbers = #tpu.dot_dimension_numbers<[1], [0], [0], [1], [0, 0, 1, 1], [], []>, precision = #tpu.contract_precision<fp32>} : vector<8x8xf32>, vector<8x512xf32>, vector<8x512xf32> -> vector<8x512xf32>
    %c0_3 = arith.constant 0 : index
    %c0_4 = arith.constant 0 : index
    %3 = vector.load %arg3[%c0_3, %c0_4] : memref<1x512xf32, #tpu.memory_space<vmem>>, vector<1x512xf32>
    %4 = vector.broadcast %3 : vector<1x512xf32> to vector<8x512xf32>
    %5 = arith.addf %2, %4 : vector<8x512xf32>
    %cst_5 = arith.constant 0.000000e+00 : f32
    %6 = vector.broadcast %cst_5 : f32 to vector<1x128xf32>
    %cst_6 = arith.constant 0.000000e+00 : f32
    %7 = vector.broadcast %cst_6 : f32 to vector<1x128xf32>
    %8 = vector.extract_strided_slice %5 {offsets = [0, 0], sizes = [1, 512], strides = [1, 1]} : vector<8x512xf32> to vector<1x512xf32>
    %c0_7 = arith.constant 0 : index
    %c0_8 = arith.constant 0 : index
    %9 = vector.load %arg2[%c0_7, %c0_8] : memref<128x512xf32, #tpu.memory_space<vmem>>, vector<128x512xf32>
    %cst_9 = arith.constant dense<0.000000e+00> : vector<1x512xf32>
    %10 = tpu.matmul %6, %9, %cst_9 {dimension_numbers = #tpu.dot_dimension_numbers<[1], [0], [0], [1], [0, 0, 1, 1], [], []>, precision = #tpu.contract_precision<fp32>} : vector<1x128xf32>, vector<128x512xf32>, vector<1x512xf32> -> vector<1x512xf32>
    %11 = arith.addf %8, %10 : vector<1x512xf32>
    %12 = math.tanh %11 : vector<1x512xf32>
    %13 = vector.extract_strided_slice %12 {offsets = [0, 0], sizes = [1, 128], strides = [1, 1]} : vector<1x512xf32> to vector<1x128xf32>
    %cst_10 = arith.constant 5.000000e-01 : f32
    %14 = vector.broadcast %cst_10 : f32 to vector<1x128xf32>
    %15 = arith.mulf %14, %13 : vector<1x128xf32>
    %cst_11 = arith.constant 5.000000e-01 : f32
    %16 = vector.broadcast %cst_11 : f32 to vector<1x128xf32>
    %17 = arith.addf %15, %16 : vector<1x128xf32>
    %18 = vector.extract_strided_slice %12 {offsets = [0, 128], sizes = [1, 128], strides = [1, 1]} : vector<1x512xf32> to vector<1x128xf32>
    %cst_12 = arith.constant 5.000000e-01 : f32
    %19 = vector.broadcast %cst_12 : f32 to vector<1x128xf32>
    %20 = arith.mulf %19, %18 : vector<1x128xf32>
    %cst_13 = arith.constant 5.000000e-01 : f32
    %21 = vector.broadcast %cst_13 : f32 to vector<1x128xf32>
    %22 = arith.addf %20, %21 : vector<1x128xf32>
    %23 = vector.extract_strided_slice %12 {offsets = [0, 256], sizes = [1, 128], strides = [1, 1]} : vector<1x512xf32> to vector<1x128xf32>
    %24 = vector.extract_strided_slice %12 {offsets = [0, 384], sizes = [1, 128], strides = [1, 1]} : vector<1x512xf32> to vector<1x128xf32>
    %cst_14 = arith.constant 5.000000e-01 : f32
    %25 = vector.broadcast %cst_14 : f32 to vector<1x128xf32>
    %26 = arith.mulf %25, %24 : vector<1x128xf32>
    %cst_15 = arith.constant 5.000000e-01 : f32
    %27 = vector.broadcast %cst_15 : f32 to vector<1x128xf32>
    %28 = arith.addf %26, %27 : vector<1x128xf32>
    %29 = arith.mulf %22, %7 : vector<1x128xf32>
    %30 = arith.mulf %17, %23 : vector<1x128xf32>
    %31 = arith.addf %29, %30 : vector<1x128xf32>
    %32 = math.tanh %31 : vector<1x128xf32>
    %33 = arith.mulf %28, %32 : vector<1x128xf32>
    %34 = vector.extract_strided_slice %5 {offsets = [1, 0], sizes = [1, 512], strides = [1, 1]} : vector<8x512xf32> to vector<1x512xf32>
    %c0_16 = arith.constant 0 : index
    %c0_17 = arith.constant 0 : index
    %35 = vector.load %arg2[%c0_16, %c0_17] : memref<128x512xf32, #tpu.memory_space<vmem>>, vector<128x512xf32>
    %cst_18 = arith.constant dense<0.000000e+00> : vector<1x512xf32>
    %36 = tpu.matmul %33, %35, %cst_18 {dimension_numbers = #tpu.dot_dimension_numbers<[1], [0], [0], [1], [0, 0, 1, 1], [], []>, precision = #tpu.contract_precision<fp32>} : vector<1x128xf32>, vector<128x512xf32>, vector<1x512xf32> -> vector<1x512xf32>
    %37 = arith.addf %34, %36 : vector<1x512xf32>
    %38 = math.tanh %37 : vector<1x512xf32>
    %39 = vector.extract_strided_slice %38 {offsets = [0, 0], sizes = [1, 128], strides = [1, 1]} : vector<1x512xf32> to vector<1x128xf32>
    %cst_19 = arith.constant 5.000000e-01 : f32
    %40 = vector.broadcast %cst_19 : f32 to vector<1x128xf32>
    %41 = arith.mulf %40, %39 : vector<1x128xf32>
    %cst_20 = arith.constant 5.000000e-01 : f32
    %42 = vector.broadcast %cst_20 : f32 to vector<1x128xf32>
    %43 = arith.addf %41, %42 : vector<1x128xf32>
    %44 = vector.extract_strided_slice %38 {offsets = [0, 128], sizes = [1, 128], strides = [1, 1]} : vector<1x512xf32> to vector<1x128xf32>
    %cst_21 = arith.constant 5.000000e-01 : f32
    %45 = vector.broadcast %cst_21 : f32 to vector<1x128xf32>
    %46 = arith.mulf %45, %44 : vector<1x128xf32>
    %cst_22 = arith.constant 5.000000e-01 : f32
    %47 = vector.broadcast %cst_22 : f32 to vector<1x128xf32>
    %48 = arith.addf %46, %47 : vector<1x128xf32>
    %49 = vector.extract_strided_slice %38 {offsets = [0, 256], sizes = [1, 128], strides = [1, 1]} : vector<1x512xf32> to vector<1x128xf32>
    %50 = vector.extract_strided_slice %38 {offsets = [0, 384], sizes = [1, 128], strides = [1, 1]} : vector<1x512xf32> to vector<1x128xf32>
    %cst_23 = arith.constant 5.000000e-01 : f32
    %51 = vector.broadcast %cst_23 : f32 to vector<1x128xf32>
    %52 = arith.mulf %51, %50 : vector<1x128xf32>
    %cst_24 = arith.constant 5.000000e-01 : f32
    %53 = vector.broadcast %cst_24 : f32 to vector<1x128xf32>
    %54 = arith.addf %52, %53 : vector<1x128xf32>
    %55 = arith.mulf %48, %31 : vector<1x128xf32>
    %56 = arith.mulf %43, %49 : vector<1x128xf32>
    %57 = arith.addf %55, %56 : vector<1x128xf32>
    %58 = math.tanh %57 : vector<1x128xf32>
    %59 = arith.mulf %54, %58 : vector<1x128xf32>
    %60 = vector.extract_strided_slice %5 {offsets = [2, 0], sizes = [1, 512], strides = [1, 1]} : vector<8x512xf32> to vector<1x512xf32>
    %c0_25 = arith.constant 0 : index
    %c0_26 = arith.constant 0 : index
    %61 = vector.load %arg2[%c0_25, %c0_26] : memref<128x512xf32, #tpu.memory_space<vmem>>, vector<128x512xf32>
    %cst_27 = arith.constant dense<0.000000e+00> : vector<1x512xf32>
    %62 = tpu.matmul %59, %61, %cst_27 {dimension_numbers = #tpu.dot_dimension_numbers<[1], [0], [0], [1], [0, 0, 1, 1], [], []>, precision = #tpu.contract_precision<fp32>} : vector<1x128xf32>, vector<128x512xf32>, vector<1x512xf32> -> vector<1x512xf32>
    %63 = arith.addf %60, %62 : vector<1x512xf32>
    %64 = math.tanh %63 : vector<1x512xf32>
    %65 = vector.extract_strided_slice %64 {offsets = [0, 0], sizes = [1, 128], strides = [1, 1]} : vector<1x512xf32> to vector<1x128xf32>
    %cst_28 = arith.constant 5.000000e-01 : f32
    %66 = vector.broadcast %cst_28 : f32 to vector<1x128xf32>
    %67 = arith.mulf %66, %65 : vector<1x128xf32>
    %cst_29 = arith.constant 5.000000e-01 : f32
    %68 = vector.broadcast %cst_29 : f32 to vector<1x128xf32>
    %69 = arith.addf %67, %68 : vector<1x128xf32>
    %70 = vector.extract_strided_slice %64 {offsets = [0, 128], sizes = [1, 128], strides = [1, 1]} : vector<1x512xf32> to vector<1x128xf32>
    %cst_30 = arith.constant 5.000000e-01 : f32
    %71 = vector.broadcast %cst_30 : f32 to vector<1x128xf32>
    %72 = arith.mulf %71, %70 : vector<1x128xf32>
    %cst_31 = arith.constant 5.000000e-01 : f32
    %73 = vector.broadcast %cst_31 : f32 to vector<1x128xf32>
    %74 = arith.addf %72, %73 : vector<1x128xf32>
    %75 = vector.extract_strided_slice %64 {offsets = [0, 256], sizes = [1, 128], strides = [1, 1]} : vector<1x512xf32> to vector<1x128xf32>
    %76 = vector.extract_strided_slice %64 {offsets = [0, 384], sizes = [1, 128], strides = [1, 1]} : vector<1x512xf32> to vector<1x128xf32>
    %cst_32 = arith.constant 5.000000e-01 : f32
    %77 = vector.broadcast %cst_32 : f32 to vector<1x128xf32>
    %78 = arith.mulf %77, %76 : vector<1x128xf32>
    %cst_33 = arith.constant 5.000000e-01 : f32
    %79 = vector.broadcast %cst_33 : f32 to vector<1x128xf32>
    %80 = arith.addf %78, %79 : vector<1x128xf32>
    %81 = arith.mulf %74, %57 : vector<1x128xf32>
    %82 = arith.mulf %69, %75 : vector<1x128xf32>
    %83 = arith.addf %81, %82 : vector<1x128xf32>
    %84 = math.tanh %83 : vector<1x128xf32>
    %85 = arith.mulf %80, %84 : vector<1x128xf32>
    %86 = vector.extract_strided_slice %5 {offsets = [3, 0], sizes = [1, 512], strides = [1, 1]} : vector<8x512xf32> to vector<1x512xf32>
    %c0_34 = arith.constant 0 : index
    %c0_35 = arith.constant 0 : index
    %87 = vector.load %arg2[%c0_34, %c0_35] : memref<128x512xf32, #tpu.memory_space<vmem>>, vector<128x512xf32>
    %cst_36 = arith.constant dense<0.000000e+00> : vector<1x512xf32>
    %88 = tpu.matmul %85, %87, %cst_36 {dimension_numbers = #tpu.dot_dimension_numbers<[1], [0], [0], [1], [0, 0, 1, 1], [], []>, precision = #tpu.contract_precision<fp32>} : vector<1x128xf32>, vector<128x512xf32>, vector<1x512xf32> -> vector<1x512xf32>
    %89 = arith.addf %86, %88 : vector<1x512xf32>
    %90 = math.tanh %89 : vector<1x512xf32>
    %91 = vector.extract_strided_slice %90 {offsets = [0, 0], sizes = [1, 128], strides = [1, 1]} : vector<1x512xf32> to vector<1x128xf32>
    %cst_37 = arith.constant 5.000000e-01 : f32
    %92 = vector.broadcast %cst_37 : f32 to vector<1x128xf32>
    %93 = arith.mulf %92, %91 : vector<1x128xf32>
    %cst_38 = arith.constant 5.000000e-01 : f32
    %94 = vector.broadcast %cst_38 : f32 to vector<1x128xf32>
    %95 = arith.addf %93, %94 : vector<1x128xf32>
    %96 = vector.extract_strided_slice %90 {offsets = [0, 128], sizes = [1, 128], strides = [1, 1]} : vector<1x512xf32> to vector<1x128xf32>
    %cst_39 = arith.constant 5.000000e-01 : f32
    %97 = vector.broadcast %cst_39 : f32 to vector<1x128xf32>
    %98 = arith.mulf %97, %96 : vector<1x128xf32>
    %cst_40 = arith.constant 5.000000e-01 : f32
    %99 = vector.broadcast %cst_40 : f32 to vector<1x128xf32>
    %100 = arith.addf %98, %99 : vector<1x128xf32>
    %101 = vector.extract_strided_slice %90 {offsets = [0, 256], sizes = [1, 128], strides = [1, 1]} : vector<1x512xf32> to vector<1x128xf32>
    %102 = vector.extract_strided_slice %90 {offsets = [0, 384], sizes = [1, 128], strides = [1, 1]} : vector<1x512xf32> to vector<1x128xf32>
    %cst_41 = arith.constant 5.000000e-01 : f32
    %103 = vector.broadcast %cst_41 : f32 to vector<1x128xf32>
    %104 = arith.mulf %103, %102 : vector<1x128xf32>
    %cst_42 = arith.constant 5.000000e-01 : f32
    %105 = vector.broadcast %cst_42 : f32 to vector<1x128xf32>
    %106 = arith.addf %104, %105 : vector<1x128xf32>
    %107 = arith.mulf %100, %83 : vector<1x128xf32>
    %108 = arith.mulf %95, %101 : vector<1x128xf32>
    %109 = arith.addf %107, %108 : vector<1x128xf32>
    %110 = math.tanh %109 : vector<1x128xf32>
    %111 = arith.mulf %106, %110 : vector<1x128xf32>
    %112 = vector.extract_strided_slice %5 {offsets = [4, 0], sizes = [1, 512], strides = [1, 1]} : vector<8x512xf32> to vector<1x512xf32>
    %c0_43 = arith.constant 0 : index
    %c0_44 = arith.constant 0 : index
    %113 = vector.load %arg2[%c0_43, %c0_44] : memref<128x512xf32, #tpu.memory_space<vmem>>, vector<128x512xf32>
    %cst_45 = arith.constant dense<0.000000e+00> : vector<1x512xf32>
    %114 = tpu.matmul %111, %113, %cst_45 {dimension_numbers = #tpu.dot_dimension_numbers<[1], [0], [0], [1], [0, 0, 1, 1], [], []>, precision = #tpu.contract_precision<fp32>} : vector<1x128xf32>, vector<128x512xf32>, vector<1x512xf32> -> vector<1x512xf32>
    %115 = arith.addf %112, %114 : vector<1x512xf32>
    %116 = math.tanh %115 : vector<1x512xf32>
    %117 = vector.extract_strided_slice %116 {offsets = [0, 0], sizes = [1, 128], strides = [1, 1]} : vector<1x512xf32> to vector<1x128xf32>
    %cst_46 = arith.constant 5.000000e-01 : f32
    %118 = vector.broadcast %cst_46 : f32 to vector<1x128xf32>
    %119 = arith.mulf %118, %117 : vector<1x128xf32>
    %cst_47 = arith.constant 5.000000e-01 : f32
    %120 = vector.broadcast %cst_47 : f32 to vector<1x128xf32>
    %121 = arith.addf %119, %120 : vector<1x128xf32>
    %122 = vector.extract_strided_slice %116 {offsets = [0, 128], sizes = [1, 128], strides = [1, 1]} : vector<1x512xf32> to vector<1x128xf32>
    %cst_48 = arith.constant 5.000000e-01 : f32
    %123 = vector.broadcast %cst_48 : f32 to vector<1x128xf32>
    %124 = arith.mulf %123, %122 : vector<1x128xf32>
    %cst_49 = arith.constant 5.000000e-01 : f32
    %125 = vector.broadcast %cst_49 : f32 to vector<1x128xf32>
    %126 = arith.addf %124, %125 : vector<1x128xf32>
    %127 = vector.extract_strided_slice %116 {offsets = [0, 256], sizes = [1, 128], strides = [1, 1]} : vector<1x512xf32> to vector<1x128xf32>
    %128 = vector.extract_strided_slice %116 {offsets = [0, 384], sizes = [1, 128], strides = [1, 1]} : vector<1x512xf32> to vector<1x128xf32>
    %cst_50 = arith.constant 5.000000e-01 : f32
    %129 = vector.broadcast %cst_50 : f32 to vector<1x128xf32>
    %130 = arith.mulf %129, %128 : vector<1x128xf32>
    %cst_51 = arith.constant 5.000000e-01 : f32
    %131 = vector.broadcast %cst_51 : f32 to vector<1x128xf32>
    %132 = arith.addf %130, %131 : vector<1x128xf32>
    %133 = arith.mulf %126, %109 : vector<1x128xf32>
    %134 = arith.mulf %121, %127 : vector<1x128xf32>
    %135 = arith.addf %133, %134 : vector<1x128xf32>
    %136 = math.tanh %135 : vector<1x128xf32>
    %137 = arith.mulf %132, %136 : vector<1x128xf32>
    %138 = vector.extract_strided_slice %5 {offsets = [5, 0], sizes = [1, 512], strides = [1, 1]} : vector<8x512xf32> to vector<1x512xf32>
    %c0_52 = arith.constant 0 : index
    %c0_53 = arith.constant 0 : index
    %139 = vector.load %arg2[%c0_52, %c0_53] : memref<128x512xf32, #tpu.memory_space<vmem>>, vector<128x512xf32>
    %cst_54 = arith.constant dense<0.000000e+00> : vector<1x512xf32>
    %140 = tpu.matmul %137, %139, %cst_54 {dimension_numbers = #tpu.dot_dimension_numbers<[1], [0], [0], [1], [0, 0, 1, 1], [], []>, precision = #tpu.contract_precision<fp32>} : vector<1x128xf32>, vector<128x512xf32>, vector<1x512xf32> -> vector<1x512xf32>
    %141 = arith.addf %138, %140 : vector<1x512xf32>
    %142 = math.tanh %141 : vector<1x512xf32>
    %143 = vector.extract_strided_slice %142 {offsets = [0, 0], sizes = [1, 128], strides = [1, 1]} : vector<1x512xf32> to vector<1x128xf32>
    %cst_55 = arith.constant 5.000000e-01 : f32
    %144 = vector.broadcast %cst_55 : f32 to vector<1x128xf32>
    %145 = arith.mulf %144, %143 : vector<1x128xf32>
    %cst_56 = arith.constant 5.000000e-01 : f32
    %146 = vector.broadcast %cst_56 : f32 to vector<1x128xf32>
    %147 = arith.addf %145, %146 : vector<1x128xf32>
    %148 = vector.extract_strided_slice %142 {offsets = [0, 128], sizes = [1, 128], strides = [1, 1]} : vector<1x512xf32> to vector<1x128xf32>
    %cst_57 = arith.constant 5.000000e-01 : f32
    %149 = vector.broadcast %cst_57 : f32 to vector<1x128xf32>
    %150 = arith.mulf %149, %148 : vector<1x128xf32>
    %cst_58 = arith.constant 5.000000e-01 : f32
    %151 = vector.broadcast %cst_58 : f32 to vector<1x128xf32>
    %152 = arith.addf %150, %151 : vector<1x128xf32>
    %153 = vector.extract_strided_slice %142 {offsets = [0, 256], sizes = [1, 128], strides = [1, 1]} : vector<1x512xf32> to vector<1x128xf32>
    %154 = vector.extract_strided_slice %142 {offsets = [0, 384], sizes = [1, 128], strides = [1, 1]} : vector<1x512xf32> to vector<1x128xf32>
    %cst_59 = arith.constant 5.000000e-01 : f32
    %155 = vector.broadcast %cst_59 : f32 to vector<1x128xf32>
    %156 = arith.mulf %155, %154 : vector<1x128xf32>
    %cst_60 = arith.constant 5.000000e-01 : f32
    %157 = vector.broadcast %cst_60 : f32 to vector<1x128xf32>
    %158 = arith.addf %156, %157 : vector<1x128xf32>
    %159 = arith.mulf %152, %135 : vector<1x128xf32>
    %160 = arith.mulf %147, %153 : vector<1x128xf32>
    %161 = arith.addf %159, %160 : vector<1x128xf32>
    %162 = math.tanh %161 : vector<1x128xf32>
    %163 = arith.mulf %158, %162 : vector<1x128xf32>
    %164 = vector.extract_strided_slice %5 {offsets = [6, 0], sizes = [1, 512], strides = [1, 1]} : vector<8x512xf32> to vector<1x512xf32>
    %c0_61 = arith.constant 0 : index
    %c0_62 = arith.constant 0 : index
    %165 = vector.load %arg2[%c0_61, %c0_62] : memref<128x512xf32, #tpu.memory_space<vmem>>, vector<128x512xf32>
    %cst_63 = arith.constant dense<0.000000e+00> : vector<1x512xf32>
    %166 = tpu.matmul %163, %165, %cst_63 {dimension_numbers = #tpu.dot_dimension_numbers<[1], [0], [0], [1], [0, 0, 1, 1], [], []>, precision = #tpu.contract_precision<fp32>} : vector<1x128xf32>, vector<128x512xf32>, vector<1x512xf32> -> vector<1x512xf32>
    %167 = arith.addf %164, %166 : vector<1x512xf32>
    %168 = math.tanh %167 : vector<1x512xf32>
    %169 = vector.extract_strided_slice %168 {offsets = [0, 0], sizes = [1, 128], strides = [1, 1]} : vector<1x512xf32> to vector<1x128xf32>
    %cst_64 = arith.constant 5.000000e-01 : f32
    %170 = vector.broadcast %cst_64 : f32 to vector<1x128xf32>
    %171 = arith.mulf %170, %169 : vector<1x128xf32>
    %cst_65 = arith.constant 5.000000e-01 : f32
    %172 = vector.broadcast %cst_65 : f32 to vector<1x128xf32>
    %173 = arith.addf %171, %172 : vector<1x128xf32>
    %174 = vector.extract_strided_slice %168 {offsets = [0, 128], sizes = [1, 128], strides = [1, 1]} : vector<1x512xf32> to vector<1x128xf32>
    %cst_66 = arith.constant 5.000000e-01 : f32
    %175 = vector.broadcast %cst_66 : f32 to vector<1x128xf32>
    %176 = arith.mulf %175, %174 : vector<1x128xf32>
    %cst_67 = arith.constant 5.000000e-01 : f32
    %177 = vector.broadcast %cst_67 : f32 to vector<1x128xf32>
    %178 = arith.addf %176, %177 : vector<1x128xf32>
    %179 = vector.extract_strided_slice %168 {offsets = [0, 256], sizes = [1, 128], strides = [1, 1]} : vector<1x512xf32> to vector<1x128xf32>
    %180 = vector.extract_strided_slice %168 {offsets = [0, 384], sizes = [1, 128], strides = [1, 1]} : vector<1x512xf32> to vector<1x128xf32>
    %cst_68 = arith.constant 5.000000e-01 : f32
    %181 = vector.broadcast %cst_68 : f32 to vector<1x128xf32>
    %182 = arith.mulf %181, %180 : vector<1x128xf32>
    %cst_69 = arith.constant 5.000000e-01 : f32
    %183 = vector.broadcast %cst_69 : f32 to vector<1x128xf32>
    %184 = arith.addf %182, %183 : vector<1x128xf32>
    %185 = arith.mulf %178, %161 : vector<1x128xf32>
    %186 = arith.mulf %173, %179 : vector<1x128xf32>
    %187 = arith.addf %185, %186 : vector<1x128xf32>
    %188 = math.tanh %187 : vector<1x128xf32>
    %189 = arith.mulf %184, %188 : vector<1x128xf32>
    %190 = vector.extract_strided_slice %5 {offsets = [7, 0], sizes = [1, 512], strides = [1, 1]} : vector<8x512xf32> to vector<1x512xf32>
    %c0_70 = arith.constant 0 : index
    %c0_71 = arith.constant 0 : index
    %191 = vector.load %arg2[%c0_70, %c0_71] : memref<128x512xf32, #tpu.memory_space<vmem>>, vector<128x512xf32>
    %cst_72 = arith.constant dense<0.000000e+00> : vector<1x512xf32>
    %192 = tpu.matmul %189, %191, %cst_72 {dimension_numbers = #tpu.dot_dimension_numbers<[1], [0], [0], [1], [0, 0, 1, 1], [], []>, precision = #tpu.contract_precision<fp32>} : vector<1x128xf32>, vector<128x512xf32>, vector<1x512xf32> -> vector<1x512xf32>
    %193 = arith.addf %190, %192 : vector<1x512xf32>
    %194 = math.tanh %193 : vector<1x512xf32>
    %195 = vector.extract_strided_slice %194 {offsets = [0, 0], sizes = [1, 128], strides = [1, 1]} : vector<1x512xf32> to vector<1x128xf32>
    %cst_73 = arith.constant 5.000000e-01 : f32
    %196 = vector.broadcast %cst_73 : f32 to vector<1x128xf32>
    %197 = arith.mulf %196, %195 : vector<1x128xf32>
    %cst_74 = arith.constant 5.000000e-01 : f32
    %198 = vector.broadcast %cst_74 : f32 to vector<1x128xf32>
    %199 = arith.addf %197, %198 : vector<1x128xf32>
    %200 = vector.extract_strided_slice %194 {offsets = [0, 128], sizes = [1, 128], strides = [1, 1]} : vector<1x512xf32> to vector<1x128xf32>
    %cst_75 = arith.constant 5.000000e-01 : f32
    %201 = vector.broadcast %cst_75 : f32 to vector<1x128xf32>
    %202 = arith.mulf %201, %200 : vector<1x128xf32>
    %cst_76 = arith.constant 5.000000e-01 : f32
    %203 = vector.broadcast %cst_76 : f32 to vector<1x128xf32>
    %204 = arith.addf %202, %203 : vector<1x128xf32>
    %205 = vector.extract_strided_slice %194 {offsets = [0, 256], sizes = [1, 128], strides = [1, 1]} : vector<1x512xf32> to vector<1x128xf32>
    %206 = vector.extract_strided_slice %194 {offsets = [0, 384], sizes = [1, 128], strides = [1, 1]} : vector<1x512xf32> to vector<1x128xf32>
    %cst_77 = arith.constant 5.000000e-01 : f32
    %207 = vector.broadcast %cst_77 : f32 to vector<1x128xf32>
    %208 = arith.mulf %207, %206 : vector<1x128xf32>
    %cst_78 = arith.constant 5.000000e-01 : f32
    %209 = vector.broadcast %cst_78 : f32 to vector<1x128xf32>
    %210 = arith.addf %208, %209 : vector<1x128xf32>
    %211 = arith.mulf %204, %187 : vector<1x128xf32>
    %212 = arith.mulf %199, %205 : vector<1x128xf32>
    %213 = arith.addf %211, %212 : vector<1x128xf32>
    %214 = math.tanh %213 : vector<1x128xf32>
    %215 = arith.mulf %210, %214 : vector<1x128xf32>
    %c0_79 = arith.constant 0 : index
    %c0_80 = arith.constant 0 : index
    %216 = vector.load %arg4[%c0_79, %c0_80] : memref<1x128xf32, #tpu.memory_space<vmem>>, vector<1x128xf32>
    %217 = arith.mulf %215, %216 : vector<1x128xf32>
    %cst_81 = arith.constant dense<0.000000e+00> : vector<1xf32>
    %218 = vector.multi_reduction <add>, %217, %cst_81 [1] : vector<1x128xf32> to vector<1xf32>
    %219 = vector.shape_cast %218 : vector<1xf32> to vector<1x1xf32>
    %c0_82 = arith.constant 0 : index
    %c0_83 = arith.constant 0 : index
    %220 = vector.load %arg5[%c0_82, %c0_83] : memref<1x1xf32, #tpu.memory_space<vmem>>, vector<1x1xf32>
    %221 = arith.addf %219, %220 : vector<1x1xf32>
    %c0_84 = arith.constant 0 : index
    %c0_85 = arith.constant 0 : index
    %222 = vector.load %arg6[%c0_84, %c0_85] : memref<1x1xf32, #tpu.memory_space<vmem>>, vector<1x1xf32>
    tpu.vector_store %arg6[%c0_84, %c0_85], %221 {strides = array<i32>} : memref<1x1xf32, #tpu.memory_space<vmem>>, vector<1x1xf32>,
    return
  }
}

</mosaic_0001>

<bundles_post_ra>
// kernel: lstm_model_forward.1
= control target key start
LH: loop header
LB: loop body
LE: loop exit
PB: predicated region body
PF: predicated region fallthrough
CT: control target
= control target key end

     0   :  { %s19549_s0 = inlined_call_operand.vmem [shape: f32[8,8], index: 0, kind: input, shape index: {}]   ;;  %s19550_s1 = inlined_call_operand.hbm [shape: f32[8,512], index: 1, kind: input, shape index: {}]   ;;  %s19551_s2 = inlined_call_operand.hbm [shape: f32[128,512], index: 2, kind: input, shape index: {}]   ;;  %s19552_s3 = inlined_call_operand.vmem [shape: f32[1,512], index: 3, kind: input, shape index: {}]   ;;  %s19553_s4 = inlined_call_operand.vmem [shape: f32[1,128], index: 4, kind: input, shape index: {}]   ;;  %s19554_s5 = inlined_call_operand.<no memory space> [shape: f32[1,1], index: 5, kind: input, shape index: {}]   ;;  %s19555_s6 = inlined_call_operand.hbm [shape: f32[1,1], index: 6, kind: output, shape index: {}]  }
   0x1   :  { %v11_v0 = vstv %s19554_s5 }
   0x2   :  { %12 = vst [vmem:[#allocation2] sm:$0x1] %v11_v0 }
   0x3   :  { %13 = vsyncpa [#allocation4], 0 }
   0x4   :  { %14 = vsyncpa [#allocation7], 0 }
   0x5   :  { %15 = vsyncpa [#allocation5], 0  ;;  %s15198_s23 = smov [#allocation3]   ;;  %s15199_s25 = smov [#allocation6]  }
   0x6   :  { %s24_s24 = sshll.u32 %s15198_s23, 4  ;;  %s33_s26 = sshll.u32 %s15199_s25, 4  ;;  %s25_s24 = int_to_ptr.vmem [resolvable:$true] %s24_s24  ;;  %s34_s26 = int_to_ptr.vmem [resolvable:$true] %s33_s26 }
   0x7   :  { %s15140_s27 = scalar_lea.vmem %s25_s24, 512  ;;  %p15145_p1 = scmp.lt.s32.totalorder %s25_s24, %s25_s24 }
   0x8   :  { %p15141_p0 = scmp.ne.s32.totalorder %s25_s24, %s15140_s27  ;;  %p15146_p2 = scmp.lt.s32.totalorder %s15140_s27, %s15140_s27 }
   0xa   :  { %p15147_p3 = por %p15146_p2, %p15145_p1 }
   0xc   :  { %p15148_p4 = pnand %p15147_p3, %p15141_p0 }
   0xe   :  { %15151 = shalt.err (!%p15148_p4)
}
   0xf   :  { %27 = dma.hbm_to_vmem [thread:$0]  %s19550_s1, 512, %s25_s24, [#allocation4]  }
  0x10   :  { %s15160_s5 = scalar_lea.vmem %s34_s26, 8192  ;;  %p15165_p6 = scmp.lt.s32.totalorder %s34_s26, %s34_s26 }
  0x11   :  { %p15161_p5 = scmp.ne.s32.totalorder %s34_s26, %s15160_s5  ;;  %p15166_p7 = scmp.lt.s32.totalorder %s15160_s5, %s15160_s5 }
  0x13   :  { %p15167_p8 = por %p15166_p7, %p15165_p6 }
  0x15   :  { %p15168_p9 = pnand %p15167_p8, %p15161_p5 }
  0x17   :  { %15171 = shalt.err (!%p15168_p9)
}
  0x18   :  { %s15200_s30 = smov 512   ;;  %s15201_s7 = smov 32  }
  0x19   :  { %39 = dma.hbm_to_vmem [thread:$0]  %s19551_s2, 8192, %s34_s26, [#allocation7], %s15200_s30, %s15200_s30, %s15201_s7  }
  0x1a   :  { %15192 = dma.done.wait [#allocation4], 512  }
  0x1b   :  { %15193 = vsyncadd [#allocation4], 4294966784 }
  0x1c   :  { %15194 = dma.done.wait [#allocation7], 8192  }
  0x1d   :  { %15195 = vsyncadd [#allocation7], 4294959104  ;;  %v19556_v1 = vmov 0.0   ;;  %vm79_vm0 = vcmask 64512   ;;  %v54_v2 = vld [vmem:[#allocation3 + $0x8] sm:$0xff]  ;;  %v53_v3 = vld [vmem:[#allocation3] sm:$0xff] }
  0x1e   :  { %149 = vmatprep.mubr.f32.mxu0 %v19556_v1  ;;  %235 = vmatprep.mubr.f32.mxu1 %v19556_v1  ;;  %v52_v4 = vld [vmem:[%s19549_s0] sm:$0xff]  ;;  %v15253_v5 = vand.u32 4294901760, %v54_v2  ;;  %v15255_v6 = vand.u32 4294901760, %v53_v3  ;;  %v55_v9 = vld [vmem:[#allocation3 + $0x10] sm:$0xff]  ;;  %v1074_v18 = vld [vmem:[#allocation6 + $0x1e8] sm:$0xff]  ;;  %vm15014_vm1 = vcmask 1047559  }
  0x1f   :  { %v81_v7 = vsel %vm79_vm0, %v52_v4, 0  ;;  %v56_v8 = vld [vmem:[#allocation3 + $0x18] sm:$0xff]  ;;  %v15264_v14 = vand.u32 4294901760, %v55_v9  ;;  %v15281_v25 = vand.u32 4294901760, %v1074_v18  ;;  %v1073_v26 = vld [vmem:[#allocation6 + $0x1e0] sm:$0xff]  ;;  %v1070_v29 = vld [vmem:[#allocation6 + $0x1c8] sm:$0xff] }
  0x20   :  { %v15257_v10 = vand.u32 4294901760, %v81_v7  ;;  %v15259_v11 = vand.u32 4294901760, %v56_v8  ;;  %114 = vmatprep.subr.mxu0 %v15253_v5  ;;  %v192_v12 = vsub.f32 %v54_v2, %v15253_v5  ;;  %v198_v13 = vsub.f32 %v53_v3, %v15255_v6  ;;  %v1069_v32 = vld [vmem:[#allocation6 + $0x1c0] sm:$0xff]  ;;  %v1066_v35 = vld [vmem:[#allocation6 + $0x1a8] sm:$0xff]  ;;  %s15203_s12 = smov [#allocation8]  }
  0x21   :  { %116 = vmatpush1.msra.mxu0 %v15255_v6  ;;  %v15277_v23 = vsub.f32 %v55_v9, %v15264_v14  ;;  %20325 = vst [vmem:[#allocation12_spill] sm:$0xff] %v15281_v25  ;;  %v15287_v34 = vand.u32 4294901760, %v1073_v26  ;;  %v15291_v36 = vsub.f32 %v1074_v18, %v15281_v25  ;;  %v15293_v37 = vand.u32 4294901760, %v1070_v29  ;;  %v1065_v38 = vld [vmem:[#allocation6 + $0x1a0] sm:$0xff]  ;;  %v1062_v40 = vld [vmem:[#allocation6 + $0x188] sm:$0xff]  ;;  %s15034_s13 = sshll.u32 %s15203_s12, 4  ;;  %s15035_s13 = int_to_ptr.vmem [resolvable:$true] %s15034_s13 }
  0x22   :  { %v15268_v15 = vsub.f32 %v81_v7, %v15257_v10  ;;  %v193_v16 = vand.u32 4294901760, %v192_v12  ;;  %275 = vmatprep.subr.mxu0 %v192_v12  ;;  %v199_v17 = vand.u32 4294901760, %v198_v13  ;;  %v15274_v20 = vsub.f32 %v56_v8, %v15259_v11  ;;  %v1061_v43 = vld [vmem:[#allocation6 + $0x180] sm:$0xff]  ;;  %v1058_v47 = vld [vmem:[#allocation6 + $0x168] sm:$0xff]  ;;  %s15172_s14 = scalar_lea.vmem %s15035_s13, 16  ;;  %s15176_s15 = scalar_lea.vmem %s15035_s13, 32 }
  0x23   :  { %v664_v33 = vand.u32 4294901760, %v15277_v23  ;;  %20326 = vst [vmem:[#allocation13_spill] sm:$0xff] %v15287_v34  ;;  %20327 = vst [vmem:[#allocation14_spill] sm:$0xff] %v15291_v36  ;;  %v15296_v39 = vand.u32 4294901760, %v1069_v32  ;;  %v15303_v42 = vand.u32 4294901760, %v1066_v35  ;;  %v15310_v45 = vsub.f32 %v1073_v26, %v15287_v34  ;;  %v1057_v51 = vld [vmem:[#allocation6 + $0x160] sm:$0xff]  ;;  %p15173_p10 = scmp.ne.s32.totalorder %s15035_s13, %s15172_s14  ;;  %p15177_p11 = scmp.lt.s32.totalorder %s15035_s13, %s15035_s13 }
  0x24   :  { %v15271_v19 = vand.u32 4294901760, %v15268_v15  ;;  %v194_v21 = vsub.f32 %v192_v12, %v193_v16  ;;  %v200_v22 = vsub.f32 %v198_v13, %v199_v17  ;;  %v658_v31 = vand.u32 4294901760, %v15274_v20  ;;  %20328 = vst [vmem:[#allocation15_spill] sm:$0xff] %v15293_v37  ;;  %v1054_v54 = vld [vmem:[#allocation6 + $0x148] sm:$0xff]  ;;  %v1053_v58 = vld [vmem:[#allocation6 + $0x140] sm:$0xff]  ;;  %p15178_p12 = scmp.lt.s32.totalorder %s15176_s15, %s15172_s14 }
  0x25   :  { %20329 = vst [vmem:[#allocation16_spill] sm:$0xff] %v15296_v39  ;;  %20330 = vst [vmem:[#allocation17_spill] sm:$0xff] %v15303_v42  ;;  %v665_v44 = vsub.f32 %v15277_v23, %v664_v33  ;;  %v15312_v46 = vand.u32 4294901760, %v1065_v38  ;;  %v15317_v48 = vand.u32 4294901760, %v15291_v36  ;;  %v15320_v49 = vsub.f32 %v1070_v29, %v15293_v37  ;;  %v1050_v63 = vld [vmem:[#allocation6 + $0x128] sm:$0xff] }
  0x26   :  { %v153_v24 = vsub.f32 %v15268_v15, %v15271_v19  ;;  %v195_v27 = vand.u32 4294901760, %v194_v21  ;;  %v201_v28 = vand.u32 4294901760, %v200_v22  ;;  %v659_v41 = vsub.f32 %v15274_v20, %v658_v31  ;;  %20331 = vst [vmem:[#allocation18_spill] sm:$0xff] %v15310_v45  ;;  %p15179_p13 = por %p15178_p12, %p15177_p11 }
  0x27   :  { %20332 = vst [vmem:[#allocation19_spill] sm:$0xff] %v15312_v46  ;;  %20333 = vst [vmem:[#allocation20_spill] sm:$0xff] %v15317_v48  ;;  %v15322_v50 = vand.u32 4294901760, %v1062_v40  ;;  %v15326_v52 = vsub.f32 %v1069_v32, %v15296_v39  ;;  %v15328_v53 = vand.u32 4294901760, %v1061_v43  ;;  %v15333_v56 = vsub.f32 %v1066_v35, %v15303_v42 }
  0x28   :  { %v15283_v30 = vand.u32 4294901760, %v153_v24  ;;  %196 = vmatprep.subr.mxu1 %v195_v27  ;;  %20334 = vst [vmem:[#allocation21_spill] sm:$0xff] %v15320_v49  ;;  %v660_v55 = vand.u32 4294901760, %v659_v41  ;;  %v15335_v57 = vand.u32 4294901760, %v1058_v47  ;;  %v666_v59 = vand.u32 4294901760, %v665_v44  ;;  %v1045_v24 = vld [vmem:[#allocation6 + $0x100] sm:$0xff]  ;;  %p15180_p0 = pnand %p15179_p13, %p15173_p10 }
  0x29   :  { %202 = vmatpush1.msra.mxu1 %v201_v28  ;;  %20335 = vst [vmem:[#allocation22_spill] sm:$0xff] %v15322_v50  ;;  %20336 = vst [vmem:[#allocation23_spill] sm:$0xff] %v15326_v52  ;;  %v15340_v60 = vand.u32 4294901760, %v15310_v45  ;;  %v15343_v61 = vsub.f32 %v1065_v38, %v15312_v46  ;;  %v15345_v62 = vand.u32 4294901760, %v1057_v51  ;;  %v1183_v0 = vsub.f32 %v15291_v36, %v15317_v48 }
  0x2a   :  { %155 = vmatmul.mubr.f32.vlgmr.msra.gmra.mxu0 %v15283_v30  ;;  %237 = vmatmul.mubr.f32.vlgmr.msra.gmra.mxu1 %v15257_v10  ;;  %20337 = vst [vmem:[#allocation24_spill] sm:$0xff] %v15328_v53  ;;  %20338 = vst [vmem:[#allocation25_spill] sm:$0xff] %v15333_v56  ;;  %v15352_v2 = vand.u32 4294901760, %v15320_v49  ;;  %v15355_v3 = vsub.f32 %v1062_v40, %v15322_v50  ;;  %v15357_v4 = vand.u32 4294901760, %v1054_v54  ;;  %v15367_v8 = vand.u32 4294901760, %v1053_v58  ;;  %v1042_v40 = vld [vmem:[#allocation6 + $0xe8] sm:$0xff] }
  0x2b   :  { %278 = vmatpush1.msra.mxu0 %v198_v13  ;;  %351 = vmatprep.subr.mxu1 %v15253_v5  ;;  %20339 = vst [vmem:[#allocation26_spill] sm:$0xff] %v15335_v57  ;;  %20340 = vst [vmem:[#allocation27_spill] sm:$0xff] %v15340_v60  ;;  %v15365_v7 = vsub.f32 %v1061_v43, %v15328_v53  ;;  %v15371_v9 = vand.u32 4294901760, %v15333_v56  ;;  %v15374_v12 = vsub.f32 %v1058_v47, %v15335_v57  ;;  %vm15026_vm2 = vcmask 7175  }
  0x2c   :  { %311 = vmatprep.mubr.f32.mxu0 %v19556_v1  ;;  %353 = vmatpush1.msra.mxu1 %v15255_v6  ;;  %20341 = vst [vmem:[#allocation28_spill] sm:$0xff] %v15343_v61  ;;  %20342 = vst [vmem:[#allocation29_spill] sm:$0xff] %v15345_v62  ;;  %v15376_v13 = vand.u32 4294901760, %v1050_v63  ;;  %v15382_v18 = vand.u32 4294901760, %v15343_v61  ;;  %v15385_v21 = vsub.f32 %v1057_v51, %v15345_v62  ;;  %v15391_v26 = vand.u32 4294901760, %v1183_v0  ;;  %v1041_v0 = vld [vmem:[#allocation6 + $0xe0] sm:$0xff] }
  0x2d   :  { %429 = vmatprep.subr.mxu0 %v193_v16  ;;  %386 = vmatprep.mubr.f32.mxu1 %v19556_v1  ;;  %20343 = vst [vmem:[#allocation30_spill] sm:$0xff] %v15352_v2  ;;  %20344 = vst [vmem:[#allocation31_spill] sm:$0xff] %v15355_v3  ;;  %v1046_v16 = vld [vmem:[#allocation6 + $0x108] sm:$0xff]  ;;  %v1195_v27 = vsub.f32 %v15320_v49, %v15352_v2  ;;  %v15396_v28 = vand.u32 4294901760, %v15355_v3  ;;  %v15399_v29 = vsub.f32 %v1054_v54, %v15357_v4 }
  0x2e   :  { %314 = vmatmul.mubr.f32.vlgmr.msra.gmra.mxu0 %v15268_v15  ;;  %390 = vmatmul.mubr.f32.vlgmr.msra.gmra.mxu1 %v15271_v19  ;;  %20345 = vst [vmem:[#allocation32_spill] sm:$0xff] %v15357_v4  ;;  %20347 = vst [vmem:[#allocation34_spill] sm:$0xff] %v15365_v7  ;;  %v15406_v32 = vand.u32 4294901760, %v15365_v7  ;;  %v15409_v35 = vsub.f32 %v1053_v58, %v15367_v8  ;;  %v15411_v38 = vand.u32 4294901760, %v1046_v16  ;;  %v15418_v43 = vand.u32 4294901760, %v15374_v12 }
  0x2f   :  { %433 = vmatpush1.msra.mxu0 %v199_v17  ;;  %505 = vmatprep.subr.mxu1 %v15253_v5  ;;  %v1049_v5 = vld [vmem:[#allocation6 + $0x120] sm:$0xff]  ;;  %20348 = vst [vmem:[#allocation35_spill] sm:$0xff] %v15367_v8  ;;  %20349 = vst [vmem:[#allocation36_spill] sm:$0xff] %v15371_v9  ;;  %v1189_v17 = vsub.f32 %v15310_v45, %v15340_v60  ;;  %v1207_v41 = vsub.f32 %v15333_v56, %v15371_v9  ;;  %v15423_v47 = vand.u32 4294901760, %v1045_v24 }
  0x30   :  { %466 = vmatprep.mubr.f32.mxu0 %v19556_v1  ;;  %507 = vmatpush1.msra.mxu1 %v15255_v6  ;;  %v15362_v6 = vand.u32 4294901760, %v15326_v52  ;;  %20350 = vst [vmem:[#allocation37_spill] sm:$0xff] %v15374_v12  ;;  %20351 = vst [vmem:[#allocation38_spill] sm:$0xff] %v15376_v13  ;;  %v15387_v22 = vand.u32 4294901760, %v1049_v5  ;;  %v15421_v44 = vsub.f32 %v1050_v63, %v15376_v13  ;;  %v15447_v63 = vand.u32 4294901760, %v1042_v40 }
  0x31   :  { %579 = vmatprep.subr.mxu0 %v15259_v11  ;;  %540 = vmatprep.mubr.f32.mxu1 %v19556_v1  ;;  %20352 = vst [vmem:[#allocation39_spill] sm:$0xff] %v15382_v18  ;;  %20353 = vst [vmem:[#allocation40_spill] sm:$0xff] %v15385_v21  ;;  %v15428_v51 = vand.u32 4294901760, %v1189_v17  ;;  %v1213_v54 = vsub.f32 %v15343_v61, %v15382_v18  ;;  %v15457_v17 = vand.u32 4294901760, %v15409_v35  ;;  %v1034_v18 = vld [vmem:[#allocation6 + $0xa8] sm:$0xff] }
  0x32   :  { %468 = vmatmul.mubr.f32.vlgmr.msra.gmra.mxu0 %v15257_v10  ;;  %542 = vmatmul.mubr.f32.vlgmr.msra.gmra.mxu1 %v15257_v10  ;;  %20346 = vst [vmem:[#allocation33_spill] sm:$0xff] %v15362_v6  ;;  %20354 = vst [vmem:[#allocation41_spill] sm:$0xff] %v15387_v22  ;;  %v15436_v58 = vsub.f32 %v1049_v5, %v15387_v22  ;;  %v15516_v48 = vand.u32 4294901760, %v1034_v18 }
  0x33   :  { %581 = vmatpush1.msra.mxu0 %v15264_v14  ;;  %661 = vmatprep.subr.mxu1 %v660_v55  ;;  %20355 = vst [vmem:[#allocation42_spill] sm:$0xff] %v15391_v26  ;;  %20356 = vst [vmem:[#allocation43_spill] sm:$0xff] %v15396_v28  ;;  %v15433_v55 = vand.u32 4294901760, %v15385_v21  ;;  %v1249_v2 = vsub.f32 %v15409_v35, %v15457_v17 }
  0x34   :  { %614 = vmatprep.mubr.f32.mxu0 %v19556_v1  ;;  %667 = vmatpush1.msra.mxu1 %v666_v59  ;;  %20357 = vst [vmem:[#allocation44_spill] sm:$0xff] %v15399_v29  ;;  %20358 = vst [vmem:[#allocation45_spill] sm:$0xff] %v15406_v32  ;;  %v15440_v59 = vand.u32 4294901760, %v1195_v27  ;;  %v15460_v27 = vsub.f32 %v1046_v16, %v15411_v38  ;;  %v15476_v16 = vand.u32 4294901760, %v1213_v54 }
  0x35   :  { %740 = vmatprep.subr.mxu0 %v15274_v20  ;;  %700 = vmatprep.mubr.f32.mxu1 %v19556_v1  ;;  %20359 = vst [vmem:[#allocation46_spill] sm:$0xff] %v15409_v35  ;;  %20360 = vst [vmem:[#allocation47_spill] sm:$0xff] %v15411_v38  ;;  %v1219_v20 = vsub.f32 %v15355_v3, %v15396_v28  ;;  %v20373_v28 = vmov 0.0   ;;  %v15492_v54 = vsub.f32 %v1042_v40, %v15447_v63 }
  0x36   :  { %620 = vmatmul.mubr.f32.vlgmr.msra.gmra.mxu0 %v15283_v30  ;;  %702 = vmatmul.mubr.f32.vlgmr.msra.gmra.mxu1 %v15257_v10  ;;  %v1201_v30 = vsub.f32 %v15326_v52, %v15362_v6  ;;  %20361 = vst [vmem:[#allocation48_spill] sm:$0xff] %v15418_v43  ;;  %20362 = vst [vmem:[#allocation49_spill] sm:$0xff] %v15421_v44 }
  0x37   :  { %743 = vmatpush1.msra.mxu0 %v15277_v23  ;;  %816 = vmatprep.subr.mxu1 %v15259_v11  ;;  %20363 = vst [vmem:[#allocation50_spill] sm:$0xff] %v15423_v47  ;;  %20364 = vst [vmem:[#allocation51_spill] sm:$0xff] %v15428_v51  ;;  %v15464_v23 = vand.u32 4294901760, %v1207_v41  ;;  %v15481_v41 = vand.u32 4294901760, %v15436_v58 }
  0x38   :  { %776 = vmatprep.mubr.f32.mxu0 %v19556_v1  ;;  %818 = vmatpush1.msra.mxu1 %v15264_v14  ;;  %20365 = vst [vmem:[#allocation52_spill] sm:$0xff] %v15433_v55  ;;  %20366 = vst [vmem:[#allocation53_spill] sm:$0xff] %v15436_v58  ;;  %v15452_v5 = vand.u32 4294901760, %v1201_v30  ;;  %v15472_v30 = vsub.f32 %v1045_v24, %v15423_v47  ;;  %v15487_v24 = vand.u32 4294901760, %v1219_v20  ;;  %v15503_v20 = vand.u32 4294901760, %v15460_v27 }
  0x39   :  { %894 = vmatprep.subr.mxu0 %v658_v31  ;;  %851 = vmatprep.mubr.f32.mxu1 %v19556_v1  ;;  %20367 = vst [vmem:[#allocation54_spill] sm:$0xff] %v15440_v59  ;;  %v15445_v31 = vand.u32 4294901760, %v15399_v29  ;;  %20369 = vst [vmem:[#allocation56_spill] sm:$0xff] %v15447_v63  ;;  %v1038_v1 = vld [vmem:[#allocation6 + $0xc8] sm:$0xff] }
  0x3a   :  { %779 = vmatmul.mubr.f32.vlgmr.msra.gmra.mxu0 %v15268_v15  ;;  %855 = vmatmul.mubr.f32.vlgmr.msra.gmra.mxu1 %v15271_v19  ;;  %20370 = vst [vmem:[#allocation57_spill] sm:$0xff] %v15452_v5  ;;  %v1225_v15 = vsub.f32 %v15365_v7, %v15406_v32  ;;  %20371 = vst [vmem:[#allocation58_spill] sm:$0xff] %v15457_v17  ;;  %v1231_v19 = vsub.f32 %v15374_v12, %v15418_v43  ;;  %v1037_v32 = vld [vmem:[#allocation6 + $0xc0] sm:$0xff]  ;;  %v15483_v43 = vand.u32 4294901760, %v1041_v0  ;;  %v1022_v12 = vld [vmem:[#allocation6 + $0x48] sm:$0xff] }
  0x3b   :  { %20368 = vst [vmem:[#allocation55_spill] sm:$0xff] %v15445_v31  ;;  %898 = vmatpush1.msra.mxu0 %v664_v33  ;;  %20372 = vst [vmem:[#allocation59_spill] sm:$0xff] %v15460_v27  ;;  %970 = vmatprep.subr.mxu1 %v15259_v11  ;;  %v15469_v33 = vand.u32 4294901760, %v15421_v44  ;;  %v1237_v11 = vsub.f32 %v15385_v21, %v15433_v55  ;;  %v15494_v9 = vand.u32 4294901760, %v1038_v1  ;;  %v1033_v55 = vld [vmem:[#allocation6 + $0xa0] sm:$0xff]  ;;  %v15505_v60 = vand.u32 4294901760, %v1037_v32 }
  0x3c   :  { %931 = vmatprep.mubr.f32.mxu0 %v20373_v28  ;;  %20374 = vst [vmem:[#allocation60_spill] sm:$0xff] %v15464_v23  ;;  %20376 = vst [vmem:[#allocation62_spill] sm:$0xff] %v15472_v30  ;;  %972 = vmatpush1.msra.mxu1 %v15264_v14  ;;  %v1243_v14 = vsub.f32 %v15399_v29, %v15445_v31  ;;  %v15498_v6 = vand.u32 4294901760, %v1225_v15  ;;  %v1030_v31 = vld [vmem:[#allocation6 + $0x88] sm:$0xff]  ;;  %v15509_v40 = vand.u32 4294901760, %v1231_v19  ;;  %v15514_v15 = vand.u32 4294901760, %v15472_v30 }
  0x3d   :  { %20375 = vst [vmem:[#allocation61_spill] sm:$0xff] %v15469_v33  ;;  %1078 = vmatprep.subr.mxu0 %v15281_v25  ;;  %20377 = vst [vmem:[#allocation63_spill] sm:$0xff] %v15476_v16  ;;  %1005 = vmatprep.mubr.f32.mxu1 %v20373_v28  ;;  %v1029_v17 = vld [vmem:[#allocation6 + $0x80] sm:$0xff]  ;;  %v15520_v35 = vand.u32 4294901760, %v1237_v11  ;;  %v15525_v19 = vsub.f32 %v1041_v0, %v15483_v43  ;;  %v15527_v29 = vand.u32 4294901760, %v1033_v55  ;;  %v15539_v21 = vand.u32 4294901760, %v1030_v31 }
  0x3e   :  { %20378 = vst [vmem:[#allocation64_spill] sm:$0xff] %v15481_v41  ;;  %20379 = vst [vmem:[#allocation65_spill] sm:$0xff] %v15483_v43  ;;  %933 = vmatmul.mubr.f32.vlgmr.msra.gmra.mxu0 %v15257_v10  ;;  %1185 = vmatprep.subr.mxu1 %v15391_v26  ;;  %v1255_v26 = vsub.f32 %v15421_v44, %v15469_v33  ;;  %v1026_v33 = vld [vmem:[#allocation6 + $0x68] sm:$0xff]  ;;  %v15531_v44 = vand.u32 4294901760, %v1243_v14  ;;  %v15537_v11 = vsub.f32 %v1038_v1, %v15494_v9 }
  0x3f   :  { %20380 = vst [vmem:[#allocation66_spill] sm:$0xff] %v15487_v24  ;;  %20381 = vst [vmem:[#allocation67_spill] sm:$0xff] %v15492_v54  ;;  %1080 = vmatpush1.msra.mxu0 %v15287_v34  ;;  %1007 = vmatmul.mubr.f32.vlgmr.msra.gmra.mxu1 %v15257_v10  ;;  %v1261_v10 = vsub.f32 %v15436_v58, %v15481_v41  ;;  %v1025_v41 = vld [vmem:[#allocation6 + $0x60] sm:$0xff]  ;;  %v15543_v0 = vand.u32 4294901760, %v1249_v2  ;;  %v15548_v14 = vsub.f32 %v1037_v32, %v15505_v60 }
  0x40   :  { %20382 = vst [vmem:[#allocation68_spill] sm:$0xff] %v15494_v9  ;;  %20383 = vst [vmem:[#allocation69_spill] sm:$0xff] %v15498_v6  ;;  %1082 = vmatprep.subr.mxu0 %v15293_v37  ;;  %1191 = vmatpush1.msra.mxu1 %v15428_v51  ;;  %v15534_v51 = vand.u32 4294901760, %v15492_v54  ;;  %v15550_v58 = vand.u32 4294901760, %v1029_v17  ;;  %v15554_v1 = vand.u32 4294901760, %v1255_v26  ;;  %v15559_v2 = vsub.f32 %v1034_v18, %v15516_v48 }
  0x41   :  { %20384 = vst [vmem:[#allocation70_spill] sm:$0xff] %v15503_v20  ;;  %20385 = vst [vmem:[#allocation71_spill] sm:$0xff] %v15505_v60  ;;  %1084 = vmatpush1.msra.mxu0 %v15296_v39  ;;  %1197 = vmatprep.subr.mxu1 %v15440_v59  ;;  %v1267_v59 = vsub.f32 %v15460_v27, %v15503_v20  ;;  %v15561_v7 = vand.u32 4294901760, %v1026_v33  ;;  %v1021_v20 = vld [vmem:[#allocation6 + $0x40] sm:$0xff]  ;;  %v15565_v32 = vand.u32 4294901760, %v1261_v10  ;;  %v15573_v27 = vand.u32 4294901760, %v1025_v41 }
  0x42   :  { %20386 = vst [vmem:[#allocation72_spill] sm:$0xff] %v15509_v40  ;;  %20387 = vst [vmem:[#allocation73_spill] sm:$0xff] %v15514_v15  ;;  %1086 = vmatprep.subr.mxu0 %v15303_v42  ;;  %1203 = vmatpush1.msra.mxu1 %v15452_v5  ;;  %v1273_v5 = vsub.f32 %v15472_v30, %v15514_v15  ;;  %v15571_v26 = vsub.f32 %v1033_v55, %v15527_v29  ;;  %v1018_v15 = vld [vmem:[#allocation6 + $0x28] sm:$0xff]  ;;  %v15585_v30 = vand.u32 4294901760, %v1022_v12  ;;  %v1017_v55 = vld [vmem:[#allocation6 + $0x20] sm:$0xff] }
  0x43   :  { %20388 = vst [vmem:[#allocation74_spill] sm:$0xff] %v15516_v48  ;;  %20389 = vst [vmem:[#allocation75_spill] sm:$0xff] %v15520_v35  ;;  %1088 = vmatpush1.msra.mxu0 %v15312_v46  ;;  %1209 = vmatprep.subr.mxu1 %v15464_v23  ;;  %v15568_v23 = vand.u32 4294901760, %v15525_v19  ;;  %v1279_v18 = vsub.f32 %v15492_v54, %v15534_v51  ;;  %v15583_v10 = vsub.f32 %v1030_v31, %v15539_v21 }
  0x44   :  { %20390 = vst [vmem:[#allocation76_spill] sm:$0xff] %v15525_v19  ;;  %20391 = vst [vmem:[#allocation77_spill] sm:$0xff] %v15527_v29  ;;  %1090 = vmatprep.subr.mxu0 %v15322_v50  ;;  %1215 = vmatpush1.msra.mxu1 %v15476_v16  ;;  %v15580_v16 = vand.u32 4294901760, %v15537_v11  ;;  %v15597_v54 = vand.u32 4294901760, %v1021_v20  ;;  %v15601_v31 = vand.u32 4294901760, %v1273_v5  ;;  %v1013_v50 = vld [vmem:[#allocation6] sm:$0xff]  ;;  %v15619_v5 = vsub.f32 %v1025_v41, %v15573_v27 }
  0x45   :  { %20392 = vst [vmem:[#allocation78_spill] sm:$0xff] %v15531_v44  ;;  %20393 = vst [vmem:[#allocation79_spill] sm:$0xff] %v15534_v51  ;;  %1092 = vmatpush1.msra.mxu0 %v15328_v53  ;;  %1221 = vmatprep.subr.mxu1 %v15487_v24  ;;  %v15589_v53 = vand.u32 4294901760, %v1267_v59  ;;  %v15592_v24 = vand.u32 4294901760, %v15548_v14  ;;  %v15595_v51 = vsub.f32 %v1029_v17, %v15550_v58 }
  0x46   :  { %20394 = vst [vmem:[#allocation80_spill] sm:$0xff] %v15537_v11  ;;  %20395 = vst [vmem:[#allocation81_spill] sm:$0xff] %v15539_v21  ;;  %1094 = vmatprep.subr.mxu0 %v15335_v57  ;;  %1227 = vmatpush1.msra.mxu1 %v15498_v6  ;;  %v1014_v57 = vld [vmem:[#allocation6 + $0x8] sm:$0xff]  ;;  %v15604_v6 = vand.u32 4294901760, %v15559_v2  ;;  %v15607_v59 = vsub.f32 %v1026_v33, %v15561_v7  ;;  %v1285_v17 = vsub.f32 %v15525_v19, %v15568_v23 }
  0x47   :  { %20396 = vst [vmem:[#allocation82_spill] sm:$0xff] %v15543_v0  ;;  %20397 = vst [vmem:[#allocation83_spill] sm:$0xff] %v15548_v14  ;;  %1096 = vmatpush1.msra.mxu0 %v15345_v62  ;;  %1233 = vmatprep.subr.mxu1 %v15509_v40  ;;  %v15609_v62 = vand.u32 4294901760, %v1018_v15  ;;  %v15616_v40 = vand.u32 4294901760, %v15571_v26  ;;  %v1291_v33 = vsub.f32 %v15537_v11, %v15580_v16  ;;  %v15633_v19 = vand.u32 4294901760, %v1014_v57 }
  0x48   :  { %20398 = vst [vmem:[#allocation84_spill] sm:$0xff] %v15550_v58  ;;  %20399 = vst [vmem:[#allocation85_spill] sm:$0xff] %v15554_v1  ;;  %1098 = vmatprep.subr.mxu0 %v15357_v4  ;;  %1239 = vmatpush1.msra.mxu1 %v15520_v35  ;;  %v15621_v4 = vand.u32 4294901760, %v1017_v55  ;;  %v15628_v35 = vand.u32 4294901760, %v15583_v10  ;;  %v1297_v41 = vsub.f32 %v15548_v14, %v15592_v24  ;;  %v15645_v11 = vand.u32 4294901760, %v1013_v50 }
  0x49   :  { %20400 = vst [vmem:[#allocation86_spill] sm:$0xff] %v15559_v2  ;;  %20401 = vst [vmem:[#allocation87_spill] sm:$0xff] %v15561_v7  ;;  %1100 = vmatpush1.msra.mxu0 %v15367_v8  ;;  %1245 = vmatprep.subr.mxu1 %v15531_v44  ;;  %v15640_v44 = vand.u32 4294901760, %v15595_v51 }
  0x4a   :  { %20402 = vst [vmem:[#allocation88_spill] sm:$0xff] %v15565_v32  ;;  %20403 = vst [vmem:[#allocation89_spill] sm:$0xff] %v15568_v23  ;;  %1102 = vmatprep.subr.mxu0 %v15376_v13  ;;  %v15631_v23 = vsub.f32 %v1022_v12, %v15585_v30  ;;  %1251 = vmatpush1.msra.mxu1 %v15543_v0  ;;  %v15649_v12 = vand.u32 4294901760, %v1279_v18  ;;  %v1303_v0 = vsub.f32 %v15559_v2, %v15604_v6 }
  0x4b   :  { %20404 = vst [vmem:[#allocation90_spill] sm:$0xff] %v15571_v26  ;;  %20405 = vst [vmem:[#allocation91_spill] sm:$0xff] %v15573_v27  ;;  %1104 = vmatpush1.msra.mxu0 %v15387_v22  ;;  %1257 = vmatprep.subr.mxu1 %v15554_v1  ;;  %v15654_v22 = vand.u32 4294901760, %v15607_v59  ;;  %v1309_v1 = vsub.f32 %v15571_v26, %v15616_v40  ;;  %v15666_v18 = vand.u32 4294901760, %v15619_v5 }
  0x4c   :  { %20406 = vst [vmem:[#allocation92_spill] sm:$0xff] %v15580_v16  ;;  %20407 = vst [vmem:[#allocation93_spill] sm:$0xff] %v15583_v10  ;;  %v15643_v16 = vsub.f32 %v1021_v20, %v15597_v54  ;;  %1106 = vmatprep.subr.mxu0 %v15411_v38  ;;  %1263 = vmatpush1.msra.mxu1 %v15565_v32  ;;  %v15661_v20 = vand.u32 4294901760, %v1285_v17  ;;  %v1315_v32 = vsub.f32 %v15583_v10, %v15628_v35 }
  0x4d   :  { %20408 = vst [vmem:[#allocation94_spill] sm:$0xff] %v15585_v30  ;;  %20409 = vst [vmem:[#allocation95_spill] sm:$0xff] %v15589_v53  ;;  %1108 = vmatpush1.msra.mxu0 %v15423_v47  ;;  %1269 = vmatprep.subr.mxu1 %v15589_v53  ;;  %v15678_v17 = vand.u32 4294901760, %v15631_v23  ;;  %v1321_v53 = vsub.f32 %v15595_v51, %v15640_v44 }
  0x4e   :  { %20410 = vst [vmem:[#allocation96_spill] sm:$0xff] %v15592_v24  ;;  %20411 = vst [vmem:[#allocation97_spill] sm:$0xff] %v15595_v51  ;;  %v15657_v24 = vsub.f32 %v1018_v15, %v15609_v62  ;;  %1110 = vmatprep.subr.mxu0 %v15447_v63  ;;  %v15673_v15 = vand.u32 4294901760, %v1291_v33  ;;  %1275 = vmatpush1.msra.mxu1 %v15601_v31  ;;  %v15690_v33 = vand.u32 4294901760, %v15643_v16 }
  0x4f   :  { %20412 = vst [vmem:[#allocation98_spill] sm:$0xff] %v15597_v54  ;;  %20413 = vst [vmem:[#allocation99_spill] sm:$0xff] %v15601_v31  ;;  %1112 = vmatpush1.msra.mxu0 %v15483_v43  ;;  %1281 = vmatprep.subr.mxu1 %v15649_v12  ;;  %v1327_v31 = vsub.f32 %v15607_v59, %v15654_v22 }
  0x50   :  { %20414 = vst [vmem:[#allocation100_spill] sm:$0xff] %v15604_v6  ;;  %20415 = vst [vmem:[#allocation101_spill] sm:$0xff] %v15607_v59  ;;  %v15669_v6 = vsub.f32 %v1017_v55, %v15621_v4  ;;  %v15685_v55 = vand.u32 4294901760, %v1297_v41  ;;  %1114 = vmatprep.subr.mxu0 %v15494_v9  ;;  %v15702_v41 = vand.u32 4294901760, %v15657_v24  ;;  %1287 = vmatpush1.msra.mxu1 %v15661_v20 }
  0x51   :  { %20416 = vst [vmem:[#allocation102_spill] sm:$0xff] %v15609_v62  ;;  %20417 = vst [vmem:[#allocation103_spill] sm:$0xff] %v15616_v40  ;;  %v15681_v40 = vsub.f32 %v1014_v57, %v15633_v19  ;;  %v15697_v57 = vand.u32 4294901760, %v1303_v0  ;;  %1116 = vmatpush1.msra.mxu0 %v15505_v60  ;;  %1293 = vmatprep.subr.mxu1 %v15673_v15  ;;  %v15715_v0 = vand.u32 4294901760, %v1315_v32  ;;  %v15733_v32 = vand.u32 4294901760, %v1327_v31 }
  0x52   :  { %20418 = vst [vmem:[#allocation104_spill] sm:$0xff] %v15619_v5  ;;  %20419 = vst [vmem:[#allocation105_spill] sm:$0xff] %v15621_v4  ;;  %1118 = vmatprep.subr.mxu0 %v15516_v48  ;;  %1299 = vmatpush1.msra.mxu1 %v15685_v55 }
  0x53   :  { %20420 = vst [vmem:[#allocation106_spill] sm:$0xff] %v15628_v35  ;;  %20421 = vst [vmem:[#allocation107_spill] sm:$0xff] %v15631_v23  ;;  %v15693_v35 = vsub.f32 %v1013_v50, %v15645_v11  ;;  %v1333_v50 = vsub.f32 %v15619_v5, %v15666_v18  ;;  %1120 = vmatpush1.msra.mxu0 %v15527_v29  ;;  %1305 = vmatprep.subr.mxu1 %v15697_v57 }
  0x54   :  { %20422 = vst [vmem:[#allocation108_spill] sm:$0xff] %v15633_v19  ;;  %20423 = vst [vmem:[#allocation109_spill] sm:$0xff] %v15640_v44  ;;  %v15706_v44 = vand.u32 4294901760, %v1309_v1  ;;  %v15724_v1 = vand.u32 4294901760, %v1321_v53  ;;  %1122 = vmatprep.subr.mxu0 %v15539_v21  ;;  %1173 = vmatprep.mubr.f32.mxu0 %v20373_v28 }
  0x55   :  { %20424 = vst [vmem:[#allocation110_spill] sm:$0xff] %v15643_v16  ;;  %20425 = vst [vmem:[#allocation111_spill] sm:$0xff] %v15645_v11  ;;  %1124 = vmatpush1.msra.mxu0 %v15550_v58  ;;  %v15739_v53 = vand.u32 4294901760, %v1333_v50  ;;  %1404 = vmatprep.mubr.f32.mxu1 %v20373_v28 }
  0x56   :  { %20426 = vst [vmem:[#allocation112_spill] sm:$0xff] %v15649_v12  ;;  %20427 = vst [vmem:[#allocation113_spill] sm:$0xff] %v15654_v22  ;;  %v15711_v12 = vand.u32 4294901760, %v15669_v6  ;;  %v1339_v22 = vsub.f32 %v15631_v23, %v15678_v17  ;;  %1311 = vmatpush1.msra.mxu1 %v15706_v44  ;;  %1126 = vmatprep.subr.mxu0 %v15561_v7 }
  0x57   :  { %20428 = vst [vmem:[#allocation114_spill] sm:$0xff] %v15657_v24  ;;  %20429 = vst [vmem:[#allocation115_spill] sm:$0xff] %v15661_v20  ;;  %v15720_v20 = vand.u32 4294901760, %v15681_v40  ;;  %1317 = vmatprep.subr.mxu1 %v15715_v0  ;;  %1128 = vmatpush1.msra.mxu0 %v15573_v27 }
  0x58   :  { %20430 = vst [vmem:[#allocation116_spill] sm:$0xff] %v15666_v18  ;;  %20431 = vst [vmem:[#allocation117_spill] sm:$0xff] %v15669_v6  ;;  %v1345_v18 = vsub.f32 %v15643_v16, %v15690_v33  ;;  %1323 = vmatpush1.msra.mxu1 %v15724_v1  ;;  %1130 = vmatprep.subr.mxu0 %v15585_v30 }
  0x59   :  { %20432 = vst [vmem:[#allocation118_spill] sm:$0xff] %v15673_v15  ;;  %20433 = vst [vmem:[#allocation119_spill] sm:$0xff] %v15678_v17  ;;  %v15729_v15 = vand.u32 4294901760, %v15693_v35  ;;  %v1351_v17 = vsub.f32 %v15657_v24, %v15702_v41  ;;  %v1363_v31 = vsub.f32 %v15681_v40, %v15720_v20  ;;  %1329 = vmatprep.subr.mxu1 %v15733_v32  ;;  %1132 = vmatpush1.msra.mxu0 %v15597_v54 }
  0x5a   :  { %20434 = vst [vmem:[#allocation120_spill] sm:$0xff] %v15681_v40  ;;  %20435 = vst [vmem:[#allocation121_spill] sm:$0xff] %v15685_v55  ;;  %v1357_v55 = vsub.f32 %v15669_v6, %v15711_v12  ;;  %1335 = vmatpush1.msra.mxu1 %v15739_v53  ;;  %1134 = vmatprep.subr.mxu0 %v15609_v62 }
  0x5b   :  { %20436 = vst [vmem:[#allocation122_spill] sm:$0xff] %v15690_v33  ;;  %20437 = vst [vmem:[#allocation123_spill] sm:$0xff] %v15693_v35  ;;  %v1369_v50 = vsub.f32 %v15693_v35, %v15729_v15  ;;  %1136 = vmatpush1.msra.mxu0 %v15621_v4 }
  0x5c   :  { %20438 = vst [vmem:[#allocation124_spill] sm:$0xff] %v15697_v57  ;;  %20439 = vst [vmem:[#allocation125_spill] sm:$0xff] %v15702_v41  ;;  %v15745_v57 = vand.u32 4294901760, %v1339_v22  ;;  %v15761_v22 = vand.u32 4294901760, %v1357_v55  ;;  %1138 = vmatprep.subr.mxu0 %v15633_v19  ;;  %v20455_v55 = vld [vmem:[#allocation22_spill] sm:$0xff] }
  0x5d   :  { %20440 = vst [vmem:[#allocation126_spill] sm:$0xff] %v15706_v44  ;;  %20441 = vst [vmem:[#allocation127_spill] sm:$0xff] %v15711_v12  ;;  %v15751_v44 = vand.u32 4294901760, %v1345_v18  ;;  %v15765_v18 = vand.u32 4294901760, %v1363_v31  ;;  %1140 = vmatpush1.msra.mxu0 %v15645_v11  ;;  %v20456_v31 = vld [vmem:[#allocation37_spill] sm:$0xff] }
  0x5e   :  { %20442 = vst [vmem:[#allocation128_spill] sm:$0xff] %v15715_v0  ;;  %20443 = vst [vmem:[#allocation129_spill] sm:$0xff] %v15720_v20  ;;  %v15757_v0 = vand.u32 4294901760, %v1351_v17  ;;  %1341 = vmatprep.subr.mxu1 %v15745_v57  ;;  %1174 = vmatmul.mubr.f32.vlgmr.msra.gmra.mxu0 %v20373_v28  ;;  %v20454_v17 = vld [vmem:[#allocation34_spill] sm:$0xff] }
  0x5f   :  { %20444 = vst [vmem:[#allocation130_spill] sm:$0xff] %v15724_v1  ;;  %20445 = vst [vmem:[#allocation131_spill] sm:$0xff] %v15729_v15  ;;  %1347 = vmatpush1.msra.mxu1 %v15751_v44  ;;  %1413 = vmatprep.subr.mxu0 %v15291_v36  ;;  %v20464_v36 = vld [vmem:[#allocation49_spill] sm:$0xff] }
  0x60   :  { %20446 = vst [vmem:[#allocation132_spill] sm:$0xff] %v15733_v32  ;;  %20447 = vst [vmem:[#allocation133_spill] sm:$0xff] %v15739_v53  ;;  %v15769_v32 = vand.u32 4294901760, %v1369_v50  ;;  %1353 = vmatprep.subr.mxu1 %v15757_v0  ;;  %1416 = vmatpush1.msra.mxu0 %v15310_v45  ;;  %v20457_v50 = vld [vmem:[#allocation24_spill] sm:$0xff]  ;;  %v20462_v45 = vld [vmem:[#allocation46_spill] sm:$0xff] }
  0x61   :  { %20448 = vst [vmem:[#allocation134_spill] sm:$0xff] %v15745_v57  ;;  %20449 = vst [vmem:[#allocation135_spill] sm:$0xff] %v15751_v44  ;;  %1359 = vmatpush1.msra.mxu1 %v15761_v22  ;;  %1419 = vmatprep.subr.mxu0 %v15320_v49  ;;  %v20460_v49 = vld [vmem:[#allocation44_spill] sm:$0xff]  ;;  %v1056_v57 = vld [vmem:[#allocation6 + $0x158] sm:$0xff] }
  0x62   :  { %20450 = vst [vmem:[#allocation136_spill] sm:$0xff] %v15757_v0  ;;  %20451 = vst [vmem:[#allocation137_spill] sm:$0xff] %v15761_v22  ;;  %1365 = vmatprep.subr.mxu1 %v15765_v18  ;;  %1422 = vmatpush1.msra.mxu0 %v15326_v52  ;;  %v20458_v52 = vld [vmem:[#allocation40_spill] sm:$0xff]  ;;  %v1059_v0 = vld [vmem:[#allocation6 + $0x170] sm:$0xff] }
  0x63   :  { %20452 = vst [vmem:[#allocation138_spill] sm:$0xff] %v15765_v18  ;;  %20453 = vst [vmem:[#allocation139_spill] sm:$0xff] %v15769_v32  ;;  %1371 = vmatpush1.msra.mxu1 %v15769_v32  ;;  %1425 = vmatprep.subr.mxu0 %v15333_v56  ;;  %v20459_v56 = vld [vmem:[#allocation26_spill] sm:$0xff] }
  0x64   :  { %1405 = vmatmul.mubr.f32.vlgmr.msra.gmra.mxu1 %v20373_v28  ;;  %1547 = vmatprep.subr.mxu1 %v15281_v25  ;;  %v20468_v32 = vld [vmem:[#allocation62_spill] sm:$0xff] }
  0x65   :  { %1549 = vmatpush1.msra.mxu1 %v15287_v34  ;;  %1428 = vmatpush1.msra.mxu0 %v15343_v61  ;;  %v20461_v61 = vld [vmem:[#allocation29_spill] sm:$0xff] }
  0x66   :  { %1551 = vmatprep.subr.mxu1 %v15293_v37  ;;  %1431 = vmatprep.subr.mxu0 %v15355_v3  ;;  %v20463_v3 = vld [vmem:[#allocation32_spill] sm:$0xff]  ;;  %v1055_v1 = vld [vmem:[#allocation6 + $0x150] sm:$0xff] }
  0x67   :  { %1553 = vmatpush1.msra.mxu1 %v15296_v39  ;;  %1434 = vmatpush1.msra.mxu0 %v20454_v17  ;;  %v20465_v17 = vld [vmem:[#allocation53_spill] sm:$0xff] }
  0x68   :  { %1555 = vmatprep.subr.mxu1 %v15303_v42  ;;  %1437 = vmatprep.subr.mxu0 %v20456_v31  ;;  %v20466_v31 = vld [vmem:[#allocation59_spill] sm:$0xff] }
  0x69   :  { %1557 = vmatpush1.msra.mxu1 %v15312_v46  ;;  %1440 = vmatpush1.msra.mxu0 %v20458_v52  ;;  %v20467_v52 = vld [vmem:[#allocation41_spill] sm:$0xff] }
  0x6a   :  { %1559 = vmatprep.subr.mxu1 %v20455_v55  ;;  %1443 = vmatprep.subr.mxu0 %v20460_v49  ;;  %v20469_v49 = vld [vmem:[#allocation67_spill] sm:$0xff] }
  0x6b   :  { %1561 = vmatpush1.msra.mxu1 %v20457_v50  ;;  %1446 = vmatpush1.msra.mxu0 %v20462_v45  ;;  %v20470_v45 = vld [vmem:[#allocation76_spill] sm:$0xff] }
  0x6c   :  { %1563 = vmatprep.subr.mxu1 %v20459_v56  ;;  %1449 = vmatprep.subr.mxu0 %v20464_v36  ;;  %v20471_v36 = vld [vmem:[#allocation80_spill] sm:$0xff] }
  0x6d   :  { %1565 = vmatpush1.msra.mxu1 %v20461_v61  ;;  %1452 = vmatpush1.msra.mxu0 %v20465_v17  ;;  %v20498_v17 = vld [vmem:[#allocation92_spill] sm:$0xff] }
  0x6e   :  { %1567 = vmatprep.subr.mxu1 %v20463_v3  ;;  %1455 = vmatprep.subr.mxu0 %v20466_v31 }
  0x6f   :  { %1569 = vmatpush1.msra.mxu1 %v15367_v8  ;;  %1458 = vmatpush1.msra.mxu0 %v20468_v32 }
  0x70   :  { %1571 = vmatprep.subr.mxu1 %v15376_v13  ;;  %1461 = vmatprep.subr.mxu0 %v20469_v49 }
  0x71   :  { %1573 = vmatpush1.msra.mxu1 %v20467_v52  ;;  %1464 = vmatpush1.msra.mxu0 %v20470_v45  ;;  %v20493_v45 = vld [vmem:[#allocation79_spill] sm:$0xff] }
  0x72   :  { %1575 = vmatprep.subr.mxu1 %v15411_v38  ;;  %1467 = vmatprep.subr.mxu0 %v20471_v36 }
  0x73   :  { %1577 = vmatpush1.msra.mxu1 %v15423_v47  ;;  %1470 = vmatpush1.msra.mxu0 %v15548_v14  ;;  %v1067_v14 = vld [vmem:[#allocation6 + $0x1b0] sm:$0xff] }
  0x74   :  { %1579 = vmatprep.subr.mxu1 %v15447_v63  ;;  %1473 = vmatprep.subr.mxu0 %v15559_v2  ;;  %v15899_v31 = vand.u32 4294901760, %v1067_v14 }
  0x75   :  { %1581 = vmatpush1.msra.mxu1 %v15483_v43  ;;  %1476 = vmatpush1.msra.mxu0 %v15571_v26  ;;  %v20488_v26 = vld [vmem:[#allocation70_spill] sm:$0xff] }
  0x76   :  { %1583 = vmatprep.subr.mxu1 %v15494_v9  ;;  %1479 = vmatprep.subr.mxu0 %v15583_v10  ;;  %20497 = vst [vmem:[#allocation147_spill] sm:$0xff] %v15899_v31 }
  0x77   :  { %1585 = vmatpush1.msra.mxu1 %v15505_v60  ;;  %1482 = vmatpush1.msra.mxu0 %v15595_v51  ;;  %v20485_v51 = vld [vmem:[#allocation61_spill] sm:$0xff] }
  0x78   :  { %1587 = vmatprep.subr.mxu1 %v15516_v48  ;;  %1485 = vmatprep.subr.mxu0 %v15607_v59  ;;  %v20484_v59 = vld [vmem:[#allocation58_spill] sm:$0xff] }
  0x79   :  { %1589 = vmatpush1.msra.mxu1 %v15527_v29  ;;  %1488 = vmatpush1.msra.mxu0 %v15619_v5 }
  0x7a   :  { %1591 = vmatprep.subr.mxu1 %v15539_v21  ;;  %1491 = vmatprep.subr.mxu0 %v15631_v23  ;;  %v20477_v23 = vld [vmem:[#allocation39_spill] sm:$0xff] }
  0x7b   :  { %1593 = vmatpush1.msra.mxu1 %v15550_v58  ;;  %1494 = vmatpush1.msra.mxu0 %v15643_v16  ;;  %v20476_v16 = vld [vmem:[#allocation36_spill] sm:$0xff] }
  0x7c   :  { %1595 = vmatprep.subr.mxu1 %v15561_v7  ;;  %1497 = vmatprep.subr.mxu0 %v15657_v24  ;;  %v20472_v24 = vld [vmem:[#allocation20_spill] sm:$0xff] }
  0x7d   :  { %1597 = vmatpush1.msra.mxu1 %v15573_v27  ;;  %1500 = vmatpush1.msra.mxu0 %v15669_v6  ;;  %v20473_v6 = vld [vmem:[#allocation27_spill] sm:$0xff] }
  0x7e   :  { %1599 = vmatprep.subr.mxu1 %v15585_v30  ;;  %1503 = vmatprep.subr.mxu0 %v15681_v40  ;;  %v20474_v40 = vld [vmem:[#allocation30_spill] sm:$0xff] }
  0x7f   :  { %1601 = vmatpush1.msra.mxu1 %v15597_v54  ;;  %1506 = vmatpush1.msra.mxu0 %v15693_v35  ;;  %v20475_v35 = vld [vmem:[#allocation33_spill] sm:$0xff] }
  0x80   :  { %1603 = vmatprep.subr.mxu1 %v15609_v62  ;;  %1539 = vmatprep.mubr.f32.mxu0 %v20373_v28 }
  0x81   :  { %1605 = vmatpush1.msra.mxu1 %v15621_v4  ;;  %1540 = vmatmul.mubr.f32.vlgmr.msra.gmra.mxu0 %v20373_v28 }
  0x82   :  { %1607 = vmatprep.subr.mxu1 %v15633_v19  ;;  %1642 = vmatprep.mubr.f32.mxu1 %v20373_v28 }
  0x83   :  { %1609 = vmatpush1.msra.mxu1 %v15645_v11  ;;  %1652 = vmatprep.subr.mxu0 %v20472_v24  ;;  %v20478_v24 = vld [vmem:[#allocation43_spill] sm:$0xff] }
  0x84   :  { %1643 = vmatmul.mubr.f32.vlgmr.msra.gmra.mxu1 %v20373_v28  ;;  %1656 = vmatpush1.msra.mxu0 %v20473_v6  ;;  %v20479_v6 = vld [vmem:[#allocation45_spill] sm:$0xff] }
  0x85   :  { %1817 = vmatprep.subr.mxu1 %v15281_v25  ;;  %1660 = vmatprep.subr.mxu0 %v20474_v40  ;;  %v1076_v40 = vld [vmem:[#allocation6 + $0x1f8] sm:$0xff] }
  0x86   :  { %1819 = vmatpush1.msra.mxu1 %v15287_v34  ;;  %1664 = vmatpush1.msra.mxu0 %v20475_v35  ;;  %v20480_v35 = vld [vmem:[#allocation48_spill] sm:$0xff]  ;;  %v15869_v5 = vand.u32 4294901760, %v1076_v40  ;;  %v1040_v34 = vld [vmem:[#allocation6 + $0xd8] sm:$0xff] }
  0x87   :  { %1821 = vmatprep.subr.mxu1 %v15293_v37  ;;  %1668 = vmatprep.subr.mxu0 %v20476_v16  ;;  %v20481_v16 = vld [vmem:[#allocation52_spill] sm:$0xff]  ;;  %v1043_v37 = vld [vmem:[#allocation6 + $0xf0] sm:$0xff] }
  0x88   :  { %1823 = vmatpush1.msra.mxu1 %v15296_v39  ;;  %1672 = vmatpush1.msra.mxu0 %v20477_v23  ;;  %v20482_v23 = vld [vmem:[#allocation55_spill] sm:$0xff]  ;;  %20483 = vst [vmem:[#allocation140_spill] sm:$0xff] %v15869_v5  ;;  %v15882_v2 = vsub.f32 %v1076_v40, %v15869_v5  ;;  %v20495_v40 = vld [vmem:[#allocation89_spill] sm:$0xff] }
  0x89   :  { %1825 = vmatprep.subr.mxu1 %v15303_v42  ;;  %1676 = vmatprep.subr.mxu0 %v20478_v24  ;;  %v1075_v24 = vld [vmem:[#allocation6 + $0x1f0] sm:$0xff] }
  0x8a   :  { %1827 = vmatpush1.msra.mxu1 %v15312_v46  ;;  %1680 = vmatpush1.msra.mxu0 %v20479_v6  ;;  %v1072_v6 = vld [vmem:[#allocation6 + $0x1d8] sm:$0xff]  ;;  %v15877_v10 = vand.u32 4294901760, %v1075_v24  ;;  %20489 = vst [vmem:[#allocation142_spill] sm:$0xff] %v15882_v2  ;;  %v15904_v18 = vand.u32 4294901760, %v15882_v2 }
  0x8b   :  { %1829 = vmatprep.subr.mxu1 %v20455_v55  ;;  %1684 = vmatprep.subr.mxu0 %v20480_v35  ;;  %v1071_v35 = vld [vmem:[#allocation6 + $0x1d0] sm:$0xff]  ;;  %v1044_v46 = vld [vmem:[#allocation6 + $0xf8] sm:$0xff] }
  0x8c   :  { %1831 = vmatpush1.msra.mxu1 %v20457_v50  ;;  %1688 = vmatpush1.msra.mxu0 %v20481_v16  ;;  %v20486_v16 = vld [vmem:[#allocation64_spill] sm:$0xff]  ;;  %20487 = vst [vmem:[#allocation141_spill] sm:$0xff] %v15877_v10  ;;  %v15888_v36 = vand.u32 4294901760, %v1071_v35  ;;  %v15897_v32 = vsub.f32 %v1075_v24, %v15877_v10  ;;  %20499 = vst [vmem:[#allocation148_spill] sm:$0xff] %v15904_v18 }
  0x8d   :  { %1833 = vmatprep.subr.mxu1 %v20459_v56  ;;  %1692 = vmatprep.subr.mxu0 %v20482_v23  ;;  %v1068_v23 = vld [vmem:[#allocation6 + $0x1b8] sm:$0xff]  ;;  %v20502_v24 = vld [vmem:[#allocation96_spill] sm:$0xff] }
  0x8e   :  { %1835 = vmatpush1.msra.mxu1 %v20461_v61  ;;  %1696 = vmatpush1.msra.mxu0 %v20484_v59  ;;  %v15884_v59 = vand.u32 4294901760, %v1072_v6  ;;  %20492 = vst [vmem:[#allocation144_spill] sm:$0xff] %v15888_v36  ;;  %v15892_v49 = vand.u32 4294901760, %v1068_v23  ;;  %20496 = vst [vmem:[#allocation146_spill] sm:$0xff] %v15897_v32  ;;  %v20528_v56 = vld [vmem:[#allocation119_spill] sm:$0xff] }
  0x8f   :  { %1837 = vmatprep.subr.mxu1 %v20463_v3  ;;  %1700 = vmatprep.subr.mxu0 %v20485_v51  ;;  %v20491_v51 = vld [vmem:[#allocation73_spill] sm:$0xff]  ;;  %v20524_v3 = vld [vmem:[#allocation116_spill] sm:$0xff] }
  0x90   :  { %1839 = vmatpush1.msra.mxu1 %v15367_v8  ;;  %1704 = vmatpush1.msra.mxu0 %v20486_v16  ;;  %20490 = vst [vmem:[#allocation143_spill] sm:$0xff] %v15884_v59  ;;  %v1064_v16 = vld [vmem:[#allocation6 + $0x198] sm:$0xff]  ;;  %20494 = vst [vmem:[#allocation145_spill] sm:$0xff] %v15892_v49 }
  0x91   :  { %1841 = vmatprep.subr.mxu1 %v15376_v13  ;;  %1708 = vmatprep.subr.mxu0 %v20488_v26  ;;  %v1063_v26 = vld [vmem:[#allocation6 + $0x190] sm:$0xff]  ;;  %v15909_v22 = vand.u32 4294901760, %v1064_v16 }
  0x92   :  { %1843 = vmatpush1.msra.mxu1 %v20467_v52  ;;  %1712 = vmatpush1.msra.mxu0 %v20491_v51  ;;  %v1060_v51 = vld [vmem:[#allocation6 + $0x178] sm:$0xff]  ;;  %v15916_v44 = vand.u32 4294901760, %v1063_v26  ;;  %v15955_v52 = vand.u32 4294901760, %v1055_v1  ;;  %v20520_v13 = vld [vmem:[#allocation113_spill] sm:$0xff] }
  0x93   :  { %1845 = vmatprep.subr.mxu1 %v15411_v38  ;;  %1716 = vmatprep.subr.mxu0 %v20493_v45  ;;  %v15907_v45 = vsub.f32 %v1072_v6, %v15884_v59  ;;  %20501 = vst [vmem:[#allocation150_spill] sm:$0xff] %v15909_v22  ;;  %v15921_v6 = vsub.f32 %v1068_v23, %v15892_v49  ;;  %v15923_v53 = vand.u32 4294901760, %v1060_v51  ;;  %v20512_v23 = vld [vmem:[#allocation106_spill] sm:$0xff]  ;;  %v20516_v38 = vld [vmem:[#allocation109_spill] sm:$0xff] }
  0x94   :  { %1847 = vmatpush1.msra.mxu1 %v15423_v47  ;;  %1720 = vmatpush1.msra.mxu0 %v20495_v40  ;;  %v15914_v40 = vsub.f32 %v1071_v35, %v15888_v36  ;;  %20504 = vst [vmem:[#allocation152_spill] sm:$0xff] %v15916_v44  ;;  %v15928_v35 = vand.u32 4294901760, %v15897_v32  ;;  %v15945_v47 = vand.u32 4294901760, %v1056_v57  ;;  %20519 = vst [vmem:[#allocation163_spill] sm:$0xff] %v15955_v52 }
  0x95   :  { %1849 = vmatprep.subr.mxu1 %v15447_v63  ;;  %1724 = vmatprep.subr.mxu0 %v20498_v17  ;;  %20500 = vst [vmem:[#allocation149_spill] sm:$0xff] %v15907_v45  ;;  %v20505_v17 = vld [vmem:[#allocation100_spill] sm:$0xff]  ;;  %20506 = vst [vmem:[#allocation153_spill] sm:$0xff] %v15921_v6  ;;  %v15933_v63 = vand.u32 4294901760, %v1059_v0  ;;  %v15963_v8 = vsub.f32 %v1060_v51, %v15923_v53  ;;  %v1047_v51 = vld [vmem:[#allocation6 + $0x110] sm:$0xff] }
  0x96   :  { %1851 = vmatpush1.msra.mxu1 %v15483_v43  ;;  %1728 = vmatpush1.msra.mxu0 %v20502_v24  ;;  %20503 = vst [vmem:[#allocation151_spill] sm:$0xff] %v15914_v40  ;;  %20507 = vst [vmem:[#allocation154_spill] sm:$0xff] %v15923_v53  ;;  %v20508_v43 = vld [vmem:[#allocation103_spill] sm:$0xff]  ;;  %v15931_v24 = vsub.f32 %v1067_v14, %v15899_v31  ;;  %v1051_v14 = vld [vmem:[#allocation6 + $0x130] sm:$0xff]  ;;  %v15989_v55 = vsub.f32 %v1056_v57, %v15945_v47  ;;  %v16013_v42 = vand.u32 4294901760, %v1047_v51 }
  0x97   :  { %1853 = vmatprep.subr.mxu1 %v15494_v9  ;;  %1732 = vmatprep.subr.mxu0 %v20505_v17  ;;  %20509 = vst [vmem:[#allocation155_spill] sm:$0xff] %v15928_v35  ;;  %20511 = vst [vmem:[#allocation157_spill] sm:$0xff] %v15933_v63  ;;  %v1052_v9 = vld [vmem:[#allocation6 + $0x138] sm:$0xff]  ;;  %v2025_v17 = vsub.f32 %v15882_v2, %v15904_v18  ;;  %v15977_v61 = vand.u32 4294901760, %v1051_v14 }
  0x98   :  { %1855 = vmatpush1.msra.mxu1 %v15505_v60  ;;  %1736 = vmatpush1.msra.mxu0 %v20508_v43  ;;  %20510 = vst [vmem:[#allocation156_spill] sm:$0xff] %v15931_v24  ;;  %v15940_v60 = vand.u32 4294901760, %v15907_v45  ;;  %v15943_v43 = vsub.f32 %v1064_v16, %v15909_v22  ;;  %20515 = vst [vmem:[#allocation160_spill] sm:$0xff] %v15945_v47  ;;  %v15960_v16 = vand.u32 4294901760, %v15921_v6 }
  0x99   :  { %1857 = vmatprep.subr.mxu1 %v15516_v48  ;;  %1740 = vmatprep.subr.mxu0 %v20512_v23  ;;  %v15950_v48 = vand.u32 4294901760, %v15914_v40  ;;  %v15953_v23 = vsub.f32 %v1063_v26, %v15916_v44  ;;  %20522 = vst [vmem:[#allocation165_spill] sm:$0xff] %v15963_v8  ;;  %v2031_v26 = vsub.f32 %v15897_v32, %v15928_v35  ;;  %20527 = vst [vmem:[#allocation169_spill] sm:$0xff] %v15977_v61 }
  0x9a   :  { %20513 = vst [vmem:[#allocation158_spill] sm:$0xff] %v15940_v60  ;;  %20514 = vst [vmem:[#allocation159_spill] sm:$0xff] %v15943_v43  ;;  %1859 = vmatpush1.msra.mxu1 %v15527_v29  ;;  %1744 = vmatpush1.msra.mxu0 %v20516_v38  ;;  %v15965_v29 = vand.u32 4294901760, %v1052_v9  ;;  %v1048_v38 = vld [vmem:[#allocation6 + $0x118] sm:$0xff]  ;;  %v15981_v50 = vand.u32 4294901760, %v2025_v17  ;;  %v15999_v17 = vsub.f32 %v1055_v1, %v15955_v52 }
  0x9b   :  { %20517 = vst [vmem:[#allocation161_spill] sm:$0xff] %v15950_v48  ;;  %20518 = vst [vmem:[#allocation162_spill] sm:$0xff] %v15953_v23  ;;  %1861 = vmatprep.subr.mxu1 %v15539_v21  ;;  %1748 = vmatprep.subr.mxu0 %v20520_v13  ;;  %v15972_v21 = vand.u32 4294901760, %v15931_v24  ;;  %v15975_v13 = vsub.f32 %v1059_v0, %v15933_v63  ;;  %v2043_v0 = vsub.f32 %v15914_v40, %v15950_v48 }
  0x9c   :  { %20521 = vst [vmem:[#allocation164_spill] sm:$0xff] %v15960_v16  ;;  %20523 = vst [vmem:[#allocation166_spill] sm:$0xff] %v15965_v29  ;;  %1863 = vmatpush1.msra.mxu1 %v15550_v58  ;;  %1752 = vmatpush1.msra.mxu0 %v20524_v3  ;;  %v2037_v3 = vsub.f32 %v15907_v45, %v15940_v60  ;;  %v15986_v58 = vand.u32 4294901760, %v15943_v43  ;;  %v2049_v57 = vsub.f32 %v15921_v6, %v15960_v16 }
  0x9d   :  { %20525 = vst [vmem:[#allocation167_spill] sm:$0xff] %v15972_v21  ;;  %20526 = vst [vmem:[#allocation168_spill] sm:$0xff] %v15975_v13  ;;  %1865 = vmatprep.subr.mxu1 %v15561_v7  ;;  %1756 = vmatprep.subr.mxu0 %v20528_v56  ;;  %v15996_v56 = vand.u32 4294901760, %v15953_v23  ;;  %v16001_v7 = vand.u32 4294901760, %v1048_v38  ;;  %v16017_v1 = vand.u32 4294901760, %v2031_v26  ;;  %v16025_v39 = vsub.f32 %v1051_v14, %v15977_v61 }
  0x9e   :  { %20529 = vst [vmem:[#allocation170_spill] sm:$0xff] %v15981_v50  ;;  %20530 = vst [vmem:[#allocation171_spill] sm:$0xff] %v15986_v58  ;;  %1867 = vmatpush1.msra.mxu1 %v15573_v27  ;;  %1760 = vmatpush1.msra.mxu0 %v15690_v33  ;;  %v16008_v33 = vand.u32 4294901760, %v15963_v8  ;;  %v16011_v27 = vsub.f32 %v1052_v9, %v15965_v29  ;;  %v16029_v9 = vand.u32 4294901760, %v2037_v3  ;;  %v16034_v26 = vand.u32 4294901760, %v15989_v55 }
  0x9f   :  { %20531 = vst [vmem:[#allocation172_spill] sm:$0xff] %v15989_v55  ;;  %20532 = vst [vmem:[#allocation173_spill] sm:$0xff] %v15996_v56  ;;  %1869 = vmatprep.subr.mxu1 %v15585_v30  ;;  %1764 = vmatprep.subr.mxu0 %v15702_v41  ;;  %v2055_v41 = vsub.f32 %v15931_v24, %v15972_v21  ;;  %v16022_v30 = vand.u32 4294901760, %v15975_v13  ;;  %v16040_v14 = vand.u32 4294901760, %v2043_v0  ;;  %v16045_v3 = vand.u32 4294901760, %v15999_v17 }
  0xa0   :  { %20533 = vst [vmem:[#allocation174_spill] sm:$0xff] %v15999_v17  ;;  %20534 = vst [vmem:[#allocation175_spill] sm:$0xff] %v16001_v7  ;;  %1871 = vmatpush1.msra.mxu1 %v15597_v54  ;;  %1768 = vmatpush1.msra.mxu0 %v15711_v12  ;;  %v2061_v12 = vsub.f32 %v15943_v43, %v15986_v58  ;;  %v16036_v54 = vand.u32 4294901760, %v1044_v46  ;;  %v16052_v25 = vand.u32 4294901760, %v2049_v57  ;;  %v1036_v58 = vld [vmem:[#allocation6 + $0xb8] sm:$0xff]  ;;  %v16082_v21 = vand.u32 4294901760, %v1040_v34 }
  0xa1   :  { %20535 = vst [vmem:[#allocation176_spill] sm:$0xff] %v16008_v33  ;;  %20536 = vst [vmem:[#allocation177_spill] sm:$0xff] %v16011_v27  ;;  %1873 = vmatprep.subr.mxu1 %v15609_v62  ;;  %1772 = vmatprep.subr.mxu0 %v15720_v20  ;;  %v2067_v20 = vsub.f32 %v15953_v23, %v15996_v56  ;;  %v16048_v62 = vsub.f32 %v1048_v38, %v16001_v7  ;;  %v1039_v56 = vld [vmem:[#allocation6 + $0xd0] sm:$0xff]  ;;  %v16064_v38 = vand.u32 4294901760, %v2055_v41 }
  0xa2   :  { %20537 = vst [vmem:[#allocation178_spill] sm:$0xff] %v16013_v42  ;;  %20538 = vst [vmem:[#allocation179_spill] sm:$0xff] %v16017_v1  ;;  %1875 = vmatpush1.msra.mxu1 %v15621_v4  ;;  %1776 = vmatpush1.msra.mxu0 %v15729_v15  ;;  %v2073_v0 = vsub.f32 %v15963_v8, %v16008_v33  ;;  %v16057_v15 = vand.u32 4294901760, %v16011_v27  ;;  %v16060_v4 = vsub.f32 %v1047_v51, %v16013_v42  ;;  %v1024_v8 = vld [vmem:[#allocation6 + $0x58] sm:$0xff] }
  0xa3   :  { %20539 = vst [vmem:[#allocation180_spill] sm:$0xff] %v16022_v30  ;;  %20540 = vst [vmem:[#allocation181_spill] sm:$0xff] %v16025_v39  ;;  %1809 = vmatprep.mubr.f32.mxu0 %v20373_v28  ;;  %1877 = vmatprep.subr.mxu1 %v15633_v19  ;;  %v2079_v57 = vsub.f32 %v15975_v13, %v16022_v30  ;;  %v16069_v19 = vand.u32 4294901760, %v16025_v39  ;;  %v16071_v33 = vand.u32 4294901760, %v1043_v37  ;;  %v16075_v51 = vand.u32 4294901760, %v2061_v12  ;;  %v1035_v30 = vld [vmem:[#allocation6 + $0xb0] sm:$0xff] }
  0xa4   :  { %20541 = vst [vmem:[#allocation182_spill] sm:$0xff] %v16029_v9  ;;  %20542 = vst [vmem:[#allocation183_spill] sm:$0xff] %v16034_v26  ;;  %1810 = vmatmul.mubr.f32.vlgmr.msra.gmra.mxu0 %v20373_v28  ;;  %1879 = vmatpush1.msra.mxu1 %v15645_v11  ;;  %v2085_v11 = vsub.f32 %v15989_v55, %v16034_v26  ;;  %v16080_v41 = vsub.f32 %v1044_v46, %v16036_v54  ;;  %v16086_v16 = vand.u32 4294901760, %v2067_v20  ;;  %v1032_v26 = vld [vmem:[#allocation6 + $0x98] sm:$0xff] }
  0xa5   :  { %20543 = vst [vmem:[#allocation184_spill] sm:$0xff] %v16036_v54  ;;  %20544 = vst [vmem:[#allocation185_spill] sm:$0xff] %v16040_v14  ;;  %1912 = vmatprep.mubr.f32.mxu1 %v20373_v28  ;;  %1920 = vmatprep.subr.mxu0 %v15869_v5  ;;  %v2091_v48 = vsub.f32 %v15999_v17, %v16045_v3  ;;  %v16091_v12 = vand.u32 4294901760, %v16048_v62  ;;  %v16093_v60 = vand.u32 4294901760, %v1039_v56  ;;  %v16097_v46 = vand.u32 4294901760, %v2073_v0 }
  0xa6   :  { %20545 = vst [vmem:[#allocation186_spill] sm:$0xff] %v16045_v3  ;;  %20546 = vst [vmem:[#allocation187_spill] sm:$0xff] %v16048_v62  ;;  %1913 = vmatmul.mubr.f32.vlgmr.msra.gmra.mxu1 %v20373_v28  ;;  %1922 = vmatpush1.msra.mxu0 %v15877_v10  ;;  %v2097_v35 = vsub.f32 %v16011_v27, %v16057_v15  ;;  %v16102_v20 = vand.u32 4294901760, %v16060_v4  ;;  %v16104_v18 = vand.u32 4294901760, %v1036_v58  ;;  %v1031_v3 = vld [vmem:[#allocation6 + $0x90] sm:$0xff]  ;;  %v16108_v17 = vand.u32 4294901760, %v2079_v57 }
  0xa7   :  { %20547 = vst [vmem:[#allocation188_spill] sm:$0xff] %v16052_v25  ;;  %20548 = vst [vmem:[#allocation189_spill] sm:$0xff] %v16057_v15  ;;  %2027 = vmatprep.subr.mxu1 %v15981_v50  ;;  %1924 = vmatprep.subr.mxu0 %v15884_v59  ;;  %v2103_v50 = vsub.f32 %v16025_v39, %v16069_v19  ;;  %v16113_v0 = vsub.f32 %v1043_v37, %v16071_v33  ;;  %v16115_v55 = vand.u32 4294901760, %v1035_v30  ;;  %v1028_v15 = vld [vmem:[#allocation6 + $0x78] sm:$0xff] }
  0xa8   :  { %20549 = vst [vmem:[#allocation190_spill] sm:$0xff] %v16060_v4  ;;  %20550 = vst [vmem:[#allocation191_spill] sm:$0xff] %v16064_v38  ;;  %2033 = vmatpush1.msra.mxu1 %v16017_v1  ;;  %1926 = vmatpush1.msra.mxu0 %v15888_v36  ;;  %v16119_v27 = vand.u32 4294901760, %v2085_v11  ;;  %v16122_v1 = vand.u32 4294901760, %v16080_v41  ;;  %v16125_v57 = vsub.f32 %v1040_v34, %v16082_v21  ;;  %v16127_v13 = vand.u32 4294901760, %v1032_v26 }
  0xa9   :  { %20551 = vst [vmem:[#allocation192_spill] sm:$0xff] %v16069_v19  ;;  %20552 = vst [vmem:[#allocation193_spill] sm:$0xff] %v16071_v33  ;;  %2039 = vmatprep.subr.mxu1 %v16029_v9  ;;  %1928 = vmatprep.subr.mxu0 %v15892_v49  ;;  %v1027_v19 = vld [vmem:[#allocation6 + $0x70] sm:$0xff]  ;;  %v16131_v37 = vand.u32 4294901760, %v2091_v48  ;;  %v2109_v9 = vsub.f32 %v16048_v62, %v16091_v12  ;;  %v16136_v11 = vsub.f32 %v1039_v56, %v16093_v60 }
  0xaa   :  { %20553 = vst [vmem:[#allocation194_spill] sm:$0xff] %v16075_v51  ;;  %20554 = vst [vmem:[#allocation195_spill] sm:$0xff] %v16080_v41  ;;  %2045 = vmatpush1.msra.mxu1 %v16040_v14  ;;  %1930 = vmatpush1.msra.mxu0 %v15899_v31  ;;  %v16138_v39 = vand.u32 4294901760, %v1031_v3  ;;  %v16142_v34 = vand.u32 4294901760, %v2097_v35  ;;  %v2115_v14 = vsub.f32 %v16060_v4, %v16102_v20  ;;  %v16149_v23 = vand.u32 4294901760, %v1028_v15 }
  0xab   :  { %20555 = vst [vmem:[#allocation196_spill] sm:$0xff] %v16082_v21  ;;  %20556 = vst [vmem:[#allocation197_spill] sm:$0xff] %v16086_v16  ;;  %2051 = vmatprep.subr.mxu1 %v16052_v25  ;;  %1932 = vmatprep.subr.mxu0 %v15909_v22  ;;  %v16147_v48 = vsub.f32 %v1036_v58, %v16104_v18  ;;  %v16153_v56 = vand.u32 4294901760, %v2103_v50  ;;  %v16156_v25 = vand.u32 4294901760, %v16113_v0  ;;  %v16161_v62 = vand.u32 4294901760, %v1027_v19  ;;  %v1015_v22 = vld [vmem:[#allocation6 + $0x10] sm:$0xff] }
  0xac   :  { %20557 = vst [vmem:[#allocation198_spill] sm:$0xff] %v16091_v12  ;;  %20558 = vst [vmem:[#allocation199_spill] sm:$0xff] %v16093_v60  ;;  %v1023_v12 = vld [vmem:[#allocation6 + $0x50] sm:$0xff]  ;;  %2057 = vmatpush1.msra.mxu1 %v16064_v38  ;;  %1934 = vmatpush1.msra.mxu0 %v15916_v44  ;;  %v16159_v35 = vsub.f32 %v1035_v30, %v16115_v55  ;;  %v2121_v58 = vsub.f32 %v16080_v41, %v16122_v1  ;;  %v16168_v38 = vand.u32 4294901760, %v16125_v57 }
  0xad   :  { %20559 = vst [vmem:[#allocation200_spill] sm:$0xff] %v16097_v46  ;;  %20560 = vst [vmem:[#allocation201_spill] sm:$0xff] %v16102_v20  ;;  %v1020_v20 = vld [vmem:[#allocation6 + $0x38] sm:$0xff]  ;;  %2063 = vmatprep.subr.mxu1 %v16075_v51  ;;  %1936 = vmatprep.subr.mxu0 %v15923_v53  ;;  %v16171_v50 = vsub.f32 %v1032_v26, %v16127_v13  ;;  %v16173_v4 = vand.u32 4294901760, %v1024_v8  ;;  %v1019_v30 = vld [vmem:[#allocation6 + $0x30] sm:$0xff]  ;;  %v16177_v44 = vand.u32 4294901760, %v2109_v9 }
  0xae   :  { %20561 = vst [vmem:[#allocation202_spill] sm:$0xff] %v16104_v18  ;;  %20562 = vst [vmem:[#allocation203_spill] sm:$0xff] %v16108_v17  ;;  %2069 = vmatpush1.msra.mxu1 %v16086_v16  ;;  %1938 = vmatpush1.msra.mxu0 %v15933_v63  ;;  %v16180_v51 = vand.u32 4294901760, %v16136_v11  ;;  %v16185_v41 = vand.u32 4294901760, %v1023_v12  ;;  %v1016_v53 = vld [vmem:[#allocation6 + $0x18] sm:$0xff]  ;;  %v16189_v26 = vand.u32 4294901760, %v2115_v14  ;;  %v16195_v9 = vsub.f32 %v1028_v15, %v16149_v23 }
  0xaf   :  { %20563 = vst [vmem:[#allocation204_spill] sm:$0xff] %v16113_v0  ;;  %20564 = vst [vmem:[#allocation205_spill] sm:$0xff] %v16115_v55  ;;  %2075 = vmatprep.subr.mxu1 %v16097_v46  ;;  %1940 = vmatprep.subr.mxu0 %v15945_v47  ;;  %v16192_v16 = vand.u32 4294901760, %v16147_v48  ;;  %v16197_v63 = vand.u32 4294901760, %v1020_v20  ;;  %v16204_v46 = vand.u32 4294901760, %v16159_v35  ;;  %v16207_v14 = vsub.f32 %v1027_v19, %v16161_v62 }
  0xb0   :  { %20565 = vst [vmem:[#allocation206_spill] sm:$0xff] %v16119_v27  ;;  %20566 = vst [vmem:[#allocation207_spill] sm:$0xff] %v16122_v1  ;;  %v16183_v1 = vsub.f32 %v1031_v3, %v16138_v39  ;;  %2081 = vmatpush1.msra.mxu1 %v16108_v17  ;;  %1942 = vmatpush1.msra.mxu0 %v15955_v52  ;;  %v2127_v3 = vsub.f32 %v16113_v0, %v16156_v25  ;;  %v16209_v47 = vand.u32 4294901760, %v1019_v30 }
  0xb1   :  { %20567 = vst [vmem:[#allocation208_spill] sm:$0xff] %v16125_v57  ;;  %20568 = vst [vmem:[#allocation209_spill] sm:$0xff] %v16127_v13  ;;  %2087 = vmatprep.subr.mxu1 %v16119_v27  ;;  %1944 = vmatprep.subr.mxu0 %v15965_v29  ;;  %v2133_v15 = vsub.f32 %v16125_v57, %v16168_v38  ;;  %v16216_v17 = vand.u32 4294901760, %v16171_v50  ;;  %v16221_v0 = vand.u32 4294901760, %v1016_v53  ;;  %v16233_v57 = vand.u32 4294901760, %v1015_v22 }
  0xb2   :  { %20569 = vst [vmem:[#allocation210_spill] sm:$0xff] %v16131_v37  ;;  %20570 = vst [vmem:[#allocation211_spill] sm:$0xff] %v16136_v11  ;;  %2093 = vmatpush1.msra.mxu1 %v16131_v37  ;;  %1946 = vmatpush1.msra.mxu0 %v15977_v61  ;;  %v2139_v19 = vsub.f32 %v16136_v11, %v16180_v51  ;;  %v16228_v27 = vand.u32 4294901760, %v16183_v1  ;;  %v2145_v37 = vsub.f32 %v16147_v48, %v16192_v16 }
  0xb3   :  { %20571 = vst [vmem:[#allocation212_spill] sm:$0xff] %v16138_v39  ;;  %20572 = vst [vmem:[#allocation213_spill] sm:$0xff] %v16142_v34  ;;  %2099 = vmatprep.subr.mxu1 %v16142_v34  ;;  %1948 = vmatprep.subr.mxu0 %v16001_v7  ;;  %v16242_v61 = vand.u32 4294901760, %v16195_v9  ;;  %v2151_v34 = vsub.f32 %v16159_v35, %v16204_v46 }
  0xb4   :  { %20573 = vst [vmem:[#allocation214_spill] sm:$0xff] %v16147_v48  ;;  %20574 = vst [vmem:[#allocation215_spill] sm:$0xff] %v16149_v23  ;;  %2105 = vmatpush1.msra.mxu1 %v16153_v56  ;;  %1950 = vmatpush1.msra.mxu0 %v16013_v42 }
  0xb5   :  { %20575 = vst [vmem:[#allocation216_spill] sm:$0xff] %v16153_v56  ;;  %20576 = vst [vmem:[#allocation217_spill] sm:$0xff] %v16156_v25  ;;  %v16219_v25 = vsub.f32 %v1024_v8, %v16173_v4  ;;  %v16237_v8 = vand.u32 4294901760, %v2121_v58  ;;  %v16254_v58 = vand.u32 4294901760, %v16207_v14  ;;  %2111 = vmatprep.subr.mxu1 %v16177_v44  ;;  %1952 = vmatprep.subr.mxu0 %v16036_v54 }
  0xb6   :  { %20577 = vst [vmem:[#allocation218_spill] sm:$0xff] %v16159_v35  ;;  %20578 = vst [vmem:[#allocation219_spill] sm:$0xff] %v16161_v62  ;;  %v2157_v56 = vsub.f32 %v16171_v50, %v16216_v17  ;;  %2117 = vmatpush1.msra.mxu1 %v16189_v26  ;;  %1954 = vmatpush1.msra.mxu0 %v16071_v33 }
  0xb7   :  { %20579 = vst [vmem:[#allocation220_spill] sm:$0xff] %v16168_v38  ;;  %20580 = vst [vmem:[#allocation221_spill] sm:$0xff] %v16171_v50  ;;  %v16231_v38 = vsub.f32 %v1023_v12, %v16185_v41  ;;  %v16249_v12 = vand.u32 4294901760, %v2127_v3  ;;  %v16266_v3 = vand.u32 4294901760, %v16219_v25  ;;  %2123 = vmatprep.subr.mxu1 %v16237_v8  ;;  %1956 = vmatprep.subr.mxu0 %v16082_v21 }
  0xb8   :  { %20581 = vst [vmem:[#allocation222_spill] sm:$0xff] %v16173_v4  ;;  %20582 = vst [vmem:[#allocation223_spill] sm:$0xff] %v16177_v44  ;;  %v2163_v44 = vsub.f32 %v16183_v1, %v16228_v27  ;;  %1958 = vmatpush1.msra.mxu0 %v16093_v60  ;;  %2015 = vmatprep.mubr.f32.mxu0 %v20373_v28 }
  0xb9   :  { %20583 = vst [vmem:[#allocation224_spill] sm:$0xff] %v16180_v51  ;;  %20584 = vst [vmem:[#allocation225_spill] sm:$0xff] %v16183_v1  ;;  %v16245_v51 = vsub.f32 %v1020_v20, %v16197_v63  ;;  %v16261_v20 = vand.u32 4294901760, %v2133_v15  ;;  %v16278_v15 = vand.u32 4294901760, %v16231_v38  ;;  %2129 = vmatpush1.msra.mxu1 %v16249_v12  ;;  %1960 = vmatprep.subr.mxu0 %v16104_v18 }
  0xba   :  { %20585 = vst [vmem:[#allocation226_spill] sm:$0xff] %v16185_v41  ;;  %20586 = vst [vmem:[#allocation227_spill] sm:$0xff] %v16189_v26  ;;  %v2169_v26 = vsub.f32 %v16195_v9, %v16242_v61  ;;  %1962 = vmatpush1.msra.mxu0 %v16115_v55  ;;  %2246 = vmatprep.mubr.f32.mxu1 %v20373_v28 }
  0xbb   :  { %20587 = vst [vmem:[#allocation228_spill] sm:$0xff] %v16192_v16  ;;  %20588 = vst [vmem:[#allocation229_spill] sm:$0xff] %v16195_v9  ;;  %v16257_v16 = vsub.f32 %v1019_v30, %v16209_v47  ;;  %v16273_v30 = vand.u32 4294901760, %v2139_v19  ;;  %v16290_v19 = vand.u32 4294901760, %v16245_v51  ;;  %2135 = vmatprep.subr.mxu1 %v16261_v20  ;;  %1964 = vmatprep.subr.mxu0 %v16127_v13 }
  0xbc   :  { %20589 = vst [vmem:[#allocation230_spill] sm:$0xff] %v16197_v63  ;;  %20590 = vst [vmem:[#allocation231_spill] sm:$0xff] %v16204_v46  ;;  %v16269_v46 = vsub.f32 %v1016_v53, %v16221_v0  ;;  %v16285_v53 = vand.u32 4294901760, %v2145_v37  ;;  %v16303_v37 = vand.u32 4294901760, %v2157_v56  ;;  %v16321_v56 = vand.u32 4294901760, %v2169_v26  ;;  %1966 = vmatpush1.msra.mxu0 %v16138_v39 }
  0xbd   :  { %20591 = vst [vmem:[#allocation232_spill] sm:$0xff] %v16207_v14  ;;  %20592 = vst [vmem:[#allocation233_spill] sm:$0xff] %v16209_v47  ;;  %2141 = vmatpush1.msra.mxu1 %v16273_v30  ;;  %1968 = vmatprep.subr.mxu0 %v16149_v23 }
  0xbe   :  { %20593 = vst [vmem:[#allocation234_spill] sm:$0xff] %v16216_v17  ;;  %20594 = vst [vmem:[#allocation235_spill] sm:$0xff] %v16219_v25  ;;  %v16281_v17 = vsub.f32 %v1015_v22, %v16233_v57  ;;  %v2175_v22 = vsub.f32 %v16207_v14, %v16254_v58  ;;  %2147 = vmatprep.subr.mxu1 %v16285_v53  ;;  %1970 = vmatpush1.msra.mxu0 %v16161_v62 }
  0xbf   :  { %20595 = vst [vmem:[#allocation236_spill] sm:$0xff] %v16221_v0  ;;  %20596 = vst [vmem:[#allocation237_spill] sm:$0xff] %v16228_v27  ;;  %v16294_v27 = vand.u32 4294901760, %v2151_v34  ;;  %v16312_v34 = vand.u32 4294901760, %v2163_v44  ;;  %1972 = vmatprep.subr.mxu0 %v16173_v4 }
  0xc0   :  { %20597 = vst [vmem:[#allocation238_spill] sm:$0xff] %v16231_v38  ;;  %20598 = vst [vmem:[#allocation239_spill] sm:$0xff] %v16233_v57  ;;  %v16327_v44 = vand.u32 4294901760, %v2175_v22  ;;  %1974 = vmatpush1.msra.mxu0 %v16185_v41 }
  0xc1   :  { %20599 = vst [vmem:[#allocation240_spill] sm:$0xff] %v16237_v8  ;;  %20600 = vst [vmem:[#allocation241_spill] sm:$0xff] %v16242_v61  ;;  %v16299_v8 = vand.u32 4294901760, %v16257_v16  ;;  %v2181_v61 = vsub.f32 %v16219_v25, %v16266_v3  ;;  %2153 = vmatpush1.msra.mxu1 %v16294_v27  ;;  %1976 = vmatprep.subr.mxu0 %v16197_v63 }
  0xc2   :  { %20601 = vst [vmem:[#allocation242_spill] sm:$0xff] %v16245_v51  ;;  %20602 = vst [vmem:[#allocation243_spill] sm:$0xff] %v16249_v12  ;;  %v16308_v12 = vand.u32 4294901760, %v16269_v46  ;;  %2159 = vmatprep.subr.mxu1 %v16303_v37  ;;  %1978 = vmatpush1.msra.mxu0 %v16209_v47 }
  0xc3   :  { %20603 = vst [vmem:[#allocation244_spill] sm:$0xff] %v16254_v58  ;;  %20604 = vst [vmem:[#allocation245_spill] sm:$0xff] %v16257_v16  ;;  %v2187_v58 = vsub.f32 %v16231_v38, %v16278_v15  ;;  %2165 = vmatpush1.msra.mxu1 %v16312_v34  ;;  %1980 = vmatprep.subr.mxu0 %v16221_v0 }
  0xc4   :  { %20605 = vst [vmem:[#allocation246_spill] sm:$0xff] %v16261_v20  ;;  %20606 = vst [vmem:[#allocation247_spill] sm:$0xff] %v16266_v3  ;;  %v16317_v20 = vand.u32 4294901760, %v16281_v17  ;;  %v2193_v3 = vsub.f32 %v16245_v51, %v16290_v19  ;;  %v2205_v26 = vsub.f32 %v16269_v46, %v16308_v12  ;;  %2171 = vmatprep.subr.mxu1 %v16321_v56  ;;  %1982 = vmatpush1.msra.mxu0 %v16233_v57 }
  0xc5   :  { %20607 = vst [vmem:[#allocation248_spill] sm:$0xff] %v16269_v46  ;;  %20608 = vst [vmem:[#allocation249_spill] sm:$0xff] %v16273_v30  ;;  %v2199_v30 = vsub.f32 %v16257_v16, %v16299_v8  ;;  %2177 = vmatpush1.msra.mxu1 %v16327_v44  ;;  %2016 = vmatmul.mubr.f32.vlgmr.msra.gmra.mxu0 %v20373_v28 }
  0xc6   :  { %20609 = vst [vmem:[#allocation250_spill] sm:$0xff] %v16278_v15  ;;  %20610 = vst [vmem:[#allocation251_spill] sm:$0xff] %v16281_v17  ;;  %v2211_v22 = vsub.f32 %v16281_v17, %v16317_v20  ;;  %2255 = vmatprep.subr.mxu0 %v15882_v2  ;;  %v20637_v2 = vld [vmem:[#allocation177_spill] sm:$0xff]  ;;  %2381 = vmatprep.mubr.f32.mxu0 %v20373_v28 }
  0xc7   :  { %20611 = vst [vmem:[#allocation252_spill] sm:$0xff] %v16285_v53  ;;  %20612 = vst [vmem:[#allocation253_spill] sm:$0xff] %v16290_v19  ;;  %v16333_v53 = vand.u32 4294901760, %v2181_v61  ;;  %v16349_v61 = vand.u32 4294901760, %v2199_v30  ;;  %2258 = vmatpush1.msra.mxu0 %v15897_v32  ;;  %v20628_v30 = vld [vmem:[#allocation150_spill] sm:$0xff] }
  0xc8   :  { %20613 = vst [vmem:[#allocation254_spill] sm:$0xff] %v16294_v27  ;;  %20614 = vst [vmem:[#allocation255_spill] sm:$0xff] %v16299_v8  ;;  %v16339_v27 = vand.u32 4294901760, %v2187_v58  ;;  %v16353_v58 = vand.u32 4294901760, %v2205_v26  ;;  %2261 = vmatprep.subr.mxu0 %v15907_v45  ;;  %v20629_v26 = vld [vmem:[#allocation165_spill] sm:$0xff]  ;;  %v20633_v45 = vld [vmem:[#allocation172_spill] sm:$0xff] }
  0xc9   :  { %20615 = vst [vmem:[#allocation256_spill] sm:$0xff] %v16303_v37  ;;  %20616 = vst [vmem:[#allocation257_spill] sm:$0xff] %v16308_v12  ;;  %v16345_v37 = vand.u32 4294901760, %v2193_v3  ;;  %2183 = vmatprep.subr.mxu1 %v16333_v53  ;;  %2264 = vmatpush1.msra.mxu0 %v15914_v40  ;;  %v20627_v3 = vld [vmem:[#allocation162_spill] sm:$0xff]  ;;  %v20631_v40 = vld [vmem:[#allocation168_spill] sm:$0xff] }
  0xca   :  { %20617 = vst [vmem:[#allocation258_spill] sm:$0xff] %v16312_v34  ;;  %20618 = vst [vmem:[#allocation259_spill] sm:$0xff] %v16317_v20  ;;  %2189 = vmatpush1.msra.mxu1 %v16339_v27  ;;  %2267 = vmatprep.subr.mxu0 %v15921_v6  ;;  %v20632_v6 = vld [vmem:[#allocation154_spill] sm:$0xff] }
  0xcb   :  { %20619 = vst [vmem:[#allocation260_spill] sm:$0xff] %v16321_v56  ;;  %20620 = vst [vmem:[#allocation261_spill] sm:$0xff] %v16327_v44  ;;  %v16357_v56 = vand.u32 4294901760, %v2211_v22  ;;  %2195 = vmatprep.subr.mxu1 %v16345_v37  ;;  %2270 = vmatpush1.msra.mxu0 %v15931_v24  ;;  %v20630_v22 = vld [vmem:[#allocation152_spill] sm:$0xff]  ;;  %v20634_v24 = vld [vmem:[#allocation157_spill] sm:$0xff] }
  0xcc   :  { %20621 = vst [vmem:[#allocation262_spill] sm:$0xff] %v16333_v53  ;;  %20622 = vst [vmem:[#allocation263_spill] sm:$0xff] %v16339_v27  ;;  %2201 = vmatpush1.msra.mxu1 %v16349_v61  ;;  %2273 = vmatprep.subr.mxu0 %v15943_v43  ;;  %v20635_v32 = vld [vmem:[#allocation174_spill] sm:$0xff]  ;;  %v20636_v43 = vld [vmem:[#allocation160_spill] sm:$0xff] }
  0xcd   :  { %20623 = vst [vmem:[#allocation264_spill] sm:$0xff] %v16345_v37  ;;  %20624 = vst [vmem:[#allocation265_spill] sm:$0xff] %v16349_v61  ;;  %2207 = vmatprep.subr.mxu1 %v16353_v58  ;;  %2276 = vmatpush1.msra.mxu0 %v20627_v3  ;;  %v20638_v3 = vld [vmem:[#allocation181_spill] sm:$0xff]  ;;  %v20733_v61 = vld [vmem:[#allocation139_spill] sm:$0xff] }
  0xce   :  { %20625 = vst [vmem:[#allocation266_spill] sm:$0xff] %v16353_v58  ;;  %20626 = vst [vmem:[#allocation267_spill] sm:$0xff] %v16357_v56  ;;  %2213 = vmatpush1.msra.mxu1 %v16357_v56  ;;  %2279 = vmatprep.subr.mxu0 %v20629_v26  ;;  %v20639_v26 = vld [vmem:[#allocation187_spill] sm:$0xff]  ;;  %v20641_v56 = vld [vmem:[#allocation190_spill] sm:$0xff] }
  0xcf   :  { %2247 = vmatmul.mubr.f32.vlgmr.msra.gmra.mxu1 %v20373_v28  ;;  %2389 = vmatprep.subr.mxu1 %v15869_v5  ;;  %v20729_v58 = vld [vmem:[#allocation137_spill] sm:$0xff] }
  0xd0   :  { %2391 = vmatpush1.msra.mxu1 %v15877_v10  ;;  %2282 = vmatpush1.msra.mxu0 %v20631_v40  ;;  %v20640_v40 = vld [vmem:[#allocation169_spill] sm:$0xff] }
  0xd1   :  { %2393 = vmatprep.subr.mxu1 %v15884_v59  ;;  %2285 = vmatprep.subr.mxu0 %v20633_v45  ;;  %v20642_v45 = vld [vmem:[#allocation195_spill] sm:$0xff] }
  0xd2   :  { %2395 = vmatpush1.msra.mxu1 %v15888_v36  ;;  %2288 = vmatpush1.msra.mxu0 %v20635_v32  ;;  %v20643_v32 = vld [vmem:[#allocation204_spill] sm:$0xff] }
  0xd3   :  { %2397 = vmatprep.subr.mxu1 %v15892_v49  ;;  %2291 = vmatprep.subr.mxu0 %v20637_v2  ;;  %v20644_v2 = vld [vmem:[#allocation208_spill] sm:$0xff] }
  0xd4   :  { %2399 = vmatpush1.msra.mxu1 %v15899_v31  ;;  %2294 = vmatpush1.msra.mxu0 %v20638_v3  ;;  %v20708_v3 = vld [vmem:[#allocation118_spill] sm:$0xff] }
  0xd5   :  { %2401 = vmatprep.subr.mxu1 %v20628_v30  ;;  %2297 = vmatprep.subr.mxu0 %v20639_v26  ;;  %v20706_v26 = vld [vmem:[#allocation115_spill] sm:$0xff] }
  0xd6   :  { %2403 = vmatpush1.msra.mxu1 %v20630_v22  ;;  %2300 = vmatpush1.msra.mxu0 %v20641_v56  ;;  %v20704_v56 = vld [vmem:[#allocation112_spill] sm:$0xff] }
  0xd7   :  { %2405 = vmatprep.subr.mxu1 %v20632_v6  ;;  %2303 = vmatprep.subr.mxu0 %v20642_v45  ;;  %v20702_v45 = vld [vmem:[#allocation99_spill] sm:$0xff] }
  0xd8   :  { %2407 = vmatpush1.msra.mxu1 %v20634_v24  ;;  %2306 = vmatpush1.msra.mxu0 %v20643_v32  ;;  %v20700_v32 = vld [vmem:[#allocation95_spill] sm:$0xff] }
  0xd9   :  { %2409 = vmatprep.subr.mxu1 %v20636_v43  ;;  %2309 = vmatprep.subr.mxu0 %v20644_v2  ;;  %v20698_v2 = vld [vmem:[#allocation88_spill] sm:$0xff] }
  0xda   :  { %2411 = vmatpush1.msra.mxu1 %v15955_v52  ;;  %2312 = vmatpush1.msra.mxu0 %v16136_v11  ;;  %v20696_v11 = vld [vmem:[#allocation85_spill] sm:$0xff] }
  0xdb   :  { %2413 = vmatprep.subr.mxu1 %v15965_v29  ;;  %2315 = vmatprep.subr.mxu0 %v16147_v48  ;;  %v20694_v48 = vld [vmem:[#allocation82_spill] sm:$0xff] }
  0xdc   :  { %2415 = vmatpush1.msra.mxu1 %v20640_v40  ;;  %2318 = vmatpush1.msra.mxu0 %v16159_v35  ;;  %v20692_v35 = vld [vmem:[#allocation78_spill] sm:$0xff] }
  0xdd   :  { %2417 = vmatprep.subr.mxu1 %v16001_v7  ;;  %2321 = vmatprep.subr.mxu0 %v16171_v50  ;;  %v20690_v50 = vld [vmem:[#allocation75_spill] sm:$0xff] }
  0xde   :  { %2419 = vmatpush1.msra.mxu1 %v16013_v42  ;;  %2324 = vmatpush1.msra.mxu0 %v16183_v1  ;;  %v20688_v1 = vld [vmem:[#allocation72_spill] sm:$0xff] }
  0xdf   :  { %2421 = vmatprep.subr.mxu1 %v16036_v54  ;;  %2327 = vmatprep.subr.mxu0 %v16195_v9  ;;  %v20686_v9 = vld [vmem:[#allocation69_spill] sm:$0xff] }
  0xe0   :  { %2423 = vmatpush1.msra.mxu1 %v16071_v33  ;;  %2330 = vmatpush1.msra.mxu0 %v16207_v14  ;;  %v20684_v14 = vld [vmem:[#allocation66_spill] sm:$0xff] }
  0xe1   :  { %2425 = vmatprep.subr.mxu1 %v16082_v21  ;;  %2333 = vmatprep.subr.mxu0 %v16219_v25  ;;  %v20650_v25 = vld [vmem:[#allocation167_spill] sm:$0xff] }
  0xe2   :  { %2427 = vmatpush1.msra.mxu1 %v16093_v60  ;;  %2336 = vmatpush1.msra.mxu0 %v16231_v38  ;;  %v20649_v38 = vld [vmem:[#allocation164_spill] sm:$0xff] }
  0xe3   :  { %2429 = vmatprep.subr.mxu1 %v16104_v18  ;;  %2339 = vmatprep.subr.mxu0 %v16245_v51  ;;  %v20645_v51 = vld [vmem:[#allocation148_spill] sm:$0xff] }
  0xe4   :  { %2431 = vmatpush1.msra.mxu1 %v16115_v55  ;;  %2342 = vmatpush1.msra.mxu0 %v16257_v16  ;;  %v20646_v16 = vld [vmem:[#allocation155_spill] sm:$0xff] }
  0xe5   :  { %2433 = vmatprep.subr.mxu1 %v16127_v13  ;;  %2345 = vmatprep.subr.mxu0 %v16269_v46  ;;  %v20647_v46 = vld [vmem:[#allocation158_spill] sm:$0xff] }
  0xe6   :  { %2435 = vmatpush1.msra.mxu1 %v16138_v39  ;;  %2348 = vmatpush1.msra.mxu0 %v16281_v17  ;;  %v20648_v17 = vld [vmem:[#allocation161_spill] sm:$0xff] }
  0xe7   :  { %2437 = vmatprep.subr.mxu1 %v16149_v23  ;;  %2382 = vmatmul.mubr.f32.vlgmr.msra.gmra.mxu0 %v20373_v28 }
  0xe8   :  { %2439 = vmatpush1.msra.mxu1 %v16161_v62  ;;  %2484 = vmatprep.mubr.f32.mxu1 %v20373_v28 }
  0xe9   :  { %2441 = vmatprep.subr.mxu1 %v16173_v4  ;;  %2494 = vmatprep.subr.mxu0 %v20645_v51  ;;  %v20651_v51 = vld [vmem:[#allocation171_spill] sm:$0xff] }
  0xea   :  { %2443 = vmatpush1.msra.mxu1 %v16185_v41  ;;  %2498 = vmatpush1.msra.mxu0 %v20646_v16  ;;  %v20652_v16 = vld [vmem:[#allocation173_spill] sm:$0xff] }
  0xeb   :  { %2445 = vmatprep.subr.mxu1 %v16197_v63  ;;  %2502 = vmatprep.subr.mxu0 %v20647_v46  ;;  %v20653_v46 = vld [vmem:[#allocation176_spill] sm:$0xff] }
  0xec   :  { %2447 = vmatpush1.msra.mxu1 %v16209_v47  ;;  %2506 = vmatpush1.msra.mxu0 %v20648_v17  ;;  %v20654_v17 = vld [vmem:[#allocation180_spill] sm:$0xff] }
  0xed   :  { %2449 = vmatprep.subr.mxu1 %v16221_v0  ;;  %2510 = vmatprep.subr.mxu0 %v20649_v38  ;;  %v20655_v38 = vld [vmem:[#allocation183_spill] sm:$0xff] }
  0xee   :  { %2451 = vmatpush1.msra.mxu1 %v16233_v57  ;;  %2514 = vmatpush1.msra.mxu0 %v20650_v25  ;;  %v20656_v25 = vld [vmem:[#allocation186_spill] sm:$0xff] }
  0xef   :  { %2485 = vmatmul.mubr.f32.vlgmr.msra.gmra.mxu1 %v20373_v28  ;;  %2659 = vmatprep.subr.mxu1 %v15869_v5 }
  0xf0   :  { %2661 = vmatpush1.msra.mxu1 %v15877_v10  ;;  %2518 = vmatprep.subr.mxu0 %v20651_v51  ;;  %v20657_v51 = vld [vmem:[#allocation189_spill] sm:$0xff] }
  0xf1   :  { %2663 = vmatprep.subr.mxu1 %v15884_v59  ;;  %2522 = vmatpush1.msra.mxu0 %v20652_v16  ;;  %v20658_v16 = vld [vmem:[#allocation192_spill] sm:$0xff] }
  0xf2   :  { %2665 = vmatpush1.msra.mxu1 %v15888_v36  ;;  %2526 = vmatprep.subr.mxu0 %v20653_v46  ;;  %v20659_v46 = vld [vmem:[#allocation198_spill] sm:$0xff]  ;;  %v57_v36 = vld [vmem:[%s19552_s3] sm:$0xf] }
  0xf3   :  { %2667 = vmatprep.subr.mxu1 %v15892_v49  ;;  %2530 = vmatpush1.msra.mxu0 %v20654_v17  ;;  %v20660_v17 = vld [vmem:[#allocation201_spill] sm:$0xff] }
  0xf4   :  { %2669 = vmatpush1.msra.mxu1 %v15899_v31  ;;  %2534 = vmatprep.subr.mxu0 %v20655_v38  ;;  %v20661_v38 = vld [vmem:[#allocation207_spill] sm:$0xff] }
  0xf5   :  { %2671 = vmatprep.subr.mxu1 %v20628_v30  ;;  %2538 = vmatpush1.msra.mxu0 %v20656_v25  ;;  %v20662_v25 = vld [vmem:[#allocation217_spill] sm:$0xff] }
  0xf6   :  { %2673 = vmatpush1.msra.mxu1 %v20630_v22  ;;  %2542 = vmatprep.subr.mxu0 %v20657_v51  ;;  %v20663_v51 = vld [vmem:[#allocation220_spill] sm:$0xff] }
  0xf7   :  { %2675 = vmatprep.subr.mxu1 %v20632_v6  ;;  %2546 = vmatpush1.msra.mxu0 %v20658_v16  ;;  %v20664_v16 = vld [vmem:[#allocation224_spill] sm:$0xff] }
  0xf8   :  { %2677 = vmatpush1.msra.mxu1 %v20634_v24  ;;  %2550 = vmatprep.subr.mxu0 %v20659_v46  ;;  %v20665_v46 = vld [vmem:[#allocation228_spill] sm:$0xff] }
  0xf9   :  { %2679 = vmatprep.subr.mxu1 %v20636_v43  ;;  %2554 = vmatpush1.msra.mxu0 %v20660_v17  ;;  %v20666_v17 = vld [vmem:[#allocation231_spill] sm:$0xff] }
  0xfa   :  { %2681 = vmatpush1.msra.mxu1 %v15955_v52  ;;  %2558 = vmatprep.subr.mxu0 %v20661_v38  ;;  %v20667_v38 = vld [vmem:[#allocation234_spill] sm:$0xff]  ;;  %v59_v52 = vlaneseq }
  0xfb   :  { %2683 = vmatprep.subr.mxu1 %v15965_v29  ;;  %2562 = vmatpush1.msra.mxu0 %v20662_v25  ;;  %v20668_v25 = vld [vmem:[#allocation237_spill] sm:$0xff] }
  0xfc   :  { %2685 = vmatpush1.msra.mxu1 %v20640_v40  ;;  %2566 = vmatprep.subr.mxu0 %v20663_v51  ;;  %v20669_v51 = vld [vmem:[#allocation241_spill] sm:$0xff]  ;;  %v60_v6 = vshrl.u32 %v59_v52, 7 }
  0xfd   :  { %2687 = vmatprep.subr.mxu1 %v16001_v7  ;;  %2570 = vmatpush1.msra.mxu0 %v20664_v16  ;;  %v20670_v16 = vld [vmem:[#allocation244_spill] sm:$0xff] }
  0xfe   :  { %2689 = vmatpush1.msra.mxu1 %v16013_v42  ;;  %2574 = vmatprep.subr.mxu0 %v20665_v46  ;;  %v20671_v46 = vld [vmem:[#allocation247_spill] sm:$0xff]  ;;  %v65_v22 = vsub.s32 1, %v60_v6  ;;  %v61_v49 = vsub.s32 0, %v60_v6 }
  0xff   :  { %2691 = vmatprep.subr.mxu1 %v16036_v54  ;;  %2578 = vmatpush1.msra.mxu0 %v20666_v17  ;;  %v20683_v17 = vld [vmem:[#allocation19_spill] sm:$0xff] }
 0x100   :  { %2693 = vmatpush1.msra.mxu1 %v16071_v33  ;;  %2582 = vmatprep.subr.mxu0 %v20667_v38  ;;  %v20681_v38 = vld [vmem:[#allocation17_spill] sm:$0xff]  ;;  %v66_v10 = vrot.slane %v57_v36, %v65_v22 }
 0x101   :  { %2695 = vmatprep.subr.mxu1 %v16082_v21  ;;  %2586 = vmatpush1.msra.mxu0 %v20668_v25  ;;  %v20680_v25 = vld [vmem:[#allocation60_spill] sm:$0xff] }
 0x102   :  { %2697 = vmatpush1.msra.mxu1 %v16093_v60  ;;  %2590 = vmatprep.subr.mxu0 %v20669_v51  ;;  %v20679_v51 = vld [vmem:[#allocation16_spill] sm:$0xff] }
 0x103   :  { %2699 = vmatprep.subr.mxu1 %v16104_v18  ;;  %2594 = vmatpush1.msra.mxu0 %v20670_v16  ;;  %v20678_v16 = vld [vmem:[#allocation57_spill] sm:$0xff] }
 0x104   :  { %2701 = vmatpush1.msra.mxu1 %v16115_v55  ;;  %2598 = vmatprep.subr.mxu0 %v20671_v46  ;;  %v20677_v46 = vld [vmem:[#allocation15_spill] sm:$0xff]  ;;  %v156_v55 = vpop.f32.mrf.mxu0 }
 0x105   :  { %2703 = vmatprep.subr.mxu1 %v16127_v13  ;;  %2602 = vmatpush1.msra.mxu0 %v16278_v15  ;;  %v20675_v15 = vld [vmem:[#allocation13_spill] sm:$0xff]  ;;  %v20731_v13 = vld [vmem:[#allocation138_spill] sm:$0xff] }
 0x106   :  { %2705 = vmatpush1.msra.mxu1 %v16138_v39  ;;  %2606 = vmatprep.subr.mxu0 %v16290_v19  ;;  %v20672_v19 = vld [vmem:[#allocation42_spill] sm:$0xff]  ;;  %v20727_v39 = vld [vmem:[#allocation136_spill] sm:$0xff]  ;;  %v158_v37 = vpop.f32.mrf.mxu0 }
 0x107   :  { %2707 = vmatprep.subr.mxu1 %v16149_v23  ;;  %2610 = vmatpush1.msra.mxu0 %v16299_v8  ;;  %v20673_v8 = vld [vmem:[#allocation12_spill] sm:$0xff]  ;;  %v20725_v23 = vld [vmem:[#allocation135_spill] sm:$0xff] }
 0x108   :  { %2709 = vmatpush1.msra.mxu1 %v16161_v62  ;;  %2614 = vmatprep.subr.mxu0 %v16308_v12  ;;  %v20674_v12 = vld [vmem:[#allocation51_spill] sm:$0xff]  ;;  %v20722_v62 = vld [vmem:[#allocation133_spill] sm:$0xff]  ;;  %v315_v27 = vpop.f32.mrf.mxu0 }
 0x109   :  { %2711 = vmatprep.subr.mxu1 %v16173_v4  ;;  %2618 = vmatpush1.msra.mxu0 %v16317_v20  ;;  %v20676_v20 = vld [vmem:[#allocation54_spill] sm:$0xff]  ;;  %v20720_v4 = vld [vmem:[#allocation132_spill] sm:$0xff] }
 0x10a   :  { %2713 = vmatpush1.msra.mxu1 %v16185_v41  ;;  %2651 = vmatprep.mubr.f32.mxu0 %v20373_v28  ;;  %v20718_v41 = vld [vmem:[#allocation130_spill] sm:$0xff]  ;;  %v317_v60 = vpop.f32.mrf.mxu0 }
 0x10b   :  { %2715 = vmatprep.subr.mxu1 %v16197_v63  ;;  %2652 = vmatmul.mubr.f32.vlgmr.msra.gmra.mxu0 %v20373_v28  ;;  %v20716_v63 = vld [vmem:[#allocation128_spill] sm:$0xff] }
 0x10c   :  { %2717 = vmatpush1.msra.mxu1 %v16209_v47  ;;  %2754 = vmatprep.mubr.f32.mxu1 %v20373_v28  ;;  %v20714_v47 = vld [vmem:[#allocation126_spill] sm:$0xff]  ;;  %v469_v21 = vpop.f32.mrf.mxu0 }
 0x10d   :  { %2719 = vmatprep.subr.mxu1 %v16221_v0  ;;  %2781 = vmatprep.subr.mxu0 %v20673_v8  ;;  %v20712_v0 = vld [vmem:[#allocation124_spill] sm:$0xff] }
 0x10e   :  { %2721 = vmatpush1.msra.mxu1 %v16233_v57  ;;  %2783 = vmatpush1.msra.mxu0 %v20675_v15  ;;  %v20710_v57 = vld [vmem:[#allocation121_spill] sm:$0xff]  ;;  %v471_v44 = vpop.f32.mrf.mxu0 }
 0x10f   :  { %2893 = vmatprep.subr.mxu1 %v20672_v19  ;;  %2755 = vmatmul.mubr.f32.vlgmr.msra.gmra.mxu1 %v20373_v28  ;;  %v20682_v19 = vld [vmem:[#allocation63_spill] sm:$0xff] }
 0x110   :  { %2899 = vmatpush1.msra.mxu1 %v20674_v12  ;;  %2785 = vmatprep.subr.mxu0 %v20677_v46  ;;  %v20685_v12 = vld [vmem:[#allocation22_spill] sm:$0xff]  ;;  %v621_v54 = vpop.f32.mrf.mxu0 }
 0x111   :  { %2905 = vmatprep.subr.mxu1 %v20676_v20  ;;  %2787 = vmatpush1.msra.mxu0 %v20679_v51  ;;  %v20687_v20 = vld [vmem:[#allocation24_spill] sm:$0xff] }
 0x112   :  { %2911 = vmatpush1.msra.mxu1 %v20678_v16  ;;  %2789 = vmatprep.subr.mxu0 %v20681_v38  ;;  %v20689_v16 = vld [vmem:[#allocation26_spill] sm:$0xff]  ;;  %v623_v42 = vpop.f32.mrf.mxu0 }
 0x113   :  { %2917 = vmatprep.subr.mxu1 %v20680_v25  ;;  %2791 = vmatpush1.msra.mxu0 %v20683_v17  ;;  %v20691_v25 = vld [vmem:[#allocation29_spill] sm:$0xff] }
 0x114   :  { %2923 = vmatpush1.msra.mxu1 %v20682_v19  ;;  %2793 = vmatprep.subr.mxu0 %v20685_v12  ;;  %v20693_v19 = vld [vmem:[#allocation32_spill] sm:$0xff]  ;;  %v780_v40 = vpop.f32.mrf.mxu0 }
 0x115   :  { %2929 = vmatprep.subr.mxu1 %v20684_v14  ;;  %2795 = vmatpush1.msra.mxu0 %v20687_v20  ;;  %v20695_v14 = vld [vmem:[#allocation35_spill] sm:$0xff] }
 0x116   :  { %2935 = vmatpush1.msra.mxu1 %v20686_v9  ;;  %2797 = vmatprep.subr.mxu0 %v20689_v16  ;;  %v20697_v9 = vld [vmem:[#allocation38_spill] sm:$0xff]  ;;  %v16579_v29 = vpop.f32.mrf.mxu0 }
 0x117   :  { %2941 = vmatprep.subr.mxu1 %v20688_v1  ;;  %2799 = vmatpush1.msra.mxu0 %v20691_v25  ;;  %v20699_v1 = vld [vmem:[#allocation41_spill] sm:$0xff] }
 0x118   :  { %2947 = vmatpush1.msra.mxu1 %v20690_v50  ;;  %2801 = vmatprep.subr.mxu0 %v20693_v19  ;;  %v20701_v50 = vld [vmem:[#allocation47_spill] sm:$0xff]  ;;  %v16583_v24 = vpop.f32.mrf.mxu0 }
 0x119   :  { %2953 = vmatprep.subr.mxu1 %v20692_v35  ;;  %2803 = vmatpush1.msra.mxu0 %v20695_v14  ;;  %v20703_v35 = vld [vmem:[#allocation50_spill] sm:$0xff] }
 0x11a   :  { %2959 = vmatpush1.msra.mxu1 %v20694_v48  ;;  %2805 = vmatprep.subr.mxu0 %v20697_v9  ;;  %v20705_v48 = vld [vmem:[#allocation56_spill] sm:$0xff]  ;;  %v16587_v31 = vpop.f32.mrf.mxu0 }
 0x11b   :  { %2965 = vmatprep.subr.mxu1 %v20696_v11  ;;  %2807 = vmatpush1.msra.mxu0 %v20699_v1  ;;  %v20707_v11 = vld [vmem:[#allocation65_spill] sm:$0xff] }
 0x11c   :  { %2971 = vmatpush1.msra.mxu1 %v20698_v2  ;;  %2809 = vmatprep.subr.mxu0 %v20701_v50  ;;  %v20709_v2 = vld [vmem:[#allocation68_spill] sm:$0xff]  ;;  %v73_v50 = vsub.s32 3, %v60_v6 }
 0x11d   :  { %2977 = vmatprep.subr.mxu1 %v20700_v32  ;;  %2811 = vmatpush1.msra.mxu0 %v20703_v35  ;;  %v20711_v32 = vld [vmem:[#allocation71_spill] sm:$0xff] }
 0x11e   :  { %2983 = vmatpush1.msra.mxu1 %v20702_v45  ;;  %2813 = vmatprep.subr.mxu0 %v20705_v48  ;;  %v20713_v45 = vld [vmem:[#allocation74_spill] sm:$0xff]  ;;  %v1175_v59 = vpop.f32.mrf.mxu0  ;;  %v74_v14 = vrot.slane %v57_v36, %v73_v50 }
 0x11f   :  { %2989 = vmatprep.subr.mxu1 %v20704_v56  ;;  %2815 = vmatpush1.msra.mxu0 %v20707_v11  ;;  %v20715_v56 = vld [vmem:[#allocation77_spill] sm:$0xff] }
 0x120   :  { %2995 = vmatpush1.msra.mxu1 %v20706_v26  ;;  %2817 = vmatprep.subr.mxu0 %v20709_v2  ;;  %v20717_v26 = vld [vmem:[#allocation81_spill] sm:$0xff] }
 0x121   :  { %3001 = vmatprep.subr.mxu1 %v20708_v3  ;;  %2819 = vmatpush1.msra.mxu0 %v20711_v32  ;;  %v20719_v3 = vld [vmem:[#allocation84_spill] sm:$0xff] }
 0x122   :  { %3007 = vmatpush1.msra.mxu1 %v20710_v57  ;;  %2821 = vmatprep.subr.mxu0 %v20713_v45  ;;  %v20721_v57 = vld [vmem:[#allocation87_spill] sm:$0xff] }
 0x123   :  { %3013 = vmatprep.subr.mxu1 %v20712_v0  ;;  %2823 = vmatpush1.msra.mxu0 %v20715_v56  ;;  %v20723_v0 = vld [vmem:[#allocation134_spill] sm:$0xff] }
 0x124   :  { %3019 = vmatpush1.msra.mxu1 %v20714_v47  ;;  %2825 = vmatprep.subr.mxu0 %v20717_v26  ;;  %v20724_v47 = vld [vmem:[#allocation91_spill] sm:$0xff] }
 0x125   :  { %3025 = vmatprep.subr.mxu1 %v20716_v63  ;;  %2827 = vmatpush1.msra.mxu0 %v20719_v3  ;;  %v20726_v63 = vld [vmem:[#allocation94_spill] sm:$0xff] }
 0x126   :  { %3031 = vmatpush1.msra.mxu1 %v20718_v41  ;;  %2829 = vmatprep.subr.mxu0 %v20721_v57  ;;  %v20728_v41 = vld [vmem:[#allocation98_spill] sm:$0xff] }
 0x127   :  { %3037 = vmatprep.subr.mxu1 %v20720_v4  ;;  %3112 = vmatprep.mubr.f32.mxu1 %v20373_v28  ;;  %v20730_v4 = vld [vmem:[#allocation102_spill] sm:$0xff] }
 0x128   :  { %3043 = vmatpush1.msra.mxu1 %v20722_v62  ;;  %2831 = vmatpush1.msra.mxu0 %v20724_v47  ;;  %v20732_v62 = vld [vmem:[#allocation105_spill] sm:$0xff]  ;;  %v69_v47 = vsub.s32 2, %v60_v6 }
 0x129   :  { %3049 = vmatprep.subr.mxu1 %v20723_v0  ;;  %2833 = vmatprep.subr.mxu0 %v20726_v63  ;;  %v20734_v0 = vld [vmem:[#allocation108_spill] sm:$0xff] }
 0x12a   :  { %3055 = vmatpush1.msra.mxu1 %v20725_v23  ;;  %2835 = vmatpush1.msra.mxu0 %v20728_v41  ;;  %v20735_v23 = vld [vmem:[#allocation111_spill] sm:$0xff]  ;;  %v70_v2 = vrot.slane %v57_v36, %v69_v47 }
 0x12b   :  { %3061 = vmatprep.subr.mxu1 %v20727_v39  ;;  %2837 = vmatprep.subr.mxu0 %v20730_v4  ;;  %v20736_v39 = vld [vmem:[#allocation14_spill] sm:$0xff] }
 0x12c   :  { %3067 = vmatpush1.msra.mxu1 %v20729_v58  ;;  %2839 = vmatpush1.msra.mxu0 %v20732_v62  ;;  %v238_v58 = vpop.f32.mrf.mxu1  ;;  %v159_v62 = vadd.f32 %v158_v37, %v66_v10 }
 0x12d   :  { %3073 = vmatprep.subr.mxu1 %v20731_v13  ;;  %2841 = vmatprep.subr.mxu0 %v20734_v0  ;;  %v1177_v0 = vpop.f32.mrf.mxu0 }
 0x12e   :  { %3079 = vmatpush1.msra.mxu1 %v20733_v61  ;;  %2843 = vmatpush1.msra.mxu0 %v20735_v23  ;;  %v240_v18 = vpop.f32.mrf.mxu1 }
 0x12f   :  { %3258 = vmatprep.subr.mxu1 %v20673_v8  ;;  %2876 = vmatprep.mubr.f32.mxu0 %v20373_v28  ;;  %v62_v8 = vrot.slane %v57_v36, %v61_v49  ;;  %v241_v63 = vadd.f32 %v240_v18, %v159_v62 }
 0x130   :  { %3122 = vmatprep.subr.mxu0 %v20736_v39  ;;  %v391_v13 = vpop.f32.mrf.mxu1 }
 0x131   :  { %v157_v52 = vadd.f32 %v156_v55, %v62_v8  ;;  %v318_v32 = vadd.f32 %v317_v60, %v241_v63  ;;  %v622_v55 = vadd.f32 %v621_v54, %v70_v2 }
 0x132   :  { %v393_v53 = vpop.f32.mrf.mxu1 }
 0x133   :  { %v239_v26 = vadd.f32 %v238_v58, %v157_v52  ;;  %v394_v37 = vadd.f32 %v393_v53, %v318_v32 }
 0x134   :  { %v16573_v61 = vpop.f32.mrf.mxu1 }
 0x135   :  { %v316_v35 = vadd.f32 %v315_v27, %v239_v26 }
 0x136   :  { %v545_v33 = vpop.f32.mrf.mxu1 }
 0x137   :  { %v392_v62 = vadd.f32 %v391_v13, %v316_v35 }
 0x138   :  { %v703_v34 = vpop.f32.mrf.mxu1 }
 0x139   :  { %v704_v60 = vadd.f32 %v703_v34, %v622_v55  ;;  %v470_v63 = vadd.f32 %v469_v21, %v392_v62 }
 0x13a   :  { %v16575_v7 = vpop.f32.mrf.mxu1 }
 0x13b   :  { %v16597_v13 = vadd.f32 %v16573_v61, %v470_v63 }
 0x13c   :  { %v16577_v39 = vpop.f32.mrf.mxu1 }
 0x13d   :  { %20738 = vst [vmem:[#allocation15_spill] sm:$0xff] %v16597_v13 }
 0x13e   :  { %v16581_v43 = vpop.f32.mrf.mxu1 }
 0x140   :  { %v16585_v30 = vpop.f32.mrf.mxu1 }
 0x141   :  { %v1541_v4 = vpop.f32.mrf.mxu0 }
 0x142   :  { %v16592_v5 = vpop.f32.mrf.mxu1 }
 0x143   :  { %v1543_v3 = vpop.f32.mrf.mxu0 }
 0x144   :  { %v1406_v23 = vpop.f32.mrf.mxu1 }
 0x145   :  { %v1407_v11 = vadd.f32 %v1406_v23, %v1175_v59  ;;  %v624_v23 = vadd.f32 %v623_v42, %v74_v14 }
 0x146   :  { %v1408_v41 = vpop.f32.mrf.mxu1 }
 0x147   :  { %v1409_v56 = vadd.f32 %v1408_v41, %v1177_v0  ;;  %v1542_v49 = vadd.f32 %v1541_v4, %v1407_v11  ;;  %v472_v0 = vadd.f32 %v471_v44, %v394_v37  ;;  %v781_v11 = vadd.f32 %v780_v40, %v704_v60 }
 0x148   :  { %v1644_v57 = vpop.f32.mrf.mxu1 }
 0x149   :  { %v1544_v22 = vadd.f32 %v1543_v3, %v1409_v56  ;;  %v1645_v18 = vadd.f32 %v1644_v57, %v1542_v49  ;;  %v16594_v6 = vadd.f32 %v545_v33, %v472_v0  ;;  %v706_v57 = vadd.f32 %v16575_v7, %v624_v23 }
 0x14a   :  { %v1646_v48 = vpop.f32.mrf.mxu1 }
 0x14b   :  { %v1647_v8 = vadd.f32 %v1646_v48, %v1544_v22  ;;  %20737 = vst [vmem:[#allocation13_spill] sm:$0xff] %v16594_v6 }
 0x164   :  { %v1811_v45 = vpop.f32.mrf.mxu0 }
 0x165   :  { %v1812_v47 = vadd.f32 %v1811_v45, %v1645_v18  ;;  %v857_v45 = vadd.f32 %v16577_v39, %v781_v11 }
 0x166   :  { %v1914_v1 = vpop.f32.mrf.mxu1  ;;  %v1813_v10 = vpop.f32.mrf.mxu0 }
 0x167   :  { %v1814_v9 = vadd.f32 %v1813_v10, %v1647_v8  ;;  %v1915_v32 = vadd.f32 %v1914_v1, %v1812_v47  ;;  %v783_v1 = vadd.f32 %v16579_v29, %v706_v57  ;;  %v935_v50 = vadd.f32 %v16583_v24, %v857_v45  ;;  %v20745_v57 = vld [vmem:[#allocation35_spill] sm:$0xff]  ;;  %v20747_v45 = vld [vmem:[#allocation38_spill] sm:$0xff] }
 0x168   :  { %v1916_v58 = vpop.f32.mrf.mxu1 }
 0x169   :  { %v1917_v59 = vadd.f32 %v1916_v58, %v1814_v9  ;;  %v2761_v42 = vadd.f32 %v1915_v32, %v16597_v13  ;;  %v859_v39 = vadd.f32 %v16581_v43, %v783_v1  ;;  %v16607_v61 = vadd.f32 %v16585_v30, %v935_v50  ;;  %v20753_v1 = vld [vmem:[#allocation50_spill] sm:$0xff]  ;;  %v20754_v50 = vld [vmem:[#allocation37_spill] sm:$0xff]  ;;  %v20874_v13 = vld [vmem:[#allocation263_spill] sm:$0xff] }
 0x16b   :  { %v2762_v36 = vadd.f32 %v1917_v59, %v16594_v6  ;;  %20739 = vst [vmem:[#allocation16_spill] sm:$0xff] %v16607_v61  ;;  %v937_v24 = vadd.f32 %v16587_v31, %v859_v39  ;;  %v20762_v39 = vld [vmem:[#allocation49_spill] sm:$0xff]  ;;  %v20876_v6 = vld [vmem:[#allocation264_spill] sm:$0xff] }
 0x16d   :  { %15052 = vtanh.f32 %v2762_v36  ;;  %v16612_v37 = vadd.f32 %v16592_v5, %v937_v24  ;;  %v20743_v36 = vld [vmem:[#allocation21_spill] sm:$0xff]  ;;  %v20768_v24 = vld [vmem:[#allocation62_spill] sm:$0xff] }
 0x16e   :  { %15054 = vtanh.f32 %v2761_v42  ;;  %v20748_v42 = vld [vmem:[#allocation28_spill] sm:$0xff] }
 0x16f   :  { %20740 = vst [vmem:[#allocation17_spill] sm:$0xff] %v16612_v37 }
 0x17a   :  { %v15053_v10 = vpop.eup %15052 }
 0x17b   :  { %v15055_v55 = vpop.eup %15054  ;;  %v2771_v8 = vmul.f32 0.5, %v15053_v10  ;;  %v20770_v10 = vld [vmem:[#allocation67_spill] sm:$0xff] }
 0x17c   :  { %v2769_v30 = vmul.f32 0.5, %v15055_v55  ;;  %v20771_v55 = vld [vmem:[#allocation87_spill] sm:$0xff] }
 0x17d   :  { %v2772_v62 = vadd.f32 0.5, %v2771_v8  ;;  %v20772_v8 = vld [vmem:[#allocation76_spill] sm:$0xff] }
 0x17e   :  { %v2770_v18 = vadd.f32 0.5, %v2769_v30  ;;  %v20774_v30 = vld [vmem:[#allocation80_spill] sm:$0xff] }
 0x185   :  { %v2017_v41 = vpop.f32.mrf.mxu0 }
 0x187   :  { %v2019_v4 = vpop.f32.mrf.mxu0 }
 0x18f   :  { %v2248_v27 = vpop.f32.mrf.mxu1 }
 0x190   :  { %v2249_v2 = vadd.f32 %v2248_v27, %v2017_v41  ;;  %v2775_v41 = vmul.f32 0.0, %v2772_v62  ;;  %v20775_v62 = vld [vmem:[#allocation94_spill] sm:$0xff] }
 0x191   :  { %v2250_v48 = vpop.f32.mrf.mxu1 }
 0x192   :  { %v2251_v40 = vadd.f32 %v2250_v48, %v2019_v4  ;;  %v20746_v48 = vld [vmem:[#allocation25_spill] sm:$0xff] }
 0x1a7   :  { %v2383_v54 = vpop.f32.mrf.mxu0 }
 0x1a8   :  { %v2384_v21 = vadd.f32 %v2383_v54, %v2249_v2  ;;  %v20742_v54 = vld [vmem:[#allocation18_spill] sm:$0xff]  ;;  %v20744_v2 = vld [vmem:[#allocation23_spill] sm:$0xff] }
 0x1a9   :  { %v2385_v33 = vpop.f32.mrf.mxu0 }
 0x1aa   :  { %v2386_v14 = vadd.f32 %v2385_v33, %v2251_v40  ;;  %v20751_v33 = vld [vmem:[#allocation47_spill] sm:$0xff]  ;;  %v20752_v40 = vld [vmem:[#allocation34_spill] sm:$0xff] }
 0x1af   :  { %v2486_v35 = vpop.f32.mrf.mxu1 }
 0x1b0   :  { %v2487_v9 = vadd.f32 %v2486_v35, %v2384_v21  ;;  %v20749_v21 = vld [vmem:[#allocation41_spill] sm:$0xff]  ;;  %v20750_v35 = vld [vmem:[#allocation31_spill] sm:$0xff] }
 0x1b1   :  { %v2488_v53 = vpop.f32.mrf.mxu1 }
 0x1b2   :  { %v2489_v3 = vadd.f32 %v2488_v53, %v2386_v14  ;;  %v20756_v14 = vld [vmem:[#allocation40_spill] sm:$0xff]  ;;  %v20757_v53 = vld [vmem:[#allocation65_spill] sm:$0xff] }
 0x1cb   :  { %v2653_v34 = vpop.f32.mrf.mxu0 }
 0x1cc   :  { %v2654_v7 = vadd.f32 %v2653_v34, %v2487_v9  ;;  %v20755_v9 = vld [vmem:[#allocation56_spill] sm:$0xff] }
 0x1cd   :  { %v2655_v44 = vpop.f32.mrf.mxu0  ;;  %v20758_v34 = vld [vmem:[#allocation44_spill] sm:$0xff] }
 0x1ce   :  { %v2656_v29 = vadd.f32 %v2655_v44, %v2489_v3  ;;  %v20761_v44 = vld [vmem:[#allocation71_spill] sm:$0xff]  ;;  %v20763_v3 = vld [vmem:[#allocation74_spill] sm:$0xff] }
 0x1cf   :  { %v2756_v56 = vpop.f32.mrf.mxu1 }
 0x1d0   :  { %v2757_v26 = vadd.f32 %v2756_v56, %v2654_v7  ;;  %v20759_v7 = vld [vmem:[#allocation68_spill] sm:$0xff]  ;;  %v20760_v56 = vld [vmem:[#allocation46_spill] sm:$0xff] }
 0x1d1   :  { %v2758_v22 = vpop.f32.mrf.mxu1 }
 0x1d2   :  { %v2763_v52 = vadd.f32 %v2757_v26, %v16607_v61  ;;  %v2759_v49 = vadd.f32 %v2758_v22, %v2656_v29  ;;  %v20764_v26 = vld [vmem:[#allocation53_spill] sm:$0xff]  ;;  %v20766_v29 = vld [vmem:[#allocation59_spill] sm:$0xff]  ;;  %v20872_v61 = vld [vmem:[#allocation262_spill] sm:$0xff] }
 0x1d3   :  { %v20767_v22 = vld [vmem:[#allocation81_spill] sm:$0xff] }
 0x1d4   :  { %15056 = vtanh.f32 %v2763_v52  ;;  %v2764_v43 = vadd.f32 %v2759_v49, %v16612_v37  ;;  %v20765_v52 = vld [vmem:[#allocation77_spill] sm:$0xff]  ;;  %v20769_v49 = vld [vmem:[#allocation84_spill] sm:$0xff] }
 0x1d5   :  { %v20870_v37 = vld [vmem:[#allocation261_spill] sm:$0xff] }
 0x1d6   :  { %15058 = vtanh.f32 %v2764_v43  ;;  %v20773_v43 = vld [vmem:[#allocation91_spill] sm:$0xff] }
 0x1e1   :  { %v15057_v58 = vpop.eup %15056 }
 0x1e2   :  { %v2776_v0 = vmul.f32 %v15057_v58, %v2770_v18  ;;  %v20776_v18 = vld [vmem:[#allocation83_spill] sm:$0xff]  ;;  %v20777_v58 = vld [vmem:[#allocation98_spill] sm:$0xff] }
 0x1e3   :  { %v15059_v31 = vpop.eup %15058 }
 0x1e4   :  { %v16615_v60 = vadd.f32 %v2776_v0, %v2775_v41  ;;  %v2773_v47 = vmul.f32 0.5, %v15059_v31  ;;  %v20778_v41 = vld [vmem:[#allocation86_spill] sm:$0xff] }
 0x1e5   :  { %v20779_v0 = vld [vmem:[#allocation102_spill] sm:$0xff] }
 0x1e6   :  { %20741 = vst [vmem:[#allocation19_spill] sm:$0xff] %v16615_v60  ;;  %15060 = vtanh.f32 %v16615_v60  ;;  %v2774_v63 = vadd.f32 0.5, %v2773_v47  ;;  %v20780_v31 = vld [vmem:[#allocation90_spill] sm:$0xff]  ;;  %v20781_v47 = vld [vmem:[#allocation105_spill] sm:$0xff]  ;;  %v20868_v60 = vld [vmem:[#allocation260_spill] sm:$0xff] }
 0x1f3   :  { %v15061_v5 = vpop.eup %15060 }
 0x1f4   :  { %v2779_v59 = vmul.f32 %v15061_v5, %v2774_v63  ;;  %v20782_v63 = vld [vmem:[#allocation93_spill] sm:$0xff]  ;;  %v20783_v5 = vld [vmem:[#allocation108_spill] sm:$0xff] }
 0x1f6   :  { %v16618_v23 = vand.u32 4294901760, %v2779_v59 }
 0x1f8   :  { %v16621_v27 = vsub.f32 %v2779_v59, %v16618_v23  ;;  %3114 = vmatmul.mubr.f32.vlgmr.msra.gmra.mxu1 %v16618_v23  ;;  %v20784_v59 = vld [vmem:[#allocation97_spill] sm:$0xff] }
 0x1f9   :  { %3260 = vmatpush1.msra.mxu1 %v20675_v15  ;;  %3353 = vmatprep.mubr.f32.mxu1 %v20373_v28 }
 0x1fa   :  { %3262 = vmatprep.subr.mxu1 %v20677_v46  ;;  %v16628_v4 = vand.u32 4294901760, %v16621_v27 }
 0x1fb   :  { %3264 = vmatpush1.msra.mxu1 %v20679_v51 }
 0x1fc   :  { %3266 = vmatprep.subr.mxu1 %v20681_v38  ;;  %v2880_v11 = vsub.f32 %v16621_v27, %v16628_v4 }
 0x1fd   :  { %3268 = vmatpush1.msra.mxu1 %v20683_v17 }
 0x1fe   :  { %3270 = vmatprep.subr.mxu1 %v20685_v12  ;;  %v16636_v32 = vand.u32 4294901760, %v2880_v11  ;;  %v20785_v11 = vld [vmem:[#allocation111_spill] sm:$0xff] }
 0x1ff   :  { %3272 = vmatpush1.msra.mxu1 %v20687_v20 }
 0x200   :  { %3274 = vmatprep.subr.mxu1 %v20689_v16  ;;  %2882 = vmatmul.mubr.f32.vlgmr.msra.gmra.mxu0 %v16636_v32 }
 0x201   :  { %3125 = vmatpush1.msra.mxu0 %v20742_v54  ;;  %3276 = vmatpush1.msra.mxu1 %v20691_v25  ;;  %v20866_v54 = vld [vmem:[#allocation258_spill] sm:$0xff] }
 0x202   :  { %3128 = vmatprep.subr.mxu0 %v20743_v36  ;;  %3278 = vmatprep.subr.mxu1 %v20693_v19  ;;  %v20864_v36 = vld [vmem:[#allocation256_spill] sm:$0xff] }
 0x203   :  { %3131 = vmatpush1.msra.mxu0 %v20744_v2  ;;  %3280 = vmatpush1.msra.mxu1 %v20745_v57  ;;  %v20862_v2 = vld [vmem:[#allocation254_spill] sm:$0xff] }
 0x204   :  { %3134 = vmatprep.subr.mxu0 %v20746_v48  ;;  %3282 = vmatprep.subr.mxu1 %v20747_v45  ;;  %v20860_v48 = vld [vmem:[#allocation252_spill] sm:$0xff] }
 0x205   :  { %3137 = vmatpush1.msra.mxu0 %v20748_v42  ;;  %3284 = vmatpush1.msra.mxu1 %v20749_v21  ;;  %v20858_v42 = vld [vmem:[#allocation249_spill] sm:$0xff] }
 0x206   :  { %3140 = vmatprep.subr.mxu0 %v20750_v35  ;;  %3286 = vmatprep.subr.mxu1 %v20751_v33  ;;  %v20856_v35 = vld [vmem:[#allocation246_spill] sm:$0xff] }
 0x207   :  { %3143 = vmatpush1.msra.mxu0 %v20752_v40  ;;  %3288 = vmatpush1.msra.mxu1 %v20753_v1  ;;  %v20854_v40 = vld [vmem:[#allocation243_spill] sm:$0xff] }
 0x208   :  { %3146 = vmatprep.subr.mxu0 %v20754_v50  ;;  %3290 = vmatprep.subr.mxu1 %v20755_v9  ;;  %v20852_v50 = vld [vmem:[#allocation240_spill] sm:$0xff] }
 0x209   :  { %3149 = vmatpush1.msra.mxu0 %v20756_v14  ;;  %3292 = vmatpush1.msra.mxu1 %v20757_v53  ;;  %v20850_v14 = vld [vmem:[#allocation227_spill] sm:$0xff] }
 0x20a   :  { %3152 = vmatprep.subr.mxu0 %v20758_v34  ;;  %3294 = vmatprep.subr.mxu1 %v20759_v7  ;;  %v20848_v34 = vld [vmem:[#allocation223_spill] sm:$0xff] }
 0x20b   :  { %3155 = vmatpush1.msra.mxu0 %v20760_v56  ;;  %3296 = vmatpush1.msra.mxu1 %v20761_v44  ;;  %v20846_v56 = vld [vmem:[#allocation216_spill] sm:$0xff] }
 0x20c   :  { %3158 = vmatprep.subr.mxu0 %v20762_v39  ;;  %3298 = vmatprep.subr.mxu1 %v20763_v3  ;;  %v20830_v39 = vld [vmem:[#allocation191_spill] sm:$0xff] }
 0x20d   :  { %3161 = vmatpush1.msra.mxu0 %v20764_v26  ;;  %3300 = vmatpush1.msra.mxu1 %v20765_v52  ;;  %v20828_v26 = vld [vmem:[#allocation188_spill] sm:$0xff] }
 0x20e   :  { %3164 = vmatprep.subr.mxu0 %v20766_v29  ;;  %3302 = vmatprep.subr.mxu1 %v20767_v22  ;;  %v20827_v29 = vld [vmem:[#allocation125_spill] sm:$0xff] }
 0x20f   :  { %3167 = vmatpush1.msra.mxu0 %v20768_v24  ;;  %3304 = vmatpush1.msra.mxu1 %v20769_v49  ;;  %v20825_v24 = vld [vmem:[#allocation122_spill] sm:$0xff] }
 0x210   :  { %3170 = vmatprep.subr.mxu0 %v20770_v10  ;;  %3306 = vmatprep.subr.mxu1 %v20771_v55  ;;  %v20823_v10 = vld [vmem:[#allocation119_spill] sm:$0xff] }
 0x211   :  { %3173 = vmatpush1.msra.mxu0 %v20772_v8  ;;  %3308 = vmatpush1.msra.mxu1 %v20773_v43  ;;  %v20793_v8 = vld [vmem:[#allocation120_spill] sm:$0xff] }
 0x212   :  { %3176 = vmatprep.subr.mxu0 %v20774_v30  ;;  %3310 = vmatprep.subr.mxu1 %v20775_v62  ;;  %v20786_v30 = vld [vmem:[#allocation101_spill] sm:$0xff] }
 0x213   :  { %3179 = vmatpush1.msra.mxu0 %v20776_v18  ;;  %3312 = vmatpush1.msra.mxu1 %v20777_v58  ;;  %v20787_v18 = vld [vmem:[#allocation12_spill] sm:$0xff] }
 0x214   :  { %3182 = vmatprep.subr.mxu0 %v20778_v41  ;;  %3314 = vmatprep.subr.mxu1 %v20779_v0  ;;  %v20788_v41 = vld [vmem:[#allocation104_spill] sm:$0xff] }
 0x215   :  { %3185 = vmatpush1.msra.mxu0 %v20780_v31  ;;  %3316 = vmatpush1.msra.mxu1 %v20781_v47  ;;  %v20789_v31 = vld [vmem:[#allocation107_spill] sm:$0xff] }
 0x216   :  { %3188 = vmatprep.subr.mxu0 %v20782_v63  ;;  %3318 = vmatprep.subr.mxu1 %v20783_v5  ;;  %v20790_v63 = vld [vmem:[#allocation110_spill] sm:$0xff] }
 0x217   :  { %3191 = vmatpush1.msra.mxu0 %v20784_v59  ;;  %3320 = vmatpush1.msra.mxu1 %v20785_v11  ;;  %v20791_v59 = vld [vmem:[#allocation114_spill] sm:$0xff] }
 0x218   :  { %3194 = vmatprep.subr.mxu0 %v20786_v30  ;;  %3357 = vmatmul.mubr.f32.vlgmr.msra.gmra.mxu1 %v16628_v4  ;;  %v20792_v30 = vld [vmem:[#allocation117_spill] sm:$0xff] }
 0x219   :  { %3532 = vmatprep.subr.mxu1 %v20787_v18  ;;  %3197 = vmatpush1.msra.mxu0 %v20788_v41  ;;  %v20794_v41 = vld [vmem:[#allocation123_spill] sm:$0xff] }
 0x21a   :  { %3534 = vmatpush1.msra.mxu1 %v20675_v15  ;;  %3200 = vmatprep.subr.mxu0 %v20789_v31  ;;  %v20800_v31 = vld [vmem:[#allocation39_spill] sm:$0xff] }
 0x21b   :  { %3536 = vmatprep.subr.mxu1 %v20677_v46  ;;  %3203 = vmatpush1.msra.mxu0 %v20790_v63  ;;  %v20795_v63 = vld [vmem:[#allocation20_spill] sm:$0xff] }
 0x21c   :  { %3538 = vmatpush1.msra.mxu1 %v20679_v51  ;;  %3206 = vmatprep.subr.mxu0 %v20791_v59  ;;  %v20796_v59 = vld [vmem:[#allocation27_spill] sm:$0xff] }
 0x21d   :  { %3540 = vmatprep.subr.mxu1 %v20681_v38  ;;  %3209 = vmatpush1.msra.mxu0 %v20792_v30  ;;  %v20797_v30 = vld [vmem:[#allocation30_spill] sm:$0xff] }
 0x21e   :  { %3542 = vmatpush1.msra.mxu1 %v20683_v17  ;;  %3212 = vmatprep.subr.mxu0 %v20793_v8  ;;  %v20798_v8 = vld [vmem:[#allocation33_spill] sm:$0xff] }
 0x21f   :  { %3544 = vmatprep.subr.mxu1 %v20685_v12  ;;  %3215 = vmatpush1.msra.mxu0 %v20794_v41  ;;  %v20799_v41 = vld [vmem:[#allocation36_spill] sm:$0xff] }
 0x220   :  { %3248 = vmatprep.mubr.f32.mxu0 %v20373_v28  ;;  %3546 = vmatpush1.msra.mxu1 %v20687_v20 }
 0x221   :  { %3251 = vmatmul.mubr.f32.vlgmr.msra.gmra.mxu0 %v16621_v27  ;;  %3366 = vmatprep.subr.mxu0 %v20795_v63  ;;  %v20801_v63 = vld [vmem:[#allocation43_spill] sm:$0xff] }
 0x222   :  { %3548 = vmatprep.subr.mxu1 %v20689_v16  ;;  %3370 = vmatpush1.msra.mxu0 %v20796_v59  ;;  %v20802_v59 = vld [vmem:[#allocation45_spill] sm:$0xff] }
 0x223   :  { %3550 = vmatpush1.msra.mxu1 %v20691_v25  ;;  %3374 = vmatprep.subr.mxu0 %v20797_v30  ;;  %v20803_v30 = vld [vmem:[#allocation48_spill] sm:$0xff] }
 0x224   :  { %3552 = vmatprep.subr.mxu1 %v20693_v19  ;;  %3378 = vmatpush1.msra.mxu0 %v20798_v8  ;;  %v20804_v8 = vld [vmem:[#allocation52_spill] sm:$0xff] }
 0x225   :  { %3554 = vmatpush1.msra.mxu1 %v20745_v57  ;;  %3382 = vmatprep.subr.mxu0 %v20799_v41  ;;  %v20805_v41 = vld [vmem:[#allocation55_spill] sm:$0xff] }
 0x226   :  { %3556 = vmatprep.subr.mxu1 %v20747_v45  ;;  %3386 = vmatpush1.msra.mxu0 %v20800_v31  ;;  %v20806_v31 = vld [vmem:[#allocation58_spill] sm:$0xff] }
 0x227   :  { %3558 = vmatpush1.msra.mxu1 %v20749_v21  ;;  %3390 = vmatprep.subr.mxu0 %v20801_v63  ;;  %v20807_v63 = vld [vmem:[#allocation61_spill] sm:$0xff] }
 0x228   :  { %3560 = vmatprep.subr.mxu1 %v20751_v33  ;;  %3394 = vmatpush1.msra.mxu0 %v20802_v59  ;;  %v20808_v59 = vld [vmem:[#allocation64_spill] sm:$0xff] }
 0x229   :  { %3562 = vmatpush1.msra.mxu1 %v20753_v1  ;;  %3398 = vmatprep.subr.mxu0 %v20803_v30  ;;  %v20809_v30 = vld [vmem:[#allocation70_spill] sm:$0xff] }
 0x22a   :  { %3564 = vmatprep.subr.mxu1 %v20755_v9  ;;  %3402 = vmatpush1.msra.mxu0 %v20804_v8  ;;  %v20810_v8 = vld [vmem:[#allocation73_spill] sm:$0xff] }
 0x22b   :  { %3566 = vmatpush1.msra.mxu1 %v20757_v53  ;;  %3406 = vmatprep.subr.mxu0 %v20805_v41  ;;  %v20811_v41 = vld [vmem:[#allocation79_spill] sm:$0xff] }
 0x22c   :  { %3568 = vmatprep.subr.mxu1 %v20759_v7  ;;  %3410 = vmatpush1.msra.mxu0 %v20806_v31  ;;  %v20812_v31 = vld [vmem:[#allocation89_spill] sm:$0xff] }
 0x22d   :  { %3570 = vmatpush1.msra.mxu1 %v20761_v44  ;;  %3414 = vmatprep.subr.mxu0 %v20807_v63  ;;  %v20813_v63 = vld [vmem:[#allocation92_spill] sm:$0xff] }
 0x22e   :  { %3572 = vmatprep.subr.mxu1 %v20763_v3  ;;  %3418 = vmatpush1.msra.mxu0 %v20808_v59  ;;  %v20814_v59 = vld [vmem:[#allocation96_spill] sm:$0xff] }
 0x22f   :  { %3574 = vmatpush1.msra.mxu1 %v20765_v52  ;;  %3422 = vmatprep.subr.mxu0 %v20809_v30  ;;  %v20815_v30 = vld [vmem:[#allocation100_spill] sm:$0xff] }
 0x230   :  { %3576 = vmatprep.subr.mxu1 %v20767_v22  ;;  %3426 = vmatpush1.msra.mxu0 %v20810_v8  ;;  %v20816_v8 = vld [vmem:[#allocation103_spill] sm:$0xff]  ;;  %v20895_v22 = vld [vmem:[#allocation153_spill] sm:$0xff] }
 0x231   :  { %3578 = vmatpush1.msra.mxu1 %v20769_v49  ;;  %3430 = vmatprep.subr.mxu0 %v20811_v41  ;;  %v20817_v41 = vld [vmem:[#allocation106_spill] sm:$0xff]  ;;  %v20894_v49 = vld [vmem:[#allocation151_spill] sm:$0xff] }
 0x232   :  { %3580 = vmatprep.subr.mxu1 %v20771_v55  ;;  %3434 = vmatpush1.msra.mxu0 %v20812_v31  ;;  %v20818_v31 = vld [vmem:[#allocation109_spill] sm:$0xff] }
 0x233   :  { %3582 = vmatpush1.msra.mxu1 %v20773_v43  ;;  %3438 = vmatprep.subr.mxu0 %v20813_v63  ;;  %v20821_v63 = vld [vmem:[#allocation116_spill] sm:$0xff]  ;;  %v20892_v43 = vld [vmem:[#allocation146_spill] sm:$0xff]  ;;  %v20893_v55 = vld [vmem:[#allocation149_spill] sm:$0xff] }
 0x234   :  { %3584 = vmatprep.subr.mxu1 %v20775_v62  ;;  %3442 = vmatpush1.msra.mxu0 %v20814_v59  ;;  %v20819_v59 = vld [vmem:[#allocation113_spill] sm:$0xff]  ;;  %v20891_v62 = vld [vmem:[#allocation142_spill] sm:$0xff] }
 0x235   :  { %3586 = vmatpush1.msra.mxu1 %v20777_v58  ;;  %3446 = vmatprep.subr.mxu0 %v20815_v30  ;;  %v20820_v30 = vld [vmem:[#allocation170_spill] sm:$0xff]  ;;  %v20890_v58 = vld [vmem:[#allocation239_spill] sm:$0xff] }
 0x236   :  { %3588 = vmatprep.subr.mxu1 %v20779_v0  ;;  %3450 = vmatpush1.msra.mxu0 %v20816_v8  ;;  %v20822_v8 = vld [vmem:[#allocation179_spill] sm:$0xff]  ;;  %v20889_v0 = vld [vmem:[#allocation236_spill] sm:$0xff] }
 0x237   :  { %3590 = vmatpush1.msra.mxu1 %v20781_v47  ;;  %3454 = vmatprep.subr.mxu0 %v20817_v41  ;;  %v20824_v41 = vld [vmem:[#allocation182_spill] sm:$0xff]  ;;  %v20882_v47 = vld [vmem:[#allocation267_spill] sm:$0xff] }
 0x238   :  { %3592 = vmatprep.subr.mxu1 %v20783_v5  ;;  %3458 = vmatpush1.msra.mxu0 %v20818_v31  ;;  %v20826_v31 = vld [vmem:[#allocation185_spill] sm:$0xff]  ;;  %v20880_v5 = vld [vmem:[#allocation266_spill] sm:$0xff] }
 0x239   :  { %3594 = vmatpush1.msra.mxu1 %v20785_v11  ;;  %3627 = vmatprep.mubr.f32.mxu1 %v20373_v28  ;;  %v20878_v11 = vld [vmem:[#allocation265_spill] sm:$0xff] }
 0x23a   :  { %3462 = vmatprep.subr.mxu0 %v20819_v59  ;;  %3629 = vmatmul.mubr.f32.vlgmr.msra.gmra.mxu1 %v16618_v23  ;;  %v20829_v59 = vld [vmem:[#allocation127_spill] sm:$0xff] }
 0x23b   :  { %3748 = vmatprep.subr.mxu1 %v20820_v30  ;;  %3466 = vmatpush1.msra.mxu0 %v20821_v63  ;;  %v20831_v30 = vld [vmem:[#allocation129_spill] sm:$0xff]  ;;  %v20832_v63 = vld [vmem:[#allocation194_spill] sm:$0xff] }
 0x23c   :  { %3754 = vmatpush1.msra.mxu1 %v20822_v8  ;;  %3470 = vmatprep.subr.mxu0 %v20823_v10  ;;  %v20833_v8 = vld [vmem:[#allocation131_spill] sm:$0xff] }
 0x23d   :  { %3760 = vmatprep.subr.mxu1 %v20824_v41  ;;  %3474 = vmatpush1.msra.mxu0 %v20825_v24  ;;  %v20834_v41 = vld [vmem:[#allocation197_spill] sm:$0xff]  ;;  %v20845_v10 = vld [vmem:[#allocation147_spill] sm:$0xff] }
 0x23e   :  { %3766 = vmatpush1.msra.mxu1 %v20826_v31  ;;  %3478 = vmatprep.subr.mxu0 %v20827_v29  ;;  %v20835_v31 = vld [vmem:[#allocation140_spill] sm:$0xff]  ;;  %v20843_v24 = vld [vmem:[#allocation145_spill] sm:$0xff] }
 0x23f   :  { %3772 = vmatprep.subr.mxu1 %v20828_v26  ;;  %3482 = vmatpush1.msra.mxu0 %v20829_v59  ;;  %v20836_v29 = vld [vmem:[#allocation200_spill] sm:$0xff]  ;;  %v20837_v26 = vld [vmem:[#allocation141_spill] sm:$0xff]  ;;  %v20838_v59 = vld [vmem:[#allocation203_spill] sm:$0xff] }
 0x240   :  { %3778 = vmatpush1.msra.mxu1 %v20830_v39  ;;  %3486 = vmatprep.subr.mxu0 %v20831_v30  ;;  %v20839_v39 = vld [vmem:[#allocation143_spill] sm:$0xff]  ;;  %v20840_v30 = vld [vmem:[#allocation206_spill] sm:$0xff] }
 0x241   :  { %3784 = vmatprep.subr.mxu1 %v20832_v63  ;;  %3490 = vmatpush1.msra.mxu0 %v20833_v8  ;;  %v20841_v63 = vld [vmem:[#allocation144_spill] sm:$0xff]  ;;  %v20842_v8 = vld [vmem:[#allocation210_spill] sm:$0xff] }
 0x242   :  { %3523 = vmatprep.mubr.f32.mxu0 %v20373_v28  ;;  %3790 = vmatpush1.msra.mxu1 %v20834_v41  ;;  %v20844_v41 = vld [vmem:[#allocation213_spill] sm:$0xff] }
 0x243   :  { %3525 = vmatmul.mubr.f32.vlgmr.msra.gmra.mxu0 %v16618_v23  ;;  %3636 = vmatprep.subr.mxu0 %v20835_v31 }
 0x244   :  { %3796 = vmatprep.subr.mxu1 %v20836_v29  ;;  %3638 = vmatpush1.msra.mxu0 %v20837_v26  ;;  %v20847_v29 = vld [vmem:[#allocation150_spill] sm:$0xff] }
 0x245   :  { %3802 = vmatpush1.msra.mxu1 %v20838_v59  ;;  %3640 = vmatprep.subr.mxu0 %v20839_v39  ;;  %v20849_v59 = vld [vmem:[#allocation152_spill] sm:$0xff] }
 0x246   :  { %3808 = vmatprep.subr.mxu1 %v20840_v30  ;;  %3642 = vmatpush1.msra.mxu0 %v20841_v63  ;;  %v20851_v30 = vld [vmem:[#allocation154_spill] sm:$0xff] }
 0x247   :  { %3814 = vmatpush1.msra.mxu1 %v20842_v8  ;;  %3644 = vmatprep.subr.mxu0 %v20843_v24  ;;  %v20853_v8 = vld [vmem:[#allocation157_spill] sm:$0xff] }
 0x248   :  { %3820 = vmatprep.subr.mxu1 %v20844_v41  ;;  %3646 = vmatpush1.msra.mxu0 %v20845_v10  ;;  %v20855_v41 = vld [vmem:[#allocation160_spill] sm:$0xff] }
 0x249   :  { %3826 = vmatpush1.msra.mxu1 %v20846_v56  ;;  %3648 = vmatprep.subr.mxu0 %v20847_v29  ;;  %v20857_v56 = vld [vmem:[#allocation163_spill] sm:$0xff] }
 0x24a   :  { %3832 = vmatprep.subr.mxu1 %v20848_v34  ;;  %3650 = vmatpush1.msra.mxu0 %v20849_v59  ;;  %v20859_v34 = vld [vmem:[#allocation166_spill] sm:$0xff] }
 0x24b   :  { %3838 = vmatpush1.msra.mxu1 %v20850_v14  ;;  %3652 = vmatprep.subr.mxu0 %v20851_v30  ;;  %v20861_v14 = vld [vmem:[#allocation169_spill] sm:$0xff] }
 0x24c   :  { %3844 = vmatprep.subr.mxu1 %v20852_v50  ;;  %3654 = vmatpush1.msra.mxu0 %v20853_v8  ;;  %v20863_v50 = vld [vmem:[#allocation175_spill] sm:$0xff] }
 0x24d   :  { %3850 = vmatpush1.msra.mxu1 %v20854_v40  ;;  %3656 = vmatprep.subr.mxu0 %v20855_v41  ;;  %v20865_v40 = vld [vmem:[#allocation178_spill] sm:$0xff] }
 0x24e   :  { %3856 = vmatprep.subr.mxu1 %v20856_v35  ;;  %3658 = vmatpush1.msra.mxu0 %v20857_v56  ;;  %v20867_v35 = vld [vmem:[#allocation184_spill] sm:$0xff] }
 0x24f   :  { %3862 = vmatpush1.msra.mxu1 %v20858_v42  ;;  %3660 = vmatprep.subr.mxu0 %v20859_v34  ;;  %v20869_v42 = vld [vmem:[#allocation193_spill] sm:$0xff] }
 0x250   :  { %3868 = vmatprep.subr.mxu1 %v20860_v48  ;;  %3662 = vmatpush1.msra.mxu0 %v20861_v14  ;;  %v20871_v48 = vld [vmem:[#allocation196_spill] sm:$0xff] }
 0x251   :  { %3874 = vmatpush1.msra.mxu1 %v20862_v2  ;;  %3664 = vmatprep.subr.mxu0 %v20863_v50  ;;  %v20873_v2 = vld [vmem:[#allocation199_spill] sm:$0xff] }
 0x252   :  { %3880 = vmatprep.subr.mxu1 %v20864_v36  ;;  %3666 = vmatpush1.msra.mxu0 %v20865_v40  ;;  %v20875_v36 = vld [vmem:[#allocation202_spill] sm:$0xff] }
 0x253   :  { %3886 = vmatpush1.msra.mxu1 %v20866_v54  ;;  %3668 = vmatprep.subr.mxu0 %v20867_v35  ;;  %v20877_v54 = vld [vmem:[#allocation205_spill] sm:$0xff] }
 0x254   :  { %3892 = vmatprep.subr.mxu1 %v20868_v60  ;;  %3670 = vmatpush1.msra.mxu0 %v20869_v42  ;;  %v20879_v60 = vld [vmem:[#allocation209_spill] sm:$0xff] }
 0x255   :  { %3898 = vmatpush1.msra.mxu1 %v20870_v37  ;;  %3672 = vmatprep.subr.mxu0 %v20871_v48  ;;  %v20881_v37 = vld [vmem:[#allocation212_spill] sm:$0xff] }
 0x256   :  { %3904 = vmatprep.subr.mxu1 %v20872_v61  ;;  %3674 = vmatpush1.msra.mxu0 %v20873_v2  ;;  %v20883_v61 = vld [vmem:[#allocation215_spill] sm:$0xff] }
 0x257   :  { %3910 = vmatpush1.msra.mxu1 %v20874_v13  ;;  %3676 = vmatprep.subr.mxu0 %v20875_v36  ;;  %v20888_v13 = vld [vmem:[#allocation233_spill] sm:$0xff] }
 0x258   :  { %3916 = vmatprep.subr.mxu1 %v20876_v6  ;;  %3678 = vmatpush1.msra.mxu0 %v20877_v54  ;;  %v20884_v6 = vld [vmem:[#allocation219_spill] sm:$0xff] }
 0x259   :  { %3922 = vmatpush1.msra.mxu1 %v20878_v11  ;;  %3680 = vmatprep.subr.mxu0 %v20879_v60  ;;  %v20885_v11 = vld [vmem:[#allocation222_spill] sm:$0xff] }
 0x25a   :  { %3928 = vmatprep.subr.mxu1 %v20880_v5  ;;  %3682 = vmatpush1.msra.mxu0 %v20881_v37  ;;  %v20886_v5 = vld [vmem:[#allocation226_spill] sm:$0xff] }
 0x25b   :  { %3934 = vmatpush1.msra.mxu1 %v20882_v47  ;;  %3967 = vmatprep.mubr.f32.mxu1 %v20373_v28  ;;  %v20887_v47 = vld [vmem:[#allocation230_spill] sm:$0xff] }
 0x25c   :  { %3684 = vmatprep.subr.mxu0 %v20883_v61  ;;  %3969 = vmatmul.mubr.f32.vlgmr.msra.gmra.mxu1 %v16618_v23 }
 0x25d   :  { %4113 = vmatprep.subr.mxu1 %v20835_v31  ;;  %3686 = vmatpush1.msra.mxu0 %v20884_v6 }
 0x25e   :  { %4115 = vmatpush1.msra.mxu1 %v20837_v26  ;;  %3688 = vmatprep.subr.mxu0 %v20885_v11 }
 0x25f   :  { %4117 = vmatprep.subr.mxu1 %v20839_v39  ;;  %3690 = vmatpush1.msra.mxu0 %v20886_v5 }
 0x260   :  { %4119 = vmatpush1.msra.mxu1 %v20841_v63  ;;  %3692 = vmatprep.subr.mxu0 %v20887_v47 }
 0x261   :  { %4121 = vmatprep.subr.mxu1 %v20843_v24  ;;  %3694 = vmatpush1.msra.mxu0 %v20888_v13 }
 0x262   :  { %4123 = vmatpush1.msra.mxu1 %v20845_v10  ;;  %3696 = vmatprep.subr.mxu0 %v20889_v0 }
 0x263   :  { %4125 = vmatprep.subr.mxu1 %v20847_v29  ;;  %3698 = vmatpush1.msra.mxu0 %v20890_v58 }
 0x264   :  { %3731 = vmatprep.mubr.f32.mxu0 %v20373_v28  ;;  %4127 = vmatpush1.msra.mxu1 %v20849_v59 }
 0x265   :  { %3737 = vmatmul.mubr.f32.vlgmr.msra.gmra.mxu0 %v16636_v32  ;;  %3977 = vmatprep.subr.mxu0 %v20891_v62  ;;  %v20896_v32 = vld [vmem:[#allocation156_spill] sm:$0xff]  ;;  %v20897_v62 = vld [vmem:[#allocation159_spill] sm:$0xff] }
 0x266   :  { %4129 = vmatprep.subr.mxu1 %v20851_v30  ;;  %3980 = vmatpush1.msra.mxu0 %v20892_v43  ;;  %v20898_v43 = vld [vmem:[#allocation162_spill] sm:$0xff] }
 0x267   :  { %4131 = vmatpush1.msra.mxu1 %v20853_v8  ;;  %3983 = vmatprep.subr.mxu0 %v20893_v55  ;;  %v20899_v55 = vld [vmem:[#allocation165_spill] sm:$0xff] }
 0x268   :  { %4133 = vmatprep.subr.mxu1 %v20855_v41  ;;  %3986 = vmatpush1.msra.mxu0 %v20894_v49  ;;  %v20900_v49 = vld [vmem:[#allocation168_spill] sm:$0xff] }
 0x269   :  { %4135 = vmatpush1.msra.mxu1 %v20857_v56  ;;  %3989 = vmatprep.subr.mxu0 %v20895_v22  ;;  %v20901_v22 = vld [vmem:[#allocation172_spill] sm:$0xff] }
 0x26a   :  { %4137 = vmatprep.subr.mxu1 %v20859_v34  ;;  %3992 = vmatpush1.msra.mxu0 %v20896_v32  ;;  %v20902_v32 = vld [vmem:[#allocation174_spill] sm:$0xff] }
 0x26b   :  { %4139 = vmatpush1.msra.mxu1 %v20861_v14  ;;  %3995 = vmatprep.subr.mxu0 %v20897_v62  ;;  %v20903_v62 = vld [vmem:[#allocation177_spill] sm:$0xff] }
 0x26c   :  { %4141 = vmatprep.subr.mxu1 %v20863_v50  ;;  %3998 = vmatpush1.msra.mxu0 %v20898_v43  ;;  %v20904_v43 = vld [vmem:[#allocation181_spill] sm:$0xff] }
 0x26d   :  { %4143 = vmatpush1.msra.mxu1 %v20865_v40  ;;  %4001 = vmatprep.subr.mxu0 %v20899_v55  ;;  %v20905_v55 = vld [vmem:[#allocation187_spill] sm:$0xff] }
 0x26e   :  { %4145 = vmatprep.subr.mxu1 %v20867_v35  ;;  %4004 = vmatpush1.msra.mxu0 %v20900_v49  ;;  %v20906_v49 = vld [vmem:[#allocation190_spill] sm:$0xff] }
 0x26f   :  { %4147 = vmatpush1.msra.mxu1 %v20869_v42  ;;  %4007 = vmatprep.subr.mxu0 %v20901_v22  ;;  %v20907_v22 = vld [vmem:[#allocation195_spill] sm:$0xff] }
 0x270   :  { %4149 = vmatprep.subr.mxu1 %v20871_v48  ;;  %4010 = vmatpush1.msra.mxu0 %v20902_v32  ;;  %v20908_v32 = vld [vmem:[#allocation204_spill] sm:$0xff] }
 0x271   :  { %4151 = vmatpush1.msra.mxu1 %v20873_v2  ;;  %4013 = vmatprep.subr.mxu0 %v20903_v62  ;;  %v20909_v62 = vld [vmem:[#allocation208_spill] sm:$0xff] }
 0x272   :  { %4153 = vmatprep.subr.mxu1 %v20875_v36  ;;  %4016 = vmatpush1.msra.mxu0 %v20904_v43  ;;  %v20910_v43 = vld [vmem:[#allocation211_spill] sm:$0xff] }
 0x273   :  { %4155 = vmatpush1.msra.mxu1 %v20877_v54  ;;  %4019 = vmatprep.subr.mxu0 %v20905_v55  ;;  %v20911_v55 = vld [vmem:[#allocation214_spill] sm:$0xff] }
 0x274   :  { %4157 = vmatprep.subr.mxu1 %v20879_v60  ;;  %4022 = vmatpush1.msra.mxu0 %v20906_v49  ;;  %v20912_v49 = vld [vmem:[#allocation218_spill] sm:$0xff] }
 0x275   :  { %4159 = vmatpush1.msra.mxu1 %v20881_v37  ;;  %4025 = vmatprep.subr.mxu0 %v20907_v22  ;;  %v20913_v22 = vld [vmem:[#allocation221_spill] sm:$0xff] }
 0x276   :  { %4161 = vmatprep.subr.mxu1 %v20883_v61  ;;  %4028 = vmatpush1.msra.mxu0 %v20908_v32  ;;  %v20914_v32 = vld [vmem:[#allocation225_spill] sm:$0xff] }
 0x277   :  { %4163 = vmatpush1.msra.mxu1 %v20884_v6  ;;  %4031 = vmatprep.subr.mxu0 %v20909_v62  ;;  %v20954_v62 = vld [vmem:[#allocation54_spill] sm:$0xff] }
 0x278   :  { %4165 = vmatprep.subr.mxu1 %v20885_v11  ;;  %4034 = vmatpush1.msra.mxu0 %v20910_v43  ;;  %v20915_v43 = vld [vmem:[#allocation229_spill] sm:$0xff] }
 0x279   :  { %4167 = vmatpush1.msra.mxu1 %v20886_v5  ;;  %4037 = vmatprep.subr.mxu0 %v20911_v55  ;;  %v20916_v55 = vld [vmem:[#allocation232_spill] sm:$0xff] }
 0x27a   :  { %4169 = vmatprep.subr.mxu1 %v20887_v47  ;;  %4040 = vmatpush1.msra.mxu0 %v20912_v49  ;;  %v20917_v49 = vld [vmem:[#allocation235_spill] sm:$0xff] }
 0x27b   :  { %4171 = vmatpush1.msra.mxu1 %v20888_v13  ;;  %4043 = vmatprep.subr.mxu0 %v20913_v22  ;;  %v20918_v22 = vld [vmem:[#allocation238_spill] sm:$0xff] }
 0x27c   :  { %4173 = vmatprep.subr.mxu1 %v20889_v0  ;;  %4046 = vmatpush1.msra.mxu0 %v20914_v32  ;;  %v20919_v32 = vld [vmem:[#allocation242_spill] sm:$0xff] }
 0x27d   :  { %4175 = vmatpush1.msra.mxu1 %v20890_v58  ;;  %4208 = vmatprep.mubr.f32.mxu1 %v20373_v28 }
 0x27e   :  { %4049 = vmatprep.subr.mxu0 %v20915_v43  ;;  %4212 = vmatmul.mubr.f32.vlgmr.msra.gmra.mxu1 %v16628_v4  ;;  %v20920_v43 = vld [vmem:[#allocation245_spill] sm:$0xff]  ;;  %v20921_v4 = vld [vmem:[#allocation248_spill] sm:$0xff] }
 0x27f   :  { %4387 = vmatprep.subr.mxu1 %v20835_v31  ;;  %4052 = vmatpush1.msra.mxu0 %v20916_v55  ;;  %v20922_v55 = vld [vmem:[#allocation251_spill] sm:$0xff] }
 0x280   :  { %4389 = vmatpush1.msra.mxu1 %v20837_v26  ;;  %4055 = vmatprep.subr.mxu0 %v20917_v49  ;;  %v20952_v49 = vld [vmem:[#allocation51_spill] sm:$0xff] }
 0x281   :  { %4391 = vmatprep.subr.mxu1 %v20839_v39  ;;  %4058 = vmatpush1.msra.mxu0 %v20918_v22  ;;  %v20923_v22 = vld [vmem:[#allocation148_spill] sm:$0xff] }
 0x282   :  { %4393 = vmatpush1.msra.mxu1 %v20841_v63  ;;  %4061 = vmatprep.subr.mxu0 %v20919_v32  ;;  %v20924_v32 = vld [vmem:[#allocation155_spill] sm:$0xff] }
 0x283   :  { %4395 = vmatprep.subr.mxu1 %v20843_v24  ;;  %4064 = vmatpush1.msra.mxu0 %v20920_v43  ;;  %v20925_v43 = vld [vmem:[#allocation158_spill] sm:$0xff] }
 0x284   :  { %4397 = vmatpush1.msra.mxu1 %v20845_v10  ;;  %4067 = vmatprep.subr.mxu0 %v20921_v4  ;;  %v20926_v4 = vld [vmem:[#allocation161_spill] sm:$0xff] }
 0x285   :  { %4399 = vmatprep.subr.mxu1 %v20847_v29  ;;  %4070 = vmatpush1.msra.mxu0 %v20922_v55  ;;  %v20927_v55 = vld [vmem:[#allocation164_spill] sm:$0xff] }
 0x286   :  { %4103 = vmatprep.mubr.f32.mxu0 %v20373_v28  ;;  %4401 = vmatpush1.msra.mxu1 %v20849_v59 }
 0x287   :  { %4106 = vmatmul.mubr.f32.vlgmr.msra.gmra.mxu0 %v16621_v27  ;;  %4221 = vmatprep.subr.mxu0 %v20923_v22  ;;  %v20928_v27 = vld [vmem:[#allocation167_spill] sm:$0xff] }
 0x288   :  { %4403 = vmatprep.subr.mxu1 %v20851_v30  ;;  %4225 = vmatpush1.msra.mxu0 %v20924_v32  ;;  %v20929_v22 = vld [vmem:[#allocation171_spill] sm:$0xff]  ;;  %v20930_v32 = vld [vmem:[#allocation173_spill] sm:$0xff] }
 0x289   :  { %4405 = vmatpush1.msra.mxu1 %v20853_v8  ;;  %4229 = vmatprep.subr.mxu0 %v20925_v43  ;;  %v20931_v43 = vld [vmem:[#allocation176_spill] sm:$0xff] }
 0x28a   :  { %4407 = vmatprep.subr.mxu1 %v20855_v41  ;;  %4233 = vmatpush1.msra.mxu0 %v20926_v4  ;;  %v20932_v4 = vld [vmem:[#allocation180_spill] sm:$0xff] }
 0x28b   :  { %4409 = vmatpush1.msra.mxu1 %v20857_v56  ;;  %4237 = vmatprep.subr.mxu0 %v20927_v55  ;;  %v20933_v55 = vld [vmem:[#allocation183_spill] sm:$0xff] }
 0x28c   :  { %4411 = vmatprep.subr.mxu1 %v20859_v34  ;;  %4241 = vmatpush1.msra.mxu0 %v20928_v27  ;;  %v20934_v27 = vld [vmem:[#allocation186_spill] sm:$0xff] }
 0x28d   :  { %4413 = vmatpush1.msra.mxu1 %v20861_v14  ;;  %4245 = vmatprep.subr.mxu0 %v20929_v22  ;;  %v20935_v22 = vld [vmem:[#allocation189_spill] sm:$0xff] }
 0x28e   :  { %4415 = vmatprep.subr.mxu1 %v20863_v50  ;;  %4249 = vmatpush1.msra.mxu0 %v20930_v32  ;;  %v20936_v32 = vld [vmem:[#allocation192_spill] sm:$0xff] }
 0x28f   :  { %4417 = vmatpush1.msra.mxu1 %v20865_v40  ;;  %4253 = vmatprep.subr.mxu0 %v20931_v43  ;;  %v20937_v43 = vld [vmem:[#allocation198_spill] sm:$0xff] }
 0x290   :  { %4419 = vmatprep.subr.mxu1 %v20867_v35  ;;  %4257 = vmatpush1.msra.mxu0 %v20932_v4  ;;  %v20938_v4 = vld [vmem:[#allocation201_spill] sm:$0xff] }
 0x291   :  { %4421 = vmatpush1.msra.mxu1 %v20869_v42  ;;  %4261 = vmatprep.subr.mxu0 %v20933_v55  ;;  %v20939_v55 = vld [vmem:[#allocation207_spill] sm:$0xff] }
 0x292   :  { %4423 = vmatprep.subr.mxu1 %v20871_v48  ;;  %4265 = vmatpush1.msra.mxu0 %v20934_v27  ;;  %v20940_v27 = vld [vmem:[#allocation217_spill] sm:$0xff] }
 0x293   :  { %4425 = vmatpush1.msra.mxu1 %v20873_v2  ;;  %4269 = vmatprep.subr.mxu0 %v20935_v22  ;;  %v20941_v22 = vld [vmem:[#allocation220_spill] sm:$0xff] }
 0x294   :  { %4427 = vmatprep.subr.mxu1 %v20875_v36  ;;  %4273 = vmatpush1.msra.mxu0 %v20936_v32  ;;  %v20942_v32 = vld [vmem:[#allocation224_spill] sm:$0xff] }
 0x295   :  { %4429 = vmatpush1.msra.mxu1 %v20877_v54  ;;  %4277 = vmatprep.subr.mxu0 %v20937_v43  ;;  %v20943_v43 = vld [vmem:[#allocation228_spill] sm:$0xff] }
 0x296   :  { %4431 = vmatprep.subr.mxu1 %v20879_v60  ;;  %4281 = vmatpush1.msra.mxu0 %v20938_v4  ;;  %v20944_v4 = vld [vmem:[#allocation231_spill] sm:$0xff] }
 0x297   :  { %4433 = vmatpush1.msra.mxu1 %v20881_v37  ;;  %4285 = vmatprep.subr.mxu0 %v20939_v55  ;;  %v20945_v55 = vld [vmem:[#allocation234_spill] sm:$0xff] }
 0x298   :  { %4435 = vmatprep.subr.mxu1 %v20883_v61  ;;  %4289 = vmatpush1.msra.mxu0 %v20940_v27  ;;  %v20946_v27 = vld [vmem:[#allocation237_spill] sm:$0xff] }
 0x299   :  { %4437 = vmatpush1.msra.mxu1 %v20884_v6  ;;  %4293 = vmatprep.subr.mxu0 %v20941_v22  ;;  %v20950_v22 = vld [vmem:[#allocation42_spill] sm:$0xff] }
 0x29a   :  { %4439 = vmatprep.subr.mxu1 %v20885_v11  ;;  %4297 = vmatpush1.msra.mxu0 %v20942_v32  ;;  %v20947_v32 = vld [vmem:[#allocation241_spill] sm:$0xff] }
 0x29b   :  { %4441 = vmatpush1.msra.mxu1 %v20886_v5  ;;  %4301 = vmatprep.subr.mxu0 %v20943_v43  ;;  %v20948_v43 = vld [vmem:[#allocation244_spill] sm:$0xff] }
 0x29c   :  { %4443 = vmatprep.subr.mxu1 %v20887_v47  ;;  %4305 = vmatpush1.msra.mxu0 %v20944_v4  ;;  %v20949_v4 = vld [vmem:[#allocation247_spill] sm:$0xff] }
 0x29d   :  { %4445 = vmatpush1.msra.mxu1 %v20888_v13  ;;  %4309 = vmatprep.subr.mxu0 %v20945_v55  ;;  %v20951_v55 = vld [vmem:[#allocation250_spill] sm:$0xff]  ;;  %v20959_v13 = vld [vmem:[#allocation259_spill] sm:$0xff] }
 0x29e   :  { %4447 = vmatprep.subr.mxu1 %v20889_v0  ;;  %4313 = vmatpush1.msra.mxu0 %v20946_v27  ;;  %v20953_v27 = vld [vmem:[#allocation253_spill] sm:$0xff] }
 0x29f   :  { %4449 = vmatpush1.msra.mxu1 %v20890_v58  ;;  %4482 = vmatprep.mubr.f32.mxu1 %v20373_v28  ;;  %v20955_v58 = vld [vmem:[#allocation255_spill] sm:$0xff]  ;;  %v20957_v0 = vld [vmem:[#allocation257_spill] sm:$0xff] }
 0x2a0   :  { %4317 = vmatprep.subr.mxu0 %v20947_v32  ;;  %4484 = vmatmul.mubr.f32.vlgmr.msra.gmra.mxu1 %v16618_v23  ;;  %v20956_v32 = vld [vmem:[#allocation57_spill] sm:$0xff] }
 0x2a1   :  { %4321 = vmatpush1.msra.mxu0 %v20948_v43  ;;  %4378 = vmatprep.mubr.f32.mxu0 %v20373_v28  ;;  %v20958_v43 = vld [vmem:[#allocation60_spill] sm:$0xff] }
 0x2a2   :  { %4325 = vmatprep.subr.mxu0 %v20949_v4  ;;  %4640 = vmatprep.subr.mxu1 %v20950_v22  ;;  %v20960_v4 = vld [vmem:[#allocation63_spill] sm:$0xff] }
 0x2a3   :  { %4329 = vmatpush1.msra.mxu0 %v20951_v55  ;;  %4646 = vmatpush1.msra.mxu1 %v20952_v49  ;;  %v20961_v55 = vld [vmem:[#allocation66_spill] sm:$0xff]  ;;  %v20962_v49 = vld [vmem:[#allocation69_spill] sm:$0xff] }
 0x2a4   :  { %4333 = vmatprep.subr.mxu0 %v20953_v27  ;;  %4652 = vmatprep.subr.mxu1 %v20954_v62  ;;  %v20963_v62 = vld [vmem:[#allocation72_spill] sm:$0xff]  ;;  %v20997_v27 = vld [vmem:[#allocation14_spill] sm:$0xff] }
 0x2a5   :  { %4337 = vmatpush1.msra.mxu0 %v20955_v58  ;;  %4658 = vmatpush1.msra.mxu1 %v20956_v32  ;;  %v20964_v32 = vld [vmem:[#allocation75_spill] sm:$0xff]  ;;  %v20995_v58 = vld [vmem:[#allocation108_spill] sm:$0xff] }
 0x2a6   :  { %4341 = vmatprep.subr.mxu0 %v20957_v0  ;;  %4664 = vmatprep.subr.mxu1 %v20958_v43  ;;  %v20965_v43 = vld [vmem:[#allocation78_spill] sm:$0xff] }
 0x2a7   :  { %4345 = vmatpush1.msra.mxu0 %v20959_v13  ;;  %4670 = vmatpush1.msra.mxu1 %v20960_v4  ;;  %v20966_v4 = vld [vmem:[#allocation82_spill] sm:$0xff]  ;;  %v20988_v13 = vld [vmem:[#allocation139_spill] sm:$0xff] }
 0x2a8   :  { %4380 = vmatmul.mubr.f32.vlgmr.msra.gmra.mxu0 %v16618_v23  ;;  %4676 = vmatprep.subr.mxu1 %v20961_v55  ;;  %v20967_v23 = vld [vmem:[#allocation85_spill] sm:$0xff]  ;;  %v20986_v55 = vld [vmem:[#allocation138_spill] sm:$0xff] }
 0x2a9   :  { %4682 = vmatpush1.msra.mxu1 %v20962_v49  ;;  %4528 = vmatprep.subr.mxu0 %v20787_v18  ;;  %v20968_v49 = vld [vmem:[#allocation88_spill] sm:$0xff]  ;;  %v20993_v0 = vld [vmem:[#allocation102_spill] sm:$0xff] }
 0x2aa   :  { %4688 = vmatprep.subr.mxu1 %v20963_v62  ;;  %4530 = vmatpush1.msra.mxu0 %v20675_v15  ;;  %v20969_v62 = vld [vmem:[#allocation95_spill] sm:$0xff] }
 0x2ab   :  { %4694 = vmatpush1.msra.mxu1 %v20964_v32  ;;  %4532 = vmatprep.subr.mxu0 %v20677_v46  ;;  %v20970_v32 = vld [vmem:[#allocation99_spill] sm:$0xff] }
 0x2ac   :  { %4700 = vmatprep.subr.mxu1 %v20965_v43  ;;  %4534 = vmatpush1.msra.mxu0 %v20679_v51  ;;  %v20971_v43 = vld [vmem:[#allocation112_spill] sm:$0xff] }
 0x2ad   :  { %4706 = vmatpush1.msra.mxu1 %v20966_v4  ;;  %4536 = vmatprep.subr.mxu0 %v20681_v38  ;;  %v20972_v4 = vld [vmem:[#allocation115_spill] sm:$0xff] }
 0x2ae   :  { %4712 = vmatprep.subr.mxu1 %v20967_v23  ;;  %4538 = vmatpush1.msra.mxu0 %v20683_v17  ;;  %v20973_v23 = vld [vmem:[#allocation118_spill] sm:$0xff] }
 0x2af   :  { %4718 = vmatpush1.msra.mxu1 %v20968_v49  ;;  %4540 = vmatprep.subr.mxu0 %v20685_v12  ;;  %v20974_v49 = vld [vmem:[#allocation121_spill] sm:$0xff] }
 0x2b0   :  { %4724 = vmatprep.subr.mxu1 %v20969_v62  ;;  %4542 = vmatpush1.msra.mxu0 %v20687_v20  ;;  %v20975_v62 = vld [vmem:[#allocation124_spill] sm:$0xff] }
 0x2b1   :  { %4730 = vmatpush1.msra.mxu1 %v20970_v32  ;;  %4544 = vmatprep.subr.mxu0 %v20689_v16  ;;  %v20976_v32 = vld [vmem:[#allocation126_spill] sm:$0xff] }
 0x2b2   :  { %4736 = vmatprep.subr.mxu1 %v20971_v43  ;;  %4546 = vmatpush1.msra.mxu0 %v20691_v25  ;;  %v20977_v43 = vld [vmem:[#allocation128_spill] sm:$0xff] }
 0x2b3   :  { %4742 = vmatpush1.msra.mxu1 %v20972_v4  ;;  %4548 = vmatprep.subr.mxu0 %v20693_v19  ;;  %v20978_v4 = vld [vmem:[#allocation130_spill] sm:$0xff] }
 0x2b4   :  { %4748 = vmatprep.subr.mxu1 %v20973_v23  ;;  %4550 = vmatpush1.msra.mxu0 %v20745_v57  ;;  %v20979_v23 = vld [vmem:[#allocation132_spill] sm:$0xff] }
 0x2b5   :  { %4754 = vmatpush1.msra.mxu1 %v20974_v49  ;;  %4552 = vmatprep.subr.mxu0 %v20747_v45  ;;  %v20980_v49 = vld [vmem:[#allocation133_spill] sm:$0xff] }
 0x2b6   :  { %4760 = vmatprep.subr.mxu1 %v20975_v62  ;;  %4554 = vmatpush1.msra.mxu0 %v20749_v21  ;;  %v20981_v62 = vld [vmem:[#allocation134_spill] sm:$0xff] }
 0x2b7   :  { %4766 = vmatpush1.msra.mxu1 %v20976_v32  ;;  %4556 = vmatprep.subr.mxu0 %v20751_v33  ;;  %v20982_v32 = vld [vmem:[#allocation135_spill] sm:$0xff] }
 0x2b8   :  { %4772 = vmatprep.subr.mxu1 %v20977_v43  ;;  %4558 = vmatpush1.msra.mxu0 %v20753_v1  ;;  %v20983_v43 = vld [vmem:[#allocation136_spill] sm:$0xff]  ;;  %v3115_v5 = vpop.f32.mrf.mxu1 }
 0x2b9   :  { %4778 = vmatpush1.msra.mxu1 %v20978_v4  ;;  %4560 = vmatprep.subr.mxu0 %v20755_v9  ;;  %v20984_v4 = vld [vmem:[#allocation137_spill] sm:$0xff] }
 0x2ba   :  { %4784 = vmatprep.subr.mxu1 %v20979_v23  ;;  %4562 = vmatpush1.msra.mxu0 %v20757_v53  ;;  %v20985_v23 = vld [vmem:[#allocation81_spill] sm:$0xff]  ;;  %v3117_v6 = vpop.f32.mrf.mxu1 }
 0x2bb   :  { %4790 = vmatpush1.msra.mxu1 %v20980_v49  ;;  %4564 = vmatprep.subr.mxu0 %v20759_v7  ;;  %v20987_v49 = vld [vmem:[#allocation84_spill] sm:$0xff] }
 0x2bc   :  { %4796 = vmatprep.subr.mxu1 %v20981_v62  ;;  %4566 = vmatpush1.msra.mxu0 %v20761_v44  ;;  %v20989_v62 = vld [vmem:[#allocation87_spill] sm:$0xff] }
 0x2bd   :  { %4802 = vmatpush1.msra.mxu1 %v20982_v32  ;;  %4568 = vmatprep.subr.mxu0 %v20763_v3  ;;  %v20990_v32 = vld [vmem:[#allocation91_spill] sm:$0xff] }
 0x2be   :  { %4808 = vmatprep.subr.mxu1 %v20983_v43  ;;  %4570 = vmatpush1.msra.mxu0 %v20765_v52  ;;  %v20991_v43 = vld [vmem:[#allocation94_spill] sm:$0xff] }
 0x2bf   :  { %4814 = vmatpush1.msra.mxu1 %v20984_v4  ;;  %4572 = vmatprep.subr.mxu0 %v20985_v23  ;;  %v20992_v4 = vld [vmem:[#allocation98_spill] sm:$0xff] }
 0x2c0   :  { %4820 = vmatprep.subr.mxu1 %v20986_v55  ;;  %4574 = vmatpush1.msra.mxu0 %v20987_v49  ;;  %v20994_v55 = vld [vmem:[#allocation105_spill] sm:$0xff]  ;;  %v2883_v22 = vpop.f32.mrf.mxu0 }
 0x2c1   :  { %4826 = vmatpush1.msra.mxu1 %v20988_v13  ;;  %4576 = vmatprep.subr.mxu0 %v20989_v62  ;;  %v20996_v13 = vld [vmem:[#allocation111_spill] sm:$0xff]  ;;  %v3116_v36 = vadd.f32 %v3115_v5, %v2883_v22 }
 0x2c2   :  { %4859 = vmatprep.mubr.f32.mxu1 %v20373_v28  ;;  %5005 = vmatprep.subr.mxu1 %v20787_v18  ;;  %v2885_v47 = vpop.f32.mrf.mxu0 }
 0x2c3   :  { %4578 = vmatpush1.msra.mxu0 %v20990_v32  ;;  %4623 = vmatprep.mubr.f32.mxu0 %v20373_v28  ;;  %v3118_v37 = vadd.f32 %v3117_v6, %v2885_v47 }
 0x2c4   :  { %4580 = vmatprep.subr.mxu0 %v20991_v43 }
 0x2c5   :  { %4582 = vmatpush1.msra.mxu0 %v20992_v4 }
 0x2c6   :  { %4584 = vmatprep.subr.mxu0 %v20993_v0 }
 0x2c7   :  { %4586 = vmatpush1.msra.mxu0 %v20994_v55 }
 0x2c8   :  { %4588 = vmatprep.subr.mxu0 %v20995_v58 }
 0x2c9   :  { %4590 = vmatpush1.msra.mxu0 %v20996_v13 }
 0x2ca   :  { %4869 = vmatprep.subr.mxu0 %v20997_v27 }
 0x2d8   :  { %v3358_v60 = vpop.f32.mrf.mxu1 }
 0x2da   :  { %v3360_v42 = vpop.f32.mrf.mxu1 }
 0x2e1   :  { %v3252_v11 = vpop.f32.mrf.mxu0 }
 0x2e2   :  { %v3253_v48 = vadd.f32 %v3252_v11, %v3116_v36 }
 0x2e3   :  { %v3254_v61 = vpop.f32.mrf.mxu0 }
 0x2e4   :  { %v3255_v2 = vadd.f32 %v3254_v61, %v3118_v37  ;;  %v3359_v14 = vadd.f32 %v3358_v60, %v3253_v48  ;;  %v20998_v37 = vld [vmem:[#allocation13_spill] sm:$0xff]  ;;  %v20999_v60 = vld [vmem:[#allocation15_spill] sm:$0xff] }
 0x2e6   :  { %v3361_v40 = vadd.f32 %v3360_v42, %v3255_v2 }
 0x2fa   :  { %v3630_v50 = vpop.f32.mrf.mxu1 }
 0x2fc   :  { %v3632_v41 = vpop.f32.mrf.mxu1 }
 0x303   :  { %v3526_v54 = vpop.f32.mrf.mxu0 }
 0x304   :  { %v3527_v27 = vadd.f32 %v3526_v54, %v3359_v14 }
 0x305   :  { %v3528_v35 = vpop.f32.mrf.mxu0 }
 0x306   :  { %v3529_v34 = vadd.f32 %v3528_v35, %v3361_v40  ;;  %v3631_v59 = vadd.f32 %v3630_v50, %v3527_v27  ;;  %v21000_v27 = vld [vmem:[#allocation16_spill] sm:$0xff] }
 0x308   :  { %v3633_v8 = vadd.f32 %v3632_v41, %v3529_v34  ;;  %v4494_v47 = vrot.slane %v3631_v59, 7 }
 0x30a   :  { %v4495_v6 = vrot.slane %v3633_v8, 7  ;;  %v4502_v48 = vadd.f32 %v4494_v47, %v20999_v60  ;;  %v21110_v60 = vld [vmem:[#allocation263_spill] sm:$0xff] }
 0x30c   :  { %v4503_v36 = vadd.f32 %v4495_v6, %v20998_v37  ;;  %v21112_v37 = vld [vmem:[#allocation264_spill] sm:$0xff] }
 0x30e   :  { %15062 = vtanh.f32 %v4503_v36 }
 0x30f   :  { %15064 = vtanh.f32 %v4502_v48  ;;  %v21002_v48 = vld [vmem:[#allocation19_spill] sm:$0xff] }
 0x31b   :  { %v15063_v6 = vpop.eup %15062 }
 0x31c   :  { %v3970_v29 = vpop.f32.mrf.mxu1  ;;  %v15065_v47 = vpop.eup %15064 }
 0x31e   :  { %v3972_v22 = vpop.f32.mrf.mxu1 }
 0x325   :  { %v3738_v56 = vpop.f32.mrf.mxu0 }
 0x326   :  { %v3971_v24 = vadd.f32 %v3970_v29, %v3738_v56 }
 0x327   :  { %v3740_v30 = vpop.f32.mrf.mxu0 }
 0x328   :  { %v3973_v5 = vadd.f32 %v3972_v22, %v3740_v30  ;;  %v4512_v22 = vmul.f32 0.5, %v15063_v6 }
 0x33e   :  { %v4213_v42 = vpop.f32.mrf.mxu1 }
 0x340   :  { %v4215_v40 = vpop.f32.mrf.mxu1 }
 0x347   :  { %v4107_v10 = vpop.f32.mrf.mxu0 }
 0x348   :  { %v4108_v2 = vadd.f32 %v4107_v10, %v3971_v24 }
 0x349   :  { %v4109_v61 = vpop.f32.mrf.mxu0 }
 0x34a   :  { %v4110_v35 = vadd.f32 %v4109_v61, %v3973_v5  ;;  %v4214_v54 = vadd.f32 %v4213_v42, %v4108_v2  ;;  %v21001_v61 = vld [vmem:[#allocation17_spill] sm:$0xff]  ;;  %v4510_v5 = vmul.f32 0.5, %v15065_v47  ;;  %v4513_v2 = vadd.f32 0.5, %v4512_v22  ;;  %v21004_v47 = vld [vmem:[#allocation18_spill] sm:$0xff] }
 0x34b   :  { %v21005_v22 = vld [vmem:[#allocation21_spill] sm:$0xff] }
 0x34c   :  { %v4216_v34 = vadd.f32 %v4215_v40, %v4110_v35  ;;  %v4511_v42 = vadd.f32 0.5, %v4510_v5  ;;  %v4517_v35 = vrot.slane %v21002_v48, 7  ;;  %v21007_v5 = vld [vmem:[#allocation25_spill] sm:$0xff]  ;;  %v21010_v48 = vld [vmem:[#allocation34_spill] sm:$0xff] }
 0x34e   :  { %v4519_v40 = vmul.f32 %v4517_v35, %v4513_v2  ;;  %v21008_v2 = vld [vmem:[#allocation28_spill] sm:$0xff]  ;;  %v21011_v35 = vld [vmem:[#allocation37_spill] sm:$0xff] }
 0x360   :  { %v4485_v8 = vpop.f32.mrf.mxu1 }
 0x362   :  { %v4487_v11 = vpop.f32.mrf.mxu1 }
 0x368   :  { %v4381_v14 = vpop.f32.mrf.mxu0 }
 0x369   :  { %v4382_v50 = vadd.f32 %v4381_v14, %v4214_v54 }
 0x36a   :  { %v4383_v41 = vpop.f32.mrf.mxu0 }
 0x36b   :  { %v4486_v56 = vadd.f32 %v4485_v8, %v4382_v50  ;;  %v4384_v29 = vadd.f32 %v4383_v41, %v4216_v34 }
 0x36d   :  { %v4496_v59 = vrot.slane %v4486_v56, 7  ;;  %v4488_v24 = vadd.f32 %v4487_v11, %v4384_v29 }
 0x36f   :  { %v4504_v30 = vadd.f32 %v4496_v59, %v21000_v27  ;;  %v4497_v10 = vrot.slane %v4488_v24, 7  ;;  %v21108_v27 = vld [vmem:[#allocation262_spill] sm:$0xff] }
 0x371   :  { %15066 = vtanh.f32 %v4504_v30  ;;  %v4505_v36 = vadd.f32 %v4497_v10, %v21001_v61  ;;  %v21106_v61 = vld [vmem:[#allocation261_spill] sm:$0xff] }
 0x373   :  { %15068 = vtanh.f32 %v4505_v36  ;;  %v21006_v36 = vld [vmem:[#allocation23_spill] sm:$0xff] }
 0x37e   :  { %v15067_v54 = vpop.eup %15066 }
 0x37f   :  { %v4520_v14 = vmul.f32 %v15067_v54, %v4511_v42  ;;  %v21009_v42 = vld [vmem:[#allocation31_spill] sm:$0xff]  ;;  %v21012_v54 = vld [vmem:[#allocation40_spill] sm:$0xff] }
 0x380   :  { %v15069_v34 = vpop.eup %15068 }
 0x381   :  { %v17043_v50 = vadd.f32 %v4520_v14, %v4519_v40  ;;  %v4514_v8 = vmul.f32 0.5, %v15069_v34  ;;  %v21013_v40 = vld [vmem:[#allocation44_spill] sm:$0xff]  ;;  %v21014_v14 = vld [vmem:[#allocation46_spill] sm:$0xff]  ;;  %v21015_v34 = vld [vmem:[#allocation49_spill] sm:$0xff] }
 0x383   :  { %21003 = vst [vmem:[#allocation22_spill] sm:$0xff] %v17043_v50  ;;  %15070 = vtanh.f32 %v17043_v50  ;;  %v4515_v41 = vadd.f32 0.5, %v4514_v8  ;;  %v21016_v8 = vld [vmem:[#allocation53_spill] sm:$0xff]  ;;  %v21104_v50 = vld [vmem:[#allocation260_spill] sm:$0xff] }
 0x390   :  { %v15071_v56 = vpop.eup %15070 }
 0x391   :  { %v4523_v29 = vmul.f32 %v15071_v56, %v4515_v41  ;;  %v21017_v41 = vld [vmem:[#allocation59_spill] sm:$0xff]  ;;  %v21018_v56 = vld [vmem:[#allocation62_spill] sm:$0xff] }
 0x393   :  { %v4525_v59 = vrot.slane %v4523_v29, 1  ;;  %v21019_v29 = vld [vmem:[#allocation67_spill] sm:$0xff] }
 0x395   :  { %v17046_v11 = vand.u32 4294901760, %v4525_v59 }
 0x397   :  { %v17049_v30 = vsub.f32 %v4525_v59, %v17046_v11  ;;  %4861 = vmatmul.mubr.f32.vlgmr.msra.gmra.mxu1 %v17046_v11  ;;  %v21020_v59 = vld [vmem:[#allocation76_spill] sm:$0xff] }
 0x398   :  { %5007 = vmatpush1.msra.mxu1 %v20675_v15  ;;  %5100 = vmatprep.mubr.f32.mxu1 %v20373_v28 }
 0x399   :  { %5009 = vmatprep.subr.mxu1 %v20677_v46  ;;  %v17056_v24 = vand.u32 4294901760, %v17049_v30 }
 0x39a   :  { %5011 = vmatpush1.msra.mxu1 %v20679_v51 }
 0x39b   :  { %5013 = vmatprep.subr.mxu1 %v20681_v38  ;;  %v4627_v10 = vsub.f32 %v17049_v30, %v17056_v24 }
 0x39c   :  { %5015 = vmatpush1.msra.mxu1 %v20683_v17 }
 0x39d   :  { %5017 = vmatprep.subr.mxu1 %v20685_v12  ;;  %v17064_v6 = vand.u32 4294901760, %v4627_v10  ;;  %v21021_v10 = vld [vmem:[#allocation80_spill] sm:$0xff] }
 0x39e   :  { %5019 = vmatpush1.msra.mxu1 %v20687_v20 }
 0x39f   :  { %5021 = vmatprep.subr.mxu1 %v20689_v16  ;;  %4629 = vmatmul.mubr.f32.vlgmr.msra.gmra.mxu0 %v17064_v6 }
 0x3a0   :  { %4872 = vmatpush1.msra.mxu0 %v21004_v47  ;;  %5023 = vmatpush1.msra.mxu1 %v20691_v25  ;;  %v21102_v47 = vld [vmem:[#allocation258_spill] sm:$0xff] }
 0x3a1   :  { %4875 = vmatprep.subr.mxu0 %v21005_v22  ;;  %5025 = vmatprep.subr.mxu1 %v20693_v19  ;;  %v21100_v22 = vld [vmem:[#allocation256_spill] sm:$0xff] }
 0x3a2   :  { %4878 = vmatpush1.msra.mxu0 %v21006_v36  ;;  %5027 = vmatpush1.msra.mxu1 %v20745_v57  ;;  %v21098_v36 = vld [vmem:[#allocation254_spill] sm:$0xff] }
 0x3a3   :  { %4881 = vmatprep.subr.mxu0 %v21007_v5  ;;  %5029 = vmatprep.subr.mxu1 %v20747_v45  ;;  %v21096_v5 = vld [vmem:[#allocation252_spill] sm:$0xff] }
 0x3a4   :  { %4884 = vmatpush1.msra.mxu0 %v21008_v2  ;;  %5031 = vmatpush1.msra.mxu1 %v20749_v21  ;;  %v21094_v2 = vld [vmem:[#allocation249_spill] sm:$0xff] }
 0x3a5   :  { %4887 = vmatprep.subr.mxu0 %v21009_v42  ;;  %5033 = vmatprep.subr.mxu1 %v20751_v33  ;;  %v21092_v42 = vld [vmem:[#allocation246_spill] sm:$0xff] }
 0x3a6   :  { %4890 = vmatpush1.msra.mxu0 %v21010_v48  ;;  %5035 = vmatpush1.msra.mxu1 %v20753_v1  ;;  %v21090_v48 = vld [vmem:[#allocation243_spill] sm:$0xff] }
 0x3a7   :  { %4893 = vmatprep.subr.mxu0 %v21011_v35  ;;  %5037 = vmatprep.subr.mxu1 %v20755_v9  ;;  %v21070_v35 = vld [vmem:[#allocation191_spill] sm:$0xff] }
 0x3a8   :  { %4896 = vmatpush1.msra.mxu0 %v21012_v54  ;;  %5039 = vmatpush1.msra.mxu1 %v20757_v53  ;;  %v21068_v54 = vld [vmem:[#allocation188_spill] sm:$0xff] }
 0x3a9   :  { %4899 = vmatprep.subr.mxu0 %v21013_v40  ;;  %5041 = vmatprep.subr.mxu1 %v20759_v7  ;;  %v21067_v40 = vld [vmem:[#allocation125_spill] sm:$0xff] }
 0x3aa   :  { %4902 = vmatpush1.msra.mxu0 %v21014_v14  ;;  %5043 = vmatpush1.msra.mxu1 %v20761_v44  ;;  %v21065_v14 = vld [vmem:[#allocation122_spill] sm:$0xff] }
 0x3ab   :  { %4905 = vmatprep.subr.mxu0 %v21015_v34  ;;  %5045 = vmatprep.subr.mxu1 %v20763_v3  ;;  %v21063_v34 = vld [vmem:[#allocation119_spill] sm:$0xff] }
 0x3ac   :  { %4908 = vmatpush1.msra.mxu0 %v21016_v8  ;;  %5047 = vmatpush1.msra.mxu1 %v20765_v52  ;;  %v21022_v8 = vld [vmem:[#allocation83_spill] sm:$0xff] }
 0x3ad   :  { %4911 = vmatprep.subr.mxu0 %v21017_v41  ;;  %5049 = vmatprep.subr.mxu1 %v20985_v23  ;;  %v21023_v41 = vld [vmem:[#allocation86_spill] sm:$0xff] }
 0x3ae   :  { %4914 = vmatpush1.msra.mxu0 %v21018_v56  ;;  %5051 = vmatpush1.msra.mxu1 %v20987_v49  ;;  %v21024_v56 = vld [vmem:[#allocation90_spill] sm:$0xff] }
 0x3af   :  { %4917 = vmatprep.subr.mxu0 %v21019_v29  ;;  %5053 = vmatprep.subr.mxu1 %v20989_v62  ;;  %v21025_v29 = vld [vmem:[#allocation93_spill] sm:$0xff] }
 0x3b0   :  { %4920 = vmatpush1.msra.mxu0 %v21020_v59  ;;  %5055 = vmatpush1.msra.mxu1 %v20990_v32  ;;  %v21026_v59 = vld [vmem:[#allocation97_spill] sm:$0xff] }
 0x3b1   :  { %4923 = vmatprep.subr.mxu0 %v21021_v10  ;;  %5057 = vmatprep.subr.mxu1 %v20991_v43  ;;  %v21027_v10 = vld [vmem:[#allocation101_spill] sm:$0xff] }
 0x3b2   :  { %4926 = vmatpush1.msra.mxu0 %v21022_v8  ;;  %5059 = vmatpush1.msra.mxu1 %v20992_v4  ;;  %v21033_v8 = vld [vmem:[#allocation120_spill] sm:$0xff] }
 0x3b3   :  { %4929 = vmatprep.subr.mxu0 %v21023_v41  ;;  %5061 = vmatprep.subr.mxu1 %v20993_v0  ;;  %v21028_v41 = vld [vmem:[#allocation104_spill] sm:$0xff] }
 0x3b4   :  { %4932 = vmatpush1.msra.mxu0 %v21024_v56  ;;  %5063 = vmatpush1.msra.mxu1 %v20994_v55  ;;  %v21029_v56 = vld [vmem:[#allocation107_spill] sm:$0xff] }
 0x3b5   :  { %4935 = vmatprep.subr.mxu0 %v21025_v29  ;;  %5065 = vmatprep.subr.mxu1 %v20995_v58  ;;  %v21030_v29 = vld [vmem:[#allocation110_spill] sm:$0xff] }
 0x3b6   :  { %4938 = vmatpush1.msra.mxu0 %v21026_v59  ;;  %5067 = vmatpush1.msra.mxu1 %v20996_v13  ;;  %v21031_v59 = vld [vmem:[#allocation114_spill] sm:$0xff] }
 0x3b7   :  { %4941 = vmatprep.subr.mxu0 %v21027_v10  ;;  %5104 = vmatmul.mubr.f32.vlgmr.msra.gmra.mxu1 %v17056_v24  ;;  %v21032_v10 = vld [vmem:[#allocation117_spill] sm:$0xff] }
 0x3b8   :  { %5279 = vmatprep.subr.mxu1 %v20787_v18  ;;  %4944 = vmatpush1.msra.mxu0 %v21028_v41  ;;  %v21034_v41 = vld [vmem:[#allocation123_spill] sm:$0xff] }
 0x3b9   :  { %5281 = vmatpush1.msra.mxu1 %v20675_v15  ;;  %4947 = vmatprep.subr.mxu0 %v21029_v56  ;;  %v21040_v56 = vld [vmem:[#allocation39_spill] sm:$0xff] }
 0x3ba   :  { %5283 = vmatprep.subr.mxu1 %v20677_v46  ;;  %4950 = vmatpush1.msra.mxu0 %v21030_v29  ;;  %v21035_v29 = vld [vmem:[#allocation20_spill] sm:$0xff] }
 0x3bb   :  { %5285 = vmatpush1.msra.mxu1 %v20679_v51  ;;  %4953 = vmatprep.subr.mxu0 %v21031_v59  ;;  %v21036_v59 = vld [vmem:[#allocation27_spill] sm:$0xff] }
 0x3bc   :  { %5287 = vmatprep.subr.mxu1 %v20681_v38  ;;  %4956 = vmatpush1.msra.mxu0 %v21032_v10  ;;  %v21037_v10 = vld [vmem:[#allocation30_spill] sm:$0xff] }
 0x3bd   :  { %5289 = vmatpush1.msra.mxu1 %v20683_v17  ;;  %4959 = vmatprep.subr.mxu0 %v21033_v8  ;;  %v21038_v8 = vld [vmem:[#allocation33_spill] sm:$0xff] }
 0x3be   :  { %5291 = vmatprep.subr.mxu1 %v20685_v12  ;;  %4962 = vmatpush1.msra.mxu0 %v21034_v41  ;;  %v21039_v41 = vld [vmem:[#allocation36_spill] sm:$0xff] }
 0x3bf   :  { %4995 = vmatprep.mubr.f32.mxu0 %v20373_v28  ;;  %5293 = vmatpush1.msra.mxu1 %v20687_v20 }
 0x3c0   :  { %4998 = vmatmul.mubr.f32.vlgmr.msra.gmra.mxu0 %v17049_v30  ;;  %5113 = vmatprep.subr.mxu0 %v21035_v29  ;;  %v21041_v29 = vld [vmem:[#allocation43_spill] sm:$0xff] }
 0x3c1   :  { %5295 = vmatprep.subr.mxu1 %v20689_v16  ;;  %5117 = vmatpush1.msra.mxu0 %v21036_v59  ;;  %v21042_v59 = vld [vmem:[#allocation45_spill] sm:$0xff] }
 0x3c2   :  { %5297 = vmatpush1.msra.mxu1 %v20691_v25  ;;  %5121 = vmatprep.subr.mxu0 %v21037_v10  ;;  %v21043_v10 = vld [vmem:[#allocation48_spill] sm:$0xff] }
 0x3c3   :  { %5299 = vmatprep.subr.mxu1 %v20693_v19  ;;  %5125 = vmatpush1.msra.mxu0 %v21038_v8  ;;  %v21044_v8 = vld [vmem:[#allocation52_spill] sm:$0xff] }
 0x3c4   :  { %5301 = vmatpush1.msra.mxu1 %v20745_v57  ;;  %5129 = vmatprep.subr.mxu0 %v21039_v41  ;;  %v21045_v41 = vld [vmem:[#allocation55_spill] sm:$0xff] }
 0x3c5   :  { %5303 = vmatprep.subr.mxu1 %v20747_v45  ;;  %5133 = vmatpush1.msra.mxu0 %v21040_v56  ;;  %v21046_v56 = vld [vmem:[#allocation58_spill] sm:$0xff] }
 0x3c6   :  { %5305 = vmatpush1.msra.mxu1 %v20749_v21  ;;  %5137 = vmatprep.subr.mxu0 %v21041_v29  ;;  %v21047_v29 = vld [vmem:[#allocation61_spill] sm:$0xff] }
 0x3c7   :  { %5307 = vmatprep.subr.mxu1 %v20751_v33  ;;  %5141 = vmatpush1.msra.mxu0 %v21042_v59  ;;  %v21048_v59 = vld [vmem:[#allocation64_spill] sm:$0xff] }
 0x3c8   :  { %5309 = vmatpush1.msra.mxu1 %v20753_v1  ;;  %5145 = vmatprep.subr.mxu0 %v21043_v10  ;;  %v21049_v10 = vld [vmem:[#allocation70_spill] sm:$0xff] }
 0x3c9   :  { %5311 = vmatprep.subr.mxu1 %v20755_v9  ;;  %5149 = vmatpush1.msra.mxu0 %v21044_v8  ;;  %v21050_v8 = vld [vmem:[#allocation73_spill] sm:$0xff] }
 0x3ca   :  { %5313 = vmatpush1.msra.mxu1 %v20757_v53  ;;  %5153 = vmatprep.subr.mxu0 %v21045_v41  ;;  %v21051_v41 = vld [vmem:[#allocation79_spill] sm:$0xff] }
 0x3cb   :  { %5315 = vmatprep.subr.mxu1 %v20759_v7  ;;  %5157 = vmatpush1.msra.mxu0 %v21046_v56  ;;  %v21052_v56 = vld [vmem:[#allocation89_spill] sm:$0xff] }
 0x3cc   :  { %5317 = vmatpush1.msra.mxu1 %v20761_v44  ;;  %5161 = vmatprep.subr.mxu0 %v21047_v29  ;;  %v21053_v29 = vld [vmem:[#allocation92_spill] sm:$0xff] }
 0x3cd   :  { %5319 = vmatprep.subr.mxu1 %v20763_v3  ;;  %5165 = vmatpush1.msra.mxu0 %v21048_v59  ;;  %v21054_v59 = vld [vmem:[#allocation96_spill] sm:$0xff] }
 0x3ce   :  { %5321 = vmatpush1.msra.mxu1 %v20765_v52  ;;  %5169 = vmatprep.subr.mxu0 %v21049_v10  ;;  %v21055_v10 = vld [vmem:[#allocation100_spill] sm:$0xff] }
 0x3cf   :  { %5323 = vmatprep.subr.mxu1 %v20985_v23  ;;  %5173 = vmatpush1.msra.mxu0 %v21050_v8  ;;  %v21056_v8 = vld [vmem:[#allocation103_spill] sm:$0xff]  ;;  %v21131_v23 = vld [vmem:[#allocation153_spill] sm:$0xff] }
 0x3d0   :  { %5325 = vmatpush1.msra.mxu1 %v20987_v49  ;;  %5177 = vmatprep.subr.mxu0 %v21051_v41  ;;  %v21057_v41 = vld [vmem:[#allocation106_spill] sm:$0xff]  ;;  %v21130_v49 = vld [vmem:[#allocation151_spill] sm:$0xff] }
 0x3d1   :  { %5327 = vmatprep.subr.mxu1 %v20989_v62  ;;  %5181 = vmatpush1.msra.mxu0 %v21052_v56  ;;  %v21058_v56 = vld [vmem:[#allocation109_spill] sm:$0xff] }
 0x3d2   :  { %5329 = vmatpush1.msra.mxu1 %v20990_v32  ;;  %5185 = vmatprep.subr.mxu0 %v21053_v29  ;;  %v21061_v29 = vld [vmem:[#allocation116_spill] sm:$0xff]  ;;  %v21128_v32 = vld [vmem:[#allocation146_spill] sm:$0xff]  ;;  %v21129_v62 = vld [vmem:[#allocation149_spill] sm:$0xff] }
 0x3d3   :  { %5331 = vmatprep.subr.mxu1 %v20991_v43  ;;  %5189 = vmatpush1.msra.mxu0 %v21054_v59  ;;  %v21059_v59 = vld [vmem:[#allocation113_spill] sm:$0xff]  ;;  %v21127_v43 = vld [vmem:[#allocation142_spill] sm:$0xff] }
 0x3d4   :  { %5333 = vmatpush1.msra.mxu1 %v20992_v4  ;;  %5193 = vmatprep.subr.mxu0 %v21055_v10  ;;  %v21060_v10 = vld [vmem:[#allocation170_spill] sm:$0xff]  ;;  %v21126_v4 = vld [vmem:[#allocation239_spill] sm:$0xff] }
 0x3d5   :  { %5335 = vmatprep.subr.mxu1 %v20993_v0  ;;  %5197 = vmatpush1.msra.mxu0 %v21056_v8  ;;  %v21062_v8 = vld [vmem:[#allocation179_spill] sm:$0xff]  ;;  %v21125_v0 = vld [vmem:[#allocation236_spill] sm:$0xff] }
 0x3d6   :  { %5337 = vmatpush1.msra.mxu1 %v20994_v55  ;;  %5201 = vmatprep.subr.mxu0 %v21057_v41  ;;  %v21064_v41 = vld [vmem:[#allocation182_spill] sm:$0xff]  ;;  %v21118_v55 = vld [vmem:[#allocation267_spill] sm:$0xff] }
 0x3d7   :  { %5339 = vmatprep.subr.mxu1 %v20995_v58  ;;  %5205 = vmatpush1.msra.mxu0 %v21058_v56  ;;  %v21066_v56 = vld [vmem:[#allocation185_spill] sm:$0xff]  ;;  %v21116_v58 = vld [vmem:[#allocation266_spill] sm:$0xff] }
 0x3d8   :  { %5341 = vmatpush1.msra.mxu1 %v20996_v13  ;;  %5374 = vmatprep.mubr.f32.mxu1 %v20373_v28  ;;  %v21114_v13 = vld [vmem:[#allocation265_spill] sm:$0xff] }
 0x3d9   :  { %5209 = vmatprep.subr.mxu0 %v21059_v59  ;;  %5376 = vmatmul.mubr.f32.vlgmr.msra.gmra.mxu1 %v17046_v11  ;;  %v21069_v59 = vld [vmem:[#allocation127_spill] sm:$0xff] }
 0x3da   :  { %5495 = vmatprep.subr.mxu1 %v21060_v10  ;;  %5213 = vmatpush1.msra.mxu0 %v21061_v29  ;;  %v21071_v10 = vld [vmem:[#allocation129_spill] sm:$0xff]  ;;  %v21072_v29 = vld [vmem:[#allocation194_spill] sm:$0xff] }
 0x3db   :  { %5501 = vmatpush1.msra.mxu1 %v21062_v8  ;;  %5217 = vmatprep.subr.mxu0 %v21063_v34  ;;  %v21073_v8 = vld [vmem:[#allocation131_spill] sm:$0xff]  ;;  %v21088_v34 = vld [vmem:[#allocation240_spill] sm:$0xff] }
 0x3dc   :  { %5507 = vmatprep.subr.mxu1 %v21064_v41  ;;  %5221 = vmatpush1.msra.mxu0 %v21065_v14  ;;  %v21074_v41 = vld [vmem:[#allocation197_spill] sm:$0xff]  ;;  %v21086_v14 = vld [vmem:[#allocation227_spill] sm:$0xff] }
 0x3dd   :  { %5513 = vmatpush1.msra.mxu1 %v21066_v56  ;;  %5225 = vmatprep.subr.mxu0 %v21067_v40  ;;  %v21075_v40 = vld [vmem:[#allocation200_spill] sm:$0xff]  ;;  %v21084_v56 = vld [vmem:[#allocation223_spill] sm:$0xff] }
 0x3de   :  { %5519 = vmatprep.subr.mxu1 %v21068_v54  ;;  %5229 = vmatpush1.msra.mxu0 %v21069_v59  ;;  %v21076_v59 = vld [vmem:[#allocation203_spill] sm:$0xff]  ;;  %v21082_v54 = vld [vmem:[#allocation216_spill] sm:$0xff] }
 0x3df   :  { %5525 = vmatpush1.msra.mxu1 %v21070_v35  ;;  %5233 = vmatprep.subr.mxu0 %v21071_v10  ;;  %v21077_v10 = vld [vmem:[#allocation206_spill] sm:$0xff]  ;;  %v21081_v35 = vld [vmem:[#allocation147_spill] sm:$0xff] }
 0x3e0   :  { %5531 = vmatprep.subr.mxu1 %v21072_v29  ;;  %5237 = vmatpush1.msra.mxu0 %v21073_v8  ;;  %v21078_v8 = vld [vmem:[#allocation210_spill] sm:$0xff]  ;;  %v21079_v29 = vld [vmem:[#allocation145_spill] sm:$0xff] }
 0x3e1   :  { %5270 = vmatprep.mubr.f32.mxu0 %v20373_v28  ;;  %5537 = vmatpush1.msra.mxu1 %v21074_v41  ;;  %v21080_v41 = vld [vmem:[#allocation213_spill] sm:$0xff] }
 0x3e2   :  { %5272 = vmatmul.mubr.f32.vlgmr.msra.gmra.mxu0 %v17046_v11  ;;  %5383 = vmatprep.subr.mxu0 %v20835_v31 }
 0x3e3   :  { %5543 = vmatprep.subr.mxu1 %v21075_v40  ;;  %5385 = vmatpush1.msra.mxu0 %v20837_v26  ;;  %v21083_v40 = vld [vmem:[#allocation150_spill] sm:$0xff] }
 0x3e4   :  { %5549 = vmatpush1.msra.mxu1 %v21076_v59  ;;  %5387 = vmatprep.subr.mxu0 %v20839_v39  ;;  %v21085_v59 = vld [vmem:[#allocation152_spill] sm:$0xff] }
 0x3e5   :  { %5555 = vmatprep.subr.mxu1 %v21077_v10  ;;  %5389 = vmatpush1.msra.mxu0 %v20841_v63  ;;  %v21087_v10 = vld [vmem:[#allocation154_spill] sm:$0xff] }
 0x3e6   :  { %5561 = vmatpush1.msra.mxu1 %v21078_v8  ;;  %5391 = vmatprep.subr.mxu0 %v21079_v29  ;;  %v21089_v8 = vld [vmem:[#allocation157_spill] sm:$0xff] }
 0x3e7   :  { %5567 = vmatprep.subr.mxu1 %v21080_v41  ;;  %5393 = vmatpush1.msra.mxu0 %v21081_v35  ;;  %v21091_v41 = vld [vmem:[#allocation160_spill] sm:$0xff] }
 0x3e8   :  { %5573 = vmatpush1.msra.mxu1 %v21082_v54  ;;  %5395 = vmatprep.subr.mxu0 %v21083_v40  ;;  %v21093_v54 = vld [vmem:[#allocation163_spill] sm:$0xff] }
 0x3e9   :  { %5579 = vmatprep.subr.mxu1 %v21084_v56  ;;  %5397 = vmatpush1.msra.mxu0 %v21085_v59  ;;  %v21095_v56 = vld [vmem:[#allocation166_spill] sm:$0xff] }
 0x3ea   :  { %5585 = vmatpush1.msra.mxu1 %v21086_v14  ;;  %5399 = vmatprep.subr.mxu0 %v21087_v10  ;;  %v21097_v14 = vld [vmem:[#allocation169_spill] sm:$0xff] }
 0x3eb   :  { %5591 = vmatprep.subr.mxu1 %v21088_v34  ;;  %5401 = vmatpush1.msra.mxu0 %v21089_v8  ;;  %v21099_v34 = vld [vmem:[#allocation175_spill] sm:$0xff] }
 0x3ec   :  { %5597 = vmatpush1.msra.mxu1 %v21090_v48  ;;  %5403 = vmatprep.subr.mxu0 %v21091_v41  ;;  %v21101_v48 = vld [vmem:[#allocation178_spill] sm:$0xff] }
 0x3ed   :  { %5603 = vmatprep.subr.mxu1 %v21092_v42  ;;  %5405 = vmatpush1.msra.mxu0 %v21093_v54  ;;  %v21103_v42 = vld [vmem:[#allocation184_spill] sm:$0xff] }
 0x3ee   :  { %5609 = vmatpush1.msra.mxu1 %v21094_v2  ;;  %5407 = vmatprep.subr.mxu0 %v21095_v56  ;;  %v21105_v2 = vld [vmem:[#allocation193_spill] sm:$0xff] }
 0x3ef   :  { %5615 = vmatprep.subr.mxu1 %v21096_v5  ;;  %5409 = vmatpush1.msra.mxu0 %v21097_v14  ;;  %v21107_v5 = vld [vmem:[#allocation196_spill] sm:$0xff] }
 0x3f0   :  { %5621 = vmatpush1.msra.mxu1 %v21098_v36  ;;  %5411 = vmatprep.subr.mxu0 %v21099_v34  ;;  %v21109_v36 = vld [vmem:[#allocation199_spill] sm:$0xff] }
 0x3f1   :  { %5627 = vmatprep.subr.mxu1 %v21100_v22  ;;  %5413 = vmatpush1.msra.mxu0 %v21101_v48  ;;  %v21111_v22 = vld [vmem:[#allocation202_spill] sm:$0xff] }
 0x3f2   :  { %5633 = vmatpush1.msra.mxu1 %v21102_v47  ;;  %5415 = vmatprep.subr.mxu0 %v21103_v42  ;;  %v21113_v47 = vld [vmem:[#allocation205_spill] sm:$0xff] }
 0x3f3   :  { %5639 = vmatprep.subr.mxu1 %v21104_v50  ;;  %5417 = vmatpush1.msra.mxu0 %v21105_v2  ;;  %v21115_v50 = vld [vmem:[#allocation209_spill] sm:$0xff] }
 0x3f4   :  { %5645 = vmatpush1.msra.mxu1 %v21106_v61  ;;  %5419 = vmatprep.subr.mxu0 %v21107_v5  ;;  %v21117_v61 = vld [vmem:[#allocation212_spill] sm:$0xff] }
 0x3f5   :  { %5651 = vmatprep.subr.mxu1 %v21108_v27  ;;  %5421 = vmatpush1.msra.mxu0 %v21109_v36  ;;  %v21119_v27 = vld [vmem:[#allocation215_spill] sm:$0xff] }
 0x3f6   :  { %5657 = vmatpush1.msra.mxu1 %v21110_v60  ;;  %5423 = vmatprep.subr.mxu0 %v21111_v22  ;;  %v21124_v60 = vld [vmem:[#allocation233_spill] sm:$0xff] }
 0x3f7   :  { %5663 = vmatprep.subr.mxu1 %v21112_v37  ;;  %5425 = vmatpush1.msra.mxu0 %v21113_v47  ;;  %v21120_v37 = vld [vmem:[#allocation219_spill] sm:$0xff] }
 0x3f8   :  { %5669 = vmatpush1.msra.mxu1 %v21114_v13  ;;  %5427 = vmatprep.subr.mxu0 %v21115_v50  ;;  %v21121_v13 = vld [vmem:[#allocation222_spill] sm:$0xff] }
 0x3f9   :  { %5675 = vmatprep.subr.mxu1 %v21116_v58  ;;  %5429 = vmatpush1.msra.mxu0 %v21117_v61  ;;  %v21122_v58 = vld [vmem:[#allocation226_spill] sm:$0xff] }
 0x3fa   :  { %5681 = vmatpush1.msra.mxu1 %v21118_v55  ;;  %5714 = vmatprep.mubr.f32.mxu1 %v20373_v28  ;;  %v21123_v55 = vld [vmem:[#allocation230_spill] sm:$0xff] }
 0x3fb   :  { %5431 = vmatprep.subr.mxu0 %v21119_v27  ;;  %5716 = vmatmul.mubr.f32.vlgmr.msra.gmra.mxu1 %v17046_v11 }
 0x3fc   :  { %5860 = vmatprep.subr.mxu1 %v20835_v31  ;;  %5433 = vmatpush1.msra.mxu0 %v21120_v37 }
 0x3fd   :  { %5862 = vmatpush1.msra.mxu1 %v20837_v26  ;;  %5435 = vmatprep.subr.mxu0 %v21121_v13 }
 0x3fe   :  { %5864 = vmatprep.subr.mxu1 %v20839_v39  ;;  %5437 = vmatpush1.msra.mxu0 %v21122_v58 }
 0x3ff   :  { %5866 = vmatpush1.msra.mxu1 %v20841_v63  ;;  %5439 = vmatprep.subr.mxu0 %v21123_v55 }
 0x400   :  { %5868 = vmatprep.subr.mxu1 %v21079_v29  ;;  %5441 = vmatpush1.msra.mxu0 %v21124_v60 }
 0x401   :  { %5870 = vmatpush1.msra.mxu1 %v21081_v35  ;;  %5443 = vmatprep.subr.mxu0 %v21125_v0 }
 0x402   :  { %5872 = vmatprep.subr.mxu1 %v21083_v40  ;;  %5445 = vmatpush1.msra.mxu0 %v21126_v4 }
 0x403   :  { %5478 = vmatprep.mubr.f32.mxu0 %v20373_v28  ;;  %5874 = vmatpush1.msra.mxu1 %v21085_v59 }
 0x404   :  { %5484 = vmatmul.mubr.f32.vlgmr.msra.gmra.mxu0 %v17064_v6  ;;  %5724 = vmatprep.subr.mxu0 %v21127_v43  ;;  %v21132_v6 = vld [vmem:[#allocation156_spill] sm:$0xff]  ;;  %v21133_v43 = vld [vmem:[#allocation159_spill] sm:$0xff] }
 0x405   :  { %5876 = vmatprep.subr.mxu1 %v21087_v10  ;;  %5727 = vmatpush1.msra.mxu0 %v21128_v32  ;;  %v21134_v32 = vld [vmem:[#allocation162_spill] sm:$0xff] }
 0x406   :  { %5878 = vmatpush1.msra.mxu1 %v21089_v8  ;;  %5730 = vmatprep.subr.mxu0 %v21129_v62  ;;  %v21135_v62 = vld [vmem:[#allocation165_spill] sm:$0xff] }
 0x407   :  { %5880 = vmatprep.subr.mxu1 %v21091_v41  ;;  %5733 = vmatpush1.msra.mxu0 %v21130_v49  ;;  %v21136_v49 = vld [vmem:[#allocation168_spill] sm:$0xff] }
 0x408   :  { %5882 = vmatpush1.msra.mxu1 %v21093_v54  ;;  %5736 = vmatprep.subr.mxu0 %v21131_v23  ;;  %v21137_v23 = vld [vmem:[#allocation172_spill] sm:$0xff] }
 0x409   :  { %5884 = vmatprep.subr.mxu1 %v21095_v56  ;;  %5739 = vmatpush1.msra.mxu0 %v21132_v6  ;;  %v21138_v6 = vld [vmem:[#allocation174_spill] sm:$0xff] }
 0x40a   :  { %5886 = vmatpush1.msra.mxu1 %v21097_v14  ;;  %5742 = vmatprep.subr.mxu0 %v21133_v43  ;;  %v21139_v43 = vld [vmem:[#allocation177_spill] sm:$0xff] }
 0x40b   :  { %5888 = vmatprep.subr.mxu1 %v21099_v34  ;;  %5745 = vmatpush1.msra.mxu0 %v21134_v32  ;;  %v21140_v32 = vld [vmem:[#allocation181_spill] sm:$0xff] }
 0x40c   :  { %5890 = vmatpush1.msra.mxu1 %v21101_v48  ;;  %5748 = vmatprep.subr.mxu0 %v21135_v62  ;;  %v21141_v62 = vld [vmem:[#allocation187_spill] sm:$0xff] }
 0x40d   :  { %5892 = vmatprep.subr.mxu1 %v21103_v42  ;;  %5751 = vmatpush1.msra.mxu0 %v21136_v49  ;;  %v21142_v49 = vld [vmem:[#allocation190_spill] sm:$0xff] }
 0x40e   :  { %5894 = vmatpush1.msra.mxu1 %v21105_v2  ;;  %5754 = vmatprep.subr.mxu0 %v21137_v23  ;;  %v21143_v23 = vld [vmem:[#allocation195_spill] sm:$0xff] }
 0x40f   :  { %5896 = vmatprep.subr.mxu1 %v21107_v5  ;;  %5757 = vmatpush1.msra.mxu0 %v21138_v6  ;;  %v21144_v6 = vld [vmem:[#allocation204_spill] sm:$0xff] }
 0x410   :  { %5898 = vmatpush1.msra.mxu1 %v21109_v36  ;;  %5760 = vmatprep.subr.mxu0 %v21139_v43  ;;  %v21145_v43 = vld [vmem:[#allocation208_spill] sm:$0xff] }
 0x411   :  { %5900 = vmatprep.subr.mxu1 %v21111_v22  ;;  %5763 = vmatpush1.msra.mxu0 %v21140_v32  ;;  %v21146_v32 = vld [vmem:[#allocation211_spill] sm:$0xff] }
 0x412   :  { %5902 = vmatpush1.msra.mxu1 %v21113_v47  ;;  %5766 = vmatprep.subr.mxu0 %v21141_v62  ;;  %v21147_v62 = vld [vmem:[#allocation214_spill] sm:$0xff] }
 0x413   :  { %5904 = vmatprep.subr.mxu1 %v21115_v50  ;;  %5769 = vmatpush1.msra.mxu0 %v21142_v49  ;;  %v21148_v49 = vld [vmem:[#allocation218_spill] sm:$0xff] }
 0x414   :  { %5906 = vmatpush1.msra.mxu1 %v21117_v61  ;;  %5772 = vmatprep.subr.mxu0 %v21143_v23  ;;  %v21149_v23 = vld [vmem:[#allocation221_spill] sm:$0xff] }
 0x415   :  { %5908 = vmatprep.subr.mxu1 %v21119_v27  ;;  %5775 = vmatpush1.msra.mxu0 %v21144_v6  ;;  %v21150_v6 = vld [vmem:[#allocation225_spill] sm:$0xff] }
 0x416   :  { %5910 = vmatpush1.msra.mxu1 %v21120_v37  ;;  %5778 = vmatprep.subr.mxu0 %v21145_v43  ;;  %v21190_v43 = vld [vmem:[#allocation54_spill] sm:$0xff] }
 0x417   :  { %5912 = vmatprep.subr.mxu1 %v21121_v13  ;;  %5781 = vmatpush1.msra.mxu0 %v21146_v32  ;;  %v21151_v32 = vld [vmem:[#allocation229_spill] sm:$0xff] }
 0x418   :  { %5914 = vmatpush1.msra.mxu1 %v21122_v58  ;;  %5784 = vmatprep.subr.mxu0 %v21147_v62  ;;  %v21152_v62 = vld [vmem:[#allocation232_spill] sm:$0xff] }
 0x419   :  { %5916 = vmatprep.subr.mxu1 %v21123_v55  ;;  %5787 = vmatpush1.msra.mxu0 %v21148_v49  ;;  %v21153_v49 = vld [vmem:[#allocation235_spill] sm:$0xff] }
 0x41a   :  { %5918 = vmatpush1.msra.mxu1 %v21124_v60  ;;  %5790 = vmatprep.subr.mxu0 %v21149_v23  ;;  %v21154_v23 = vld [vmem:[#allocation238_spill] sm:$0xff] }
 0x41b   :  { %5920 = vmatprep.subr.mxu1 %v21125_v0  ;;  %5793 = vmatpush1.msra.mxu0 %v21150_v6  ;;  %v21155_v6 = vld [vmem:[#allocation242_spill] sm:$0xff] }
 0x41c   :  { %5922 = vmatpush1.msra.mxu1 %v21126_v4  ;;  %5955 = vmatprep.mubr.f32.mxu1 %v20373_v28 }
 0x41d   :  { %5796 = vmatprep.subr.mxu0 %v21151_v32  ;;  %5959 = vmatmul.mubr.f32.vlgmr.msra.gmra.mxu1 %v17056_v24  ;;  %v21156_v32 = vld [vmem:[#allocation245_spill] sm:$0xff]  ;;  %v21157_v24 = vld [vmem:[#allocation248_spill] sm:$0xff] }
 0x41e   :  { %6134 = vmatprep.subr.mxu1 %v20835_v31  ;;  %5799 = vmatpush1.msra.mxu0 %v21152_v62  ;;  %v21158_v62 = vld [vmem:[#allocation251_spill] sm:$0xff] }
 0x41f   :  { %6136 = vmatpush1.msra.mxu1 %v20837_v26  ;;  %5802 = vmatprep.subr.mxu0 %v21153_v49  ;;  %v21188_v49 = vld [vmem:[#allocation51_spill] sm:$0xff] }
 0x420   :  { %6138 = vmatprep.subr.mxu1 %v20839_v39  ;;  %5805 = vmatpush1.msra.mxu0 %v21154_v23  ;;  %v21159_v23 = vld [vmem:[#allocation148_spill] sm:$0xff] }
 0x421   :  { %6140 = vmatpush1.msra.mxu1 %v20841_v63  ;;  %5808 = vmatprep.subr.mxu0 %v21155_v6  ;;  %v21160_v6 = vld [vmem:[#allocation155_spill] sm:$0xff] }
 0x422   :  { %6142 = vmatprep.subr.mxu1 %v21079_v29  ;;  %5811 = vmatpush1.msra.mxu0 %v21156_v32  ;;  %v21161_v32 = vld [vmem:[#allocation158_spill] sm:$0xff] }
 0x423   :  { %6144 = vmatpush1.msra.mxu1 %v21081_v35  ;;  %5814 = vmatprep.subr.mxu0 %v21157_v24  ;;  %v21162_v24 = vld [vmem:[#allocation161_spill] sm:$0xff] }
 0x424   :  { %6146 = vmatprep.subr.mxu1 %v21083_v40  ;;  %5817 = vmatpush1.msra.mxu0 %v21158_v62  ;;  %v21163_v62 = vld [vmem:[#allocation164_spill] sm:$0xff] }
 0x425   :  { %5850 = vmatprep.mubr.f32.mxu0 %v20373_v28  ;;  %6148 = vmatpush1.msra.mxu1 %v21085_v59 }
 0x426   :  { %5853 = vmatmul.mubr.f32.vlgmr.msra.gmra.mxu0 %v17049_v30  ;;  %5968 = vmatprep.subr.mxu0 %v21159_v23  ;;  %v21164_v30 = vld [vmem:[#allocation167_spill] sm:$0xff] }
 0x427   :  { %6150 = vmatprep.subr.mxu1 %v21087_v10  ;;  %5972 = vmatpush1.msra.mxu0 %v21160_v6  ;;  %v21165_v23 = vld [vmem:[#allocation171_spill] sm:$0xff]  ;;  %v21166_v6 = vld [vmem:[#allocation173_spill] sm:$0xff] }
 0x428   :  { %6152 = vmatpush1.msra.mxu1 %v21089_v8  ;;  %5976 = vmatprep.subr.mxu0 %v21161_v32  ;;  %v21167_v32 = vld [vmem:[#allocation176_spill] sm:$0xff] }
 0x429   :  { %6154 = vmatprep.subr.mxu1 %v21091_v41  ;;  %5980 = vmatpush1.msra.mxu0 %v21162_v24  ;;  %v21168_v24 = vld [vmem:[#allocation180_spill] sm:$0xff] }
 0x42a   :  { %6156 = vmatpush1.msra.mxu1 %v21093_v54  ;;  %5984 = vmatprep.subr.mxu0 %v21163_v62  ;;  %v21169_v62 = vld [vmem:[#allocation183_spill] sm:$0xff] }
 0x42b   :  { %6158 = vmatprep.subr.mxu1 %v21095_v56  ;;  %5988 = vmatpush1.msra.mxu0 %v21164_v30  ;;  %v21170_v30 = vld [vmem:[#allocation186_spill] sm:$0xff] }
 0x42c   :  { %6160 = vmatpush1.msra.mxu1 %v21097_v14  ;;  %5992 = vmatprep.subr.mxu0 %v21165_v23  ;;  %v21171_v23 = vld [vmem:[#allocation189_spill] sm:$0xff] }
 0x42d   :  { %6162 = vmatprep.subr.mxu1 %v21099_v34  ;;  %5996 = vmatpush1.msra.mxu0 %v21166_v6  ;;  %v21172_v6 = vld [vmem:[#allocation192_spill] sm:$0xff] }
 0x42e   :  { %6164 = vmatpush1.msra.mxu1 %v21101_v48  ;;  %6000 = vmatprep.subr.mxu0 %v21167_v32  ;;  %v21173_v32 = vld [vmem:[#allocation198_spill] sm:$0xff] }
 0x42f   :  { %6166 = vmatprep.subr.mxu1 %v21103_v42  ;;  %6004 = vmatpush1.msra.mxu0 %v21168_v24  ;;  %v21174_v24 = vld [vmem:[#allocation201_spill] sm:$0xff] }
 0x430   :  { %6168 = vmatpush1.msra.mxu1 %v21105_v2  ;;  %6008 = vmatprep.subr.mxu0 %v21169_v62  ;;  %v21175_v62 = vld [vmem:[#allocation207_spill] sm:$0xff] }
 0x431   :  { %6170 = vmatprep.subr.mxu1 %v21107_v5  ;;  %6012 = vmatpush1.msra.mxu0 %v21170_v30  ;;  %v21176_v30 = vld [vmem:[#allocation217_spill] sm:$0xff] }
 0x432   :  { %6172 = vmatpush1.msra.mxu1 %v21109_v36  ;;  %6016 = vmatprep.subr.mxu0 %v21171_v23  ;;  %v21177_v23 = vld [vmem:[#allocation220_spill] sm:$0xff] }
 0x433   :  { %6174 = vmatprep.subr.mxu1 %v21111_v22  ;;  %6020 = vmatpush1.msra.mxu0 %v21172_v6  ;;  %v21178_v6 = vld [vmem:[#allocation224_spill] sm:$0xff] }
 0x434   :  { %6176 = vmatpush1.msra.mxu1 %v21113_v47  ;;  %6024 = vmatprep.subr.mxu0 %v21173_v32  ;;  %v21179_v32 = vld [vmem:[#allocation228_spill] sm:$0xff] }
 0x435   :  { %6178 = vmatprep.subr.mxu1 %v21115_v50  ;;  %6028 = vmatpush1.msra.mxu0 %v21174_v24  ;;  %v21180_v24 = vld [vmem:[#allocation231_spill] sm:$0xff] }
 0x436   :  { %6180 = vmatpush1.msra.mxu1 %v21117_v61  ;;  %6032 = vmatprep.subr.mxu0 %v21175_v62  ;;  %v21181_v62 = vld [vmem:[#allocation234_spill] sm:$0xff] }
 0x437   :  { %6182 = vmatprep.subr.mxu1 %v21119_v27  ;;  %6036 = vmatpush1.msra.mxu0 %v21176_v30  ;;  %v21182_v30 = vld [vmem:[#allocation237_spill] sm:$0xff] }
 0x438   :  { %6184 = vmatpush1.msra.mxu1 %v21120_v37  ;;  %6040 = vmatprep.subr.mxu0 %v21177_v23  ;;  %v21186_v23 = vld [vmem:[#allocation42_spill] sm:$0xff] }
 0x439   :  { %6186 = vmatprep.subr.mxu1 %v21121_v13  ;;  %6044 = vmatpush1.msra.mxu0 %v21178_v6  ;;  %v21183_v6 = vld [vmem:[#allocation241_spill] sm:$0xff] }
 0x43a   :  { %6188 = vmatpush1.msra.mxu1 %v21122_v58  ;;  %6048 = vmatprep.subr.mxu0 %v21179_v32  ;;  %v21184_v32 = vld [vmem:[#allocation244_spill] sm:$0xff] }
 0x43b   :  { %6190 = vmatprep.subr.mxu1 %v21123_v55  ;;  %6052 = vmatpush1.msra.mxu0 %v21180_v24  ;;  %v21185_v24 = vld [vmem:[#allocation247_spill] sm:$0xff] }
 0x43c   :  { %6192 = vmatpush1.msra.mxu1 %v21124_v60  ;;  %6056 = vmatprep.subr.mxu0 %v21181_v62  ;;  %v21187_v62 = vld [vmem:[#allocation250_spill] sm:$0xff]  ;;  %v21195_v60 = vld [vmem:[#allocation259_spill] sm:$0xff] }
 0x43d   :  { %6194 = vmatprep.subr.mxu1 %v21125_v0  ;;  %6060 = vmatpush1.msra.mxu0 %v21182_v30  ;;  %v21189_v30 = vld [vmem:[#allocation253_spill] sm:$0xff] }
 0x43e   :  { %6196 = vmatpush1.msra.mxu1 %v21126_v4  ;;  %6229 = vmatprep.mubr.f32.mxu1 %v20373_v28  ;;  %v21191_v4 = vld [vmem:[#allocation255_spill] sm:$0xff]  ;;  %v21193_v0 = vld [vmem:[#allocation257_spill] sm:$0xff] }
 0x43f   :  { %6064 = vmatprep.subr.mxu0 %v21183_v6  ;;  %6231 = vmatmul.mubr.f32.vlgmr.msra.gmra.mxu1 %v17046_v11  ;;  %v21192_v6 = vld [vmem:[#allocation57_spill] sm:$0xff] }
 0x440   :  { %6068 = vmatpush1.msra.mxu0 %v21184_v32  ;;  %6125 = vmatprep.mubr.f32.mxu0 %v20373_v28  ;;  %v21194_v32 = vld [vmem:[#allocation60_spill] sm:$0xff] }
 0x441   :  { %6072 = vmatprep.subr.mxu0 %v21185_v24  ;;  %6387 = vmatprep.subr.mxu1 %v21186_v23  ;;  %v21196_v24 = vld [vmem:[#allocation63_spill] sm:$0xff] }
 0x442   :  { %6076 = vmatpush1.msra.mxu0 %v21187_v62  ;;  %6393 = vmatpush1.msra.mxu1 %v21188_v49  ;;  %v21197_v62 = vld [vmem:[#allocation66_spill] sm:$0xff]  ;;  %v21198_v49 = vld [vmem:[#allocation69_spill] sm:$0xff] }
 0x443   :  { %6080 = vmatprep.subr.mxu0 %v21189_v30  ;;  %6399 = vmatprep.subr.mxu1 %v21190_v43  ;;  %v21199_v43 = vld [vmem:[#allocation72_spill] sm:$0xff]  ;;  %v21233_v30 = vld [vmem:[#allocation14_spill] sm:$0xff] }
 0x444   :  { %6084 = vmatpush1.msra.mxu0 %v21191_v4  ;;  %6405 = vmatpush1.msra.mxu1 %v21192_v6  ;;  %v21200_v6 = vld [vmem:[#allocation75_spill] sm:$0xff]  ;;  %v21231_v4 = vld [vmem:[#allocation108_spill] sm:$0xff] }
 0x445   :  { %6088 = vmatprep.subr.mxu0 %v21193_v0  ;;  %6411 = vmatprep.subr.mxu1 %v21194_v32  ;;  %v21201_v32 = vld [vmem:[#allocation78_spill] sm:$0xff] }
 0x446   :  { %6092 = vmatpush1.msra.mxu0 %v21195_v60  ;;  %6417 = vmatpush1.msra.mxu1 %v21196_v24  ;;  %v21202_v24 = vld [vmem:[#allocation82_spill] sm:$0xff]  ;;  %v21224_v60 = vld [vmem:[#allocation139_spill] sm:$0xff] }
 0x447   :  { %6127 = vmatmul.mubr.f32.vlgmr.msra.gmra.mxu0 %v17046_v11  ;;  %6423 = vmatprep.subr.mxu1 %v21197_v62  ;;  %v21203_v11 = vld [vmem:[#allocation85_spill] sm:$0xff]  ;;  %v21222_v62 = vld [vmem:[#allocation138_spill] sm:$0xff] }
 0x448   :  { %6429 = vmatpush1.msra.mxu1 %v21198_v49  ;;  %6275 = vmatprep.subr.mxu0 %v20787_v18  ;;  %v21204_v49 = vld [vmem:[#allocation88_spill] sm:$0xff]  ;;  %v21229_v0 = vld [vmem:[#allocation102_spill] sm:$0xff] }
 0x449   :  { %6435 = vmatprep.subr.mxu1 %v21199_v43  ;;  %6277 = vmatpush1.msra.mxu0 %v20675_v15  ;;  %v21205_v43 = vld [vmem:[#allocation95_spill] sm:$0xff] }
 0x44a   :  { %6441 = vmatpush1.msra.mxu1 %v21200_v6  ;;  %6279 = vmatprep.subr.mxu0 %v20677_v46  ;;  %v21206_v6 = vld [vmem:[#allocation99_spill] sm:$0xff] }
 0x44b   :  { %6447 = vmatprep.subr.mxu1 %v21201_v32  ;;  %6281 = vmatpush1.msra.mxu0 %v20679_v51  ;;  %v21207_v32 = vld [vmem:[#allocation112_spill] sm:$0xff] }
 0x44c   :  { %6453 = vmatpush1.msra.mxu1 %v21202_v24  ;;  %6283 = vmatprep.subr.mxu0 %v20681_v38  ;;  %v21208_v24 = vld [vmem:[#allocation115_spill] sm:$0xff] }
 0x44d   :  { %6459 = vmatprep.subr.mxu1 %v21203_v11  ;;  %6285 = vmatpush1.msra.mxu0 %v20683_v17  ;;  %v21209_v11 = vld [vmem:[#allocation118_spill] sm:$0xff] }
 0x44e   :  { %6465 = vmatpush1.msra.mxu1 %v21204_v49  ;;  %6287 = vmatprep.subr.mxu0 %v20685_v12  ;;  %v21210_v49 = vld [vmem:[#allocation121_spill] sm:$0xff] }
 0x44f   :  { %6471 = vmatprep.subr.mxu1 %v21205_v43  ;;  %6289 = vmatpush1.msra.mxu0 %v20687_v20  ;;  %v21211_v43 = vld [vmem:[#allocation124_spill] sm:$0xff] }
 0x450   :  { %6477 = vmatpush1.msra.mxu1 %v21206_v6  ;;  %6291 = vmatprep.subr.mxu0 %v20689_v16  ;;  %v21212_v6 = vld [vmem:[#allocation126_spill] sm:$0xff] }
 0x451   :  { %6483 = vmatprep.subr.mxu1 %v21207_v32  ;;  %6293 = vmatpush1.msra.mxu0 %v20691_v25  ;;  %v21213_v32 = vld [vmem:[#allocation128_spill] sm:$0xff] }
 0x452   :  { %6489 = vmatpush1.msra.mxu1 %v21208_v24  ;;  %6295 = vmatprep.subr.mxu0 %v20693_v19  ;;  %v21214_v24 = vld [vmem:[#allocation130_spill] sm:$0xff] }
 0x453   :  { %6495 = vmatprep.subr.mxu1 %v21209_v11  ;;  %6297 = vmatpush1.msra.mxu0 %v20745_v57  ;;  %v21215_v11 = vld [vmem:[#allocation132_spill] sm:$0xff] }
 0x454   :  { %6501 = vmatpush1.msra.mxu1 %v21210_v49  ;;  %6299 = vmatprep.subr.mxu0 %v20747_v45  ;;  %v21216_v49 = vld [vmem:[#allocation133_spill] sm:$0xff] }
 0x455   :  { %6507 = vmatprep.subr.mxu1 %v21211_v43  ;;  %6301 = vmatpush1.msra.mxu0 %v20749_v21  ;;  %v21217_v43 = vld [vmem:[#allocation134_spill] sm:$0xff] }
 0x456   :  { %6513 = vmatpush1.msra.mxu1 %v21212_v6  ;;  %6303 = vmatprep.subr.mxu0 %v20751_v33  ;;  %v21218_v6 = vld [vmem:[#allocation135_spill] sm:$0xff] }
 0x457   :  { %6519 = vmatprep.subr.mxu1 %v21213_v32  ;;  %6305 = vmatpush1.msra.mxu0 %v20753_v1  ;;  %v21219_v32 = vld [vmem:[#allocation136_spill] sm:$0xff]  ;;  %v4862_v58 = vpop.f32.mrf.mxu1 }
 0x458   :  { %6525 = vmatpush1.msra.mxu1 %v21214_v24  ;;  %6307 = vmatprep.subr.mxu0 %v20755_v9  ;;  %v21220_v24 = vld [vmem:[#allocation137_spill] sm:$0xff] }
 0x459   :  { %6531 = vmatprep.subr.mxu1 %v21215_v11  ;;  %6309 = vmatpush1.msra.mxu0 %v20757_v53  ;;  %v21221_v11 = vld [vmem:[#allocation81_spill] sm:$0xff]  ;;  %v4864_v37 = vpop.f32.mrf.mxu1 }
 0x45a   :  { %6537 = vmatpush1.msra.mxu1 %v21216_v49  ;;  %6311 = vmatprep.subr.mxu0 %v20759_v7  ;;  %v21223_v49 = vld [vmem:[#allocation84_spill] sm:$0xff] }
 0x45b   :  { %6543 = vmatprep.subr.mxu1 %v21217_v43  ;;  %6313 = vmatpush1.msra.mxu0 %v20761_v44  ;;  %v21225_v43 = vld [vmem:[#allocation87_spill] sm:$0xff] }
 0x45c   :  { %6549 = vmatpush1.msra.mxu1 %v21218_v6  ;;  %6315 = vmatprep.subr.mxu0 %v20763_v3  ;;  %v21226_v6 = vld [vmem:[#allocation91_spill] sm:$0xff] }
 0x45d   :  { %6555 = vmatprep.subr.mxu1 %v21219_v32  ;;  %6317 = vmatpush1.msra.mxu0 %v20765_v52  ;;  %v21227_v32 = vld [vmem:[#allocation94_spill] sm:$0xff] }
 0x45e   :  { %6561 = vmatpush1.msra.mxu1 %v21220_v24  ;;  %6319 = vmatprep.subr.mxu0 %v21221_v11  ;;  %v21228_v24 = vld [vmem:[#allocation98_spill] sm:$0xff] }
 0x45f   :  { %6567 = vmatprep.subr.mxu1 %v21222_v62  ;;  %6321 = vmatpush1.msra.mxu0 %v21223_v49  ;;  %v21230_v62 = vld [vmem:[#allocation105_spill] sm:$0xff]  ;;  %v4630_v23 = vpop.f32.mrf.mxu0 }
 0x460   :  { %6573 = vmatpush1.msra.mxu1 %v21224_v60  ;;  %6323 = vmatprep.subr.mxu0 %v21225_v43  ;;  %v21232_v60 = vld [vmem:[#allocation111_spill] sm:$0xff]  ;;  %v4863_v22 = vadd.f32 %v4862_v58, %v4630_v23 }
 0x461   :  { %6606 = vmatprep.mubr.f32.mxu1 %v20373_v28  ;;  %6752 = vmatprep.subr.mxu1 %v20787_v18  ;;  %v4632_v55 = vpop.f32.mrf.mxu0 }
 0x462   :  { %6325 = vmatpush1.msra.mxu0 %v21226_v6  ;;  %6370 = vmatprep.mubr.f32.mxu0 %v20373_v28  ;;  %v4865_v61 = vadd.f32 %v4864_v37, %v4632_v55 }
 0x463   :  { %6327 = vmatprep.subr.mxu0 %v21227_v32 }
 0x464   :  { %6329 = vmatpush1.msra.mxu0 %v21228_v24 }
 0x465   :  { %6331 = vmatprep.subr.mxu0 %v21229_v0 }
 0x466   :  { %6333 = vmatpush1.msra.mxu0 %v21230_v62 }
 0x467   :  { %6335 = vmatprep.subr.mxu0 %v21231_v4 }
 0x468   :  { %6337 = vmatpush1.msra.mxu0 %v21232_v60 }
 0x469   :  { %6616 = vmatprep.subr.mxu0 %v21233_v30 }
 0x477   :  { %v5105_v50 = vpop.f32.mrf.mxu1 }
 0x479   :  { %v5107_v2 = vpop.f32.mrf.mxu1 }
 0x480   :  { %v4999_v13 = vpop.f32.mrf.mxu0 }
 0x481   :  { %v5000_v5 = vadd.f32 %v4999_v13, %v4863_v22  ;;  %v21234_v13 = vld [vmem:[#allocation13_spill] sm:$0xff] }
 0x482   :  { %v5001_v27 = vpop.f32.mrf.mxu0 }
 0x483   :  { %v5002_v36 = vadd.f32 %v5001_v27, %v4865_v61  ;;  %v5106_v14 = vadd.f32 %v5105_v50, %v5000_v5  ;;  %v21235_v50 = vld [vmem:[#allocation15_spill] sm:$0xff] }
 0x485   :  { %v5108_v48 = vadd.f32 %v5107_v2, %v5002_v36 }
 0x499   :  { %v5377_v34 = vpop.f32.mrf.mxu1 }
 0x49b   :  { %v5379_v41 = vpop.f32.mrf.mxu1 }
 0x4a2   :  { %v5273_v47 = vpop.f32.mrf.mxu0 }
 0x4a3   :  { %v5274_v30 = vadd.f32 %v5273_v47, %v5106_v14 }
 0x4a4   :  { %v5275_v42 = vpop.f32.mrf.mxu0 }
 0x4a5   :  { %v5276_v56 = vadd.f32 %v5275_v42, %v5108_v48  ;;  %v5378_v59 = vadd.f32 %v5377_v34, %v5274_v30  ;;  %v21236_v30 = vld [vmem:[#allocation16_spill] sm:$0xff] }
 0x4a7   :  { %v5380_v8 = vadd.f32 %v5379_v41, %v5276_v56  ;;  %v6241_v37 = vrot.slane %v5378_v59, 6 }
 0x4a9   :  { %v6242_v55 = vrot.slane %v5380_v8, 6  ;;  %v6249_v5 = vadd.f32 %v6241_v37, %v21235_v50  ;;  %v21346_v50 = vld [vmem:[#allocation263_spill] sm:$0xff] }
 0x4ab   :  { %v6250_v27 = vadd.f32 %v6242_v55, %v21234_v13  ;;  %v21348_v13 = vld [vmem:[#allocation264_spill] sm:$0xff] }
 0x4ad   :  { %15072 = vtanh.f32 %v6250_v27 }
 0x4ae   :  { %15074 = vtanh.f32 %v6249_v5  ;;  %v21238_v5 = vld [vmem:[#allocation22_spill] sm:$0xff] }
 0x4ba   :  { %v15073_v55 = vpop.eup %15072 }
 0x4bb   :  { %v5717_v40 = vpop.f32.mrf.mxu1  ;;  %v15075_v37 = vpop.eup %15074 }
 0x4bd   :  { %v5719_v58 = vpop.f32.mrf.mxu1 }
 0x4c4   :  { %v5485_v54 = vpop.f32.mrf.mxu0 }
 0x4c5   :  { %v5718_v29 = vadd.f32 %v5717_v40, %v5485_v54 }
 0x4c6   :  { %v5487_v10 = vpop.f32.mrf.mxu0 }
 0x4c7   :  { %v5720_v61 = vadd.f32 %v5719_v58, %v5487_v10  ;;  %v6259_v58 = vmul.f32 0.5, %v15073_v55 }
 0x4dd   :  { %v5960_v36 = vpop.f32.mrf.mxu1 }
 0x4df   :  { %v5962_v42 = vpop.f32.mrf.mxu1 }
 0x4e6   :  { %v5854_v35 = vpop.f32.mrf.mxu0 }
 0x4e7   :  { %v5855_v22 = vadd.f32 %v5854_v35, %v5718_v29 }
 0x4e8   :  { %v5856_v23 = vpop.f32.mrf.mxu0 }
 0x4e9   :  { %v5857_v2 = vadd.f32 %v5856_v23, %v5720_v61  ;;  %v5961_v47 = vadd.f32 %v5960_v36, %v5855_v22  ;;  %v21237_v23 = vld [vmem:[#allocation17_spill] sm:$0xff]  ;;  %v6257_v61 = vmul.f32 0.5, %v15075_v37  ;;  %v6260_v22 = vadd.f32 0.5, %v6259_v58  ;;  %v21240_v37 = vld [vmem:[#allocation18_spill] sm:$0xff] }
 0x4ea   :  { %v21241_v58 = vld [vmem:[#allocation21_spill] sm:$0xff] }
 0x4eb   :  { %v5963_v34 = vadd.f32 %v5962_v42, %v5857_v2  ;;  %v6258_v36 = vadd.f32 0.5, %v6257_v61  ;;  %v6264_v2 = vrot.slane %v21238_v5, 7  ;;  %v21243_v61 = vld [vmem:[#allocation25_spill] sm:$0xff]  ;;  %v21246_v5 = vld [vmem:[#allocation34_spill] sm:$0xff] }
 0x4ed   :  { %v6266_v42 = vmul.f32 %v6264_v2, %v6260_v22  ;;  %v21244_v22 = vld [vmem:[#allocation28_spill] sm:$0xff]  ;;  %v21247_v2 = vld [vmem:[#allocation37_spill] sm:$0xff] }
 0x4ff   :  { %v6232_v8 = vpop.f32.mrf.mxu1 }
 0x501   :  { %v6234_v59 = vpop.f32.mrf.mxu1 }
 0x507   :  { %v6128_v48 = vpop.f32.mrf.mxu0 }
 0x508   :  { %v6129_v14 = vadd.f32 %v6128_v48, %v5961_v47 }
 0x509   :  { %v6130_v41 = vpop.f32.mrf.mxu0 }
 0x50a   :  { %v6233_v54 = vadd.f32 %v6232_v8, %v6129_v14  ;;  %v6131_v40 = vadd.f32 %v6130_v41, %v5963_v34 }
 0x50c   :  { %v6243_v56 = vrot.slane %v6233_v54, 6  ;;  %v6235_v35 = vadd.f32 %v6234_v59, %v6131_v40 }
 0x50e   :  { %v6251_v10 = vadd.f32 %v6243_v56, %v21236_v30  ;;  %v6244_v29 = vrot.slane %v6235_v35, 6  ;;  %v21344_v30 = vld [vmem:[#allocation262_spill] sm:$0xff] }
 0x510   :  { %15076 = vtanh.f32 %v6251_v10  ;;  %v6252_v27 = vadd.f32 %v6244_v29, %v21237_v23  ;;  %v21342_v23 = vld [vmem:[#allocation261_spill] sm:$0xff] }
 0x512   :  { %15078 = vtanh.f32 %v6252_v27  ;;  %v21242_v27 = vld [vmem:[#allocation23_spill] sm:$0xff] }
 0x51d   :  { %v15077_v47 = vpop.eup %15076 }
 0x51e   :  { %v6267_v48 = vmul.f32 %v15077_v47, %v6258_v36  ;;  %v21245_v36 = vld [vmem:[#allocation31_spill] sm:$0xff]  ;;  %v21248_v47 = vld [vmem:[#allocation40_spill] sm:$0xff] }
 0x51f   :  { %v15079_v34 = vpop.eup %15078 }
 0x520   :  { %v17471_v14 = vadd.f32 %v6267_v48, %v6266_v42  ;;  %v6261_v8 = vmul.f32 0.5, %v15079_v34  ;;  %v21249_v42 = vld [vmem:[#allocation44_spill] sm:$0xff]  ;;  %v21250_v48 = vld [vmem:[#allocation46_spill] sm:$0xff]  ;;  %v21251_v34 = vld [vmem:[#allocation49_spill] sm:$0xff] }
 0x522   :  { %21239 = vst [vmem:[#allocation24_spill] sm:$0xff] %v17471_v14  ;;  %15080 = vtanh.f32 %v17471_v14  ;;  %v6262_v41 = vadd.f32 0.5, %v6261_v8  ;;  %v21252_v8 = vld [vmem:[#allocation53_spill] sm:$0xff]  ;;  %v21340_v14 = vld [vmem:[#allocation260_spill] sm:$0xff] }
 0x52f   :  { %v15081_v54 = vpop.eup %15080 }
 0x530   :  { %v6270_v40 = vmul.f32 %v15081_v54, %v6262_v41  ;;  %v21253_v41 = vld [vmem:[#allocation59_spill] sm:$0xff]  ;;  %v21254_v54 = vld [vmem:[#allocation62_spill] sm:$0xff] }
 0x532   :  { %v6272_v56 = vrot.slane %v6270_v40, 2  ;;  %v21255_v40 = vld [vmem:[#allocation67_spill] sm:$0xff] }
 0x534   :  { %v17474_v59 = vand.u32 4294901760, %v6272_v56 }
 0x536   :  { %v17477_v10 = vsub.f32 %v6272_v56, %v17474_v59  ;;  %6608 = vmatmul.mubr.f32.vlgmr.msra.gmra.mxu1 %v17474_v59  ;;  %v21256_v56 = vld [vmem:[#allocation76_spill] sm:$0xff] }
 0x537   :  { %6754 = vmatpush1.msra.mxu1 %v20675_v15  ;;  %6847 = vmatprep.mubr.f32.mxu1 %v20373_v28 }
 0x538   :  { %6756 = vmatprep.subr.mxu1 %v20677_v46  ;;  %v17484_v35 = vand.u32 4294901760, %v17477_v10 }
 0x539   :  { %6758 = vmatpush1.msra.mxu1 %v20679_v51 }
 0x53a   :  { %6760 = vmatprep.subr.mxu1 %v20681_v38  ;;  %v6374_v29 = vsub.f32 %v17477_v10, %v17484_v35 }
 0x53b   :  { %6762 = vmatpush1.msra.mxu1 %v20683_v17 }
 0x53c   :  { %6764 = vmatprep.subr.mxu1 %v20685_v12  ;;  %v17492_v55 = vand.u32 4294901760, %v6374_v29  ;;  %v21257_v29 = vld [vmem:[#allocation80_spill] sm:$0xff] }
 0x53d   :  { %6766 = vmatpush1.msra.mxu1 %v20687_v20 }
 0x53e   :  { %6768 = vmatprep.subr.mxu1 %v20689_v16  ;;  %6376 = vmatmul.mubr.f32.vlgmr.msra.gmra.mxu0 %v17492_v55 }
 0x53f   :  { %6619 = vmatpush1.msra.mxu0 %v21240_v37  ;;  %6770 = vmatpush1.msra.mxu1 %v20691_v25  ;;  %v21338_v37 = vld [vmem:[#allocation258_spill] sm:$0xff] }
 0x540   :  { %6622 = vmatprep.subr.mxu0 %v21241_v58  ;;  %6772 = vmatprep.subr.mxu1 %v20693_v19  ;;  %v21336_v58 = vld [vmem:[#allocation256_spill] sm:$0xff] }
 0x541   :  { %6625 = vmatpush1.msra.mxu0 %v21242_v27  ;;  %6774 = vmatpush1.msra.mxu1 %v20745_v57  ;;  %v21334_v27 = vld [vmem:[#allocation254_spill] sm:$0xff] }
 0x542   :  { %6628 = vmatprep.subr.mxu0 %v21243_v61  ;;  %6776 = vmatprep.subr.mxu1 %v20747_v45  ;;  %v21332_v61 = vld [vmem:[#allocation252_spill] sm:$0xff] }
 0x543   :  { %6631 = vmatpush1.msra.mxu0 %v21244_v22  ;;  %6778 = vmatpush1.msra.mxu1 %v20749_v21  ;;  %v21330_v22 = vld [vmem:[#allocation249_spill] sm:$0xff] }
 0x544   :  { %6634 = vmatprep.subr.mxu0 %v21245_v36  ;;  %6780 = vmatprep.subr.mxu1 %v20751_v33  ;;  %v21328_v36 = vld [vmem:[#allocation246_spill] sm:$0xff] }
 0x545   :  { %6637 = vmatpush1.msra.mxu0 %v21246_v5  ;;  %6782 = vmatpush1.msra.mxu1 %v20753_v1  ;;  %v21326_v5 = vld [vmem:[#allocation243_spill] sm:$0xff] }
 0x546   :  { %6640 = vmatprep.subr.mxu0 %v21247_v2  ;;  %6784 = vmatprep.subr.mxu1 %v20755_v9  ;;  %v21306_v2 = vld [vmem:[#allocation191_spill] sm:$0xff] }
 0x547   :  { %6643 = vmatpush1.msra.mxu0 %v21248_v47  ;;  %6786 = vmatpush1.msra.mxu1 %v20757_v53  ;;  %v21304_v47 = vld [vmem:[#allocation188_spill] sm:$0xff] }
 0x548   :  { %6646 = vmatprep.subr.mxu0 %v21249_v42  ;;  %6788 = vmatprep.subr.mxu1 %v20759_v7  ;;  %v21303_v42 = vld [vmem:[#allocation125_spill] sm:$0xff] }
 0x549   :  { %6649 = vmatpush1.msra.mxu0 %v21250_v48  ;;  %6790 = vmatpush1.msra.mxu1 %v20761_v44  ;;  %v21301_v48 = vld [vmem:[#allocation122_spill] sm:$0xff] }
 0x54a   :  { %6652 = vmatprep.subr.mxu0 %v21251_v34  ;;  %6792 = vmatprep.subr.mxu1 %v20763_v3  ;;  %v21299_v34 = vld [vmem:[#allocation119_spill] sm:$0xff] }
 0x54b   :  { %6655 = vmatpush1.msra.mxu0 %v21252_v8  ;;  %6794 = vmatpush1.msra.mxu1 %v20765_v52  ;;  %v21258_v8 = vld [vmem:[#allocation83_spill] sm:$0xff] }
 0x54c   :  { %6658 = vmatprep.subr.mxu0 %v21253_v41  ;;  %6796 = vmatprep.subr.mxu1 %v21221_v11  ;;  %v21259_v41 = vld [vmem:[#allocation86_spill] sm:$0xff] }
 0x54d   :  { %6661 = vmatpush1.msra.mxu0 %v21254_v54  ;;  %6798 = vmatpush1.msra.mxu1 %v21223_v49  ;;  %v21260_v54 = vld [vmem:[#allocation90_spill] sm:$0xff] }
 0x54e   :  { %6664 = vmatprep.subr.mxu0 %v21255_v40  ;;  %6800 = vmatprep.subr.mxu1 %v21225_v43  ;;  %v21261_v40 = vld [vmem:[#allocation93_spill] sm:$0xff] }
 0x54f   :  { %6667 = vmatpush1.msra.mxu0 %v21256_v56  ;;  %6802 = vmatpush1.msra.mxu1 %v21226_v6  ;;  %v21262_v56 = vld [vmem:[#allocation97_spill] sm:$0xff] }
 0x550   :  { %6670 = vmatprep.subr.mxu0 %v21257_v29  ;;  %6804 = vmatprep.subr.mxu1 %v21227_v32  ;;  %v21263_v29 = vld [vmem:[#allocation101_spill] sm:$0xff] }
 0x551   :  { %6673 = vmatpush1.msra.mxu0 %v21258_v8  ;;  %6806 = vmatpush1.msra.mxu1 %v21228_v24  ;;  %v21269_v8 = vld [vmem:[#allocation120_spill] sm:$0xff] }
 0x552   :  { %6676 = vmatprep.subr.mxu0 %v21259_v41  ;;  %6808 = vmatprep.subr.mxu1 %v21229_v0  ;;  %v21264_v41 = vld [vmem:[#allocation104_spill] sm:$0xff] }
 0x553   :  { %6679 = vmatpush1.msra.mxu0 %v21260_v54  ;;  %6810 = vmatpush1.msra.mxu1 %v21230_v62  ;;  %v21265_v54 = vld [vmem:[#allocation107_spill] sm:$0xff] }
 0x554   :  { %6682 = vmatprep.subr.mxu0 %v21261_v40  ;;  %6812 = vmatprep.subr.mxu1 %v21231_v4  ;;  %v21266_v40 = vld [vmem:[#allocation110_spill] sm:$0xff] }
 0x555   :  { %6685 = vmatpush1.msra.mxu0 %v21262_v56  ;;  %6814 = vmatpush1.msra.mxu1 %v21232_v60  ;;  %v21267_v56 = vld [vmem:[#allocation114_spill] sm:$0xff] }
 0x556   :  { %6688 = vmatprep.subr.mxu0 %v21263_v29  ;;  %6851 = vmatmul.mubr.f32.vlgmr.msra.gmra.mxu1 %v17484_v35  ;;  %v21268_v29 = vld [vmem:[#allocation117_spill] sm:$0xff] }
 0x557   :  { %7026 = vmatprep.subr.mxu1 %v20787_v18  ;;  %6691 = vmatpush1.msra.mxu0 %v21264_v41  ;;  %v21270_v41 = vld [vmem:[#allocation123_spill] sm:$0xff] }
 0x558   :  { %7028 = vmatpush1.msra.mxu1 %v20675_v15  ;;  %6694 = vmatprep.subr.mxu0 %v21265_v54  ;;  %v21276_v54 = vld [vmem:[#allocation39_spill] sm:$0xff] }
 0x559   :  { %7030 = vmatprep.subr.mxu1 %v20677_v46  ;;  %6697 = vmatpush1.msra.mxu0 %v21266_v40  ;;  %v21271_v40 = vld [vmem:[#allocation20_spill] sm:$0xff] }
 0x55a   :  { %7032 = vmatpush1.msra.mxu1 %v20679_v51  ;;  %6700 = vmatprep.subr.mxu0 %v21267_v56  ;;  %v21272_v56 = vld [vmem:[#allocation27_spill] sm:$0xff] }
 0x55b   :  { %7034 = vmatprep.subr.mxu1 %v20681_v38  ;;  %6703 = vmatpush1.msra.mxu0 %v21268_v29  ;;  %v21273_v29 = vld [vmem:[#allocation30_spill] sm:$0xff] }
 0x55c   :  { %7036 = vmatpush1.msra.mxu1 %v20683_v17  ;;  %6706 = vmatprep.subr.mxu0 %v21269_v8  ;;  %v21274_v8 = vld [vmem:[#allocation33_spill] sm:$0xff] }
 0x55d   :  { %7038 = vmatprep.subr.mxu1 %v20685_v12  ;;  %6709 = vmatpush1.msra.mxu0 %v21270_v41  ;;  %v21275_v41 = vld [vmem:[#allocation36_spill] sm:$0xff] }
 0x55e   :  { %6742 = vmatprep.mubr.f32.mxu0 %v20373_v28  ;;  %7040 = vmatpush1.msra.mxu1 %v20687_v20 }
 0x55f   :  { %6745 = vmatmul.mubr.f32.vlgmr.msra.gmra.mxu0 %v17477_v10  ;;  %6860 = vmatprep.subr.mxu0 %v21271_v40  ;;  %v21277_v40 = vld [vmem:[#allocation43_spill] sm:$0xff] }
 0x560   :  { %7042 = vmatprep.subr.mxu1 %v20689_v16  ;;  %6864 = vmatpush1.msra.mxu0 %v21272_v56  ;;  %v21278_v56 = vld [vmem:[#allocation45_spill] sm:$0xff] }
 0x561   :  { %7044 = vmatpush1.msra.mxu1 %v20691_v25  ;;  %6868 = vmatprep.subr.mxu0 %v21273_v29  ;;  %v21279_v29 = vld [vmem:[#allocation48_spill] sm:$0xff] }
 0x562   :  { %7046 = vmatprep.subr.mxu1 %v20693_v19  ;;  %6872 = vmatpush1.msra.mxu0 %v21274_v8  ;;  %v21280_v8 = vld [vmem:[#allocation52_spill] sm:$0xff] }
 0x563   :  { %7048 = vmatpush1.msra.mxu1 %v20745_v57  ;;  %6876 = vmatprep.subr.mxu0 %v21275_v41  ;;  %v21281_v41 = vld [vmem:[#allocation55_spill] sm:$0xff] }
 0x564   :  { %7050 = vmatprep.subr.mxu1 %v20747_v45  ;;  %6880 = vmatpush1.msra.mxu0 %v21276_v54  ;;  %v21282_v54 = vld [vmem:[#allocation58_spill] sm:$0xff] }
 0x565   :  { %7052 = vmatpush1.msra.mxu1 %v20749_v21  ;;  %6884 = vmatprep.subr.mxu0 %v21277_v40  ;;  %v21283_v40 = vld [vmem:[#allocation61_spill] sm:$0xff] }
 0x566   :  { %7054 = vmatprep.subr.mxu1 %v20751_v33  ;;  %6888 = vmatpush1.msra.mxu0 %v21278_v56  ;;  %v21284_v56 = vld [vmem:[#allocation64_spill] sm:$0xff] }
 0x567   :  { %7056 = vmatpush1.msra.mxu1 %v20753_v1  ;;  %6892 = vmatprep.subr.mxu0 %v21279_v29  ;;  %v21285_v29 = vld [vmem:[#allocation70_spill] sm:$0xff] }
 0x568   :  { %7058 = vmatprep.subr.mxu1 %v20755_v9  ;;  %6896 = vmatpush1.msra.mxu0 %v21280_v8  ;;  %v21286_v8 = vld [vmem:[#allocation73_spill] sm:$0xff] }
 0x569   :  { %7060 = vmatpush1.msra.mxu1 %v20757_v53  ;;  %6900 = vmatprep.subr.mxu0 %v21281_v41  ;;  %v21287_v41 = vld [vmem:[#allocation79_spill] sm:$0xff] }
 0x56a   :  { %7062 = vmatprep.subr.mxu1 %v20759_v7  ;;  %6904 = vmatpush1.msra.mxu0 %v21282_v54  ;;  %v21288_v54 = vld [vmem:[#allocation89_spill] sm:$0xff] }
 0x56b   :  { %7064 = vmatpush1.msra.mxu1 %v20761_v44  ;;  %6908 = vmatprep.subr.mxu0 %v21283_v40  ;;  %v21289_v40 = vld [vmem:[#allocation92_spill] sm:$0xff] }
 0x56c   :  { %7066 = vmatprep.subr.mxu1 %v20763_v3  ;;  %6912 = vmatpush1.msra.mxu0 %v21284_v56  ;;  %v21290_v56 = vld [vmem:[#allocation96_spill] sm:$0xff] }
 0x56d   :  { %7068 = vmatpush1.msra.mxu1 %v20765_v52  ;;  %6916 = vmatprep.subr.mxu0 %v21285_v29  ;;  %v21291_v29 = vld [vmem:[#allocation100_spill] sm:$0xff] }
 0x56e   :  { %7070 = vmatprep.subr.mxu1 %v21221_v11  ;;  %6920 = vmatpush1.msra.mxu0 %v21286_v8  ;;  %v21292_v8 = vld [vmem:[#allocation103_spill] sm:$0xff]  ;;  %v21367_v11 = vld [vmem:[#allocation153_spill] sm:$0xff] }
 0x56f   :  { %7072 = vmatpush1.msra.mxu1 %v21223_v49  ;;  %6924 = vmatprep.subr.mxu0 %v21287_v41  ;;  %v21293_v41 = vld [vmem:[#allocation106_spill] sm:$0xff]  ;;  %v21366_v49 = vld [vmem:[#allocation151_spill] sm:$0xff] }
 0x570   :  { %7074 = vmatprep.subr.mxu1 %v21225_v43  ;;  %6928 = vmatpush1.msra.mxu0 %v21288_v54  ;;  %v21294_v54 = vld [vmem:[#allocation109_spill] sm:$0xff] }
 0x571   :  { %7076 = vmatpush1.msra.mxu1 %v21226_v6  ;;  %6932 = vmatprep.subr.mxu0 %v21289_v40  ;;  %v21297_v40 = vld [vmem:[#allocation116_spill] sm:$0xff]  ;;  %v21364_v6 = vld [vmem:[#allocation146_spill] sm:$0xff]  ;;  %v21365_v43 = vld [vmem:[#allocation149_spill] sm:$0xff] }
 0x572   :  { %7078 = vmatprep.subr.mxu1 %v21227_v32  ;;  %6936 = vmatpush1.msra.mxu0 %v21290_v56  ;;  %v21295_v56 = vld [vmem:[#allocation113_spill] sm:$0xff]  ;;  %v21363_v32 = vld [vmem:[#allocation142_spill] sm:$0xff] }
 0x573   :  { %7080 = vmatpush1.msra.mxu1 %v21228_v24  ;;  %6940 = vmatprep.subr.mxu0 %v21291_v29  ;;  %v21296_v29 = vld [vmem:[#allocation170_spill] sm:$0xff]  ;;  %v21362_v24 = vld [vmem:[#allocation239_spill] sm:$0xff] }
 0x574   :  { %7082 = vmatprep.subr.mxu1 %v21229_v0  ;;  %6944 = vmatpush1.msra.mxu0 %v21292_v8  ;;  %v21298_v8 = vld [vmem:[#allocation179_spill] sm:$0xff]  ;;  %v21361_v0 = vld [vmem:[#allocation236_spill] sm:$0xff] }
 0x575   :  { %7084 = vmatpush1.msra.mxu1 %v21230_v62  ;;  %6948 = vmatprep.subr.mxu0 %v21293_v41  ;;  %v21300_v41 = vld [vmem:[#allocation182_spill] sm:$0xff]  ;;  %v21354_v62 = vld [vmem:[#allocation267_spill] sm:$0xff] }
 0x576   :  { %7086 = vmatprep.subr.mxu1 %v21231_v4  ;;  %6952 = vmatpush1.msra.mxu0 %v21294_v54  ;;  %v21302_v54 = vld [vmem:[#allocation185_spill] sm:$0xff]  ;;  %v21352_v4 = vld [vmem:[#allocation266_spill] sm:$0xff] }
 0x577   :  { %7088 = vmatpush1.msra.mxu1 %v21232_v60  ;;  %7121 = vmatprep.mubr.f32.mxu1 %v20373_v28  ;;  %v21350_v60 = vld [vmem:[#allocation265_spill] sm:$0xff] }
 0x578   :  { %6956 = vmatprep.subr.mxu0 %v21295_v56  ;;  %7123 = vmatmul.mubr.f32.vlgmr.msra.gmra.mxu1 %v17474_v59  ;;  %v21305_v56 = vld [vmem:[#allocation127_spill] sm:$0xff] }
 0x579   :  { %7242 = vmatprep.subr.mxu1 %v21296_v29  ;;  %6960 = vmatpush1.msra.mxu0 %v21297_v40  ;;  %v21307_v29 = vld [vmem:[#allocation129_spill] sm:$0xff]  ;;  %v21308_v40 = vld [vmem:[#allocation194_spill] sm:$0xff] }
 0x57a   :  { %7248 = vmatpush1.msra.mxu1 %v21298_v8  ;;  %6964 = vmatprep.subr.mxu0 %v21299_v34  ;;  %v21309_v8 = vld [vmem:[#allocation131_spill] sm:$0xff]  ;;  %v21324_v34 = vld [vmem:[#allocation240_spill] sm:$0xff] }
 0x57b   :  { %7254 = vmatprep.subr.mxu1 %v21300_v41  ;;  %6968 = vmatpush1.msra.mxu0 %v21301_v48  ;;  %v21310_v41 = vld [vmem:[#allocation197_spill] sm:$0xff]  ;;  %v21322_v48 = vld [vmem:[#allocation227_spill] sm:$0xff] }
 0x57c   :  { %7260 = vmatpush1.msra.mxu1 %v21302_v54  ;;  %6972 = vmatprep.subr.mxu0 %v21303_v42  ;;  %v21311_v42 = vld [vmem:[#allocation200_spill] sm:$0xff]  ;;  %v21320_v54 = vld [vmem:[#allocation223_spill] sm:$0xff] }
 0x57d   :  { %7266 = vmatprep.subr.mxu1 %v21304_v47  ;;  %6976 = vmatpush1.msra.mxu0 %v21305_v56  ;;  %v21312_v56 = vld [vmem:[#allocation203_spill] sm:$0xff]  ;;  %v21318_v47 = vld [vmem:[#allocation216_spill] sm:$0xff] }
 0x57e   :  { %7272 = vmatpush1.msra.mxu1 %v21306_v2  ;;  %6980 = vmatprep.subr.mxu0 %v21307_v29  ;;  %v21313_v29 = vld [vmem:[#allocation206_spill] sm:$0xff]  ;;  %v21317_v2 = vld [vmem:[#allocation147_spill] sm:$0xff] }
 0x57f   :  { %7278 = vmatprep.subr.mxu1 %v21308_v40  ;;  %6984 = vmatpush1.msra.mxu0 %v21309_v8  ;;  %v21314_v8 = vld [vmem:[#allocation210_spill] sm:$0xff]  ;;  %v21315_v40 = vld [vmem:[#allocation145_spill] sm:$0xff] }
 0x580   :  { %7017 = vmatprep.mubr.f32.mxu0 %v20373_v28  ;;  %7284 = vmatpush1.msra.mxu1 %v21310_v41  ;;  %v21316_v41 = vld [vmem:[#allocation213_spill] sm:$0xff] }
 0x581   :  { %7019 = vmatmul.mubr.f32.vlgmr.msra.gmra.mxu0 %v17474_v59  ;;  %7130 = vmatprep.subr.mxu0 %v20835_v31 }
 0x582   :  { %7290 = vmatprep.subr.mxu1 %v21311_v42  ;;  %7132 = vmatpush1.msra.mxu0 %v20837_v26  ;;  %v21319_v42 = vld [vmem:[#allocation150_spill] sm:$0xff] }
 0x583   :  { %7296 = vmatpush1.msra.mxu1 %v21312_v56  ;;  %7134 = vmatprep.subr.mxu0 %v20839_v39  ;;  %v21321_v56 = vld [vmem:[#allocation152_spill] sm:$0xff] }
 0x584   :  { %7302 = vmatprep.subr.mxu1 %v21313_v29  ;;  %7136 = vmatpush1.msra.mxu0 %v20841_v63  ;;  %v21323_v29 = vld [vmem:[#allocation154_spill] sm:$0xff] }
 0x585   :  { %7308 = vmatpush1.msra.mxu1 %v21314_v8  ;;  %7138 = vmatprep.subr.mxu0 %v21315_v40  ;;  %v21325_v8 = vld [vmem:[#allocation157_spill] sm:$0xff] }
 0x586   :  { %7314 = vmatprep.subr.mxu1 %v21316_v41  ;;  %7140 = vmatpush1.msra.mxu0 %v21317_v2  ;;  %v21327_v41 = vld [vmem:[#allocation160_spill] sm:$0xff] }
 0x587   :  { %7320 = vmatpush1.msra.mxu1 %v21318_v47  ;;  %7142 = vmatprep.subr.mxu0 %v21319_v42  ;;  %v21329_v47 = vld [vmem:[#allocation163_spill] sm:$0xff] }
 0x588   :  { %7326 = vmatprep.subr.mxu1 %v21320_v54  ;;  %7144 = vmatpush1.msra.mxu0 %v21321_v56  ;;  %v21331_v54 = vld [vmem:[#allocation166_spill] sm:$0xff] }
 0x589   :  { %7332 = vmatpush1.msra.mxu1 %v21322_v48  ;;  %7146 = vmatprep.subr.mxu0 %v21323_v29  ;;  %v21333_v48 = vld [vmem:[#allocation169_spill] sm:$0xff] }
 0x58a   :  { %7338 = vmatprep.subr.mxu1 %v21324_v34  ;;  %7148 = vmatpush1.msra.mxu0 %v21325_v8  ;;  %v21335_v34 = vld [vmem:[#allocation175_spill] sm:$0xff] }
 0x58b   :  { %7344 = vmatpush1.msra.mxu1 %v21326_v5  ;;  %7150 = vmatprep.subr.mxu0 %v21327_v41  ;;  %v21337_v5 = vld [vmem:[#allocation178_spill] sm:$0xff] }
 0x58c   :  { %7350 = vmatprep.subr.mxu1 %v21328_v36  ;;  %7152 = vmatpush1.msra.mxu0 %v21329_v47  ;;  %v21339_v36 = vld [vmem:[#allocation184_spill] sm:$0xff] }
 0x58d   :  { %7356 = vmatpush1.msra.mxu1 %v21330_v22  ;;  %7154 = vmatprep.subr.mxu0 %v21331_v54  ;;  %v21341_v22 = vld [vmem:[#allocation193_spill] sm:$0xff] }
 0x58e   :  { %7362 = vmatprep.subr.mxu1 %v21332_v61  ;;  %7156 = vmatpush1.msra.mxu0 %v21333_v48  ;;  %v21343_v61 = vld [vmem:[#allocation196_spill] sm:$0xff] }
 0x58f   :  { %7368 = vmatpush1.msra.mxu1 %v21334_v27  ;;  %7158 = vmatprep.subr.mxu0 %v21335_v34  ;;  %v21345_v27 = vld [vmem:[#allocation199_spill] sm:$0xff] }
 0x590   :  { %7374 = vmatprep.subr.mxu1 %v21336_v58  ;;  %7160 = vmatpush1.msra.mxu0 %v21337_v5  ;;  %v21347_v58 = vld [vmem:[#allocation202_spill] sm:$0xff] }
 0x591   :  { %7380 = vmatpush1.msra.mxu1 %v21338_v37  ;;  %7162 = vmatprep.subr.mxu0 %v21339_v36  ;;  %v21349_v37 = vld [vmem:[#allocation205_spill] sm:$0xff] }
 0x592   :  { %7386 = vmatprep.subr.mxu1 %v21340_v14  ;;  %7164 = vmatpush1.msra.mxu0 %v21341_v22  ;;  %v21351_v14 = vld [vmem:[#allocation209_spill] sm:$0xff] }
 0x593   :  { %7392 = vmatpush1.msra.mxu1 %v21342_v23  ;;  %7166 = vmatprep.subr.mxu0 %v21343_v61  ;;  %v21353_v23 = vld [vmem:[#allocation212_spill] sm:$0xff] }
 0x594   :  { %7398 = vmatprep.subr.mxu1 %v21344_v30  ;;  %7168 = vmatpush1.msra.mxu0 %v21345_v27  ;;  %v21355_v30 = vld [vmem:[#allocation215_spill] sm:$0xff] }
 0x595   :  { %7404 = vmatpush1.msra.mxu1 %v21346_v50  ;;  %7170 = vmatprep.subr.mxu0 %v21347_v58  ;;  %v21360_v50 = vld [vmem:[#allocation233_spill] sm:$0xff] }
 0x596   :  { %7410 = vmatprep.subr.mxu1 %v21348_v13  ;;  %7172 = vmatpush1.msra.mxu0 %v21349_v37  ;;  %v21356_v13 = vld [vmem:[#allocation219_spill] sm:$0xff] }
 0x597   :  { %7416 = vmatpush1.msra.mxu1 %v21350_v60  ;;  %7174 = vmatprep.subr.mxu0 %v21351_v14  ;;  %v21357_v60 = vld [vmem:[#allocation222_spill] sm:$0xff] }
 0x598   :  { %7422 = vmatprep.subr.mxu1 %v21352_v4  ;;  %7176 = vmatpush1.msra.mxu0 %v21353_v23  ;;  %v21358_v4 = vld [vmem:[#allocation226_spill] sm:$0xff] }
 0x599   :  { %7428 = vmatpush1.msra.mxu1 %v21354_v62  ;;  %7461 = vmatprep.mubr.f32.mxu1 %v20373_v28  ;;  %v21359_v62 = vld [vmem:[#allocation230_spill] sm:$0xff] }
 0x59a   :  { %7178 = vmatprep.subr.mxu0 %v21355_v30  ;;  %7463 = vmatmul.mubr.f32.vlgmr.msra.gmra.mxu1 %v17474_v59 }
 0x59b   :  { %7607 = vmatprep.subr.mxu1 %v20835_v31  ;;  %7180 = vmatpush1.msra.mxu0 %v21356_v13 }
 0x59c   :  { %7609 = vmatpush1.msra.mxu1 %v20837_v26  ;;  %7182 = vmatprep.subr.mxu0 %v21357_v60 }
 0x59d   :  { %7611 = vmatprep.subr.mxu1 %v20839_v39  ;;  %7184 = vmatpush1.msra.mxu0 %v21358_v4 }
 0x59e   :  { %7613 = vmatpush1.msra.mxu1 %v20841_v63  ;;  %7186 = vmatprep.subr.mxu0 %v21359_v62 }
 0x59f   :  { %7615 = vmatprep.subr.mxu1 %v21315_v40  ;;  %7188 = vmatpush1.msra.mxu0 %v21360_v50 }
 0x5a0   :  { %7617 = vmatpush1.msra.mxu1 %v21317_v2  ;;  %7190 = vmatprep.subr.mxu0 %v21361_v0 }
 0x5a1   :  { %7619 = vmatprep.subr.mxu1 %v21319_v42  ;;  %7192 = vmatpush1.msra.mxu0 %v21362_v24 }
 0x5a2   :  { %7225 = vmatprep.mubr.f32.mxu0 %v20373_v28  ;;  %7621 = vmatpush1.msra.mxu1 %v21321_v56 }
 0x5a3   :  { %7231 = vmatmul.mubr.f32.vlgmr.msra.gmra.mxu0 %v17492_v55  ;;  %7471 = vmatprep.subr.mxu0 %v21363_v32  ;;  %v21368_v55 = vld [vmem:[#allocation156_spill] sm:$0xff]  ;;  %v21369_v32 = vld [vmem:[#allocation159_spill] sm:$0xff] }
 0x5a4   :  { %7623 = vmatprep.subr.mxu1 %v21323_v29  ;;  %7474 = vmatpush1.msra.mxu0 %v21364_v6  ;;  %v21370_v6 = vld [vmem:[#allocation162_spill] sm:$0xff] }
 0x5a5   :  { %7625 = vmatpush1.msra.mxu1 %v21325_v8  ;;  %7477 = vmatprep.subr.mxu0 %v21365_v43  ;;  %v21371_v43 = vld [vmem:[#allocation165_spill] sm:$0xff] }
 0x5a6   :  { %7627 = vmatprep.subr.mxu1 %v21327_v41  ;;  %7480 = vmatpush1.msra.mxu0 %v21366_v49  ;;  %v21372_v49 = vld [vmem:[#allocation168_spill] sm:$0xff] }
 0x5a7   :  { %7629 = vmatpush1.msra.mxu1 %v21329_v47  ;;  %7483 = vmatprep.subr.mxu0 %v21367_v11  ;;  %v21373_v11 = vld [vmem:[#allocation172_spill] sm:$0xff] }
 0x5a8   :  { %7631 = vmatprep.subr.mxu1 %v21331_v54  ;;  %7486 = vmatpush1.msra.mxu0 %v21368_v55  ;;  %v21374_v55 = vld [vmem:[#allocation174_spill] sm:$0xff] }
 0x5a9   :  { %7633 = vmatpush1.msra.mxu1 %v21333_v48  ;;  %7489 = vmatprep.subr.mxu0 %v21369_v32  ;;  %v21375_v32 = vld [vmem:[#allocation177_spill] sm:$0xff] }
 0x5aa   :  { %7635 = vmatprep.subr.mxu1 %v21335_v34  ;;  %7492 = vmatpush1.msra.mxu0 %v21370_v6  ;;  %v21376_v6 = vld [vmem:[#allocation181_spill] sm:$0xff] }
 0x5ab   :  { %7637 = vmatpush1.msra.mxu1 %v21337_v5  ;;  %7495 = vmatprep.subr.mxu0 %v21371_v43  ;;  %v21377_v43 = vld [vmem:[#allocation187_spill] sm:$0xff] }
 0x5ac   :  { %7639 = vmatprep.subr.mxu1 %v21339_v36  ;;  %7498 = vmatpush1.msra.mxu0 %v21372_v49  ;;  %v21378_v49 = vld [vmem:[#allocation190_spill] sm:$0xff] }
 0x5ad   :  { %7641 = vmatpush1.msra.mxu1 %v21341_v22  ;;  %7501 = vmatprep.subr.mxu0 %v21373_v11  ;;  %v21379_v11 = vld [vmem:[#allocation195_spill] sm:$0xff] }
 0x5ae   :  { %7643 = vmatprep.subr.mxu1 %v21343_v61  ;;  %7504 = vmatpush1.msra.mxu0 %v21374_v55  ;;  %v21380_v55 = vld [vmem:[#allocation204_spill] sm:$0xff] }
 0x5af   :  { %7645 = vmatpush1.msra.mxu1 %v21345_v27  ;;  %7507 = vmatprep.subr.mxu0 %v21375_v32  ;;  %v21381_v32 = vld [vmem:[#allocation208_spill] sm:$0xff] }
 0x5b0   :  { %7647 = vmatprep.subr.mxu1 %v21347_v58  ;;  %7510 = vmatpush1.msra.mxu0 %v21376_v6  ;;  %v21382_v6 = vld [vmem:[#allocation211_spill] sm:$0xff] }
 0x5b1   :  { %7649 = vmatpush1.msra.mxu1 %v21349_v37  ;;  %7513 = vmatprep.subr.mxu0 %v21377_v43  ;;  %v21383_v43 = vld [vmem:[#allocation214_spill] sm:$0xff] }
 0x5b2   :  { %7651 = vmatprep.subr.mxu1 %v21351_v14  ;;  %7516 = vmatpush1.msra.mxu0 %v21378_v49  ;;  %v21384_v49 = vld [vmem:[#allocation218_spill] sm:$0xff] }
 0x5b3   :  { %7653 = vmatpush1.msra.mxu1 %v21353_v23  ;;  %7519 = vmatprep.subr.mxu0 %v21379_v11  ;;  %v21385_v11 = vld [vmem:[#allocation221_spill] sm:$0xff] }
 0x5b4   :  { %7655 = vmatprep.subr.mxu1 %v21355_v30  ;;  %7522 = vmatpush1.msra.mxu0 %v21380_v55  ;;  %v21386_v55 = vld [vmem:[#allocation225_spill] sm:$0xff] }
 0x5b5   :  { %7657 = vmatpush1.msra.mxu1 %v21356_v13  ;;  %7525 = vmatprep.subr.mxu0 %v21381_v32  ;;  %v21426_v32 = vld [vmem:[#allocation54_spill] sm:$0xff] }
 0x5b6   :  { %7659 = vmatprep.subr.mxu1 %v21357_v60  ;;  %7528 = vmatpush1.msra.mxu0 %v21382_v6  ;;  %v21387_v6 = vld [vmem:[#allocation229_spill] sm:$0xff] }
 0x5b7   :  { %7661 = vmatpush1.msra.mxu1 %v21358_v4  ;;  %7531 = vmatprep.subr.mxu0 %v21383_v43  ;;  %v21388_v43 = vld [vmem:[#allocation232_spill] sm:$0xff] }
 0x5b8   :  { %7663 = vmatprep.subr.mxu1 %v21359_v62  ;;  %7534 = vmatpush1.msra.mxu0 %v21384_v49  ;;  %v21389_v49 = vld [vmem:[#allocation235_spill] sm:$0xff] }
 0x5b9   :  { %7665 = vmatpush1.msra.mxu1 %v21360_v50  ;;  %7537 = vmatprep.subr.mxu0 %v21385_v11  ;;  %v21390_v11 = vld [vmem:[#allocation238_spill] sm:$0xff] }
 0x5ba   :  { %7667 = vmatprep.subr.mxu1 %v21361_v0  ;;  %7540 = vmatpush1.msra.mxu0 %v21386_v55  ;;  %v21391_v55 = vld [vmem:[#allocation242_spill] sm:$0xff] }
 0x5bb   :  { %7669 = vmatpush1.msra.mxu1 %v21362_v24  ;;  %7702 = vmatprep.mubr.f32.mxu1 %v20373_v28 }
 0x5bc   :  { %7543 = vmatprep.subr.mxu0 %v21387_v6  ;;  %7706 = vmatmul.mubr.f32.vlgmr.msra.gmra.mxu1 %v17484_v35  ;;  %v21392_v6 = vld [vmem:[#allocation245_spill] sm:$0xff]  ;;  %v21393_v35 = vld [vmem:[#allocation248_spill] sm:$0xff] }
 0x5bd   :  { %7881 = vmatprep.subr.mxu1 %v20835_v31  ;;  %7546 = vmatpush1.msra.mxu0 %v21388_v43  ;;  %v21394_v43 = vld [vmem:[#allocation251_spill] sm:$0xff] }
 0x5be   :  { %7883 = vmatpush1.msra.mxu1 %v20837_v26  ;;  %7549 = vmatprep.subr.mxu0 %v21389_v49  ;;  %v21424_v49 = vld [vmem:[#allocation51_spill] sm:$0xff] }
 0x5bf   :  { %7885 = vmatprep.subr.mxu1 %v20839_v39  ;;  %7552 = vmatpush1.msra.mxu0 %v21390_v11  ;;  %v21395_v11 = vld [vmem:[#allocation148_spill] sm:$0xff] }
 0x5c0   :  { %7887 = vmatpush1.msra.mxu1 %v20841_v63  ;;  %7555 = vmatprep.subr.mxu0 %v21391_v55  ;;  %v21396_v55 = vld [vmem:[#allocation155_spill] sm:$0xff] }
 0x5c1   :  { %7889 = vmatprep.subr.mxu1 %v21315_v40  ;;  %7558 = vmatpush1.msra.mxu0 %v21392_v6  ;;  %v21397_v6 = vld [vmem:[#allocation158_spill] sm:$0xff] }
 0x5c2   :  { %7891 = vmatpush1.msra.mxu1 %v21317_v2  ;;  %7561 = vmatprep.subr.mxu0 %v21393_v35  ;;  %v21398_v35 = vld [vmem:[#allocation161_spill] sm:$0xff] }
 0x5c3   :  { %7893 = vmatprep.subr.mxu1 %v21319_v42  ;;  %7564 = vmatpush1.msra.mxu0 %v21394_v43  ;;  %v21399_v43 = vld [vmem:[#allocation164_spill] sm:$0xff] }
 0x5c4   :  { %7597 = vmatprep.mubr.f32.mxu0 %v20373_v28  ;;  %7895 = vmatpush1.msra.mxu1 %v21321_v56 }
 0x5c5   :  { %7600 = vmatmul.mubr.f32.vlgmr.msra.gmra.mxu0 %v17477_v10  ;;  %7715 = vmatprep.subr.mxu0 %v21395_v11  ;;  %v21400_v10 = vld [vmem:[#allocation167_spill] sm:$0xff] }
 0x5c6   :  { %7897 = vmatprep.subr.mxu1 %v21323_v29  ;;  %7719 = vmatpush1.msra.mxu0 %v21396_v55  ;;  %v21401_v11 = vld [vmem:[#allocation171_spill] sm:$0xff]  ;;  %v21402_v55 = vld [vmem:[#allocation173_spill] sm:$0xff] }
 0x5c7   :  { %7899 = vmatpush1.msra.mxu1 %v21325_v8  ;;  %7723 = vmatprep.subr.mxu0 %v21397_v6  ;;  %v21403_v6 = vld [vmem:[#allocation176_spill] sm:$0xff] }
 0x5c8   :  { %7901 = vmatprep.subr.mxu1 %v21327_v41  ;;  %7727 = vmatpush1.msra.mxu0 %v21398_v35  ;;  %v21404_v35 = vld [vmem:[#allocation180_spill] sm:$0xff] }
 0x5c9   :  { %7903 = vmatpush1.msra.mxu1 %v21329_v47  ;;  %7731 = vmatprep.subr.mxu0 %v21399_v43  ;;  %v21405_v43 = vld [vmem:[#allocation183_spill] sm:$0xff] }
 0x5ca   :  { %7905 = vmatprep.subr.mxu1 %v21331_v54  ;;  %7735 = vmatpush1.msra.mxu0 %v21400_v10  ;;  %v21406_v10 = vld [vmem:[#allocation186_spill] sm:$0xff] }
 0x5cb   :  { %7907 = vmatpush1.msra.mxu1 %v21333_v48  ;;  %7739 = vmatprep.subr.mxu0 %v21401_v11  ;;  %v21407_v11 = vld [vmem:[#allocation189_spill] sm:$0xff] }
 0x5cc   :  { %7909 = vmatprep.subr.mxu1 %v21335_v34  ;;  %7743 = vmatpush1.msra.mxu0 %v21402_v55  ;;  %v21408_v55 = vld [vmem:[#allocation192_spill] sm:$0xff] }
 0x5cd   :  { %7911 = vmatpush1.msra.mxu1 %v21337_v5  ;;  %7747 = vmatprep.subr.mxu0 %v21403_v6  ;;  %v21409_v6 = vld [vmem:[#allocation198_spill] sm:$0xff] }
 0x5ce   :  { %7913 = vmatprep.subr.mxu1 %v21339_v36  ;;  %7751 = vmatpush1.msra.mxu0 %v21404_v35  ;;  %v21410_v35 = vld [vmem:[#allocation201_spill] sm:$0xff] }
 0x5cf   :  { %7915 = vmatpush1.msra.mxu1 %v21341_v22  ;;  %7755 = vmatprep.subr.mxu0 %v21405_v43  ;;  %v21411_v43 = vld [vmem:[#allocation207_spill] sm:$0xff] }
 0x5d0   :  { %7917 = vmatprep.subr.mxu1 %v21343_v61  ;;  %7759 = vmatpush1.msra.mxu0 %v21406_v10  ;;  %v21412_v10 = vld [vmem:[#allocation217_spill] sm:$0xff] }
 0x5d1   :  { %7919 = vmatpush1.msra.mxu1 %v21345_v27  ;;  %7763 = vmatprep.subr.mxu0 %v21407_v11  ;;  %v21413_v11 = vld [vmem:[#allocation220_spill] sm:$0xff] }
 0x5d2   :  { %7921 = vmatprep.subr.mxu1 %v21347_v58  ;;  %7767 = vmatpush1.msra.mxu0 %v21408_v55  ;;  %v21414_v55 = vld [vmem:[#allocation224_spill] sm:$0xff] }
 0x5d3   :  { %7923 = vmatpush1.msra.mxu1 %v21349_v37  ;;  %7771 = vmatprep.subr.mxu0 %v21409_v6  ;;  %v21415_v6 = vld [vmem:[#allocation228_spill] sm:$0xff] }
 0x5d4   :  { %7925 = vmatprep.subr.mxu1 %v21351_v14  ;;  %7775 = vmatpush1.msra.mxu0 %v21410_v35  ;;  %v21416_v35 = vld [vmem:[#allocation231_spill] sm:$0xff] }
 0x5d5   :  { %7927 = vmatpush1.msra.mxu1 %v21353_v23  ;;  %7779 = vmatprep.subr.mxu0 %v21411_v43  ;;  %v21417_v43 = vld [vmem:[#allocation234_spill] sm:$0xff] }
 0x5d6   :  { %7929 = vmatprep.subr.mxu1 %v21355_v30  ;;  %7783 = vmatpush1.msra.mxu0 %v21412_v10  ;;  %v21418_v10 = vld [vmem:[#allocation237_spill] sm:$0xff] }
 0x5d7   :  { %7931 = vmatpush1.msra.mxu1 %v21356_v13  ;;  %7787 = vmatprep.subr.mxu0 %v21413_v11  ;;  %v21422_v11 = vld [vmem:[#allocation42_spill] sm:$0xff] }
 0x5d8   :  { %7933 = vmatprep.subr.mxu1 %v21357_v60  ;;  %7791 = vmatpush1.msra.mxu0 %v21414_v55  ;;  %v21419_v55 = vld [vmem:[#allocation241_spill] sm:$0xff] }
 0x5d9   :  { %7935 = vmatpush1.msra.mxu1 %v21358_v4  ;;  %7795 = vmatprep.subr.mxu0 %v21415_v6  ;;  %v21420_v6 = vld [vmem:[#allocation244_spill] sm:$0xff] }
 0x5da   :  { %7937 = vmatprep.subr.mxu1 %v21359_v62  ;;  %7799 = vmatpush1.msra.mxu0 %v21416_v35  ;;  %v21421_v35 = vld [vmem:[#allocation247_spill] sm:$0xff] }
 0x5db   :  { %7939 = vmatpush1.msra.mxu1 %v21360_v50  ;;  %7803 = vmatprep.subr.mxu0 %v21417_v43  ;;  %v21423_v43 = vld [vmem:[#allocation250_spill] sm:$0xff]  ;;  %v21431_v50 = vld [vmem:[#allocation259_spill] sm:$0xff] }
 0x5dc   :  { %7941 = vmatprep.subr.mxu1 %v21361_v0  ;;  %7807 = vmatpush1.msra.mxu0 %v21418_v10  ;;  %v21425_v10 = vld [vmem:[#allocation253_spill] sm:$0xff] }
 0x5dd   :  { %7943 = vmatpush1.msra.mxu1 %v21362_v24  ;;  %7976 = vmatprep.mubr.f32.mxu1 %v20373_v28  ;;  %v21427_v24 = vld [vmem:[#allocation255_spill] sm:$0xff]  ;;  %v21429_v0 = vld [vmem:[#allocation257_spill] sm:$0xff] }
 0x5de   :  { %7811 = vmatprep.subr.mxu0 %v21419_v55  ;;  %7978 = vmatmul.mubr.f32.vlgmr.msra.gmra.mxu1 %v17474_v59  ;;  %v21428_v55 = vld [vmem:[#allocation57_spill] sm:$0xff] }
 0x5df   :  { %7815 = vmatpush1.msra.mxu0 %v21420_v6  ;;  %7872 = vmatprep.mubr.f32.mxu0 %v20373_v28  ;;  %v21430_v6 = vld [vmem:[#allocation60_spill] sm:$0xff] }
 0x5e0   :  { %7819 = vmatprep.subr.mxu0 %v21421_v35  ;;  %8134 = vmatprep.subr.mxu1 %v21422_v11  ;;  %v21432_v35 = vld [vmem:[#allocation63_spill] sm:$0xff] }
 0x5e1   :  { %7823 = vmatpush1.msra.mxu0 %v21423_v43  ;;  %8140 = vmatpush1.msra.mxu1 %v21424_v49  ;;  %v21433_v43 = vld [vmem:[#allocation66_spill] sm:$0xff]  ;;  %v21434_v49 = vld [vmem:[#allocation69_spill] sm:$0xff] }
 0x5e2   :  { %7827 = vmatprep.subr.mxu0 %v21425_v10  ;;  %8146 = vmatprep.subr.mxu1 %v21426_v32  ;;  %v21435_v32 = vld [vmem:[#allocation72_spill] sm:$0xff]  ;;  %v21469_v10 = vld [vmem:[#allocation14_spill] sm:$0xff] }
 0x5e3   :  { %7831 = vmatpush1.msra.mxu0 %v21427_v24  ;;  %8152 = vmatpush1.msra.mxu1 %v21428_v55  ;;  %v21436_v55 = vld [vmem:[#allocation75_spill] sm:$0xff]  ;;  %v21467_v24 = vld [vmem:[#allocation108_spill] sm:$0xff] }
 0x5e4   :  { %7835 = vmatprep.subr.mxu0 %v21429_v0  ;;  %8158 = vmatprep.subr.mxu1 %v21430_v6  ;;  %v21437_v6 = vld [vmem:[#allocation78_spill] sm:$0xff] }
 0x5e5   :  { %7839 = vmatpush1.msra.mxu0 %v21431_v50  ;;  %8164 = vmatpush1.msra.mxu1 %v21432_v35  ;;  %v21438_v35 = vld [vmem:[#allocation82_spill] sm:$0xff]  ;;  %v21460_v50 = vld [vmem:[#allocation139_spill] sm:$0xff] }
 0x5e6   :  { %7874 = vmatmul.mubr.f32.vlgmr.msra.gmra.mxu0 %v17474_v59  ;;  %8170 = vmatprep.subr.mxu1 %v21433_v43  ;;  %v21439_v59 = vld [vmem:[#allocation85_spill] sm:$0xff]  ;;  %v21458_v43 = vld [vmem:[#allocation138_spill] sm:$0xff] }
 0x5e7   :  { %8176 = vmatpush1.msra.mxu1 %v21434_v49  ;;  %8022 = vmatprep.subr.mxu0 %v20787_v18  ;;  %v21440_v49 = vld [vmem:[#allocation88_spill] sm:$0xff]  ;;  %v21465_v0 = vld [vmem:[#allocation102_spill] sm:$0xff] }
 0x5e8   :  { %8182 = vmatprep.subr.mxu1 %v21435_v32  ;;  %8024 = vmatpush1.msra.mxu0 %v20675_v15  ;;  %v21441_v32 = vld [vmem:[#allocation95_spill] sm:$0xff] }
 0x5e9   :  { %8188 = vmatpush1.msra.mxu1 %v21436_v55  ;;  %8026 = vmatprep.subr.mxu0 %v20677_v46  ;;  %v21442_v55 = vld [vmem:[#allocation99_spill] sm:$0xff] }
 0x5ea   :  { %8194 = vmatprep.subr.mxu1 %v21437_v6  ;;  %8028 = vmatpush1.msra.mxu0 %v20679_v51  ;;  %v21443_v6 = vld [vmem:[#allocation112_spill] sm:$0xff] }
 0x5eb   :  { %8200 = vmatpush1.msra.mxu1 %v21438_v35  ;;  %8030 = vmatprep.subr.mxu0 %v20681_v38  ;;  %v21444_v35 = vld [vmem:[#allocation115_spill] sm:$0xff] }
 0x5ec   :  { %8206 = vmatprep.subr.mxu1 %v21439_v59  ;;  %8032 = vmatpush1.msra.mxu0 %v20683_v17  ;;  %v21445_v59 = vld [vmem:[#allocation118_spill] sm:$0xff] }
 0x5ed   :  { %8212 = vmatpush1.msra.mxu1 %v21440_v49  ;;  %8034 = vmatprep.subr.mxu0 %v20685_v12  ;;  %v21446_v49 = vld [vmem:[#allocation121_spill] sm:$0xff] }
 0x5ee   :  { %8218 = vmatprep.subr.mxu1 %v21441_v32  ;;  %8036 = vmatpush1.msra.mxu0 %v20687_v20  ;;  %v21447_v32 = vld [vmem:[#allocation124_spill] sm:$0xff] }
 0x5ef   :  { %8224 = vmatpush1.msra.mxu1 %v21442_v55  ;;  %8038 = vmatprep.subr.mxu0 %v20689_v16  ;;  %v21448_v55 = vld [vmem:[#allocation126_spill] sm:$0xff] }
 0x5f0   :  { %8230 = vmatprep.subr.mxu1 %v21443_v6  ;;  %8040 = vmatpush1.msra.mxu0 %v20691_v25  ;;  %v21449_v6 = vld [vmem:[#allocation128_spill] sm:$0xff] }
 0x5f1   :  { %8236 = vmatpush1.msra.mxu1 %v21444_v35  ;;  %8042 = vmatprep.subr.mxu0 %v20693_v19  ;;  %v21450_v35 = vld [vmem:[#allocation130_spill] sm:$0xff] }
 0x5f2   :  { %8242 = vmatprep.subr.mxu1 %v21445_v59  ;;  %8044 = vmatpush1.msra.mxu0 %v20745_v57  ;;  %v21451_v59 = vld [vmem:[#allocation132_spill] sm:$0xff] }
 0x5f3   :  { %8248 = vmatpush1.msra.mxu1 %v21446_v49  ;;  %8046 = vmatprep.subr.mxu0 %v20747_v45  ;;  %v21452_v49 = vld [vmem:[#allocation133_spill] sm:$0xff] }
 0x5f4   :  { %8254 = vmatprep.subr.mxu1 %v21447_v32  ;;  %8048 = vmatpush1.msra.mxu0 %v20749_v21  ;;  %v21453_v32 = vld [vmem:[#allocation134_spill] sm:$0xff] }
 0x5f5   :  { %8260 = vmatpush1.msra.mxu1 %v21448_v55  ;;  %8050 = vmatprep.subr.mxu0 %v20751_v33  ;;  %v21454_v55 = vld [vmem:[#allocation135_spill] sm:$0xff] }
 0x5f6   :  { %8266 = vmatprep.subr.mxu1 %v21449_v6  ;;  %8052 = vmatpush1.msra.mxu0 %v20753_v1  ;;  %v21455_v6 = vld [vmem:[#allocation136_spill] sm:$0xff]  ;;  %v6609_v4 = vpop.f32.mrf.mxu1 }
 0x5f7   :  { %8272 = vmatpush1.msra.mxu1 %v21450_v35  ;;  %8054 = vmatprep.subr.mxu0 %v20755_v9  ;;  %v21456_v35 = vld [vmem:[#allocation137_spill] sm:$0xff] }
 0x5f8   :  { %8278 = vmatprep.subr.mxu1 %v21451_v59  ;;  %8056 = vmatpush1.msra.mxu0 %v20757_v53  ;;  %v21457_v59 = vld [vmem:[#allocation81_spill] sm:$0xff]  ;;  %v6611_v13 = vpop.f32.mrf.mxu1 }
 0x5f9   :  { %8284 = vmatpush1.msra.mxu1 %v21452_v49  ;;  %8058 = vmatprep.subr.mxu0 %v20759_v7  ;;  %v21459_v49 = vld [vmem:[#allocation84_spill] sm:$0xff] }
 0x5fa   :  { %8290 = vmatprep.subr.mxu1 %v21453_v32  ;;  %8060 = vmatpush1.msra.mxu0 %v20761_v44  ;;  %v21461_v32 = vld [vmem:[#allocation87_spill] sm:$0xff] }
 0x5fb   :  { %8296 = vmatpush1.msra.mxu1 %v21454_v55  ;;  %8062 = vmatprep.subr.mxu0 %v20763_v3  ;;  %v21462_v55 = vld [vmem:[#allocation91_spill] sm:$0xff] }
 0x5fc   :  { %8302 = vmatprep.subr.mxu1 %v21455_v6  ;;  %8064 = vmatpush1.msra.mxu0 %v20765_v52  ;;  %v21463_v6 = vld [vmem:[#allocation94_spill] sm:$0xff] }
 0x5fd   :  { %8308 = vmatpush1.msra.mxu1 %v21456_v35  ;;  %8066 = vmatprep.subr.mxu0 %v21457_v59  ;;  %v21464_v35 = vld [vmem:[#allocation98_spill] sm:$0xff] }
 0x5fe   :  { %8314 = vmatprep.subr.mxu1 %v21458_v43  ;;  %8068 = vmatpush1.msra.mxu0 %v21459_v49  ;;  %v21466_v43 = vld [vmem:[#allocation105_spill] sm:$0xff]  ;;  %v6377_v11 = vpop.f32.mrf.mxu0 }
 0x5ff   :  { %8320 = vmatpush1.msra.mxu1 %v21460_v50  ;;  %8070 = vmatprep.subr.mxu0 %v21461_v32  ;;  %v21468_v50 = vld [vmem:[#allocation111_spill] sm:$0xff]  ;;  %v6610_v58 = vadd.f32 %v6609_v4, %v6377_v11 }
 0x600   :  { %8353 = vmatprep.mubr.f32.mxu1 %v20373_v28  ;;  %8499 = vmatprep.subr.mxu1 %v20787_v18  ;;  %v6379_v62 = vpop.f32.mrf.mxu0 }
 0x601   :  { %8072 = vmatpush1.msra.mxu0 %v21462_v55  ;;  %8117 = vmatprep.mubr.f32.mxu0 %v20373_v28  ;;  %v6612_v23 = vadd.f32 %v6611_v13, %v6379_v62 }
 0x602   :  { %8074 = vmatprep.subr.mxu0 %v21463_v6 }
 0x603   :  { %8076 = vmatpush1.msra.mxu0 %v21464_v35 }
 0x604   :  { %8078 = vmatprep.subr.mxu0 %v21465_v0 }
 0x605   :  { %8080 = vmatpush1.msra.mxu0 %v21466_v43 }
 0x606   :  { %8082 = vmatprep.subr.mxu0 %v21467_v24 }
 0x607   :  { %8084 = vmatpush1.msra.mxu0 %v21468_v50 }
 0x608   :  { %8363 = vmatprep.subr.mxu0 %v21469_v10 }
 0x616   :  { %v6852_v14 = vpop.f32.mrf.mxu1 }
 0x618   :  { %v6854_v22 = vpop.f32.mrf.mxu1 }
 0x61f   :  { %v6746_v60 = vpop.f32.mrf.mxu0 }
 0x620   :  { %v6747_v61 = vadd.f32 %v6746_v60, %v6610_v58  ;;  %v21470_v60 = vld [vmem:[#allocation13_spill] sm:$0xff] }
 0x621   :  { %v6748_v30 = vpop.f32.mrf.mxu0 }
 0x622   :  { %v6749_v27 = vadd.f32 %v6748_v30, %v6612_v23  ;;  %v6853_v48 = vadd.f32 %v6852_v14, %v6747_v61  ;;  %v21471_v14 = vld [vmem:[#allocation15_spill] sm:$0xff] }
 0x624   :  { %v6855_v5 = vadd.f32 %v6854_v22, %v6749_v27 }
 0x638   :  { %v7124_v34 = vpop.f32.mrf.mxu1 }
 0x63a   :  { %v7126_v41 = vpop.f32.mrf.mxu1 }
 0x641   :  { %v7020_v37 = vpop.f32.mrf.mxu0 }
 0x642   :  { %v7021_v10 = vadd.f32 %v7020_v37, %v6853_v48 }
 0x643   :  { %v7022_v36 = vpop.f32.mrf.mxu0 }
 0x644   :  { %v7023_v54 = vadd.f32 %v7022_v36, %v6855_v5  ;;  %v7125_v56 = vadd.f32 %v7124_v34, %v7021_v10  ;;  %v21472_v10 = vld [vmem:[#allocation16_spill] sm:$0xff] }
 0x646   :  { %v7127_v8 = vadd.f32 %v7126_v41, %v7023_v54  ;;  %v7988_v13 = vrot.slane %v7125_v56, 5 }
 0x648   :  { %v7989_v62 = vrot.slane %v7127_v8, 5  ;;  %v7996_v61 = vadd.f32 %v7988_v13, %v21471_v14  ;;  %v21582_v14 = vld [vmem:[#allocation263_spill] sm:$0xff] }
 0x64a   :  { %v7997_v30 = vadd.f32 %v7989_v62, %v21470_v60  ;;  %v21584_v60 = vld [vmem:[#allocation264_spill] sm:$0xff] }
 0x64c   :  { %15082 = vtanh.f32 %v7997_v30 }
 0x64d   :  { %15084 = vtanh.f32 %v7996_v61  ;;  %v21474_v61 = vld [vmem:[#allocation24_spill] sm:$0xff] }
 0x659   :  { %v15083_v62 = vpop.eup %15082 }
 0x65a   :  { %v7464_v42 = vpop.f32.mrf.mxu1  ;;  %v15085_v13 = vpop.eup %15084 }
 0x65c   :  { %v7466_v4 = vpop.f32.mrf.mxu1 }
 0x663   :  { %v7232_v47 = vpop.f32.mrf.mxu0 }
 0x664   :  { %v7465_v40 = vadd.f32 %v7464_v42, %v7232_v47 }
 0x665   :  { %v7234_v29 = vpop.f32.mrf.mxu0 }
 0x666   :  { %v7467_v23 = vadd.f32 %v7466_v4, %v7234_v29  ;;  %v8006_v4 = vmul.f32 0.5, %v15083_v62 }
 0x67c   :  { %v7707_v27 = vpop.f32.mrf.mxu1 }
 0x67e   :  { %v7709_v36 = vpop.f32.mrf.mxu1 }
 0x685   :  { %v7601_v2 = vpop.f32.mrf.mxu0 }
 0x686   :  { %v7602_v58 = vadd.f32 %v7601_v2, %v7465_v40 }
 0x687   :  { %v7603_v11 = vpop.f32.mrf.mxu0 }
 0x688   :  { %v7604_v22 = vadd.f32 %v7603_v11, %v7467_v23  ;;  %v7708_v37 = vadd.f32 %v7707_v27, %v7602_v58  ;;  %v21473_v11 = vld [vmem:[#allocation17_spill] sm:$0xff]  ;;  %v8004_v23 = vmul.f32 0.5, %v15085_v13  ;;  %v8007_v58 = vadd.f32 0.5, %v8006_v4  ;;  %v21476_v13 = vld [vmem:[#allocation18_spill] sm:$0xff] }
 0x689   :  { %v21477_v4 = vld [vmem:[#allocation21_spill] sm:$0xff] }
 0x68a   :  { %v7710_v34 = vadd.f32 %v7709_v36, %v7604_v22  ;;  %v8005_v27 = vadd.f32 0.5, %v8004_v23  ;;  %v8011_v22 = vrot.slane %v21474_v61, 7  ;;  %v21479_v23 = vld [vmem:[#allocation25_spill] sm:$0xff]  ;;  %v21482_v61 = vld [vmem:[#allocation34_spill] sm:$0xff] }
 0x68c   :  { %v8013_v36 = vmul.f32 %v8011_v22, %v8007_v58  ;;  %v21480_v58 = vld [vmem:[#allocation28_spill] sm:$0xff]  ;;  %v21483_v22 = vld [vmem:[#allocation37_spill] sm:$0xff] }
 0x69e   :  { %v7979_v8 = vpop.f32.mrf.mxu1 }
 0x6a0   :  { %v7981_v56 = vpop.f32.mrf.mxu1 }
 0x6a6   :  { %v7875_v5 = vpop.f32.mrf.mxu0 }
 0x6a7   :  { %v7876_v48 = vadd.f32 %v7875_v5, %v7708_v37 }
 0x6a8   :  { %v7877_v41 = vpop.f32.mrf.mxu0 }
 0x6a9   :  { %v7980_v47 = vadd.f32 %v7979_v8, %v7876_v48  ;;  %v7878_v42 = vadd.f32 %v7877_v41, %v7710_v34 }
 0x6ab   :  { %v7990_v54 = vrot.slane %v7980_v47, 5  ;;  %v7982_v2 = vadd.f32 %v7981_v56, %v7878_v42 }
 0x6ad   :  { %v7998_v29 = vadd.f32 %v7990_v54, %v21472_v10  ;;  %v7991_v40 = vrot.slane %v7982_v2, 5  ;;  %v21580_v10 = vld [vmem:[#allocation262_spill] sm:$0xff] }
 0x6af   :  { %15086 = vtanh.f32 %v7998_v29  ;;  %v7999_v30 = vadd.f32 %v7991_v40, %v21473_v11  ;;  %v21578_v11 = vld [vmem:[#allocation261_spill] sm:$0xff] }
 0x6b1   :  { %15088 = vtanh.f32 %v7999_v30  ;;  %v21478_v30 = vld [vmem:[#allocation23_spill] sm:$0xff] }
 0x6bc   :  { %v15087_v37 = vpop.eup %15086 }
 0x6bd   :  { %v8014_v5 = vmul.f32 %v15087_v37, %v8005_v27  ;;  %v21481_v27 = vld [vmem:[#allocation31_spill] sm:$0xff]  ;;  %v21484_v37 = vld [vmem:[#allocation40_spill] sm:$0xff] }
 0x6be   :  { %v15089_v34 = vpop.eup %15088 }
 0x6bf   :  { %v17899_v48 = vadd.f32 %v8014_v5, %v8013_v36  ;;  %v8008_v8 = vmul.f32 0.5, %v15089_v34  ;;  %v21485_v36 = vld [vmem:[#allocation44_spill] sm:$0xff]  ;;  %v21486_v5 = vld [vmem:[#allocation46_spill] sm:$0xff]  ;;  %v21487_v34 = vld [vmem:[#allocation49_spill] sm:$0xff] }
 0x6c1   :  { %21475 = vst [vmem:[#allocation26_spill] sm:$0xff] %v17899_v48  ;;  %15090 = vtanh.f32 %v17899_v48  ;;  %v8009_v41 = vadd.f32 0.5, %v8008_v8  ;;  %v21488_v8 = vld [vmem:[#allocation53_spill] sm:$0xff]  ;;  %v21576_v48 = vld [vmem:[#allocation260_spill] sm:$0xff] }
 0x6ce   :  { %v15091_v47 = vpop.eup %15090 }
 0x6cf   :  { %v8017_v42 = vmul.f32 %v15091_v47, %v8009_v41  ;;  %v21489_v41 = vld [vmem:[#allocation59_spill] sm:$0xff]  ;;  %v21490_v47 = vld [vmem:[#allocation62_spill] sm:$0xff] }
 0x6d1   :  { %v8019_v54 = vrot.slane %v8017_v42, 3  ;;  %v21491_v42 = vld [vmem:[#allocation67_spill] sm:$0xff] }
 0x6d3   :  { %v17902_v56 = vand.u32 4294901760, %v8019_v54 }
 0x6d5   :  { %v17905_v29 = vsub.f32 %v8019_v54, %v17902_v56  ;;  %8355 = vmatmul.mubr.f32.vlgmr.msra.gmra.mxu1 %v17902_v56  ;;  %v21492_v54 = vld [vmem:[#allocation76_spill] sm:$0xff] }
 0x6d6   :  { %8501 = vmatpush1.msra.mxu1 %v20675_v15  ;;  %8594 = vmatprep.mubr.f32.mxu1 %v20373_v28 }
 0x6d7   :  { %8503 = vmatprep.subr.mxu1 %v20677_v46  ;;  %v17912_v2 = vand.u32 4294901760, %v17905_v29 }
 0x6d8   :  { %8505 = vmatpush1.msra.mxu1 %v20679_v51 }
 0x6d9   :  { %8507 = vmatprep.subr.mxu1 %v20681_v38  ;;  %v8121_v40 = vsub.f32 %v17905_v29, %v17912_v2 }
 0x6da   :  { %8509 = vmatpush1.msra.mxu1 %v20683_v17 }
 0x6db   :  { %8511 = vmatprep.subr.mxu1 %v20685_v12  ;;  %v17920_v62 = vand.u32 4294901760, %v8121_v40  ;;  %v21493_v40 = vld [vmem:[#allocation80_spill] sm:$0xff] }
 0x6dc   :  { %8513 = vmatpush1.msra.mxu1 %v20687_v20 }
 0x6dd   :  { %8515 = vmatprep.subr.mxu1 %v20689_v16  ;;  %8123 = vmatmul.mubr.f32.vlgmr.msra.gmra.mxu0 %v17920_v62 }
 0x6de   :  { %8366 = vmatpush1.msra.mxu0 %v21476_v13  ;;  %8517 = vmatpush1.msra.mxu1 %v20691_v25  ;;  %v21574_v13 = vld [vmem:[#allocation258_spill] sm:$0xff] }
 0x6df   :  { %8369 = vmatprep.subr.mxu0 %v21477_v4  ;;  %8519 = vmatprep.subr.mxu1 %v20693_v19  ;;  %v21572_v4 = vld [vmem:[#allocation256_spill] sm:$0xff] }
 0x6e0   :  { %8372 = vmatpush1.msra.mxu0 %v21478_v30  ;;  %8521 = vmatpush1.msra.mxu1 %v20745_v57  ;;  %v21570_v30 = vld [vmem:[#allocation254_spill] sm:$0xff] }
 0x6e1   :  { %8375 = vmatprep.subr.mxu0 %v21479_v23  ;;  %8523 = vmatprep.subr.mxu1 %v20747_v45  ;;  %v21568_v23 = vld [vmem:[#allocation252_spill] sm:$0xff] }
 0x6e2   :  { %8378 = vmatpush1.msra.mxu0 %v21480_v58  ;;  %8525 = vmatpush1.msra.mxu1 %v20749_v21  ;;  %v21566_v58 = vld [vmem:[#allocation249_spill] sm:$0xff] }
 0x6e3   :  { %8381 = vmatprep.subr.mxu0 %v21481_v27  ;;  %8527 = vmatprep.subr.mxu1 %v20751_v33  ;;  %v21564_v27 = vld [vmem:[#allocation246_spill] sm:$0xff] }
 0x6e4   :  { %8384 = vmatpush1.msra.mxu0 %v21482_v61  ;;  %8529 = vmatpush1.msra.mxu1 %v20753_v1  ;;  %v21562_v61 = vld [vmem:[#allocation243_spill] sm:$0xff] }
 0x6e5   :  { %8387 = vmatprep.subr.mxu0 %v21483_v22  ;;  %8531 = vmatprep.subr.mxu1 %v20755_v9  ;;  %v21542_v22 = vld [vmem:[#allocation191_spill] sm:$0xff] }
 0x6e6   :  { %8390 = vmatpush1.msra.mxu0 %v21484_v37  ;;  %8533 = vmatpush1.msra.mxu1 %v20757_v53  ;;  %v21540_v37 = vld [vmem:[#allocation188_spill] sm:$0xff] }
 0x6e7   :  { %8393 = vmatprep.subr.mxu0 %v21485_v36  ;;  %8535 = vmatprep.subr.mxu1 %v20759_v7  ;;  %v21539_v36 = vld [vmem:[#allocation125_spill] sm:$0xff] }
 0x6e8   :  { %8396 = vmatpush1.msra.mxu0 %v21486_v5  ;;  %8537 = vmatpush1.msra.mxu1 %v20761_v44  ;;  %v21537_v5 = vld [vmem:[#allocation122_spill] sm:$0xff] }
 0x6e9   :  { %8399 = vmatprep.subr.mxu0 %v21487_v34  ;;  %8539 = vmatprep.subr.mxu1 %v20763_v3  ;;  %v21535_v34 = vld [vmem:[#allocation119_spill] sm:$0xff] }
 0x6ea   :  { %8402 = vmatpush1.msra.mxu0 %v21488_v8  ;;  %8541 = vmatpush1.msra.mxu1 %v20765_v52  ;;  %v21494_v8 = vld [vmem:[#allocation83_spill] sm:$0xff] }
 0x6eb   :  { %8405 = vmatprep.subr.mxu0 %v21489_v41  ;;  %8543 = vmatprep.subr.mxu1 %v21457_v59  ;;  %v21495_v41 = vld [vmem:[#allocation86_spill] sm:$0xff] }
 0x6ec   :  { %8408 = vmatpush1.msra.mxu0 %v21490_v47  ;;  %8545 = vmatpush1.msra.mxu1 %v21459_v49  ;;  %v21496_v47 = vld [vmem:[#allocation90_spill] sm:$0xff] }
 0x6ed   :  { %8411 = vmatprep.subr.mxu0 %v21491_v42  ;;  %8547 = vmatprep.subr.mxu1 %v21461_v32  ;;  %v21497_v42 = vld [vmem:[#allocation93_spill] sm:$0xff] }
 0x6ee   :  { %8414 = vmatpush1.msra.mxu0 %v21492_v54  ;;  %8549 = vmatpush1.msra.mxu1 %v21462_v55  ;;  %v21498_v54 = vld [vmem:[#allocation97_spill] sm:$0xff] }
 0x6ef   :  { %8417 = vmatprep.subr.mxu0 %v21493_v40  ;;  %8551 = vmatprep.subr.mxu1 %v21463_v6  ;;  %v21499_v40 = vld [vmem:[#allocation101_spill] sm:$0xff] }
 0x6f0   :  { %8420 = vmatpush1.msra.mxu0 %v21494_v8  ;;  %8553 = vmatpush1.msra.mxu1 %v21464_v35  ;;  %v21505_v8 = vld [vmem:[#allocation120_spill] sm:$0xff] }
 0x6f1   :  { %8423 = vmatprep.subr.mxu0 %v21495_v41  ;;  %8555 = vmatprep.subr.mxu1 %v21465_v0  ;;  %v21500_v41 = vld [vmem:[#allocation104_spill] sm:$0xff] }
 0x6f2   :  { %8426 = vmatpush1.msra.mxu0 %v21496_v47  ;;  %8557 = vmatpush1.msra.mxu1 %v21466_v43  ;;  %v21501_v47 = vld [vmem:[#allocation107_spill] sm:$0xff] }
 0x6f3   :  { %8429 = vmatprep.subr.mxu0 %v21497_v42  ;;  %8559 = vmatprep.subr.mxu1 %v21467_v24  ;;  %v21502_v42 = vld [vmem:[#allocation110_spill] sm:$0xff] }
 0x6f4   :  { %8432 = vmatpush1.msra.mxu0 %v21498_v54  ;;  %8561 = vmatpush1.msra.mxu1 %v21468_v50  ;;  %v21503_v54 = vld [vmem:[#allocation114_spill] sm:$0xff] }
 0x6f5   :  { %8435 = vmatprep.subr.mxu0 %v21499_v40  ;;  %8598 = vmatmul.mubr.f32.vlgmr.msra.gmra.mxu1 %v17912_v2  ;;  %v21504_v40 = vld [vmem:[#allocation117_spill] sm:$0xff] }
 0x6f6   :  { %8773 = vmatprep.subr.mxu1 %v20787_v18  ;;  %8438 = vmatpush1.msra.mxu0 %v21500_v41  ;;  %v21506_v41 = vld [vmem:[#allocation123_spill] sm:$0xff] }
 0x6f7   :  { %8775 = vmatpush1.msra.mxu1 %v20675_v15  ;;  %8441 = vmatprep.subr.mxu0 %v21501_v47  ;;  %v21512_v47 = vld [vmem:[#allocation39_spill] sm:$0xff] }
 0x6f8   :  { %8777 = vmatprep.subr.mxu1 %v20677_v46  ;;  %8444 = vmatpush1.msra.mxu0 %v21502_v42  ;;  %v21507_v42 = vld [vmem:[#allocation20_spill] sm:$0xff] }
 0x6f9   :  { %8779 = vmatpush1.msra.mxu1 %v20679_v51  ;;  %8447 = vmatprep.subr.mxu0 %v21503_v54  ;;  %v21508_v54 = vld [vmem:[#allocation27_spill] sm:$0xff] }
 0x6fa   :  { %8781 = vmatprep.subr.mxu1 %v20681_v38  ;;  %8450 = vmatpush1.msra.mxu0 %v21504_v40  ;;  %v21509_v40 = vld [vmem:[#allocation30_spill] sm:$0xff] }
 0x6fb   :  { %8783 = vmatpush1.msra.mxu1 %v20683_v17  ;;  %8453 = vmatprep.subr.mxu0 %v21505_v8  ;;  %v21510_v8 = vld [vmem:[#allocation33_spill] sm:$0xff] }
 0x6fc   :  { %8785 = vmatprep.subr.mxu1 %v20685_v12  ;;  %8456 = vmatpush1.msra.mxu0 %v21506_v41  ;;  %v21511_v41 = vld [vmem:[#allocation36_spill] sm:$0xff] }
 0x6fd   :  { %8489 = vmatprep.mubr.f32.mxu0 %v20373_v28  ;;  %8787 = vmatpush1.msra.mxu1 %v20687_v20 }
 0x6fe   :  { %8492 = vmatmul.mubr.f32.vlgmr.msra.gmra.mxu0 %v17905_v29  ;;  %8607 = vmatprep.subr.mxu0 %v21507_v42  ;;  %v21513_v42 = vld [vmem:[#allocation43_spill] sm:$0xff] }
 0x6ff   :  { %8789 = vmatprep.subr.mxu1 %v20689_v16  ;;  %8611 = vmatpush1.msra.mxu0 %v21508_v54  ;;  %v21514_v54 = vld [vmem:[#allocation45_spill] sm:$0xff] }
 0x700   :  { %8791 = vmatpush1.msra.mxu1 %v20691_v25  ;;  %8615 = vmatprep.subr.mxu0 %v21509_v40  ;;  %v21515_v40 = vld [vmem:[#allocation48_spill] sm:$0xff] }
 0x701   :  { %8793 = vmatprep.subr.mxu1 %v20693_v19  ;;  %8619 = vmatpush1.msra.mxu0 %v21510_v8  ;;  %v21516_v8 = vld [vmem:[#allocation52_spill] sm:$0xff] }
 0x702   :  { %8795 = vmatpush1.msra.mxu1 %v20745_v57  ;;  %8623 = vmatprep.subr.mxu0 %v21511_v41  ;;  %v21517_v41 = vld [vmem:[#allocation55_spill] sm:$0xff] }
 0x703   :  { %8797 = vmatprep.subr.mxu1 %v20747_v45  ;;  %8627 = vmatpush1.msra.mxu0 %v21512_v47  ;;  %v21518_v47 = vld [vmem:[#allocation58_spill] sm:$0xff] }
 0x704   :  { %8799 = vmatpush1.msra.mxu1 %v20749_v21  ;;  %8631 = vmatprep.subr.mxu0 %v21513_v42  ;;  %v21519_v42 = vld [vmem:[#allocation61_spill] sm:$0xff] }
 0x705   :  { %8801 = vmatprep.subr.mxu1 %v20751_v33  ;;  %8635 = vmatpush1.msra.mxu0 %v21514_v54  ;;  %v21520_v54 = vld [vmem:[#allocation64_spill] sm:$0xff] }
 0x706   :  { %8803 = vmatpush1.msra.mxu1 %v20753_v1  ;;  %8639 = vmatprep.subr.mxu0 %v21515_v40  ;;  %v21521_v40 = vld [vmem:[#allocation70_spill] sm:$0xff] }
 0x707   :  { %8805 = vmatprep.subr.mxu1 %v20755_v9  ;;  %8643 = vmatpush1.msra.mxu0 %v21516_v8  ;;  %v21522_v8 = vld [vmem:[#allocation73_spill] sm:$0xff] }
 0x708   :  { %8807 = vmatpush1.msra.mxu1 %v20757_v53  ;;  %8647 = vmatprep.subr.mxu0 %v21517_v41  ;;  %v21523_v41 = vld [vmem:[#allocation79_spill] sm:$0xff] }
 0x709   :  { %8809 = vmatprep.subr.mxu1 %v20759_v7  ;;  %8651 = vmatpush1.msra.mxu0 %v21518_v47  ;;  %v21524_v47 = vld [vmem:[#allocation89_spill] sm:$0xff] }
 0x70a   :  { %8811 = vmatpush1.msra.mxu1 %v20761_v44  ;;  %8655 = vmatprep.subr.mxu0 %v21519_v42  ;;  %v21525_v42 = vld [vmem:[#allocation92_spill] sm:$0xff] }
 0x70b   :  { %8813 = vmatprep.subr.mxu1 %v20763_v3  ;;  %8659 = vmatpush1.msra.mxu0 %v21520_v54  ;;  %v21526_v54 = vld [vmem:[#allocation96_spill] sm:$0xff] }
 0x70c   :  { %8815 = vmatpush1.msra.mxu1 %v20765_v52  ;;  %8663 = vmatprep.subr.mxu0 %v21521_v40  ;;  %v21527_v40 = vld [vmem:[#allocation100_spill] sm:$0xff] }
 0x70d   :  { %8817 = vmatprep.subr.mxu1 %v21457_v59  ;;  %8667 = vmatpush1.msra.mxu0 %v21522_v8  ;;  %v21528_v8 = vld [vmem:[#allocation103_spill] sm:$0xff]  ;;  %v21603_v59 = vld [vmem:[#allocation153_spill] sm:$0xff] }
 0x70e   :  { %8819 = vmatpush1.msra.mxu1 %v21459_v49  ;;  %8671 = vmatprep.subr.mxu0 %v21523_v41  ;;  %v21529_v41 = vld [vmem:[#allocation106_spill] sm:$0xff]  ;;  %v21602_v49 = vld [vmem:[#allocation151_spill] sm:$0xff] }
 0x70f   :  { %8821 = vmatprep.subr.mxu1 %v21461_v32  ;;  %8675 = vmatpush1.msra.mxu0 %v21524_v47  ;;  %v21530_v47 = vld [vmem:[#allocation109_spill] sm:$0xff] }
 0x710   :  { %8823 = vmatpush1.msra.mxu1 %v21462_v55  ;;  %8679 = vmatprep.subr.mxu0 %v21525_v42  ;;  %v21533_v42 = vld [vmem:[#allocation116_spill] sm:$0xff]  ;;  %v21600_v55 = vld [vmem:[#allocation146_spill] sm:$0xff]  ;;  %v21601_v32 = vld [vmem:[#allocation149_spill] sm:$0xff] }
 0x711   :  { %8825 = vmatprep.subr.mxu1 %v21463_v6  ;;  %8683 = vmatpush1.msra.mxu0 %v21526_v54  ;;  %v21531_v54 = vld [vmem:[#allocation113_spill] sm:$0xff]  ;;  %v21599_v6 = vld [vmem:[#allocation142_spill] sm:$0xff] }
 0x712   :  { %8827 = vmatpush1.msra.mxu1 %v21464_v35  ;;  %8687 = vmatprep.subr.mxu0 %v21527_v40  ;;  %v21532_v40 = vld [vmem:[#allocation170_spill] sm:$0xff]  ;;  %v21598_v35 = vld [vmem:[#allocation239_spill] sm:$0xff] }
 0x713   :  { %8829 = vmatprep.subr.mxu1 %v21465_v0  ;;  %8691 = vmatpush1.msra.mxu0 %v21528_v8  ;;  %v21534_v8 = vld [vmem:[#allocation179_spill] sm:$0xff]  ;;  %v21597_v0 = vld [vmem:[#allocation236_spill] sm:$0xff] }
 0x714   :  { %8831 = vmatpush1.msra.mxu1 %v21466_v43  ;;  %8695 = vmatprep.subr.mxu0 %v21529_v41  ;;  %v21536_v41 = vld [vmem:[#allocation182_spill] sm:$0xff]  ;;  %v21590_v43 = vld [vmem:[#allocation267_spill] sm:$0xff] }
 0x715   :  { %8833 = vmatprep.subr.mxu1 %v21467_v24  ;;  %8699 = vmatpush1.msra.mxu0 %v21530_v47  ;;  %v21538_v47 = vld [vmem:[#allocation185_spill] sm:$0xff]  ;;  %v21588_v24 = vld [vmem:[#allocation266_spill] sm:$0xff] }
 0x716   :  { %8835 = vmatpush1.msra.mxu1 %v21468_v50  ;;  %8868 = vmatprep.mubr.f32.mxu1 %v20373_v28  ;;  %v21586_v50 = vld [vmem:[#allocation265_spill] sm:$0xff] }
 0x717   :  { %8703 = vmatprep.subr.mxu0 %v21531_v54  ;;  %8870 = vmatmul.mubr.f32.vlgmr.msra.gmra.mxu1 %v17902_v56  ;;  %v21541_v54 = vld [vmem:[#allocation127_spill] sm:$0xff] }
 0x718   :  { %8989 = vmatprep.subr.mxu1 %v21532_v40  ;;  %8707 = vmatpush1.msra.mxu0 %v21533_v42  ;;  %v21543_v40 = vld [vmem:[#allocation129_spill] sm:$0xff]  ;;  %v21544_v42 = vld [vmem:[#allocation194_spill] sm:$0xff] }
 0x719   :  { %8995 = vmatpush1.msra.mxu1 %v21534_v8  ;;  %8711 = vmatprep.subr.mxu0 %v21535_v34  ;;  %v21545_v8 = vld [vmem:[#allocation131_spill] sm:$0xff]  ;;  %v21560_v34 = vld [vmem:[#allocation240_spill] sm:$0xff] }
 0x71a   :  { %9001 = vmatprep.subr.mxu1 %v21536_v41  ;;  %8715 = vmatpush1.msra.mxu0 %v21537_v5  ;;  %v21546_v41 = vld [vmem:[#allocation197_spill] sm:$0xff]  ;;  %v21558_v5 = vld [vmem:[#allocation227_spill] sm:$0xff] }
 0x71b   :  { %9007 = vmatpush1.msra.mxu1 %v21538_v47  ;;  %8719 = vmatprep.subr.mxu0 %v21539_v36  ;;  %v21547_v36 = vld [vmem:[#allocation200_spill] sm:$0xff]  ;;  %v21556_v47 = vld [vmem:[#allocation223_spill] sm:$0xff] }
 0x71c   :  { %9013 = vmatprep.subr.mxu1 %v21540_v37  ;;  %8723 = vmatpush1.msra.mxu0 %v21541_v54  ;;  %v21548_v54 = vld [vmem:[#allocation203_spill] sm:$0xff]  ;;  %v21554_v37 = vld [vmem:[#allocation216_spill] sm:$0xff] }
 0x71d   :  { %9019 = vmatpush1.msra.mxu1 %v21542_v22  ;;  %8727 = vmatprep.subr.mxu0 %v21543_v40  ;;  %v21549_v40 = vld [vmem:[#allocation206_spill] sm:$0xff]  ;;  %v21553_v22 = vld [vmem:[#allocation147_spill] sm:$0xff] }
 0x71e   :  { %9025 = vmatprep.subr.mxu1 %v21544_v42  ;;  %8731 = vmatpush1.msra.mxu0 %v21545_v8  ;;  %v21550_v8 = vld [vmem:[#allocation210_spill] sm:$0xff]  ;;  %v21551_v42 = vld [vmem:[#allocation145_spill] sm:$0xff] }
 0x71f   :  { %8764 = vmatprep.mubr.f32.mxu0 %v20373_v28  ;;  %9031 = vmatpush1.msra.mxu1 %v21546_v41  ;;  %v21552_v41 = vld [vmem:[#allocation213_spill] sm:$0xff] }
 0x720   :  { %8766 = vmatmul.mubr.f32.vlgmr.msra.gmra.mxu0 %v17902_v56  ;;  %8877 = vmatprep.subr.mxu0 %v20835_v31 }
 0x721   :  { %9037 = vmatprep.subr.mxu1 %v21547_v36  ;;  %8879 = vmatpush1.msra.mxu0 %v20837_v26  ;;  %v21555_v36 = vld [vmem:[#allocation150_spill] sm:$0xff] }
 0x722   :  { %9043 = vmatpush1.msra.mxu1 %v21548_v54  ;;  %8881 = vmatprep.subr.mxu0 %v20839_v39  ;;  %v21557_v54 = vld [vmem:[#allocation152_spill] sm:$0xff] }
 0x723   :  { %9049 = vmatprep.subr.mxu1 %v21549_v40  ;;  %8883 = vmatpush1.msra.mxu0 %v20841_v63  ;;  %v21559_v40 = vld [vmem:[#allocation154_spill] sm:$0xff] }
 0x724   :  { %9055 = vmatpush1.msra.mxu1 %v21550_v8  ;;  %8885 = vmatprep.subr.mxu0 %v21551_v42  ;;  %v21561_v8 = vld [vmem:[#allocation157_spill] sm:$0xff] }
 0x725   :  { %9061 = vmatprep.subr.mxu1 %v21552_v41  ;;  %8887 = vmatpush1.msra.mxu0 %v21553_v22  ;;  %v21563_v41 = vld [vmem:[#allocation160_spill] sm:$0xff] }
 0x726   :  { %9067 = vmatpush1.msra.mxu1 %v21554_v37  ;;  %8889 = vmatprep.subr.mxu0 %v21555_v36  ;;  %v21565_v37 = vld [vmem:[#allocation163_spill] sm:$0xff] }
 0x727   :  { %9073 = vmatprep.subr.mxu1 %v21556_v47  ;;  %8891 = vmatpush1.msra.mxu0 %v21557_v54  ;;  %v21567_v47 = vld [vmem:[#allocation166_spill] sm:$0xff] }
 0x728   :  { %9079 = vmatpush1.msra.mxu1 %v21558_v5  ;;  %8893 = vmatprep.subr.mxu0 %v21559_v40  ;;  %v21569_v5 = vld [vmem:[#allocation169_spill] sm:$0xff] }
 0x729   :  { %9085 = vmatprep.subr.mxu1 %v21560_v34  ;;  %8895 = vmatpush1.msra.mxu0 %v21561_v8  ;;  %v21571_v34 = vld [vmem:[#allocation175_spill] sm:$0xff] }
 0x72a   :  { %9091 = vmatpush1.msra.mxu1 %v21562_v61  ;;  %8897 = vmatprep.subr.mxu0 %v21563_v41  ;;  %v21573_v61 = vld [vmem:[#allocation178_spill] sm:$0xff] }
 0x72b   :  { %9097 = vmatprep.subr.mxu1 %v21564_v27  ;;  %8899 = vmatpush1.msra.mxu0 %v21565_v37  ;;  %v21575_v27 = vld [vmem:[#allocation184_spill] sm:$0xff] }
 0x72c   :  { %9103 = vmatpush1.msra.mxu1 %v21566_v58  ;;  %8901 = vmatprep.subr.mxu0 %v21567_v47  ;;  %v21577_v58 = vld [vmem:[#allocation193_spill] sm:$0xff] }
 0x72d   :  { %9109 = vmatprep.subr.mxu1 %v21568_v23  ;;  %8903 = vmatpush1.msra.mxu0 %v21569_v5  ;;  %v21579_v23 = vld [vmem:[#allocation196_spill] sm:$0xff] }
 0x72e   :  { %9115 = vmatpush1.msra.mxu1 %v21570_v30  ;;  %8905 = vmatprep.subr.mxu0 %v21571_v34  ;;  %v21581_v30 = vld [vmem:[#allocation199_spill] sm:$0xff] }
 0x72f   :  { %9121 = vmatprep.subr.mxu1 %v21572_v4  ;;  %8907 = vmatpush1.msra.mxu0 %v21573_v61  ;;  %v21583_v4 = vld [vmem:[#allocation202_spill] sm:$0xff] }
 0x730   :  { %9127 = vmatpush1.msra.mxu1 %v21574_v13  ;;  %8909 = vmatprep.subr.mxu0 %v21575_v27  ;;  %v21585_v13 = vld [vmem:[#allocation205_spill] sm:$0xff] }
 0x731   :  { %9133 = vmatprep.subr.mxu1 %v21576_v48  ;;  %8911 = vmatpush1.msra.mxu0 %v21577_v58  ;;  %v21587_v48 = vld [vmem:[#allocation209_spill] sm:$0xff] }
 0x732   :  { %9139 = vmatpush1.msra.mxu1 %v21578_v11  ;;  %8913 = vmatprep.subr.mxu0 %v21579_v23  ;;  %v21589_v11 = vld [vmem:[#allocation212_spill] sm:$0xff] }
 0x733   :  { %9145 = vmatprep.subr.mxu1 %v21580_v10  ;;  %8915 = vmatpush1.msra.mxu0 %v21581_v30  ;;  %v21591_v10 = vld [vmem:[#allocation215_spill] sm:$0xff] }
 0x734   :  { %9151 = vmatpush1.msra.mxu1 %v21582_v14  ;;  %8917 = vmatprep.subr.mxu0 %v21583_v4  ;;  %v21596_v14 = vld [vmem:[#allocation233_spill] sm:$0xff] }
 0x735   :  { %9157 = vmatprep.subr.mxu1 %v21584_v60  ;;  %8919 = vmatpush1.msra.mxu0 %v21585_v13  ;;  %v21592_v60 = vld [vmem:[#allocation219_spill] sm:$0xff] }
 0x736   :  { %9163 = vmatpush1.msra.mxu1 %v21586_v50  ;;  %8921 = vmatprep.subr.mxu0 %v21587_v48  ;;  %v21593_v50 = vld [vmem:[#allocation222_spill] sm:$0xff] }
 0x737   :  { %9169 = vmatprep.subr.mxu1 %v21588_v24  ;;  %8923 = vmatpush1.msra.mxu0 %v21589_v11  ;;  %v21594_v24 = vld [vmem:[#allocation226_spill] sm:$0xff] }
 0x738   :  { %9175 = vmatpush1.msra.mxu1 %v21590_v43  ;;  %9208 = vmatprep.mubr.f32.mxu1 %v20373_v28  ;;  %v21595_v43 = vld [vmem:[#allocation230_spill] sm:$0xff] }
 0x739   :  { %8925 = vmatprep.subr.mxu0 %v21591_v10  ;;  %9210 = vmatmul.mubr.f32.vlgmr.msra.gmra.mxu1 %v17902_v56 }
 0x73a   :  { %9354 = vmatprep.subr.mxu1 %v20835_v31  ;;  %8927 = vmatpush1.msra.mxu0 %v21592_v60 }
 0x73b   :  { %9356 = vmatpush1.msra.mxu1 %v20837_v26  ;;  %8929 = vmatprep.subr.mxu0 %v21593_v50 }
 0x73c   :  { %9358 = vmatprep.subr.mxu1 %v20839_v39  ;;  %8931 = vmatpush1.msra.mxu0 %v21594_v24 }
 0x73d   :  { %9360 = vmatpush1.msra.mxu1 %v20841_v63  ;;  %8933 = vmatprep.subr.mxu0 %v21595_v43 }
 0x73e   :  { %9362 = vmatprep.subr.mxu1 %v21551_v42  ;;  %8935 = vmatpush1.msra.mxu0 %v21596_v14 }
 0x73f   :  { %9364 = vmatpush1.msra.mxu1 %v21553_v22  ;;  %8937 = vmatprep.subr.mxu0 %v21597_v0 }
 0x740   :  { %9366 = vmatprep.subr.mxu1 %v21555_v36  ;;  %8939 = vmatpush1.msra.mxu0 %v21598_v35 }
 0x741   :  { %8972 = vmatprep.mubr.f32.mxu0 %v20373_v28  ;;  %9368 = vmatpush1.msra.mxu1 %v21557_v54 }
 0x742   :  { %8978 = vmatmul.mubr.f32.vlgmr.msra.gmra.mxu0 %v17920_v62  ;;  %9218 = vmatprep.subr.mxu0 %v21599_v6  ;;  %v21604_v62 = vld [vmem:[#allocation156_spill] sm:$0xff]  ;;  %v21605_v6 = vld [vmem:[#allocation159_spill] sm:$0xff] }
 0x743   :  { %9370 = vmatprep.subr.mxu1 %v21559_v40  ;;  %9221 = vmatpush1.msra.mxu0 %v21600_v55  ;;  %v21606_v55 = vld [vmem:[#allocation162_spill] sm:$0xff] }
 0x744   :  { %9372 = vmatpush1.msra.mxu1 %v21561_v8  ;;  %9224 = vmatprep.subr.mxu0 %v21601_v32  ;;  %v21607_v32 = vld [vmem:[#allocation165_spill] sm:$0xff] }
 0x745   :  { %9374 = vmatprep.subr.mxu1 %v21563_v41  ;;  %9227 = vmatpush1.msra.mxu0 %v21602_v49  ;;  %v21608_v49 = vld [vmem:[#allocation168_spill] sm:$0xff] }
 0x746   :  { %9376 = vmatpush1.msra.mxu1 %v21565_v37  ;;  %9230 = vmatprep.subr.mxu0 %v21603_v59  ;;  %v21609_v59 = vld [vmem:[#allocation172_spill] sm:$0xff] }
 0x747   :  { %9378 = vmatprep.subr.mxu1 %v21567_v47  ;;  %9233 = vmatpush1.msra.mxu0 %v21604_v62  ;;  %v21610_v62 = vld [vmem:[#allocation174_spill] sm:$0xff] }
 0x748   :  { %9380 = vmatpush1.msra.mxu1 %v21569_v5  ;;  %9236 = vmatprep.subr.mxu0 %v21605_v6  ;;  %v21611_v6 = vld [vmem:[#allocation177_spill] sm:$0xff] }
 0x749   :  { %9382 = vmatprep.subr.mxu1 %v21571_v34  ;;  %9239 = vmatpush1.msra.mxu0 %v21606_v55  ;;  %v21612_v55 = vld [vmem:[#allocation181_spill] sm:$0xff] }
 0x74a   :  { %9384 = vmatpush1.msra.mxu1 %v21573_v61  ;;  %9242 = vmatprep.subr.mxu0 %v21607_v32  ;;  %v21613_v32 = vld [vmem:[#allocation187_spill] sm:$0xff] }
 0x74b   :  { %9386 = vmatprep.subr.mxu1 %v21575_v27  ;;  %9245 = vmatpush1.msra.mxu0 %v21608_v49  ;;  %v21614_v49 = vld [vmem:[#allocation190_spill] sm:$0xff] }
 0x74c   :  { %9388 = vmatpush1.msra.mxu1 %v21577_v58  ;;  %9248 = vmatprep.subr.mxu0 %v21609_v59  ;;  %v21615_v59 = vld [vmem:[#allocation195_spill] sm:$0xff] }
 0x74d   :  { %9390 = vmatprep.subr.mxu1 %v21579_v23  ;;  %9251 = vmatpush1.msra.mxu0 %v21610_v62  ;;  %v21616_v62 = vld [vmem:[#allocation204_spill] sm:$0xff] }
 0x74e   :  { %9392 = vmatpush1.msra.mxu1 %v21581_v30  ;;  %9254 = vmatprep.subr.mxu0 %v21611_v6  ;;  %v21617_v6 = vld [vmem:[#allocation208_spill] sm:$0xff] }
 0x74f   :  { %9394 = vmatprep.subr.mxu1 %v21583_v4  ;;  %9257 = vmatpush1.msra.mxu0 %v21612_v55  ;;  %v21618_v55 = vld [vmem:[#allocation211_spill] sm:$0xff] }
 0x750   :  { %9396 = vmatpush1.msra.mxu1 %v21585_v13  ;;  %9260 = vmatprep.subr.mxu0 %v21613_v32  ;;  %v21619_v32 = vld [vmem:[#allocation214_spill] sm:$0xff] }
 0x751   :  { %9398 = vmatprep.subr.mxu1 %v21587_v48  ;;  %9263 = vmatpush1.msra.mxu0 %v21614_v49  ;;  %v21620_v49 = vld [vmem:[#allocation218_spill] sm:$0xff] }
 0x752   :  { %9400 = vmatpush1.msra.mxu1 %v21589_v11  ;;  %9266 = vmatprep.subr.mxu0 %v21615_v59  ;;  %v21621_v59 = vld [vmem:[#allocation221_spill] sm:$0xff] }
 0x753   :  { %9402 = vmatprep.subr.mxu1 %v21591_v10  ;;  %9269 = vmatpush1.msra.mxu0 %v21616_v62  ;;  %v21622_v62 = vld [vmem:[#allocation225_spill] sm:$0xff] }
 0x754   :  { %9404 = vmatpush1.msra.mxu1 %v21592_v60  ;;  %9272 = vmatprep.subr.mxu0 %v21617_v6  ;;  %v21662_v6 = vld [vmem:[#allocation54_spill] sm:$0xff] }
 0x755   :  { %9406 = vmatprep.subr.mxu1 %v21593_v50  ;;  %9275 = vmatpush1.msra.mxu0 %v21618_v55  ;;  %v21623_v55 = vld [vmem:[#allocation229_spill] sm:$0xff] }
 0x756   :  { %9408 = vmatpush1.msra.mxu1 %v21594_v24  ;;  %9278 = vmatprep.subr.mxu0 %v21619_v32  ;;  %v21624_v32 = vld [vmem:[#allocation232_spill] sm:$0xff] }
 0x757   :  { %9410 = vmatprep.subr.mxu1 %v21595_v43  ;;  %9281 = vmatpush1.msra.mxu0 %v21620_v49  ;;  %v21625_v49 = vld [vmem:[#allocation235_spill] sm:$0xff] }
 0x758   :  { %9412 = vmatpush1.msra.mxu1 %v21596_v14  ;;  %9284 = vmatprep.subr.mxu0 %v21621_v59  ;;  %v21626_v59 = vld [vmem:[#allocation238_spill] sm:$0xff] }
 0x759   :  { %9414 = vmatprep.subr.mxu1 %v21597_v0  ;;  %9287 = vmatpush1.msra.mxu0 %v21622_v62  ;;  %v21627_v62 = vld [vmem:[#allocation242_spill] sm:$0xff] }
 0x75a   :  { %9416 = vmatpush1.msra.mxu1 %v21598_v35  ;;  %9449 = vmatprep.mubr.f32.mxu1 %v20373_v28 }
 0x75b   :  { %9290 = vmatprep.subr.mxu0 %v21623_v55  ;;  %9453 = vmatmul.mubr.f32.vlgmr.msra.gmra.mxu1 %v17912_v2  ;;  %v21628_v55 = vld [vmem:[#allocation245_spill] sm:$0xff]  ;;  %v21629_v2 = vld [vmem:[#allocation248_spill] sm:$0xff] }
 0x75c   :  { %9628 = vmatprep.subr.mxu1 %v20835_v31  ;;  %9293 = vmatpush1.msra.mxu0 %v21624_v32  ;;  %v21630_v32 = vld [vmem:[#allocation251_spill] sm:$0xff] }
 0x75d   :  { %9630 = vmatpush1.msra.mxu1 %v20837_v26  ;;  %9296 = vmatprep.subr.mxu0 %v21625_v49  ;;  %v21660_v49 = vld [vmem:[#allocation51_spill] sm:$0xff] }
 0x75e   :  { %9632 = vmatprep.subr.mxu1 %v20839_v39  ;;  %9299 = vmatpush1.msra.mxu0 %v21626_v59  ;;  %v21631_v59 = vld [vmem:[#allocation148_spill] sm:$0xff] }
 0x75f   :  { %9634 = vmatpush1.msra.mxu1 %v20841_v63  ;;  %9302 = vmatprep.subr.mxu0 %v21627_v62  ;;  %v21632_v62 = vld [vmem:[#allocation155_spill] sm:$0xff] }
 0x760   :  { %9636 = vmatprep.subr.mxu1 %v21551_v42  ;;  %9305 = vmatpush1.msra.mxu0 %v21628_v55  ;;  %v21633_v55 = vld [vmem:[#allocation158_spill] sm:$0xff] }
 0x761   :  { %9638 = vmatpush1.msra.mxu1 %v21553_v22  ;;  %9308 = vmatprep.subr.mxu0 %v21629_v2  ;;  %v21634_v2 = vld [vmem:[#allocation161_spill] sm:$0xff] }
 0x762   :  { %9640 = vmatprep.subr.mxu1 %v21555_v36  ;;  %9311 = vmatpush1.msra.mxu0 %v21630_v32  ;;  %v21635_v32 = vld [vmem:[#allocation164_spill] sm:$0xff] }
 0x763   :  { %9344 = vmatprep.mubr.f32.mxu0 %v20373_v28  ;;  %9642 = vmatpush1.msra.mxu1 %v21557_v54 }
 0x764   :  { %9347 = vmatmul.mubr.f32.vlgmr.msra.gmra.mxu0 %v17905_v29  ;;  %9462 = vmatprep.subr.mxu0 %v21631_v59  ;;  %v21636_v29 = vld [vmem:[#allocation167_spill] sm:$0xff] }
 0x765   :  { %9644 = vmatprep.subr.mxu1 %v21559_v40  ;;  %9466 = vmatpush1.msra.mxu0 %v21632_v62  ;;  %v21637_v59 = vld [vmem:[#allocation171_spill] sm:$0xff]  ;;  %v21638_v62 = vld [vmem:[#allocation173_spill] sm:$0xff] }
 0x766   :  { %9646 = vmatpush1.msra.mxu1 %v21561_v8  ;;  %9470 = vmatprep.subr.mxu0 %v21633_v55  ;;  %v21639_v55 = vld [vmem:[#allocation176_spill] sm:$0xff] }
 0x767   :  { %9648 = vmatprep.subr.mxu1 %v21563_v41  ;;  %9474 = vmatpush1.msra.mxu0 %v21634_v2  ;;  %v21640_v2 = vld [vmem:[#allocation180_spill] sm:$0xff] }
 0x768   :  { %9650 = vmatpush1.msra.mxu1 %v21565_v37  ;;  %9478 = vmatprep.subr.mxu0 %v21635_v32  ;;  %v21641_v32 = vld [vmem:[#allocation183_spill] sm:$0xff] }
 0x769   :  { %9652 = vmatprep.subr.mxu1 %v21567_v47  ;;  %9482 = vmatpush1.msra.mxu0 %v21636_v29  ;;  %v21642_v29 = vld [vmem:[#allocation186_spill] sm:$0xff] }
 0x76a   :  { %9654 = vmatpush1.msra.mxu1 %v21569_v5  ;;  %9486 = vmatprep.subr.mxu0 %v21637_v59  ;;  %v21643_v59 = vld [vmem:[#allocation189_spill] sm:$0xff] }
 0x76b   :  { %9656 = vmatprep.subr.mxu1 %v21571_v34  ;;  %9490 = vmatpush1.msra.mxu0 %v21638_v62  ;;  %v21644_v62 = vld [vmem:[#allocation192_spill] sm:$0xff] }
 0x76c   :  { %9658 = vmatpush1.msra.mxu1 %v21573_v61  ;;  %9494 = vmatprep.subr.mxu0 %v21639_v55  ;;  %v21645_v55 = vld [vmem:[#allocation198_spill] sm:$0xff] }
 0x76d   :  { %9660 = vmatprep.subr.mxu1 %v21575_v27  ;;  %9498 = vmatpush1.msra.mxu0 %v21640_v2  ;;  %v21646_v2 = vld [vmem:[#allocation201_spill] sm:$0xff] }
 0x76e   :  { %9662 = vmatpush1.msra.mxu1 %v21577_v58  ;;  %9502 = vmatprep.subr.mxu0 %v21641_v32  ;;  %v21647_v32 = vld [vmem:[#allocation207_spill] sm:$0xff] }
 0x76f   :  { %9664 = vmatprep.subr.mxu1 %v21579_v23  ;;  %9506 = vmatpush1.msra.mxu0 %v21642_v29  ;;  %v21648_v29 = vld [vmem:[#allocation217_spill] sm:$0xff] }
 0x770   :  { %9666 = vmatpush1.msra.mxu1 %v21581_v30  ;;  %9510 = vmatprep.subr.mxu0 %v21643_v59  ;;  %v21649_v59 = vld [vmem:[#allocation220_spill] sm:$0xff] }
 0x771   :  { %9668 = vmatprep.subr.mxu1 %v21583_v4  ;;  %9514 = vmatpush1.msra.mxu0 %v21644_v62  ;;  %v21650_v62 = vld [vmem:[#allocation224_spill] sm:$0xff] }
 0x772   :  { %9670 = vmatpush1.msra.mxu1 %v21585_v13  ;;  %9518 = vmatprep.subr.mxu0 %v21645_v55  ;;  %v21651_v55 = vld [vmem:[#allocation228_spill] sm:$0xff] }
 0x773   :  { %9672 = vmatprep.subr.mxu1 %v21587_v48  ;;  %9522 = vmatpush1.msra.mxu0 %v21646_v2  ;;  %v21652_v2 = vld [vmem:[#allocation231_spill] sm:$0xff] }
 0x774   :  { %9674 = vmatpush1.msra.mxu1 %v21589_v11  ;;  %9526 = vmatprep.subr.mxu0 %v21647_v32  ;;  %v21653_v32 = vld [vmem:[#allocation234_spill] sm:$0xff] }
 0x775   :  { %9676 = vmatprep.subr.mxu1 %v21591_v10  ;;  %9530 = vmatpush1.msra.mxu0 %v21648_v29  ;;  %v21654_v29 = vld [vmem:[#allocation237_spill] sm:$0xff] }
 0x776   :  { %9678 = vmatpush1.msra.mxu1 %v21592_v60  ;;  %9534 = vmatprep.subr.mxu0 %v21649_v59  ;;  %v21658_v59 = vld [vmem:[#allocation42_spill] sm:$0xff] }
 0x777   :  { %9680 = vmatprep.subr.mxu1 %v21593_v50  ;;  %9538 = vmatpush1.msra.mxu0 %v21650_v62  ;;  %v21655_v62 = vld [vmem:[#allocation241_spill] sm:$0xff] }
 0x778   :  { %9682 = vmatpush1.msra.mxu1 %v21594_v24  ;;  %9542 = vmatprep.subr.mxu0 %v21651_v55  ;;  %v21656_v55 = vld [vmem:[#allocation244_spill] sm:$0xff] }
 0x779   :  { %9684 = vmatprep.subr.mxu1 %v21595_v43  ;;  %9546 = vmatpush1.msra.mxu0 %v21652_v2  ;;  %v21657_v2 = vld [vmem:[#allocation247_spill] sm:$0xff] }
 0x77a   :  { %9686 = vmatpush1.msra.mxu1 %v21596_v14  ;;  %9550 = vmatprep.subr.mxu0 %v21653_v32  ;;  %v21659_v32 = vld [vmem:[#allocation250_spill] sm:$0xff]  ;;  %v21667_v14 = vld [vmem:[#allocation259_spill] sm:$0xff] }
 0x77b   :  { %9688 = vmatprep.subr.mxu1 %v21597_v0  ;;  %9554 = vmatpush1.msra.mxu0 %v21654_v29  ;;  %v21661_v29 = vld [vmem:[#allocation253_spill] sm:$0xff] }
 0x77c   :  { %9690 = vmatpush1.msra.mxu1 %v21598_v35  ;;  %9723 = vmatprep.mubr.f32.mxu1 %v20373_v28  ;;  %v21663_v35 = vld [vmem:[#allocation255_spill] sm:$0xff]  ;;  %v21665_v0 = vld [vmem:[#allocation257_spill] sm:$0xff] }
 0x77d   :  { %9558 = vmatprep.subr.mxu0 %v21655_v62  ;;  %9725 = vmatmul.mubr.f32.vlgmr.msra.gmra.mxu1 %v17902_v56  ;;  %v21664_v62 = vld [vmem:[#allocation57_spill] sm:$0xff] }
 0x77e   :  { %9562 = vmatpush1.msra.mxu0 %v21656_v55  ;;  %9619 = vmatprep.mubr.f32.mxu0 %v20373_v28  ;;  %v21666_v55 = vld [vmem:[#allocation60_spill] sm:$0xff] }
 0x77f   :  { %9566 = vmatprep.subr.mxu0 %v21657_v2  ;;  %9881 = vmatprep.subr.mxu1 %v21658_v59  ;;  %v21668_v2 = vld [vmem:[#allocation63_spill] sm:$0xff] }
 0x780   :  { %9570 = vmatpush1.msra.mxu0 %v21659_v32  ;;  %9887 = vmatpush1.msra.mxu1 %v21660_v49  ;;  %v21669_v32 = vld [vmem:[#allocation66_spill] sm:$0xff]  ;;  %v21670_v49 = vld [vmem:[#allocation69_spill] sm:$0xff] }
 0x781   :  { %9574 = vmatprep.subr.mxu0 %v21661_v29  ;;  %9893 = vmatprep.subr.mxu1 %v21662_v6  ;;  %v21671_v6 = vld [vmem:[#allocation72_spill] sm:$0xff]  ;;  %v21705_v29 = vld [vmem:[#allocation14_spill] sm:$0xff] }
 0x782   :  { %9578 = vmatpush1.msra.mxu0 %v21663_v35  ;;  %9899 = vmatpush1.msra.mxu1 %v21664_v62  ;;  %v21672_v62 = vld [vmem:[#allocation75_spill] sm:$0xff]  ;;  %v21703_v35 = vld [vmem:[#allocation108_spill] sm:$0xff] }
 0x783   :  { %9582 = vmatprep.subr.mxu0 %v21665_v0  ;;  %9905 = vmatprep.subr.mxu1 %v21666_v55  ;;  %v21673_v55 = vld [vmem:[#allocation78_spill] sm:$0xff] }
 0x784   :  { %9586 = vmatpush1.msra.mxu0 %v21667_v14  ;;  %9911 = vmatpush1.msra.mxu1 %v21668_v2  ;;  %v21674_v2 = vld [vmem:[#allocation82_spill] sm:$0xff]  ;;  %v21696_v14 = vld [vmem:[#allocation139_spill] sm:$0xff] }
 0x785   :  { %9621 = vmatmul.mubr.f32.vlgmr.msra.gmra.mxu0 %v17902_v56  ;;  %9917 = vmatprep.subr.mxu1 %v21669_v32  ;;  %v21675_v56 = vld [vmem:[#allocation85_spill] sm:$0xff]  ;;  %v21694_v32 = vld [vmem:[#allocation138_spill] sm:$0xff] }
 0x786   :  { %9923 = vmatpush1.msra.mxu1 %v21670_v49  ;;  %9769 = vmatprep.subr.mxu0 %v20787_v18  ;;  %v21676_v49 = vld [vmem:[#allocation88_spill] sm:$0xff]  ;;  %v21701_v0 = vld [vmem:[#allocation102_spill] sm:$0xff] }
 0x787   :  { %9929 = vmatprep.subr.mxu1 %v21671_v6  ;;  %9771 = vmatpush1.msra.mxu0 %v20675_v15  ;;  %v21677_v6 = vld [vmem:[#allocation95_spill] sm:$0xff] }
 0x788   :  { %9935 = vmatpush1.msra.mxu1 %v21672_v62  ;;  %9773 = vmatprep.subr.mxu0 %v20677_v46  ;;  %v21678_v62 = vld [vmem:[#allocation99_spill] sm:$0xff] }
 0x789   :  { %9941 = vmatprep.subr.mxu1 %v21673_v55  ;;  %9775 = vmatpush1.msra.mxu0 %v20679_v51  ;;  %v21679_v55 = vld [vmem:[#allocation112_spill] sm:$0xff] }
 0x78a   :  { %9947 = vmatpush1.msra.mxu1 %v21674_v2  ;;  %9777 = vmatprep.subr.mxu0 %v20681_v38  ;;  %v21680_v2 = vld [vmem:[#allocation115_spill] sm:$0xff] }
 0x78b   :  { %9953 = vmatprep.subr.mxu1 %v21675_v56  ;;  %9779 = vmatpush1.msra.mxu0 %v20683_v17  ;;  %v21681_v56 = vld [vmem:[#allocation118_spill] sm:$0xff] }
 0x78c   :  { %9959 = vmatpush1.msra.mxu1 %v21676_v49  ;;  %9781 = vmatprep.subr.mxu0 %v20685_v12  ;;  %v21682_v49 = vld [vmem:[#allocation121_spill] sm:$0xff] }
 0x78d   :  { %9965 = vmatprep.subr.mxu1 %v21677_v6  ;;  %9783 = vmatpush1.msra.mxu0 %v20687_v20  ;;  %v21683_v6 = vld [vmem:[#allocation124_spill] sm:$0xff] }
 0x78e   :  { %9971 = vmatpush1.msra.mxu1 %v21678_v62  ;;  %9785 = vmatprep.subr.mxu0 %v20689_v16  ;;  %v21684_v62 = vld [vmem:[#allocation126_spill] sm:$0xff] }
 0x78f   :  { %9977 = vmatprep.subr.mxu1 %v21679_v55  ;;  %9787 = vmatpush1.msra.mxu0 %v20691_v25  ;;  %v21685_v55 = vld [vmem:[#allocation128_spill] sm:$0xff] }
 0x790   :  { %9983 = vmatpush1.msra.mxu1 %v21680_v2  ;;  %9789 = vmatprep.subr.mxu0 %v20693_v19  ;;  %v21686_v2 = vld [vmem:[#allocation130_spill] sm:$0xff] }
 0x791   :  { %9989 = vmatprep.subr.mxu1 %v21681_v56  ;;  %9791 = vmatpush1.msra.mxu0 %v20745_v57  ;;  %v21687_v56 = vld [vmem:[#allocation132_spill] sm:$0xff] }
 0x792   :  { %9995 = vmatpush1.msra.mxu1 %v21682_v49  ;;  %9793 = vmatprep.subr.mxu0 %v20747_v45  ;;  %v21688_v49 = vld [vmem:[#allocation133_spill] sm:$0xff] }
 0x793   :  { %10001 = vmatprep.subr.mxu1 %v21683_v6  ;;  %9795 = vmatpush1.msra.mxu0 %v20749_v21  ;;  %v21689_v6 = vld [vmem:[#allocation134_spill] sm:$0xff] }
 0x794   :  { %10007 = vmatpush1.msra.mxu1 %v21684_v62  ;;  %9797 = vmatprep.subr.mxu0 %v20751_v33  ;;  %v21690_v62 = vld [vmem:[#allocation135_spill] sm:$0xff] }
 0x795   :  { %10013 = vmatprep.subr.mxu1 %v21685_v55  ;;  %9799 = vmatpush1.msra.mxu0 %v20753_v1  ;;  %v21691_v55 = vld [vmem:[#allocation136_spill] sm:$0xff]  ;;  %v8356_v24 = vpop.f32.mrf.mxu1 }
 0x796   :  { %10019 = vmatpush1.msra.mxu1 %v21686_v2  ;;  %9801 = vmatprep.subr.mxu0 %v20755_v9  ;;  %v21692_v2 = vld [vmem:[#allocation137_spill] sm:$0xff] }
 0x797   :  { %10025 = vmatprep.subr.mxu1 %v21687_v56  ;;  %9803 = vmatpush1.msra.mxu0 %v20757_v53  ;;  %v21693_v56 = vld [vmem:[#allocation81_spill] sm:$0xff]  ;;  %v8358_v60 = vpop.f32.mrf.mxu1 }
 0x798   :  { %10031 = vmatpush1.msra.mxu1 %v21688_v49  ;;  %9805 = vmatprep.subr.mxu0 %v20759_v7  ;;  %v21695_v49 = vld [vmem:[#allocation84_spill] sm:$0xff] }
 0x799   :  { %10037 = vmatprep.subr.mxu1 %v21689_v6  ;;  %9807 = vmatpush1.msra.mxu0 %v20761_v44  ;;  %v21697_v6 = vld [vmem:[#allocation87_spill] sm:$0xff] }
 0x79a   :  { %10043 = vmatpush1.msra.mxu1 %v21690_v62  ;;  %9809 = vmatprep.subr.mxu0 %v20763_v3  ;;  %v21698_v62 = vld [vmem:[#allocation91_spill] sm:$0xff] }
 0x79b   :  { %10049 = vmatprep.subr.mxu1 %v21691_v55  ;;  %9811 = vmatpush1.msra.mxu0 %v20765_v52  ;;  %v21699_v55 = vld [vmem:[#allocation94_spill] sm:$0xff] }
 0x79c   :  { %10055 = vmatpush1.msra.mxu1 %v21692_v2  ;;  %9813 = vmatprep.subr.mxu0 %v21693_v56  ;;  %v21700_v2 = vld [vmem:[#allocation98_spill] sm:$0xff] }
 0x79d   :  { %10061 = vmatprep.subr.mxu1 %v21694_v32  ;;  %9815 = vmatpush1.msra.mxu0 %v21695_v49  ;;  %v21702_v32 = vld [vmem:[#allocation105_spill] sm:$0xff]  ;;  %v8124_v59 = vpop.f32.mrf.mxu0 }
 0x79e   :  { %10067 = vmatpush1.msra.mxu1 %v21696_v14  ;;  %9817 = vmatprep.subr.mxu0 %v21697_v6  ;;  %v21704_v14 = vld [vmem:[#allocation111_spill] sm:$0xff]  ;;  %v8357_v4 = vadd.f32 %v8356_v24, %v8124_v59 }
 0x79f   :  { %10100 = vmatprep.mubr.f32.mxu1 %v20373_v28  ;;  %10246 = vmatprep.subr.mxu1 %v20787_v18  ;;  %v8126_v43 = vpop.f32.mrf.mxu0 }
 0x7a0   :  { %9819 = vmatpush1.msra.mxu0 %v21698_v62  ;;  %9864 = vmatprep.mubr.f32.mxu0 %v20373_v28  ;;  %v8359_v11 = vadd.f32 %v8358_v60, %v8126_v43 }
 0x7a1   :  { %9821 = vmatprep.subr.mxu0 %v21699_v55 }
 0x7a2   :  { %9823 = vmatpush1.msra.mxu0 %v21700_v2 }
 0x7a3   :  { %9825 = vmatprep.subr.mxu0 %v21701_v0 }
 0x7a4   :  { %9827 = vmatpush1.msra.mxu0 %v21702_v32 }
 0x7a5   :  { %9829 = vmatprep.subr.mxu0 %v21703_v35 }
 0x7a6   :  { %9831 = vmatpush1.msra.mxu0 %v21704_v14 }
 0x7a7   :  { %10110 = vmatprep.subr.mxu0 %v21705_v29 }
 0x7b5   :  { %v8599_v48 = vpop.f32.mrf.mxu1 }
 0x7b7   :  { %v8601_v58 = vpop.f32.mrf.mxu1 }
 0x7be   :  { %v8493_v50 = vpop.f32.mrf.mxu0 }
 0x7bf   :  { %v8494_v23 = vadd.f32 %v8493_v50, %v8357_v4  ;;  %v21706_v50 = vld [vmem:[#allocation13_spill] sm:$0xff] }
 0x7c0   :  { %v8495_v10 = vpop.f32.mrf.mxu0 }
 0x7c1   :  { %v8496_v30 = vadd.f32 %v8495_v10, %v8359_v11  ;;  %v8600_v5 = vadd.f32 %v8599_v48, %v8494_v23  ;;  %v21707_v48 = vld [vmem:[#allocation15_spill] sm:$0xff] }
 0x7c3   :  { %v8602_v61 = vadd.f32 %v8601_v58, %v8496_v30 }
 0x7d7   :  { %v8871_v34 = vpop.f32.mrf.mxu1 }
 0x7d9   :  { %v8873_v41 = vpop.f32.mrf.mxu1 }
 0x7e0   :  { %v8767_v13 = vpop.f32.mrf.mxu0 }
 0x7e1   :  { %v8768_v29 = vadd.f32 %v8767_v13, %v8600_v5 }
 0x7e2   :  { %v8769_v27 = vpop.f32.mrf.mxu0 }
 0x7e3   :  { %v8770_v47 = vadd.f32 %v8769_v27, %v8602_v61  ;;  %v8872_v54 = vadd.f32 %v8871_v34, %v8768_v29  ;;  %v21708_v29 = vld [vmem:[#allocation16_spill] sm:$0xff] }
 0x7e5   :  { %v8874_v8 = vadd.f32 %v8873_v41, %v8770_v47  ;;  %v9735_v60 = vrot.slane %v8872_v54, 4 }
 0x7e7   :  { %v9736_v43 = vrot.slane %v8874_v8, 4  ;;  %v9743_v23 = vadd.f32 %v9735_v60, %v21707_v48  ;;  %v21818_v48 = vld [vmem:[#allocation263_spill] sm:$0xff] }
 0x7e9   :  { %v9744_v10 = vadd.f32 %v9736_v43, %v21706_v50  ;;  %v21820_v50 = vld [vmem:[#allocation264_spill] sm:$0xff] }
 0x7eb   :  { %15092 = vtanh.f32 %v9744_v10 }
 0x7ec   :  { %15094 = vtanh.f32 %v9743_v23  ;;  %v21710_v23 = vld [vmem:[#allocation26_spill] sm:$0xff] }
 0x7f8   :  { %v15093_v43 = vpop.eup %15092 }
 0x7f9   :  { %v9211_v36 = vpop.f32.mrf.mxu1  ;;  %v15095_v60 = vpop.eup %15094 }
 0x7fb   :  { %v9213_v24 = vpop.f32.mrf.mxu1 }
 0x802   :  { %v8979_v37 = vpop.f32.mrf.mxu0 }
 0x803   :  { %v9212_v42 = vadd.f32 %v9211_v36, %v8979_v37 }
 0x804   :  { %v8981_v40 = vpop.f32.mrf.mxu0 }
 0x805   :  { %v9214_v11 = vadd.f32 %v9213_v24, %v8981_v40  ;;  %v9753_v24 = vmul.f32 0.5, %v15093_v43 }
 0x81b   :  { %v9454_v30 = vpop.f32.mrf.mxu1 }
 0x81d   :  { %v9456_v27 = vpop.f32.mrf.mxu1 }
 0x824   :  { %v9348_v22 = vpop.f32.mrf.mxu0 }
 0x825   :  { %v9349_v4 = vadd.f32 %v9348_v22, %v9212_v42 }
 0x826   :  { %v9350_v59 = vpop.f32.mrf.mxu0 }
 0x827   :  { %v9351_v58 = vadd.f32 %v9350_v59, %v9214_v11  ;;  %v9455_v13 = vadd.f32 %v9454_v30, %v9349_v4  ;;  %v21709_v59 = vld [vmem:[#allocation17_spill] sm:$0xff]  ;;  %v9751_v11 = vmul.f32 0.5, %v15095_v60  ;;  %v9754_v4 = vadd.f32 0.5, %v9753_v24  ;;  %v21712_v60 = vld [vmem:[#allocation18_spill] sm:$0xff] }
 0x828   :  { %v21713_v24 = vld [vmem:[#allocation21_spill] sm:$0xff] }
 0x829   :  { %v9457_v34 = vadd.f32 %v9456_v27, %v9351_v58  ;;  %v9752_v30 = vadd.f32 0.5, %v9751_v11  ;;  %v9758_v58 = vrot.slane %v21710_v23, 7  ;;  %v21715_v11 = vld [vmem:[#allocation25_spill] sm:$0xff]  ;;  %v21718_v23 = vld [vmem:[#allocation34_spill] sm:$0xff] }
 0x82b   :  { %v9760_v27 = vmul.f32 %v9758_v58, %v9754_v4  ;;  %v21716_v4 = vld [vmem:[#allocation28_spill] sm:$0xff]  ;;  %v21719_v58 = vld [vmem:[#allocation37_spill] sm:$0xff] }
 0x83d   :  { %v9726_v8 = vpop.f32.mrf.mxu1 }
 0x83f   :  { %v9728_v54 = vpop.f32.mrf.mxu1 }
 0x845   :  { %v9622_v61 = vpop.f32.mrf.mxu0 }
 0x846   :  { %v9623_v5 = vadd.f32 %v9622_v61, %v9455_v13 }
 0x847   :  { %v9624_v41 = vpop.f32.mrf.mxu0 }
 0x848   :  { %v9727_v37 = vadd.f32 %v9726_v8, %v9623_v5  ;;  %v9625_v36 = vadd.f32 %v9624_v41, %v9457_v34 }
 0x84a   :  { %v9737_v47 = vrot.slane %v9727_v37, 4  ;;  %v9729_v22 = vadd.f32 %v9728_v54, %v9625_v36 }
 0x84c   :  { %v9745_v40 = vadd.f32 %v9737_v47, %v21708_v29  ;;  %v9738_v42 = vrot.slane %v9729_v22, 4  ;;  %v21816_v29 = vld [vmem:[#allocation262_spill] sm:$0xff] }
 0x84e   :  { %15096 = vtanh.f32 %v9745_v40  ;;  %v9746_v10 = vadd.f32 %v9738_v42, %v21709_v59  ;;  %v21814_v59 = vld [vmem:[#allocation261_spill] sm:$0xff] }
 0x850   :  { %15098 = vtanh.f32 %v9746_v10  ;;  %v21714_v10 = vld [vmem:[#allocation23_spill] sm:$0xff] }
 0x85b   :  { %v15097_v13 = vpop.eup %15096 }
 0x85c   :  { %v9761_v61 = vmul.f32 %v15097_v13, %v9752_v30  ;;  %v21717_v30 = vld [vmem:[#allocation31_spill] sm:$0xff]  ;;  %v21720_v13 = vld [vmem:[#allocation40_spill] sm:$0xff] }
 0x85d   :  { %v15099_v34 = vpop.eup %15098 }
 0x85e   :  { %v18327_v5 = vadd.f32 %v9761_v61, %v9760_v27  ;;  %v9755_v8 = vmul.f32 0.5, %v15099_v34  ;;  %v21721_v27 = vld [vmem:[#allocation44_spill] sm:$0xff]  ;;  %v21722_v61 = vld [vmem:[#allocation46_spill] sm:$0xff]  ;;  %v21723_v34 = vld [vmem:[#allocation49_spill] sm:$0xff] }
 0x860   :  { %21711 = vst [vmem:[#allocation29_spill] sm:$0xff] %v18327_v5  ;;  %15100 = vtanh.f32 %v18327_v5  ;;  %v9756_v41 = vadd.f32 0.5, %v9755_v8  ;;  %v21724_v8 = vld [vmem:[#allocation53_spill] sm:$0xff]  ;;  %v21812_v5 = vld [vmem:[#allocation260_spill] sm:$0xff] }
 0x86d   :  { %v15101_v37 = vpop.eup %15100 }
 0x86e   :  { %v9764_v36 = vmul.f32 %v15101_v37, %v9756_v41  ;;  %v21725_v41 = vld [vmem:[#allocation59_spill] sm:$0xff]  ;;  %v21726_v37 = vld [vmem:[#allocation62_spill] sm:$0xff] }
 0x870   :  { %v9766_v47 = vrot.slane %v9764_v36, 4  ;;  %v21727_v36 = vld [vmem:[#allocation67_spill] sm:$0xff] }
 0x872   :  { %v18330_v54 = vand.u32 4294901760, %v9766_v47 }
 0x874   :  { %v18333_v40 = vsub.f32 %v9766_v47, %v18330_v54  ;;  %10102 = vmatmul.mubr.f32.vlgmr.msra.gmra.mxu1 %v18330_v54  ;;  %v21728_v47 = vld [vmem:[#allocation76_spill] sm:$0xff] }
 0x875   :  { %10248 = vmatpush1.msra.mxu1 %v20675_v15  ;;  %10341 = vmatprep.mubr.f32.mxu1 %v20373_v28 }
 0x876   :  { %10250 = vmatprep.subr.mxu1 %v20677_v46  ;;  %v18340_v22 = vand.u32 4294901760, %v18333_v40 }
 0x877   :  { %10252 = vmatpush1.msra.mxu1 %v20679_v51 }
 0x878   :  { %10254 = vmatprep.subr.mxu1 %v20681_v38  ;;  %v9868_v42 = vsub.f32 %v18333_v40, %v18340_v22 }
 0x879   :  { %10256 = vmatpush1.msra.mxu1 %v20683_v17 }
 0x87a   :  { %10258 = vmatprep.subr.mxu1 %v20685_v12  ;;  %v18348_v43 = vand.u32 4294901760, %v9868_v42  ;;  %v21729_v42 = vld [vmem:[#allocation80_spill] sm:$0xff] }
 0x87b   :  { %10260 = vmatpush1.msra.mxu1 %v20687_v20 }
 0x87c   :  { %10262 = vmatprep.subr.mxu1 %v20689_v16  ;;  %9870 = vmatmul.mubr.f32.vlgmr.msra.gmra.mxu0 %v18348_v43 }
 0x87d   :  { %10113 = vmatpush1.msra.mxu0 %v21712_v60  ;;  %10264 = vmatpush1.msra.mxu1 %v20691_v25  ;;  %v21810_v60 = vld [vmem:[#allocation258_spill] sm:$0xff] }
 0x87e   :  { %10116 = vmatprep.subr.mxu0 %v21713_v24  ;;  %10266 = vmatprep.subr.mxu1 %v20693_v19  ;;  %v21808_v24 = vld [vmem:[#allocation256_spill] sm:$0xff] }
 0x87f   :  { %10119 = vmatpush1.msra.mxu0 %v21714_v10  ;;  %10268 = vmatpush1.msra.mxu1 %v20745_v57  ;;  %v21806_v10 = vld [vmem:[#allocation254_spill] sm:$0xff] }
 0x880   :  { %10122 = vmatprep.subr.mxu0 %v21715_v11  ;;  %10270 = vmatprep.subr.mxu1 %v20747_v45  ;;  %v21804_v11 = vld [vmem:[#allocation252_spill] sm:$0xff] }
 0x881   :  { %10125 = vmatpush1.msra.mxu0 %v21716_v4  ;;  %10272 = vmatpush1.msra.mxu1 %v20749_v21  ;;  %v21802_v4 = vld [vmem:[#allocation249_spill] sm:$0xff] }
 0x882   :  { %10128 = vmatprep.subr.mxu0 %v21717_v30  ;;  %10274 = vmatprep.subr.mxu1 %v20751_v33  ;;  %v21800_v30 = vld [vmem:[#allocation246_spill] sm:$0xff] }
 0x883   :  { %10131 = vmatpush1.msra.mxu0 %v21718_v23  ;;  %10276 = vmatpush1.msra.mxu1 %v20753_v1  ;;  %v21798_v23 = vld [vmem:[#allocation243_spill] sm:$0xff] }
 0x884   :  { %10134 = vmatprep.subr.mxu0 %v21719_v58  ;;  %10278 = vmatprep.subr.mxu1 %v20755_v9  ;;  %v21778_v58 = vld [vmem:[#allocation191_spill] sm:$0xff] }
 0x885   :  { %10137 = vmatpush1.msra.mxu0 %v21720_v13  ;;  %10280 = vmatpush1.msra.mxu1 %v20757_v53  ;;  %v21776_v13 = vld [vmem:[#allocation188_spill] sm:$0xff] }
 0x886   :  { %10140 = vmatprep.subr.mxu0 %v21721_v27  ;;  %10282 = vmatprep.subr.mxu1 %v20759_v7  ;;  %v21775_v27 = vld [vmem:[#allocation125_spill] sm:$0xff] }
 0x887   :  { %10143 = vmatpush1.msra.mxu0 %v21722_v61  ;;  %10284 = vmatpush1.msra.mxu1 %v20761_v44  ;;  %v21773_v61 = vld [vmem:[#allocation122_spill] sm:$0xff] }
 0x888   :  { %10146 = vmatprep.subr.mxu0 %v21723_v34  ;;  %10286 = vmatprep.subr.mxu1 %v20763_v3  ;;  %v21771_v34 = vld [vmem:[#allocation119_spill] sm:$0xff] }
 0x889   :  { %10149 = vmatpush1.msra.mxu0 %v21724_v8  ;;  %10288 = vmatpush1.msra.mxu1 %v20765_v52  ;;  %v21730_v8 = vld [vmem:[#allocation83_spill] sm:$0xff] }
 0x88a   :  { %10152 = vmatprep.subr.mxu0 %v21725_v41  ;;  %10290 = vmatprep.subr.mxu1 %v21693_v56  ;;  %v21731_v41 = vld [vmem:[#allocation86_spill] sm:$0xff] }
 0x88b   :  { %10155 = vmatpush1.msra.mxu0 %v21726_v37  ;;  %10292 = vmatpush1.msra.mxu1 %v21695_v49  ;;  %v21732_v37 = vld [vmem:[#allocation90_spill] sm:$0xff] }
 0x88c   :  { %10158 = vmatprep.subr.mxu0 %v21727_v36  ;;  %10294 = vmatprep.subr.mxu1 %v21697_v6  ;;  %v21733_v36 = vld [vmem:[#allocation93_spill] sm:$0xff] }
 0x88d   :  { %10161 = vmatpush1.msra.mxu0 %v21728_v47  ;;  %10296 = vmatpush1.msra.mxu1 %v21698_v62  ;;  %v21734_v47 = vld [vmem:[#allocation97_spill] sm:$0xff] }
 0x88e   :  { %10164 = vmatprep.subr.mxu0 %v21729_v42  ;;  %10298 = vmatprep.subr.mxu1 %v21699_v55  ;;  %v21735_v42 = vld [vmem:[#allocation101_spill] sm:$0xff] }
 0x88f   :  { %10167 = vmatpush1.msra.mxu0 %v21730_v8  ;;  %10300 = vmatpush1.msra.mxu1 %v21700_v2  ;;  %v21741_v8 = vld [vmem:[#allocation120_spill] sm:$0xff] }
 0x890   :  { %10170 = vmatprep.subr.mxu0 %v21731_v41  ;;  %10302 = vmatprep.subr.mxu1 %v21701_v0  ;;  %v21736_v41 = vld [vmem:[#allocation104_spill] sm:$0xff] }
 0x891   :  { %10173 = vmatpush1.msra.mxu0 %v21732_v37  ;;  %10304 = vmatpush1.msra.mxu1 %v21702_v32  ;;  %v21737_v37 = vld [vmem:[#allocation107_spill] sm:$0xff] }
 0x892   :  { %10176 = vmatprep.subr.mxu0 %v21733_v36  ;;  %10306 = vmatprep.subr.mxu1 %v21703_v35  ;;  %v21738_v36 = vld [vmem:[#allocation110_spill] sm:$0xff] }
 0x893   :  { %10179 = vmatpush1.msra.mxu0 %v21734_v47  ;;  %10308 = vmatpush1.msra.mxu1 %v21704_v14  ;;  %v21739_v47 = vld [vmem:[#allocation114_spill] sm:$0xff] }
 0x894   :  { %10182 = vmatprep.subr.mxu0 %v21735_v42  ;;  %10345 = vmatmul.mubr.f32.vlgmr.msra.gmra.mxu1 %v18340_v22  ;;  %v21740_v42 = vld [vmem:[#allocation117_spill] sm:$0xff] }
 0x895   :  { %10520 = vmatprep.subr.mxu1 %v20787_v18  ;;  %10185 = vmatpush1.msra.mxu0 %v21736_v41  ;;  %v21742_v41 = vld [vmem:[#allocation123_spill] sm:$0xff] }
 0x896   :  { %10522 = vmatpush1.msra.mxu1 %v20675_v15  ;;  %10188 = vmatprep.subr.mxu0 %v21737_v37  ;;  %v21748_v37 = vld [vmem:[#allocation39_spill] sm:$0xff] }
 0x897   :  { %10524 = vmatprep.subr.mxu1 %v20677_v46  ;;  %10191 = vmatpush1.msra.mxu0 %v21738_v36  ;;  %v21743_v36 = vld [vmem:[#allocation20_spill] sm:$0xff] }
 0x898   :  { %10526 = vmatpush1.msra.mxu1 %v20679_v51  ;;  %10194 = vmatprep.subr.mxu0 %v21739_v47  ;;  %v21744_v47 = vld [vmem:[#allocation27_spill] sm:$0xff] }
 0x899   :  { %10528 = vmatprep.subr.mxu1 %v20681_v38  ;;  %10197 = vmatpush1.msra.mxu0 %v21740_v42  ;;  %v21745_v42 = vld [vmem:[#allocation30_spill] sm:$0xff] }
 0x89a   :  { %10530 = vmatpush1.msra.mxu1 %v20683_v17  ;;  %10200 = vmatprep.subr.mxu0 %v21741_v8  ;;  %v21746_v8 = vld [vmem:[#allocation33_spill] sm:$0xff] }
 0x89b   :  { %10532 = vmatprep.subr.mxu1 %v20685_v12  ;;  %10203 = vmatpush1.msra.mxu0 %v21742_v41  ;;  %v21747_v41 = vld [vmem:[#allocation36_spill] sm:$0xff] }
 0x89c   :  { %10236 = vmatprep.mubr.f32.mxu0 %v20373_v28  ;;  %10534 = vmatpush1.msra.mxu1 %v20687_v20 }
 0x89d   :  { %10239 = vmatmul.mubr.f32.vlgmr.msra.gmra.mxu0 %v18333_v40  ;;  %10354 = vmatprep.subr.mxu0 %v21743_v36  ;;  %v21749_v36 = vld [vmem:[#allocation43_spill] sm:$0xff] }
 0x89e   :  { %10536 = vmatprep.subr.mxu1 %v20689_v16  ;;  %10358 = vmatpush1.msra.mxu0 %v21744_v47  ;;  %v21750_v47 = vld [vmem:[#allocation45_spill] sm:$0xff] }
 0x89f   :  { %10538 = vmatpush1.msra.mxu1 %v20691_v25  ;;  %10362 = vmatprep.subr.mxu0 %v21745_v42  ;;  %v21751_v42 = vld [vmem:[#allocation48_spill] sm:$0xff] }
 0x8a0   :  { %10540 = vmatprep.subr.mxu1 %v20693_v19  ;;  %10366 = vmatpush1.msra.mxu0 %v21746_v8  ;;  %v21752_v8 = vld [vmem:[#allocation52_spill] sm:$0xff] }
 0x8a1   :  { %10542 = vmatpush1.msra.mxu1 %v20745_v57  ;;  %10370 = vmatprep.subr.mxu0 %v21747_v41  ;;  %v21753_v41 = vld [vmem:[#allocation55_spill] sm:$0xff] }
 0x8a2   :  { %10544 = vmatprep.subr.mxu1 %v20747_v45  ;;  %10374 = vmatpush1.msra.mxu0 %v21748_v37  ;;  %v21754_v37 = vld [vmem:[#allocation58_spill] sm:$0xff] }
 0x8a3   :  { %10546 = vmatpush1.msra.mxu1 %v20749_v21  ;;  %10378 = vmatprep.subr.mxu0 %v21749_v36  ;;  %v21755_v36 = vld [vmem:[#allocation61_spill] sm:$0xff] }
 0x8a4   :  { %10548 = vmatprep.subr.mxu1 %v20751_v33  ;;  %10382 = vmatpush1.msra.mxu0 %v21750_v47  ;;  %v21756_v47 = vld [vmem:[#allocation64_spill] sm:$0xff] }
 0x8a5   :  { %10550 = vmatpush1.msra.mxu1 %v20753_v1  ;;  %10386 = vmatprep.subr.mxu0 %v21751_v42  ;;  %v21757_v42 = vld [vmem:[#allocation70_spill] sm:$0xff] }
 0x8a6   :  { %10552 = vmatprep.subr.mxu1 %v20755_v9  ;;  %10390 = vmatpush1.msra.mxu0 %v21752_v8  ;;  %v21758_v8 = vld [vmem:[#allocation73_spill] sm:$0xff] }
 0x8a7   :  { %10554 = vmatpush1.msra.mxu1 %v20757_v53  ;;  %10394 = vmatprep.subr.mxu0 %v21753_v41  ;;  %v21759_v41 = vld [vmem:[#allocation79_spill] sm:$0xff] }
 0x8a8   :  { %10556 = vmatprep.subr.mxu1 %v20759_v7  ;;  %10398 = vmatpush1.msra.mxu0 %v21754_v37  ;;  %v21760_v37 = vld [vmem:[#allocation89_spill] sm:$0xff] }
 0x8a9   :  { %10558 = vmatpush1.msra.mxu1 %v20761_v44  ;;  %10402 = vmatprep.subr.mxu0 %v21755_v36  ;;  %v21761_v36 = vld [vmem:[#allocation92_spill] sm:$0xff] }
 0x8aa   :  { %10560 = vmatprep.subr.mxu1 %v20763_v3  ;;  %10406 = vmatpush1.msra.mxu0 %v21756_v47  ;;  %v21762_v47 = vld [vmem:[#allocation96_spill] sm:$0xff] }
 0x8ab   :  { %10562 = vmatpush1.msra.mxu1 %v20765_v52  ;;  %10410 = vmatprep.subr.mxu0 %v21757_v42  ;;  %v21763_v42 = vld [vmem:[#allocation100_spill] sm:$0xff] }
 0x8ac   :  { %10564 = vmatprep.subr.mxu1 %v21693_v56  ;;  %10414 = vmatpush1.msra.mxu0 %v21758_v8  ;;  %v21764_v8 = vld [vmem:[#allocation103_spill] sm:$0xff]  ;;  %v21839_v56 = vld [vmem:[#allocation153_spill] sm:$0xff] }
 0x8ad   :  { %10566 = vmatpush1.msra.mxu1 %v21695_v49  ;;  %10418 = vmatprep.subr.mxu0 %v21759_v41  ;;  %v21765_v41 = vld [vmem:[#allocation106_spill] sm:$0xff]  ;;  %v21838_v49 = vld [vmem:[#allocation151_spill] sm:$0xff] }
 0x8ae   :  { %10568 = vmatprep.subr.mxu1 %v21697_v6  ;;  %10422 = vmatpush1.msra.mxu0 %v21760_v37  ;;  %v21766_v37 = vld [vmem:[#allocation109_spill] sm:$0xff] }
 0x8af   :  { %10570 = vmatpush1.msra.mxu1 %v21698_v62  ;;  %10426 = vmatprep.subr.mxu0 %v21761_v36  ;;  %v21769_v36 = vld [vmem:[#allocation116_spill] sm:$0xff]  ;;  %v21836_v62 = vld [vmem:[#allocation146_spill] sm:$0xff]  ;;  %v21837_v6 = vld [vmem:[#allocation149_spill] sm:$0xff] }
 0x8b0   :  { %10572 = vmatprep.subr.mxu1 %v21699_v55  ;;  %10430 = vmatpush1.msra.mxu0 %v21762_v47  ;;  %v21767_v47 = vld [vmem:[#allocation113_spill] sm:$0xff]  ;;  %v21835_v55 = vld [vmem:[#allocation142_spill] sm:$0xff] }
 0x8b1   :  { %10574 = vmatpush1.msra.mxu1 %v21700_v2  ;;  %10434 = vmatprep.subr.mxu0 %v21763_v42  ;;  %v21768_v42 = vld [vmem:[#allocation170_spill] sm:$0xff]  ;;  %v21834_v2 = vld [vmem:[#allocation239_spill] sm:$0xff] }
 0x8b2   :  { %10576 = vmatprep.subr.mxu1 %v21701_v0  ;;  %10438 = vmatpush1.msra.mxu0 %v21764_v8  ;;  %v21770_v8 = vld [vmem:[#allocation179_spill] sm:$0xff]  ;;  %v21833_v0 = vld [vmem:[#allocation236_spill] sm:$0xff] }
 0x8b3   :  { %10578 = vmatpush1.msra.mxu1 %v21702_v32  ;;  %10442 = vmatprep.subr.mxu0 %v21765_v41  ;;  %v21772_v41 = vld [vmem:[#allocation182_spill] sm:$0xff]  ;;  %v21826_v32 = vld [vmem:[#allocation267_spill] sm:$0xff] }
 0x8b4   :  { %10580 = vmatprep.subr.mxu1 %v21703_v35  ;;  %10446 = vmatpush1.msra.mxu0 %v21766_v37  ;;  %v21774_v37 = vld [vmem:[#allocation185_spill] sm:$0xff]  ;;  %v21824_v35 = vld [vmem:[#allocation266_spill] sm:$0xff] }
 0x8b5   :  { %10582 = vmatpush1.msra.mxu1 %v21704_v14  ;;  %10615 = vmatprep.mubr.f32.mxu1 %v20373_v28  ;;  %v21822_v14 = vld [vmem:[#allocation265_spill] sm:$0xff] }
 0x8b6   :  { %10450 = vmatprep.subr.mxu0 %v21767_v47  ;;  %10617 = vmatmul.mubr.f32.vlgmr.msra.gmra.mxu1 %v18330_v54  ;;  %v21777_v47 = vld [vmem:[#allocation127_spill] sm:$0xff] }
 0x8b7   :  { %10736 = vmatprep.subr.mxu1 %v21768_v42  ;;  %10454 = vmatpush1.msra.mxu0 %v21769_v36  ;;  %v21779_v42 = vld [vmem:[#allocation129_spill] sm:$0xff]  ;;  %v21780_v36 = vld [vmem:[#allocation194_spill] sm:$0xff] }
 0x8b8   :  { %10742 = vmatpush1.msra.mxu1 %v21770_v8  ;;  %10458 = vmatprep.subr.mxu0 %v21771_v34  ;;  %v21781_v8 = vld [vmem:[#allocation131_spill] sm:$0xff]  ;;  %v21796_v34 = vld [vmem:[#allocation240_spill] sm:$0xff] }
 0x8b9   :  { %10748 = vmatprep.subr.mxu1 %v21772_v41  ;;  %10462 = vmatpush1.msra.mxu0 %v21773_v61  ;;  %v21782_v41 = vld [vmem:[#allocation197_spill] sm:$0xff]  ;;  %v21794_v61 = vld [vmem:[#allocation227_spill] sm:$0xff] }
 0x8ba   :  { %10754 = vmatpush1.msra.mxu1 %v21774_v37  ;;  %10466 = vmatprep.subr.mxu0 %v21775_v27  ;;  %v21783_v27 = vld [vmem:[#allocation200_spill] sm:$0xff]  ;;  %v21792_v37 = vld [vmem:[#allocation223_spill] sm:$0xff] }
 0x8bb   :  { %10760 = vmatprep.subr.mxu1 %v21776_v13  ;;  %10470 = vmatpush1.msra.mxu0 %v21777_v47  ;;  %v21784_v47 = vld [vmem:[#allocation203_spill] sm:$0xff]  ;;  %v21790_v13 = vld [vmem:[#allocation216_spill] sm:$0xff] }
 0x8bc   :  { %10766 = vmatpush1.msra.mxu1 %v21778_v58  ;;  %10474 = vmatprep.subr.mxu0 %v21779_v42  ;;  %v21785_v42 = vld [vmem:[#allocation206_spill] sm:$0xff]  ;;  %v21789_v58 = vld [vmem:[#allocation147_spill] sm:$0xff] }
 0x8bd   :  { %10772 = vmatprep.subr.mxu1 %v21780_v36  ;;  %10478 = vmatpush1.msra.mxu0 %v21781_v8  ;;  %v21786_v8 = vld [vmem:[#allocation210_spill] sm:$0xff]  ;;  %v21787_v36 = vld [vmem:[#allocation145_spill] sm:$0xff] }
 0x8be   :  { %10511 = vmatprep.mubr.f32.mxu0 %v20373_v28  ;;  %10778 = vmatpush1.msra.mxu1 %v21782_v41  ;;  %v21788_v41 = vld [vmem:[#allocation213_spill] sm:$0xff] }
 0x8bf   :  { %10513 = vmatmul.mubr.f32.vlgmr.msra.gmra.mxu0 %v18330_v54  ;;  %10624 = vmatprep.subr.mxu0 %v20835_v31 }
 0x8c0   :  { %10784 = vmatprep.subr.mxu1 %v21783_v27  ;;  %10626 = vmatpush1.msra.mxu0 %v20837_v26  ;;  %v21791_v27 = vld [vmem:[#allocation150_spill] sm:$0xff] }
 0x8c1   :  { %10790 = vmatpush1.msra.mxu1 %v21784_v47  ;;  %10628 = vmatprep.subr.mxu0 %v20839_v39  ;;  %v21793_v47 = vld [vmem:[#allocation152_spill] sm:$0xff] }
 0x8c2   :  { %10796 = vmatprep.subr.mxu1 %v21785_v42  ;;  %10630 = vmatpush1.msra.mxu0 %v20841_v63  ;;  %v21795_v42 = vld [vmem:[#allocation154_spill] sm:$0xff] }
 0x8c3   :  { %10802 = vmatpush1.msra.mxu1 %v21786_v8  ;;  %10632 = vmatprep.subr.mxu0 %v21787_v36  ;;  %v21797_v8 = vld [vmem:[#allocation157_spill] sm:$0xff] }
 0x8c4   :  { %10808 = vmatprep.subr.mxu1 %v21788_v41  ;;  %10634 = vmatpush1.msra.mxu0 %v21789_v58  ;;  %v21799_v41 = vld [vmem:[#allocation160_spill] sm:$0xff] }
 0x8c5   :  { %10814 = vmatpush1.msra.mxu1 %v21790_v13  ;;  %10636 = vmatprep.subr.mxu0 %v21791_v27  ;;  %v21801_v13 = vld [vmem:[#allocation163_spill] sm:$0xff] }
 0x8c6   :  { %10820 = vmatprep.subr.mxu1 %v21792_v37  ;;  %10638 = vmatpush1.msra.mxu0 %v21793_v47  ;;  %v21803_v37 = vld [vmem:[#allocation166_spill] sm:$0xff] }
 0x8c7   :  { %10826 = vmatpush1.msra.mxu1 %v21794_v61  ;;  %10640 = vmatprep.subr.mxu0 %v21795_v42  ;;  %v21805_v61 = vld [vmem:[#allocation169_spill] sm:$0xff] }
 0x8c8   :  { %10832 = vmatprep.subr.mxu1 %v21796_v34  ;;  %10642 = vmatpush1.msra.mxu0 %v21797_v8  ;;  %v21807_v34 = vld [vmem:[#allocation175_spill] sm:$0xff] }
 0x8c9   :  { %10838 = vmatpush1.msra.mxu1 %v21798_v23  ;;  %10644 = vmatprep.subr.mxu0 %v21799_v41  ;;  %v21809_v23 = vld [vmem:[#allocation178_spill] sm:$0xff] }
 0x8ca   :  { %10844 = vmatprep.subr.mxu1 %v21800_v30  ;;  %10646 = vmatpush1.msra.mxu0 %v21801_v13  ;;  %v21811_v30 = vld [vmem:[#allocation184_spill] sm:$0xff] }
 0x8cb   :  { %10850 = vmatpush1.msra.mxu1 %v21802_v4  ;;  %10648 = vmatprep.subr.mxu0 %v21803_v37  ;;  %v21813_v4 = vld [vmem:[#allocation193_spill] sm:$0xff] }
 0x8cc   :  { %10856 = vmatprep.subr.mxu1 %v21804_v11  ;;  %10650 = vmatpush1.msra.mxu0 %v21805_v61  ;;  %v21815_v11 = vld [vmem:[#allocation196_spill] sm:$0xff] }
 0x8cd   :  { %10862 = vmatpush1.msra.mxu1 %v21806_v10  ;;  %10652 = vmatprep.subr.mxu0 %v21807_v34  ;;  %v21817_v10 = vld [vmem:[#allocation199_spill] sm:$0xff] }
 0x8ce   :  { %10868 = vmatprep.subr.mxu1 %v21808_v24  ;;  %10654 = vmatpush1.msra.mxu0 %v21809_v23  ;;  %v21819_v24 = vld [vmem:[#allocation202_spill] sm:$0xff] }
 0x8cf   :  { %10874 = vmatpush1.msra.mxu1 %v21810_v60  ;;  %10656 = vmatprep.subr.mxu0 %v21811_v30  ;;  %v21821_v60 = vld [vmem:[#allocation205_spill] sm:$0xff] }
 0x8d0   :  { %10880 = vmatprep.subr.mxu1 %v21812_v5  ;;  %10658 = vmatpush1.msra.mxu0 %v21813_v4  ;;  %v21823_v5 = vld [vmem:[#allocation209_spill] sm:$0xff] }
 0x8d1   :  { %10886 = vmatpush1.msra.mxu1 %v21814_v59  ;;  %10660 = vmatprep.subr.mxu0 %v21815_v11  ;;  %v21825_v59 = vld [vmem:[#allocation212_spill] sm:$0xff] }
 0x8d2   :  { %10892 = vmatprep.subr.mxu1 %v21816_v29  ;;  %10662 = vmatpush1.msra.mxu0 %v21817_v10  ;;  %v21827_v29 = vld [vmem:[#allocation215_spill] sm:$0xff] }
 0x8d3   :  { %10898 = vmatpush1.msra.mxu1 %v21818_v48  ;;  %10664 = vmatprep.subr.mxu0 %v21819_v24  ;;  %v21832_v48 = vld [vmem:[#allocation233_spill] sm:$0xff] }
 0x8d4   :  { %10904 = vmatprep.subr.mxu1 %v21820_v50  ;;  %10666 = vmatpush1.msra.mxu0 %v21821_v60  ;;  %v21828_v50 = vld [vmem:[#allocation219_spill] sm:$0xff] }
 0x8d5   :  { %10910 = vmatpush1.msra.mxu1 %v21822_v14  ;;  %10668 = vmatprep.subr.mxu0 %v21823_v5  ;;  %v21829_v14 = vld [vmem:[#allocation222_spill] sm:$0xff] }
 0x8d6   :  { %10916 = vmatprep.subr.mxu1 %v21824_v35  ;;  %10670 = vmatpush1.msra.mxu0 %v21825_v59  ;;  %v21830_v35 = vld [vmem:[#allocation226_spill] sm:$0xff] }
 0x8d7   :  { %10922 = vmatpush1.msra.mxu1 %v21826_v32  ;;  %10955 = vmatprep.mubr.f32.mxu1 %v20373_v28  ;;  %v21831_v32 = vld [vmem:[#allocation230_spill] sm:$0xff] }
 0x8d8   :  { %10672 = vmatprep.subr.mxu0 %v21827_v29  ;;  %10957 = vmatmul.mubr.f32.vlgmr.msra.gmra.mxu1 %v18330_v54 }
 0x8d9   :  { %11101 = vmatprep.subr.mxu1 %v20835_v31  ;;  %10674 = vmatpush1.msra.mxu0 %v21828_v50 }
 0x8da   :  { %11103 = vmatpush1.msra.mxu1 %v20837_v26  ;;  %10676 = vmatprep.subr.mxu0 %v21829_v14 }
 0x8db   :  { %11105 = vmatprep.subr.mxu1 %v20839_v39  ;;  %10678 = vmatpush1.msra.mxu0 %v21830_v35 }
 0x8dc   :  { %11107 = vmatpush1.msra.mxu1 %v20841_v63  ;;  %10680 = vmatprep.subr.mxu0 %v21831_v32 }
 0x8dd   :  { %11109 = vmatprep.subr.mxu1 %v21787_v36  ;;  %10682 = vmatpush1.msra.mxu0 %v21832_v48 }
 0x8de   :  { %11111 = vmatpush1.msra.mxu1 %v21789_v58  ;;  %10684 = vmatprep.subr.mxu0 %v21833_v0 }
 0x8df   :  { %11113 = vmatprep.subr.mxu1 %v21791_v27  ;;  %10686 = vmatpush1.msra.mxu0 %v21834_v2 }
 0x8e0   :  { %10719 = vmatprep.mubr.f32.mxu0 %v20373_v28  ;;  %11115 = vmatpush1.msra.mxu1 %v21793_v47 }
 0x8e1   :  { %10725 = vmatmul.mubr.f32.vlgmr.msra.gmra.mxu0 %v18348_v43  ;;  %10965 = vmatprep.subr.mxu0 %v21835_v55  ;;  %v21840_v43 = vld [vmem:[#allocation156_spill] sm:$0xff]  ;;  %v21841_v55 = vld [vmem:[#allocation159_spill] sm:$0xff] }
 0x8e2   :  { %11117 = vmatprep.subr.mxu1 %v21795_v42  ;;  %10968 = vmatpush1.msra.mxu0 %v21836_v62  ;;  %v21842_v62 = vld [vmem:[#allocation162_spill] sm:$0xff] }
 0x8e3   :  { %11119 = vmatpush1.msra.mxu1 %v21797_v8  ;;  %10971 = vmatprep.subr.mxu0 %v21837_v6  ;;  %v21843_v6 = vld [vmem:[#allocation165_spill] sm:$0xff] }
 0x8e4   :  { %11121 = vmatprep.subr.mxu1 %v21799_v41  ;;  %10974 = vmatpush1.msra.mxu0 %v21838_v49  ;;  %v21844_v49 = vld [vmem:[#allocation168_spill] sm:$0xff] }
 0x8e5   :  { %11123 = vmatpush1.msra.mxu1 %v21801_v13  ;;  %10977 = vmatprep.subr.mxu0 %v21839_v56  ;;  %v21845_v56 = vld [vmem:[#allocation172_spill] sm:$0xff] }
 0x8e6   :  { %11125 = vmatprep.subr.mxu1 %v21803_v37  ;;  %10980 = vmatpush1.msra.mxu0 %v21840_v43  ;;  %v21846_v43 = vld [vmem:[#allocation174_spill] sm:$0xff] }
 0x8e7   :  { %11127 = vmatpush1.msra.mxu1 %v21805_v61  ;;  %10983 = vmatprep.subr.mxu0 %v21841_v55  ;;  %v21847_v55 = vld [vmem:[#allocation177_spill] sm:$0xff] }
 0x8e8   :  { %11129 = vmatprep.subr.mxu1 %v21807_v34  ;;  %10986 = vmatpush1.msra.mxu0 %v21842_v62  ;;  %v21848_v62 = vld [vmem:[#allocation181_spill] sm:$0xff] }
 0x8e9   :  { %11131 = vmatpush1.msra.mxu1 %v21809_v23  ;;  %10989 = vmatprep.subr.mxu0 %v21843_v6  ;;  %v21849_v6 = vld [vmem:[#allocation187_spill] sm:$0xff] }
 0x8ea   :  { %11133 = vmatprep.subr.mxu1 %v21811_v30  ;;  %10992 = vmatpush1.msra.mxu0 %v21844_v49  ;;  %v21850_v49 = vld [vmem:[#allocation190_spill] sm:$0xff] }
 0x8eb   :  { %11135 = vmatpush1.msra.mxu1 %v21813_v4  ;;  %10995 = vmatprep.subr.mxu0 %v21845_v56  ;;  %v21851_v56 = vld [vmem:[#allocation195_spill] sm:$0xff] }
 0x8ec   :  { %11137 = vmatprep.subr.mxu1 %v21815_v11  ;;  %10998 = vmatpush1.msra.mxu0 %v21846_v43  ;;  %v21852_v43 = vld [vmem:[#allocation204_spill] sm:$0xff] }
 0x8ed   :  { %11139 = vmatpush1.msra.mxu1 %v21817_v10  ;;  %11001 = vmatprep.subr.mxu0 %v21847_v55  ;;  %v21853_v55 = vld [vmem:[#allocation208_spill] sm:$0xff] }
 0x8ee   :  { %11141 = vmatprep.subr.mxu1 %v21819_v24  ;;  %11004 = vmatpush1.msra.mxu0 %v21848_v62  ;;  %v21854_v62 = vld [vmem:[#allocation211_spill] sm:$0xff] }
 0x8ef   :  { %11143 = vmatpush1.msra.mxu1 %v21821_v60  ;;  %11007 = vmatprep.subr.mxu0 %v21849_v6  ;;  %v21855_v6 = vld [vmem:[#allocation214_spill] sm:$0xff] }
 0x8f0   :  { %11145 = vmatprep.subr.mxu1 %v21823_v5  ;;  %11010 = vmatpush1.msra.mxu0 %v21850_v49  ;;  %v21856_v49 = vld [vmem:[#allocation218_spill] sm:$0xff] }
 0x8f1   :  { %11147 = vmatpush1.msra.mxu1 %v21825_v59  ;;  %11013 = vmatprep.subr.mxu0 %v21851_v56  ;;  %v21857_v56 = vld [vmem:[#allocation221_spill] sm:$0xff] }
 0x8f2   :  { %11149 = vmatprep.subr.mxu1 %v21827_v29  ;;  %11016 = vmatpush1.msra.mxu0 %v21852_v43  ;;  %v21858_v43 = vld [vmem:[#allocation225_spill] sm:$0xff] }
 0x8f3   :  { %11151 = vmatpush1.msra.mxu1 %v21828_v50  ;;  %11019 = vmatprep.subr.mxu0 %v21853_v55  ;;  %v21898_v55 = vld [vmem:[#allocation54_spill] sm:$0xff] }
 0x8f4   :  { %11153 = vmatprep.subr.mxu1 %v21829_v14  ;;  %11022 = vmatpush1.msra.mxu0 %v21854_v62  ;;  %v21859_v62 = vld [vmem:[#allocation229_spill] sm:$0xff] }
 0x8f5   :  { %11155 = vmatpush1.msra.mxu1 %v21830_v35  ;;  %11025 = vmatprep.subr.mxu0 %v21855_v6  ;;  %v21860_v6 = vld [vmem:[#allocation232_spill] sm:$0xff] }
 0x8f6   :  { %11157 = vmatprep.subr.mxu1 %v21831_v32  ;;  %11028 = vmatpush1.msra.mxu0 %v21856_v49  ;;  %v21861_v49 = vld [vmem:[#allocation235_spill] sm:$0xff] }
 0x8f7   :  { %11159 = vmatpush1.msra.mxu1 %v21832_v48  ;;  %11031 = vmatprep.subr.mxu0 %v21857_v56  ;;  %v21862_v56 = vld [vmem:[#allocation238_spill] sm:$0xff] }
 0x8f8   :  { %11161 = vmatprep.subr.mxu1 %v21833_v0  ;;  %11034 = vmatpush1.msra.mxu0 %v21858_v43  ;;  %v21863_v43 = vld [vmem:[#allocation242_spill] sm:$0xff] }
 0x8f9   :  { %11163 = vmatpush1.msra.mxu1 %v21834_v2  ;;  %11196 = vmatprep.mubr.f32.mxu1 %v20373_v28 }
 0x8fa   :  { %11037 = vmatprep.subr.mxu0 %v21859_v62  ;;  %11200 = vmatmul.mubr.f32.vlgmr.msra.gmra.mxu1 %v18340_v22  ;;  %v21864_v62 = vld [vmem:[#allocation245_spill] sm:$0xff]  ;;  %v21865_v22 = vld [vmem:[#allocation248_spill] sm:$0xff] }
 0x8fb   :  { %11375 = vmatprep.subr.mxu1 %v20835_v31  ;;  %11040 = vmatpush1.msra.mxu0 %v21860_v6  ;;  %v21866_v6 = vld [vmem:[#allocation251_spill] sm:$0xff] }
 0x8fc   :  { %11377 = vmatpush1.msra.mxu1 %v20837_v26  ;;  %11043 = vmatprep.subr.mxu0 %v21861_v49  ;;  %v21896_v49 = vld [vmem:[#allocation51_spill] sm:$0xff] }
 0x8fd   :  { %11379 = vmatprep.subr.mxu1 %v20839_v39  ;;  %11046 = vmatpush1.msra.mxu0 %v21862_v56  ;;  %v21867_v56 = vld [vmem:[#allocation148_spill] sm:$0xff] }
 0x8fe   :  { %11381 = vmatpush1.msra.mxu1 %v20841_v63  ;;  %11049 = vmatprep.subr.mxu0 %v21863_v43  ;;  %v21868_v43 = vld [vmem:[#allocation155_spill] sm:$0xff] }
 0x8ff   :  { %11383 = vmatprep.subr.mxu1 %v21787_v36  ;;  %11052 = vmatpush1.msra.mxu0 %v21864_v62  ;;  %v21869_v62 = vld [vmem:[#allocation158_spill] sm:$0xff] }
 0x900   :  { %11385 = vmatpush1.msra.mxu1 %v21789_v58  ;;  %11055 = vmatprep.subr.mxu0 %v21865_v22  ;;  %v21870_v22 = vld [vmem:[#allocation161_spill] sm:$0xff] }
 0x901   :  { %11387 = vmatprep.subr.mxu1 %v21791_v27  ;;  %11058 = vmatpush1.msra.mxu0 %v21866_v6  ;;  %v21871_v6 = vld [vmem:[#allocation164_spill] sm:$0xff] }
 0x902   :  { %11091 = vmatprep.mubr.f32.mxu0 %v20373_v28  ;;  %11389 = vmatpush1.msra.mxu1 %v21793_v47 }
 0x903   :  { %11094 = vmatmul.mubr.f32.vlgmr.msra.gmra.mxu0 %v18333_v40  ;;  %11209 = vmatprep.subr.mxu0 %v21867_v56  ;;  %v21872_v40 = vld [vmem:[#allocation167_spill] sm:$0xff] }
 0x904   :  { %11391 = vmatprep.subr.mxu1 %v21795_v42  ;;  %11213 = vmatpush1.msra.mxu0 %v21868_v43  ;;  %v21873_v56 = vld [vmem:[#allocation171_spill] sm:$0xff]  ;;  %v21874_v43 = vld [vmem:[#allocation173_spill] sm:$0xff] }
 0x905   :  { %11393 = vmatpush1.msra.mxu1 %v21797_v8  ;;  %11217 = vmatprep.subr.mxu0 %v21869_v62  ;;  %v21875_v62 = vld [vmem:[#allocation176_spill] sm:$0xff] }
 0x906   :  { %11395 = vmatprep.subr.mxu1 %v21799_v41  ;;  %11221 = vmatpush1.msra.mxu0 %v21870_v22  ;;  %v21876_v22 = vld [vmem:[#allocation180_spill] sm:$0xff] }
 0x907   :  { %11397 = vmatpush1.msra.mxu1 %v21801_v13  ;;  %11225 = vmatprep.subr.mxu0 %v21871_v6  ;;  %v21877_v6 = vld [vmem:[#allocation183_spill] sm:$0xff] }
 0x908   :  { %11399 = vmatprep.subr.mxu1 %v21803_v37  ;;  %11229 = vmatpush1.msra.mxu0 %v21872_v40  ;;  %v21878_v40 = vld [vmem:[#allocation186_spill] sm:$0xff] }
 0x909   :  { %11401 = vmatpush1.msra.mxu1 %v21805_v61  ;;  %11233 = vmatprep.subr.mxu0 %v21873_v56  ;;  %v21879_v56 = vld [vmem:[#allocation189_spill] sm:$0xff] }
 0x90a   :  { %11403 = vmatprep.subr.mxu1 %v21807_v34  ;;  %11237 = vmatpush1.msra.mxu0 %v21874_v43  ;;  %v21880_v43 = vld [vmem:[#allocation192_spill] sm:$0xff] }
 0x90b   :  { %11405 = vmatpush1.msra.mxu1 %v21809_v23  ;;  %11241 = vmatprep.subr.mxu0 %v21875_v62  ;;  %v21881_v62 = vld [vmem:[#allocation198_spill] sm:$0xff] }
 0x90c   :  { %11407 = vmatprep.subr.mxu1 %v21811_v30  ;;  %11245 = vmatpush1.msra.mxu0 %v21876_v22  ;;  %v21882_v22 = vld [vmem:[#allocation201_spill] sm:$0xff] }
 0x90d   :  { %11409 = vmatpush1.msra.mxu1 %v21813_v4  ;;  %11249 = vmatprep.subr.mxu0 %v21877_v6  ;;  %v21883_v6 = vld [vmem:[#allocation207_spill] sm:$0xff] }
 0x90e   :  { %11411 = vmatprep.subr.mxu1 %v21815_v11  ;;  %11253 = vmatpush1.msra.mxu0 %v21878_v40  ;;  %v21884_v40 = vld [vmem:[#allocation217_spill] sm:$0xff] }
 0x90f   :  { %11413 = vmatpush1.msra.mxu1 %v21817_v10  ;;  %11257 = vmatprep.subr.mxu0 %v21879_v56  ;;  %v21885_v56 = vld [vmem:[#allocation220_spill] sm:$0xff] }
 0x910   :  { %11415 = vmatprep.subr.mxu1 %v21819_v24  ;;  %11261 = vmatpush1.msra.mxu0 %v21880_v43  ;;  %v21886_v43 = vld [vmem:[#allocation224_spill] sm:$0xff] }
 0x911   :  { %11417 = vmatpush1.msra.mxu1 %v21821_v60  ;;  %11265 = vmatprep.subr.mxu0 %v21881_v62  ;;  %v21887_v62 = vld [vmem:[#allocation228_spill] sm:$0xff] }
 0x912   :  { %11419 = vmatprep.subr.mxu1 %v21823_v5  ;;  %11269 = vmatpush1.msra.mxu0 %v21882_v22  ;;  %v21888_v22 = vld [vmem:[#allocation231_spill] sm:$0xff] }
 0x913   :  { %11421 = vmatpush1.msra.mxu1 %v21825_v59  ;;  %11273 = vmatprep.subr.mxu0 %v21883_v6  ;;  %v21889_v6 = vld [vmem:[#allocation234_spill] sm:$0xff] }
 0x914   :  { %11423 = vmatprep.subr.mxu1 %v21827_v29  ;;  %11277 = vmatpush1.msra.mxu0 %v21884_v40  ;;  %v21890_v40 = vld [vmem:[#allocation237_spill] sm:$0xff] }
 0x915   :  { %11425 = vmatpush1.msra.mxu1 %v21828_v50  ;;  %11281 = vmatprep.subr.mxu0 %v21885_v56  ;;  %v21894_v56 = vld [vmem:[#allocation42_spill] sm:$0xff] }
 0x916   :  { %11427 = vmatprep.subr.mxu1 %v21829_v14  ;;  %11285 = vmatpush1.msra.mxu0 %v21886_v43  ;;  %v21891_v43 = vld [vmem:[#allocation241_spill] sm:$0xff] }
 0x917   :  { %11429 = vmatpush1.msra.mxu1 %v21830_v35  ;;  %11289 = vmatprep.subr.mxu0 %v21887_v62  ;;  %v21892_v62 = vld [vmem:[#allocation244_spill] sm:$0xff] }
 0x918   :  { %11431 = vmatprep.subr.mxu1 %v21831_v32  ;;  %11293 = vmatpush1.msra.mxu0 %v21888_v22  ;;  %v21893_v22 = vld [vmem:[#allocation247_spill] sm:$0xff] }
 0x919   :  { %11433 = vmatpush1.msra.mxu1 %v21832_v48  ;;  %11297 = vmatprep.subr.mxu0 %v21889_v6  ;;  %v21895_v6 = vld [vmem:[#allocation250_spill] sm:$0xff]  ;;  %v21903_v48 = vld [vmem:[#allocation259_spill] sm:$0xff] }
 0x91a   :  { %11435 = vmatprep.subr.mxu1 %v21833_v0  ;;  %11301 = vmatpush1.msra.mxu0 %v21890_v40  ;;  %v21897_v40 = vld [vmem:[#allocation253_spill] sm:$0xff] }
 0x91b   :  { %11437 = vmatpush1.msra.mxu1 %v21834_v2  ;;  %11470 = vmatprep.mubr.f32.mxu1 %v20373_v28  ;;  %v21899_v2 = vld [vmem:[#allocation255_spill] sm:$0xff]  ;;  %v21901_v0 = vld [vmem:[#allocation257_spill] sm:$0xff] }
 0x91c   :  { %11305 = vmatprep.subr.mxu0 %v21891_v43  ;;  %11472 = vmatmul.mubr.f32.vlgmr.msra.gmra.mxu1 %v18330_v54  ;;  %v21900_v43 = vld [vmem:[#allocation57_spill] sm:$0xff] }
 0x91d   :  { %11309 = vmatpush1.msra.mxu0 %v21892_v62  ;;  %11366 = vmatprep.mubr.f32.mxu0 %v20373_v28  ;;  %v21902_v62 = vld [vmem:[#allocation60_spill] sm:$0xff] }
 0x91e   :  { %11313 = vmatprep.subr.mxu0 %v21893_v22  ;;  %11628 = vmatprep.subr.mxu1 %v21894_v56  ;;  %v21904_v22 = vld [vmem:[#allocation63_spill] sm:$0xff] }
 0x91f   :  { %11317 = vmatpush1.msra.mxu0 %v21895_v6  ;;  %11634 = vmatpush1.msra.mxu1 %v21896_v49  ;;  %v21905_v6 = vld [vmem:[#allocation66_spill] sm:$0xff]  ;;  %v21906_v49 = vld [vmem:[#allocation69_spill] sm:$0xff] }
 0x920   :  { %11321 = vmatprep.subr.mxu0 %v21897_v40  ;;  %11640 = vmatprep.subr.mxu1 %v21898_v55  ;;  %v21907_v55 = vld [vmem:[#allocation72_spill] sm:$0xff]  ;;  %v21941_v40 = vld [vmem:[#allocation14_spill] sm:$0xff] }
 0x921   :  { %11325 = vmatpush1.msra.mxu0 %v21899_v2  ;;  %11646 = vmatpush1.msra.mxu1 %v21900_v43  ;;  %v21908_v43 = vld [vmem:[#allocation75_spill] sm:$0xff]  ;;  %v21939_v2 = vld [vmem:[#allocation108_spill] sm:$0xff] }
 0x922   :  { %11329 = vmatprep.subr.mxu0 %v21901_v0  ;;  %11652 = vmatprep.subr.mxu1 %v21902_v62  ;;  %v21909_v62 = vld [vmem:[#allocation78_spill] sm:$0xff] }
 0x923   :  { %11333 = vmatpush1.msra.mxu0 %v21903_v48  ;;  %11658 = vmatpush1.msra.mxu1 %v21904_v22  ;;  %v21910_v22 = vld [vmem:[#allocation82_spill] sm:$0xff]  ;;  %v21932_v48 = vld [vmem:[#allocation139_spill] sm:$0xff] }
 0x924   :  { %11368 = vmatmul.mubr.f32.vlgmr.msra.gmra.mxu0 %v18330_v54  ;;  %11664 = vmatprep.subr.mxu1 %v21905_v6  ;;  %v21911_v54 = vld [vmem:[#allocation85_spill] sm:$0xff]  ;;  %v21930_v6 = vld [vmem:[#allocation138_spill] sm:$0xff] }
 0x925   :  { %11670 = vmatpush1.msra.mxu1 %v21906_v49  ;;  %11516 = vmatprep.subr.mxu0 %v20787_v18  ;;  %v21912_v49 = vld [vmem:[#allocation88_spill] sm:$0xff]  ;;  %v21937_v0 = vld [vmem:[#allocation102_spill] sm:$0xff] }
 0x926   :  { %11676 = vmatprep.subr.mxu1 %v21907_v55  ;;  %11518 = vmatpush1.msra.mxu0 %v20675_v15  ;;  %v21913_v55 = vld [vmem:[#allocation95_spill] sm:$0xff] }
 0x927   :  { %11682 = vmatpush1.msra.mxu1 %v21908_v43  ;;  %11520 = vmatprep.subr.mxu0 %v20677_v46  ;;  %v21914_v43 = vld [vmem:[#allocation99_spill] sm:$0xff] }
 0x928   :  { %11688 = vmatprep.subr.mxu1 %v21909_v62  ;;  %11522 = vmatpush1.msra.mxu0 %v20679_v51  ;;  %v21915_v62 = vld [vmem:[#allocation112_spill] sm:$0xff] }
 0x929   :  { %11694 = vmatpush1.msra.mxu1 %v21910_v22  ;;  %11524 = vmatprep.subr.mxu0 %v20681_v38  ;;  %v21916_v22 = vld [vmem:[#allocation115_spill] sm:$0xff] }
 0x92a   :  { %11700 = vmatprep.subr.mxu1 %v21911_v54  ;;  %11526 = vmatpush1.msra.mxu0 %v20683_v17  ;;  %v21917_v54 = vld [vmem:[#allocation118_spill] sm:$0xff] }
 0x92b   :  { %11706 = vmatpush1.msra.mxu1 %v21912_v49  ;;  %11528 = vmatprep.subr.mxu0 %v20685_v12  ;;  %v21918_v49 = vld [vmem:[#allocation121_spill] sm:$0xff] }
 0x92c   :  { %11712 = vmatprep.subr.mxu1 %v21913_v55  ;;  %11530 = vmatpush1.msra.mxu0 %v20687_v20  ;;  %v21919_v55 = vld [vmem:[#allocation124_spill] sm:$0xff] }
 0x92d   :  { %11718 = vmatpush1.msra.mxu1 %v21914_v43  ;;  %11532 = vmatprep.subr.mxu0 %v20689_v16  ;;  %v21920_v43 = vld [vmem:[#allocation126_spill] sm:$0xff] }
 0x92e   :  { %11724 = vmatprep.subr.mxu1 %v21915_v62  ;;  %11534 = vmatpush1.msra.mxu0 %v20691_v25  ;;  %v21921_v62 = vld [vmem:[#allocation128_spill] sm:$0xff] }
 0x92f   :  { %11730 = vmatpush1.msra.mxu1 %v21916_v22  ;;  %11536 = vmatprep.subr.mxu0 %v20693_v19  ;;  %v21922_v22 = vld [vmem:[#allocation130_spill] sm:$0xff] }
 0x930   :  { %11736 = vmatprep.subr.mxu1 %v21917_v54  ;;  %11538 = vmatpush1.msra.mxu0 %v20745_v57  ;;  %v21923_v54 = vld [vmem:[#allocation132_spill] sm:$0xff] }
 0x931   :  { %11742 = vmatpush1.msra.mxu1 %v21918_v49  ;;  %11540 = vmatprep.subr.mxu0 %v20747_v45  ;;  %v21924_v49 = vld [vmem:[#allocation133_spill] sm:$0xff] }
 0x932   :  { %11748 = vmatprep.subr.mxu1 %v21919_v55  ;;  %11542 = vmatpush1.msra.mxu0 %v20749_v21  ;;  %v21925_v55 = vld [vmem:[#allocation134_spill] sm:$0xff] }
 0x933   :  { %11754 = vmatpush1.msra.mxu1 %v21920_v43  ;;  %11544 = vmatprep.subr.mxu0 %v20751_v33  ;;  %v21926_v43 = vld [vmem:[#allocation135_spill] sm:$0xff] }
 0x934   :  { %11760 = vmatprep.subr.mxu1 %v21921_v62  ;;  %11546 = vmatpush1.msra.mxu0 %v20753_v1  ;;  %v21927_v62 = vld [vmem:[#allocation136_spill] sm:$0xff]  ;;  %v10103_v35 = vpop.f32.mrf.mxu1 }
 0x935   :  { %11766 = vmatpush1.msra.mxu1 %v21922_v22  ;;  %11548 = vmatprep.subr.mxu0 %v20755_v9  ;;  %v21928_v22 = vld [vmem:[#allocation137_spill] sm:$0xff] }
 0x936   :  { %11772 = vmatprep.subr.mxu1 %v21923_v54  ;;  %11550 = vmatpush1.msra.mxu0 %v20757_v53  ;;  %v21929_v54 = vld [vmem:[#allocation81_spill] sm:$0xff]  ;;  %v10105_v50 = vpop.f32.mrf.mxu1 }
 0x937   :  { %11778 = vmatpush1.msra.mxu1 %v21924_v49  ;;  %11552 = vmatprep.subr.mxu0 %v20759_v7  ;;  %v21931_v49 = vld [vmem:[#allocation84_spill] sm:$0xff] }
 0x938   :  { %11784 = vmatprep.subr.mxu1 %v21925_v55  ;;  %11554 = vmatpush1.msra.mxu0 %v20761_v44  ;;  %v21933_v55 = vld [vmem:[#allocation87_spill] sm:$0xff] }
 0x939   :  { %11790 = vmatpush1.msra.mxu1 %v21926_v43  ;;  %11556 = vmatprep.subr.mxu0 %v20763_v3  ;;  %v21934_v43 = vld [vmem:[#allocation91_spill] sm:$0xff] }
 0x93a   :  { %11796 = vmatprep.subr.mxu1 %v21927_v62  ;;  %11558 = vmatpush1.msra.mxu0 %v20765_v52  ;;  %v21935_v62 = vld [vmem:[#allocation94_spill] sm:$0xff] }
 0x93b   :  { %11802 = vmatpush1.msra.mxu1 %v21928_v22  ;;  %11560 = vmatprep.subr.mxu0 %v21929_v54  ;;  %v21936_v22 = vld [vmem:[#allocation98_spill] sm:$0xff] }
 0x93c   :  { %11808 = vmatprep.subr.mxu1 %v21930_v6  ;;  %11562 = vmatpush1.msra.mxu0 %v21931_v49  ;;  %v21938_v6 = vld [vmem:[#allocation105_spill] sm:$0xff]  ;;  %v9871_v56 = vpop.f32.mrf.mxu0 }
 0x93d   :  { %11814 = vmatpush1.msra.mxu1 %v21932_v48  ;;  %11564 = vmatprep.subr.mxu0 %v21933_v55  ;;  %v21940_v48 = vld [vmem:[#allocation111_spill] sm:$0xff]  ;;  %v10104_v24 = vadd.f32 %v10103_v35, %v9871_v56 }
 0x93e   :  { %11847 = vmatprep.mubr.f32.mxu1 %v20373_v28  ;;  %11993 = vmatprep.subr.mxu1 %v20787_v18  ;;  %v9873_v32 = vpop.f32.mrf.mxu0 }
 0x93f   :  { %11566 = vmatpush1.msra.mxu0 %v21934_v43  ;;  %11611 = vmatprep.mubr.f32.mxu0 %v20373_v28  ;;  %v10106_v59 = vadd.f32 %v10105_v50, %v9873_v32 }
 0x940   :  { %11568 = vmatprep.subr.mxu0 %v21935_v62 }
 0x941   :  { %11570 = vmatpush1.msra.mxu0 %v21936_v22 }
 0x942   :  { %11572 = vmatprep.subr.mxu0 %v21937_v0 }
 0x943   :  { %11574 = vmatpush1.msra.mxu0 %v21938_v6 }
 0x944   :  { %11576 = vmatprep.subr.mxu0 %v21939_v2 }
 0x945   :  { %11578 = vmatpush1.msra.mxu0 %v21940_v48 }
 0x946   :  { %11857 = vmatprep.subr.mxu0 %v21941_v40 }
 0x954   :  { %v10346_v5 = vpop.f32.mrf.mxu1 }
 0x956   :  { %v10348_v4 = vpop.f32.mrf.mxu1 }
 0x95d   :  { %v10240_v14 = vpop.f32.mrf.mxu0 }
 0x95e   :  { %v10241_v11 = vadd.f32 %v10240_v14, %v10104_v24  ;;  %v21942_v14 = vld [vmem:[#allocation13_spill] sm:$0xff] }
 0x95f   :  { %v10242_v29 = vpop.f32.mrf.mxu0 }
 0x960   :  { %v10243_v10 = vadd.f32 %v10242_v29, %v10106_v59  ;;  %v10347_v61 = vadd.f32 %v10346_v5, %v10241_v11  ;;  %v21943_v5 = vld [vmem:[#allocation15_spill] sm:$0xff] }
 0x962   :  { %v10349_v23 = vadd.f32 %v10348_v4, %v10243_v10 }
 0x976   :  { %v10618_v34 = vpop.f32.mrf.mxu1 }
 0x978   :  { %v10620_v41 = vpop.f32.mrf.mxu1 }
 0x97f   :  { %v10514_v60 = vpop.f32.mrf.mxu0 }
 0x980   :  { %v10515_v40 = vadd.f32 %v10514_v60, %v10347_v61 }
 0x981   :  { %v10516_v30 = vpop.f32.mrf.mxu0 }
 0x982   :  { %v10517_v37 = vadd.f32 %v10516_v30, %v10349_v23  ;;  %v10619_v47 = vadd.f32 %v10618_v34, %v10515_v40  ;;  %v21944_v40 = vld [vmem:[#allocation16_spill] sm:$0xff] }
 0x984   :  { %v10621_v8 = vadd.f32 %v10620_v41, %v10517_v37  ;;  %v11482_v50 = vrot.slane %v10619_v47, 3 }
 0x986   :  { %v11483_v32 = vrot.slane %v10621_v8, 3  ;;  %v11490_v11 = vadd.f32 %v11482_v50, %v21943_v5  ;;  %v22054_v5 = vld [vmem:[#allocation263_spill] sm:$0xff] }
 0x988   :  { %v11491_v29 = vadd.f32 %v11483_v32, %v21942_v14  ;;  %v22056_v14 = vld [vmem:[#allocation264_spill] sm:$0xff] }
 0x98a   :  { %15102 = vtanh.f32 %v11491_v29 }
 0x98b   :  { %15104 = vtanh.f32 %v11490_v11  ;;  %v21946_v11 = vld [vmem:[#allocation29_spill] sm:$0xff] }
 0x997   :  { %v15103_v32 = vpop.eup %15102 }
 0x998   :  { %v10958_v27 = vpop.f32.mrf.mxu1  ;;  %v15105_v50 = vpop.eup %15104 }
 0x99a   :  { %v10960_v35 = vpop.f32.mrf.mxu1 }
 0x9a1   :  { %v10726_v13 = vpop.f32.mrf.mxu0 }
 0x9a2   :  { %v10959_v36 = vadd.f32 %v10958_v27, %v10726_v13 }
 0x9a3   :  { %v10728_v42 = vpop.f32.mrf.mxu0 }
 0x9a4   :  { %v10961_v59 = vadd.f32 %v10960_v35, %v10728_v42  ;;  %v11500_v35 = vmul.f32 0.5, %v15103_v32 }
 0x9ba   :  { %v11201_v10 = vpop.f32.mrf.mxu1 }
 0x9bc   :  { %v11203_v30 = vpop.f32.mrf.mxu1 }
 0x9c3   :  { %v11095_v58 = vpop.f32.mrf.mxu0 }
 0x9c4   :  { %v11096_v24 = vadd.f32 %v11095_v58, %v10959_v36 }
 0x9c5   :  { %v11097_v56 = vpop.f32.mrf.mxu0 }
 0x9c6   :  { %v11098_v4 = vadd.f32 %v11097_v56, %v10961_v59  ;;  %v11202_v60 = vadd.f32 %v11201_v10, %v11096_v24  ;;  %v21945_v56 = vld [vmem:[#allocation17_spill] sm:$0xff]  ;;  %v11498_v59 = vmul.f32 0.5, %v15105_v50  ;;  %v11501_v24 = vadd.f32 0.5, %v11500_v35  ;;  %v21948_v50 = vld [vmem:[#allocation18_spill] sm:$0xff] }
 0x9c7   :  { %v21949_v35 = vld [vmem:[#allocation21_spill] sm:$0xff] }
 0x9c8   :  { %v11204_v34 = vadd.f32 %v11203_v30, %v11098_v4  ;;  %v11499_v10 = vadd.f32 0.5, %v11498_v59  ;;  %v11505_v4 = vrot.slane %v21946_v11, 7  ;;  %v21951_v59 = vld [vmem:[#allocation25_spill] sm:$0xff]  ;;  %v21954_v11 = vld [vmem:[#allocation34_spill] sm:$0xff] }
 0x9ca   :  { %v11507_v30 = vmul.f32 %v11505_v4, %v11501_v24  ;;  %v21952_v24 = vld [vmem:[#allocation28_spill] sm:$0xff]  ;;  %v21955_v4 = vld [vmem:[#allocation37_spill] sm:$0xff] }
 0x9dc   :  { %v11473_v8 = vpop.f32.mrf.mxu1 }
 0x9de   :  { %v11475_v47 = vpop.f32.mrf.mxu1 }
 0x9e4   :  { %v11369_v23 = vpop.f32.mrf.mxu0 }
 0x9e5   :  { %v11370_v61 = vadd.f32 %v11369_v23, %v11202_v60 }
 0x9e6   :  { %v11371_v41 = vpop.f32.mrf.mxu0 }
 0x9e7   :  { %v11474_v13 = vadd.f32 %v11473_v8, %v11370_v61  ;;  %v11372_v27 = vadd.f32 %v11371_v41, %v11204_v34 }
 0x9e9   :  { %v11484_v37 = vrot.slane %v11474_v13, 3  ;;  %v11476_v58 = vadd.f32 %v11475_v47, %v11372_v27 }
 0x9eb   :  { %v11492_v42 = vadd.f32 %v11484_v37, %v21944_v40  ;;  %v11485_v36 = vrot.slane %v11476_v58, 3  ;;  %v22052_v40 = vld [vmem:[#allocation262_spill] sm:$0xff] }
 0x9ed   :  { %15106 = vtanh.f32 %v11492_v42  ;;  %v11493_v29 = vadd.f32 %v11485_v36, %v21945_v56  ;;  %v22050_v56 = vld [vmem:[#allocation261_spill] sm:$0xff] }
 0x9ef   :  { %15108 = vtanh.f32 %v11493_v29  ;;  %v21950_v29 = vld [vmem:[#allocation23_spill] sm:$0xff] }
 0x9fa   :  { %v15107_v60 = vpop.eup %15106 }
 0x9fb   :  { %v11508_v23 = vmul.f32 %v15107_v60, %v11499_v10  ;;  %v21953_v10 = vld [vmem:[#allocation31_spill] sm:$0xff]  ;;  %v21956_v60 = vld [vmem:[#allocation40_spill] sm:$0xff] }
 0x9fc   :  { %v15109_v34 = vpop.eup %15108 }
 0x9fd   :  { %v18755_v61 = vadd.f32 %v11508_v23, %v11507_v30  ;;  %v11502_v8 = vmul.f32 0.5, %v15109_v34  ;;  %v21957_v30 = vld [vmem:[#allocation44_spill] sm:$0xff]  ;;  %v21958_v23 = vld [vmem:[#allocation46_spill] sm:$0xff]  ;;  %v21959_v34 = vld [vmem:[#allocation49_spill] sm:$0xff] }
 0x9ff   :  { %21947 = vst [vmem:[#allocation32_spill] sm:$0xff] %v18755_v61  ;;  %15110 = vtanh.f32 %v18755_v61  ;;  %v11503_v41 = vadd.f32 0.5, %v11502_v8  ;;  %v21960_v8 = vld [vmem:[#allocation53_spill] sm:$0xff]  ;;  %v22048_v61 = vld [vmem:[#allocation260_spill] sm:$0xff] }
 0xa0c   :  { %v15111_v13 = vpop.eup %15110 }
 0xa0d   :  { %v11511_v27 = vmul.f32 %v15111_v13, %v11503_v41  ;;  %v21961_v41 = vld [vmem:[#allocation59_spill] sm:$0xff]  ;;  %v21962_v13 = vld [vmem:[#allocation62_spill] sm:$0xff] }
 0xa0f   :  { %v11513_v37 = vrot.slane %v11511_v27, 5  ;;  %v21963_v27 = vld [vmem:[#allocation67_spill] sm:$0xff] }
 0xa11   :  { %v18758_v47 = vand.u32 4294901760, %v11513_v37 }
 0xa13   :  { %v18761_v42 = vsub.f32 %v11513_v37, %v18758_v47  ;;  %11849 = vmatmul.mubr.f32.vlgmr.msra.gmra.mxu1 %v18758_v47  ;;  %v21964_v37 = vld [vmem:[#allocation76_spill] sm:$0xff] }
 0xa14   :  { %11995 = vmatpush1.msra.mxu1 %v20675_v15  ;;  %12088 = vmatprep.mubr.f32.mxu1 %v20373_v28 }
 0xa15   :  { %11997 = vmatprep.subr.mxu1 %v20677_v46  ;;  %v18768_v58 = vand.u32 4294901760, %v18761_v42 }
 0xa16   :  { %11999 = vmatpush1.msra.mxu1 %v20679_v51 }
 0xa17   :  { %12001 = vmatprep.subr.mxu1 %v20681_v38  ;;  %v11615_v36 = vsub.f32 %v18761_v42, %v18768_v58 }
 0xa18   :  { %12003 = vmatpush1.msra.mxu1 %v20683_v17 }
 0xa19   :  { %12005 = vmatprep.subr.mxu1 %v20685_v12  ;;  %v18776_v32 = vand.u32 4294901760, %v11615_v36  ;;  %v21965_v36 = vld [vmem:[#allocation80_spill] sm:$0xff] }
 0xa1a   :  { %12007 = vmatpush1.msra.mxu1 %v20687_v20 }
 0xa1b   :  { %12009 = vmatprep.subr.mxu1 %v20689_v16  ;;  %11617 = vmatmul.mubr.f32.vlgmr.msra.gmra.mxu0 %v18776_v32 }
 0xa1c   :  { %11860 = vmatpush1.msra.mxu0 %v21948_v50  ;;  %12011 = vmatpush1.msra.mxu1 %v20691_v25  ;;  %v22046_v50 = vld [vmem:[#allocation258_spill] sm:$0xff] }
 0xa1d   :  { %11863 = vmatprep.subr.mxu0 %v21949_v35  ;;  %12013 = vmatprep.subr.mxu1 %v20693_v19  ;;  %v22044_v35 = vld [vmem:[#allocation256_spill] sm:$0xff] }
 0xa1e   :  { %11866 = vmatpush1.msra.mxu0 %v21950_v29  ;;  %12015 = vmatpush1.msra.mxu1 %v20745_v57  ;;  %v22042_v29 = vld [vmem:[#allocation254_spill] sm:$0xff] }
 0xa1f   :  { %11869 = vmatprep.subr.mxu0 %v21951_v59  ;;  %12017 = vmatprep.subr.mxu1 %v20747_v45  ;;  %v22040_v59 = vld [vmem:[#allocation252_spill] sm:$0xff] }
 0xa20   :  { %11872 = vmatpush1.msra.mxu0 %v21952_v24  ;;  %12019 = vmatpush1.msra.mxu1 %v20749_v21  ;;  %v22038_v24 = vld [vmem:[#allocation249_spill] sm:$0xff] }
 0xa21   :  { %11875 = vmatprep.subr.mxu0 %v21953_v10  ;;  %12021 = vmatprep.subr.mxu1 %v20751_v33  ;;  %v22036_v10 = vld [vmem:[#allocation246_spill] sm:$0xff] }
 0xa22   :  { %11878 = vmatpush1.msra.mxu0 %v21954_v11  ;;  %12023 = vmatpush1.msra.mxu1 %v20753_v1  ;;  %v22034_v11 = vld [vmem:[#allocation243_spill] sm:$0xff] }
 0xa23   :  { %11881 = vmatprep.subr.mxu0 %v21955_v4  ;;  %12025 = vmatprep.subr.mxu1 %v20755_v9  ;;  %v22014_v4 = vld [vmem:[#allocation191_spill] sm:$0xff] }
 0xa24   :  { %11884 = vmatpush1.msra.mxu0 %v21956_v60  ;;  %12027 = vmatpush1.msra.mxu1 %v20757_v53  ;;  %v22012_v60 = vld [vmem:[#allocation188_spill] sm:$0xff] }
 0xa25   :  { %11887 = vmatprep.subr.mxu0 %v21957_v30  ;;  %12029 = vmatprep.subr.mxu1 %v20759_v7  ;;  %v22011_v30 = vld [vmem:[#allocation125_spill] sm:$0xff] }
 0xa26   :  { %11890 = vmatpush1.msra.mxu0 %v21958_v23  ;;  %12031 = vmatpush1.msra.mxu1 %v20761_v44  ;;  %v22009_v23 = vld [vmem:[#allocation122_spill] sm:$0xff] }
 0xa27   :  { %11893 = vmatprep.subr.mxu0 %v21959_v34  ;;  %12033 = vmatprep.subr.mxu1 %v20763_v3  ;;  %v22007_v34 = vld [vmem:[#allocation119_spill] sm:$0xff] }
 0xa28   :  { %11896 = vmatpush1.msra.mxu0 %v21960_v8  ;;  %12035 = vmatpush1.msra.mxu1 %v20765_v52  ;;  %v21966_v8 = vld [vmem:[#allocation83_spill] sm:$0xff] }
 0xa29   :  { %11899 = vmatprep.subr.mxu0 %v21961_v41  ;;  %12037 = vmatprep.subr.mxu1 %v21929_v54  ;;  %v21967_v41 = vld [vmem:[#allocation86_spill] sm:$0xff] }
 0xa2a   :  { %11902 = vmatpush1.msra.mxu0 %v21962_v13  ;;  %12039 = vmatpush1.msra.mxu1 %v21931_v49  ;;  %v21968_v13 = vld [vmem:[#allocation90_spill] sm:$0xff] }
 0xa2b   :  { %11905 = vmatprep.subr.mxu0 %v21963_v27  ;;  %12041 = vmatprep.subr.mxu1 %v21933_v55  ;;  %v21969_v27 = vld [vmem:[#allocation93_spill] sm:$0xff] }
 0xa2c   :  { %11908 = vmatpush1.msra.mxu0 %v21964_v37  ;;  %12043 = vmatpush1.msra.mxu1 %v21934_v43  ;;  %v21970_v37 = vld [vmem:[#allocation97_spill] sm:$0xff] }
 0xa2d   :  { %11911 = vmatprep.subr.mxu0 %v21965_v36  ;;  %12045 = vmatprep.subr.mxu1 %v21935_v62  ;;  %v21971_v36 = vld [vmem:[#allocation101_spill] sm:$0xff] }
 0xa2e   :  { %11914 = vmatpush1.msra.mxu0 %v21966_v8  ;;  %12047 = vmatpush1.msra.mxu1 %v21936_v22  ;;  %v21977_v8 = vld [vmem:[#allocation120_spill] sm:$0xff] }
 0xa2f   :  { %11917 = vmatprep.subr.mxu0 %v21967_v41  ;;  %12049 = vmatprep.subr.mxu1 %v21937_v0  ;;  %v21972_v41 = vld [vmem:[#allocation104_spill] sm:$0xff] }
 0xa30   :  { %11920 = vmatpush1.msra.mxu0 %v21968_v13  ;;  %12051 = vmatpush1.msra.mxu1 %v21938_v6  ;;  %v21973_v13 = vld [vmem:[#allocation107_spill] sm:$0xff] }
 0xa31   :  { %11923 = vmatprep.subr.mxu0 %v21969_v27  ;;  %12053 = vmatprep.subr.mxu1 %v21939_v2  ;;  %v21974_v27 = vld [vmem:[#allocation110_spill] sm:$0xff] }
 0xa32   :  { %11926 = vmatpush1.msra.mxu0 %v21970_v37  ;;  %12055 = vmatpush1.msra.mxu1 %v21940_v48  ;;  %v21975_v37 = vld [vmem:[#allocation114_spill] sm:$0xff] }
 0xa33   :  { %11929 = vmatprep.subr.mxu0 %v21971_v36  ;;  %12092 = vmatmul.mubr.f32.vlgmr.msra.gmra.mxu1 %v18768_v58  ;;  %v21976_v36 = vld [vmem:[#allocation117_spill] sm:$0xff] }
 0xa34   :  { %12267 = vmatprep.subr.mxu1 %v20787_v18  ;;  %11932 = vmatpush1.msra.mxu0 %v21972_v41  ;;  %v21978_v41 = vld [vmem:[#allocation123_spill] sm:$0xff] }
 0xa35   :  { %12269 = vmatpush1.msra.mxu1 %v20675_v15  ;;  %11935 = vmatprep.subr.mxu0 %v21973_v13  ;;  %v21984_v13 = vld [vmem:[#allocation39_spill] sm:$0xff] }
 0xa36   :  { %12271 = vmatprep.subr.mxu1 %v20677_v46  ;;  %11938 = vmatpush1.msra.mxu0 %v21974_v27  ;;  %v21979_v27 = vld [vmem:[#allocation20_spill] sm:$0xff] }
 0xa37   :  { %12273 = vmatpush1.msra.mxu1 %v20679_v51  ;;  %11941 = vmatprep.subr.mxu0 %v21975_v37  ;;  %v21980_v37 = vld [vmem:[#allocation27_spill] sm:$0xff] }
 0xa38   :  { %12275 = vmatprep.subr.mxu1 %v20681_v38  ;;  %11944 = vmatpush1.msra.mxu0 %v21976_v36  ;;  %v21981_v36 = vld [vmem:[#allocation30_spill] sm:$0xff] }
 0xa39   :  { %12277 = vmatpush1.msra.mxu1 %v20683_v17  ;;  %11947 = vmatprep.subr.mxu0 %v21977_v8  ;;  %v21982_v8 = vld [vmem:[#allocation33_spill] sm:$0xff] }
 0xa3a   :  { %12279 = vmatprep.subr.mxu1 %v20685_v12  ;;  %11950 = vmatpush1.msra.mxu0 %v21978_v41  ;;  %v21983_v41 = vld [vmem:[#allocation36_spill] sm:$0xff] }
 0xa3b   :  { %11983 = vmatprep.mubr.f32.mxu0 %v20373_v28  ;;  %12281 = vmatpush1.msra.mxu1 %v20687_v20 }
 0xa3c   :  { %11986 = vmatmul.mubr.f32.vlgmr.msra.gmra.mxu0 %v18761_v42  ;;  %12101 = vmatprep.subr.mxu0 %v21979_v27  ;;  %v21985_v27 = vld [vmem:[#allocation43_spill] sm:$0xff] }
 0xa3d   :  { %12283 = vmatprep.subr.mxu1 %v20689_v16  ;;  %12105 = vmatpush1.msra.mxu0 %v21980_v37  ;;  %v21986_v37 = vld [vmem:[#allocation45_spill] sm:$0xff] }
 0xa3e   :  { %12285 = vmatpush1.msra.mxu1 %v20691_v25  ;;  %12109 = vmatprep.subr.mxu0 %v21981_v36  ;;  %v21987_v36 = vld [vmem:[#allocation48_spill] sm:$0xff] }
 0xa3f   :  { %12287 = vmatprep.subr.mxu1 %v20693_v19  ;;  %12113 = vmatpush1.msra.mxu0 %v21982_v8  ;;  %v21988_v8 = vld [vmem:[#allocation52_spill] sm:$0xff] }
 0xa40   :  { %12289 = vmatpush1.msra.mxu1 %v20745_v57  ;;  %12117 = vmatprep.subr.mxu0 %v21983_v41  ;;  %v21989_v41 = vld [vmem:[#allocation55_spill] sm:$0xff] }
 0xa41   :  { %12291 = vmatprep.subr.mxu1 %v20747_v45  ;;  %12121 = vmatpush1.msra.mxu0 %v21984_v13  ;;  %v21990_v13 = vld [vmem:[#allocation58_spill] sm:$0xff] }
 0xa42   :  { %12293 = vmatpush1.msra.mxu1 %v20749_v21  ;;  %12125 = vmatprep.subr.mxu0 %v21985_v27  ;;  %v21991_v27 = vld [vmem:[#allocation61_spill] sm:$0xff] }
 0xa43   :  { %12295 = vmatprep.subr.mxu1 %v20751_v33  ;;  %12129 = vmatpush1.msra.mxu0 %v21986_v37  ;;  %v21992_v37 = vld [vmem:[#allocation64_spill] sm:$0xff] }
 0xa44   :  { %12297 = vmatpush1.msra.mxu1 %v20753_v1  ;;  %12133 = vmatprep.subr.mxu0 %v21987_v36  ;;  %v21993_v36 = vld [vmem:[#allocation70_spill] sm:$0xff] }
 0xa45   :  { %12299 = vmatprep.subr.mxu1 %v20755_v9  ;;  %12137 = vmatpush1.msra.mxu0 %v21988_v8  ;;  %v21994_v8 = vld [vmem:[#allocation73_spill] sm:$0xff] }
 0xa46   :  { %12301 = vmatpush1.msra.mxu1 %v20757_v53  ;;  %12141 = vmatprep.subr.mxu0 %v21989_v41  ;;  %v21995_v41 = vld [vmem:[#allocation79_spill] sm:$0xff] }
 0xa47   :  { %12303 = vmatprep.subr.mxu1 %v20759_v7  ;;  %12145 = vmatpush1.msra.mxu0 %v21990_v13  ;;  %v21996_v13 = vld [vmem:[#allocation89_spill] sm:$0xff] }
 0xa48   :  { %12305 = vmatpush1.msra.mxu1 %v20761_v44  ;;  %12149 = vmatprep.subr.mxu0 %v21991_v27  ;;  %v21997_v27 = vld [vmem:[#allocation92_spill] sm:$0xff] }
 0xa49   :  { %12307 = vmatprep.subr.mxu1 %v20763_v3  ;;  %12153 = vmatpush1.msra.mxu0 %v21992_v37  ;;  %v21998_v37 = vld [vmem:[#allocation96_spill] sm:$0xff] }
 0xa4a   :  { %12309 = vmatpush1.msra.mxu1 %v20765_v52  ;;  %12157 = vmatprep.subr.mxu0 %v21993_v36  ;;  %v21999_v36 = vld [vmem:[#allocation100_spill] sm:$0xff] }
 0xa4b   :  { %12311 = vmatprep.subr.mxu1 %v21929_v54  ;;  %12161 = vmatpush1.msra.mxu0 %v21994_v8  ;;  %v22000_v8 = vld [vmem:[#allocation103_spill] sm:$0xff]  ;;  %v22075_v54 = vld [vmem:[#allocation153_spill] sm:$0xff] }
 0xa4c   :  { %12313 = vmatpush1.msra.mxu1 %v21931_v49  ;;  %12165 = vmatprep.subr.mxu0 %v21995_v41  ;;  %v22001_v41 = vld [vmem:[#allocation106_spill] sm:$0xff]  ;;  %v22074_v49 = vld [vmem:[#allocation151_spill] sm:$0xff] }
 0xa4d   :  { %12315 = vmatprep.subr.mxu1 %v21933_v55  ;;  %12169 = vmatpush1.msra.mxu0 %v21996_v13  ;;  %v22002_v13 = vld [vmem:[#allocation109_spill] sm:$0xff] }
 0xa4e   :  { %12317 = vmatpush1.msra.mxu1 %v21934_v43  ;;  %12173 = vmatprep.subr.mxu0 %v21997_v27  ;;  %v22005_v27 = vld [vmem:[#allocation116_spill] sm:$0xff]  ;;  %v22072_v43 = vld [vmem:[#allocation146_spill] sm:$0xff]  ;;  %v22073_v55 = vld [vmem:[#allocation149_spill] sm:$0xff] }
 0xa4f   :  { %12319 = vmatprep.subr.mxu1 %v21935_v62  ;;  %12177 = vmatpush1.msra.mxu0 %v21998_v37  ;;  %v22003_v37 = vld [vmem:[#allocation113_spill] sm:$0xff]  ;;  %v22071_v62 = vld [vmem:[#allocation142_spill] sm:$0xff] }
 0xa50   :  { %12321 = vmatpush1.msra.mxu1 %v21936_v22  ;;  %12181 = vmatprep.subr.mxu0 %v21999_v36  ;;  %v22004_v36 = vld [vmem:[#allocation170_spill] sm:$0xff]  ;;  %v22070_v22 = vld [vmem:[#allocation239_spill] sm:$0xff] }
 0xa51   :  { %12323 = vmatprep.subr.mxu1 %v21937_v0  ;;  %12185 = vmatpush1.msra.mxu0 %v22000_v8  ;;  %v22006_v8 = vld [vmem:[#allocation179_spill] sm:$0xff]  ;;  %v22069_v0 = vld [vmem:[#allocation236_spill] sm:$0xff] }
 0xa52   :  { %12325 = vmatpush1.msra.mxu1 %v21938_v6  ;;  %12189 = vmatprep.subr.mxu0 %v22001_v41  ;;  %v22008_v41 = vld [vmem:[#allocation182_spill] sm:$0xff]  ;;  %v22062_v6 = vld [vmem:[#allocation267_spill] sm:$0xff] }
 0xa53   :  { %12327 = vmatprep.subr.mxu1 %v21939_v2  ;;  %12193 = vmatpush1.msra.mxu0 %v22002_v13  ;;  %v22010_v13 = vld [vmem:[#allocation185_spill] sm:$0xff]  ;;  %v22060_v2 = vld [vmem:[#allocation266_spill] sm:$0xff] }
 0xa54   :  { %12329 = vmatpush1.msra.mxu1 %v21940_v48  ;;  %12362 = vmatprep.mubr.f32.mxu1 %v20373_v28  ;;  %v22058_v48 = vld [vmem:[#allocation265_spill] sm:$0xff] }
 0xa55   :  { %12197 = vmatprep.subr.mxu0 %v22003_v37  ;;  %12364 = vmatmul.mubr.f32.vlgmr.msra.gmra.mxu1 %v18758_v47  ;;  %v22013_v37 = vld [vmem:[#allocation127_spill] sm:$0xff] }
 0xa56   :  { %12483 = vmatprep.subr.mxu1 %v22004_v36  ;;  %12201 = vmatpush1.msra.mxu0 %v22005_v27  ;;  %v22015_v36 = vld [vmem:[#allocation129_spill] sm:$0xff]  ;;  %v22016_v27 = vld [vmem:[#allocation194_spill] sm:$0xff] }
 0xa57   :  { %12489 = vmatpush1.msra.mxu1 %v22006_v8  ;;  %12205 = vmatprep.subr.mxu0 %v22007_v34  ;;  %v22017_v8 = vld [vmem:[#allocation131_spill] sm:$0xff]  ;;  %v22032_v34 = vld [vmem:[#allocation240_spill] sm:$0xff] }
 0xa58   :  { %12495 = vmatprep.subr.mxu1 %v22008_v41  ;;  %12209 = vmatpush1.msra.mxu0 %v22009_v23  ;;  %v22018_v41 = vld [vmem:[#allocation197_spill] sm:$0xff]  ;;  %v22030_v23 = vld [vmem:[#allocation227_spill] sm:$0xff] }
 0xa59   :  { %12501 = vmatpush1.msra.mxu1 %v22010_v13  ;;  %12213 = vmatprep.subr.mxu0 %v22011_v30  ;;  %v22019_v30 = vld [vmem:[#allocation200_spill] sm:$0xff]  ;;  %v22028_v13 = vld [vmem:[#allocation223_spill] sm:$0xff] }
 0xa5a   :  { %12507 = vmatprep.subr.mxu1 %v22012_v60  ;;  %12217 = vmatpush1.msra.mxu0 %v22013_v37  ;;  %v22020_v37 = vld [vmem:[#allocation203_spill] sm:$0xff]  ;;  %v22026_v60 = vld [vmem:[#allocation216_spill] sm:$0xff] }
 0xa5b   :  { %12513 = vmatpush1.msra.mxu1 %v22014_v4  ;;  %12221 = vmatprep.subr.mxu0 %v22015_v36  ;;  %v22021_v36 = vld [vmem:[#allocation206_spill] sm:$0xff]  ;;  %v22025_v4 = vld [vmem:[#allocation147_spill] sm:$0xff] }
 0xa5c   :  { %12519 = vmatprep.subr.mxu1 %v22016_v27  ;;  %12225 = vmatpush1.msra.mxu0 %v22017_v8  ;;  %v22022_v8 = vld [vmem:[#allocation210_spill] sm:$0xff]  ;;  %v22023_v27 = vld [vmem:[#allocation145_spill] sm:$0xff] }
 0xa5d   :  { %12258 = vmatprep.mubr.f32.mxu0 %v20373_v28  ;;  %12525 = vmatpush1.msra.mxu1 %v22018_v41  ;;  %v22024_v41 = vld [vmem:[#allocation213_spill] sm:$0xff] }
 0xa5e   :  { %12260 = vmatmul.mubr.f32.vlgmr.msra.gmra.mxu0 %v18758_v47  ;;  %12371 = vmatprep.subr.mxu0 %v20835_v31 }
 0xa5f   :  { %12531 = vmatprep.subr.mxu1 %v22019_v30  ;;  %12373 = vmatpush1.msra.mxu0 %v20837_v26  ;;  %v22027_v30 = vld [vmem:[#allocation150_spill] sm:$0xff] }
 0xa60   :  { %12537 = vmatpush1.msra.mxu1 %v22020_v37  ;;  %12375 = vmatprep.subr.mxu0 %v20839_v39  ;;  %v22029_v37 = vld [vmem:[#allocation152_spill] sm:$0xff] }
 0xa61   :  { %12543 = vmatprep.subr.mxu1 %v22021_v36  ;;  %12377 = vmatpush1.msra.mxu0 %v20841_v63  ;;  %v22031_v36 = vld [vmem:[#allocation154_spill] sm:$0xff] }
 0xa62   :  { %12549 = vmatpush1.msra.mxu1 %v22022_v8  ;;  %12379 = vmatprep.subr.mxu0 %v22023_v27  ;;  %v22033_v8 = vld [vmem:[#allocation157_spill] sm:$0xff] }
 0xa63   :  { %12555 = vmatprep.subr.mxu1 %v22024_v41  ;;  %12381 = vmatpush1.msra.mxu0 %v22025_v4  ;;  %v22035_v41 = vld [vmem:[#allocation160_spill] sm:$0xff] }
 0xa64   :  { %12561 = vmatpush1.msra.mxu1 %v22026_v60  ;;  %12383 = vmatprep.subr.mxu0 %v22027_v30  ;;  %v22037_v60 = vld [vmem:[#allocation163_spill] sm:$0xff] }
 0xa65   :  { %12567 = vmatprep.subr.mxu1 %v22028_v13  ;;  %12385 = vmatpush1.msra.mxu0 %v22029_v37  ;;  %v22039_v13 = vld [vmem:[#allocation166_spill] sm:$0xff] }
 0xa66   :  { %12573 = vmatpush1.msra.mxu1 %v22030_v23  ;;  %12387 = vmatprep.subr.mxu0 %v22031_v36  ;;  %v22041_v23 = vld [vmem:[#allocation169_spill] sm:$0xff] }
 0xa67   :  { %12579 = vmatprep.subr.mxu1 %v22032_v34  ;;  %12389 = vmatpush1.msra.mxu0 %v22033_v8  ;;  %v22043_v34 = vld [vmem:[#allocation175_spill] sm:$0xff] }
 0xa68   :  { %12585 = vmatpush1.msra.mxu1 %v22034_v11  ;;  %12391 = vmatprep.subr.mxu0 %v22035_v41  ;;  %v22045_v11 = vld [vmem:[#allocation178_spill] sm:$0xff] }
 0xa69   :  { %12591 = vmatprep.subr.mxu1 %v22036_v10  ;;  %12393 = vmatpush1.msra.mxu0 %v22037_v60  ;;  %v22047_v10 = vld [vmem:[#allocation184_spill] sm:$0xff] }
 0xa6a   :  { %12597 = vmatpush1.msra.mxu1 %v22038_v24  ;;  %12395 = vmatprep.subr.mxu0 %v22039_v13  ;;  %v22049_v24 = vld [vmem:[#allocation193_spill] sm:$0xff] }
 0xa6b   :  { %12603 = vmatprep.subr.mxu1 %v22040_v59  ;;  %12397 = vmatpush1.msra.mxu0 %v22041_v23  ;;  %v22051_v59 = vld [vmem:[#allocation196_spill] sm:$0xff] }
 0xa6c   :  { %12609 = vmatpush1.msra.mxu1 %v22042_v29  ;;  %12399 = vmatprep.subr.mxu0 %v22043_v34  ;;  %v22053_v29 = vld [vmem:[#allocation199_spill] sm:$0xff] }
 0xa6d   :  { %12615 = vmatprep.subr.mxu1 %v22044_v35  ;;  %12401 = vmatpush1.msra.mxu0 %v22045_v11  ;;  %v22055_v35 = vld [vmem:[#allocation202_spill] sm:$0xff] }
 0xa6e   :  { %12621 = vmatpush1.msra.mxu1 %v22046_v50  ;;  %12403 = vmatprep.subr.mxu0 %v22047_v10  ;;  %v22057_v50 = vld [vmem:[#allocation205_spill] sm:$0xff] }
 0xa6f   :  { %12627 = vmatprep.subr.mxu1 %v22048_v61  ;;  %12405 = vmatpush1.msra.mxu0 %v22049_v24  ;;  %v22059_v61 = vld [vmem:[#allocation209_spill] sm:$0xff] }
 0xa70   :  { %12633 = vmatpush1.msra.mxu1 %v22050_v56  ;;  %12407 = vmatprep.subr.mxu0 %v22051_v59  ;;  %v22061_v56 = vld [vmem:[#allocation212_spill] sm:$0xff] }
 0xa71   :  { %12639 = vmatprep.subr.mxu1 %v22052_v40  ;;  %12409 = vmatpush1.msra.mxu0 %v22053_v29  ;;  %v22063_v40 = vld [vmem:[#allocation215_spill] sm:$0xff] }
 0xa72   :  { %12645 = vmatpush1.msra.mxu1 %v22054_v5  ;;  %12411 = vmatprep.subr.mxu0 %v22055_v35  ;;  %v22068_v5 = vld [vmem:[#allocation233_spill] sm:$0xff] }
 0xa73   :  { %12651 = vmatprep.subr.mxu1 %v22056_v14  ;;  %12413 = vmatpush1.msra.mxu0 %v22057_v50  ;;  %v22064_v14 = vld [vmem:[#allocation219_spill] sm:$0xff] }
 0xa74   :  { %12657 = vmatpush1.msra.mxu1 %v22058_v48  ;;  %12415 = vmatprep.subr.mxu0 %v22059_v61  ;;  %v22065_v48 = vld [vmem:[#allocation222_spill] sm:$0xff] }
 0xa75   :  { %12663 = vmatprep.subr.mxu1 %v22060_v2  ;;  %12417 = vmatpush1.msra.mxu0 %v22061_v56  ;;  %v22066_v2 = vld [vmem:[#allocation226_spill] sm:$0xff] }
 0xa76   :  { %12669 = vmatpush1.msra.mxu1 %v22062_v6  ;;  %12702 = vmatprep.mubr.f32.mxu1 %v20373_v28  ;;  %v22067_v6 = vld [vmem:[#allocation230_spill] sm:$0xff] }
 0xa77   :  { %12419 = vmatprep.subr.mxu0 %v22063_v40  ;;  %12704 = vmatmul.mubr.f32.vlgmr.msra.gmra.mxu1 %v18758_v47 }
 0xa78   :  { %12848 = vmatprep.subr.mxu1 %v20835_v31  ;;  %12421 = vmatpush1.msra.mxu0 %v22064_v14 }
 0xa79   :  { %12850 = vmatpush1.msra.mxu1 %v20837_v26  ;;  %12423 = vmatprep.subr.mxu0 %v22065_v48 }
 0xa7a   :  { %12852 = vmatprep.subr.mxu1 %v20839_v39  ;;  %12425 = vmatpush1.msra.mxu0 %v22066_v2 }
 0xa7b   :  { %12854 = vmatpush1.msra.mxu1 %v20841_v63  ;;  %12427 = vmatprep.subr.mxu0 %v22067_v6 }
 0xa7c   :  { %12856 = vmatprep.subr.mxu1 %v22023_v27  ;;  %12429 = vmatpush1.msra.mxu0 %v22068_v5 }
 0xa7d   :  { %12858 = vmatpush1.msra.mxu1 %v22025_v4  ;;  %12431 = vmatprep.subr.mxu0 %v22069_v0 }
 0xa7e   :  { %12860 = vmatprep.subr.mxu1 %v22027_v30  ;;  %12433 = vmatpush1.msra.mxu0 %v22070_v22 }
 0xa7f   :  { %12466 = vmatprep.mubr.f32.mxu0 %v20373_v28  ;;  %12862 = vmatpush1.msra.mxu1 %v22029_v37 }
 0xa80   :  { %12472 = vmatmul.mubr.f32.vlgmr.msra.gmra.mxu0 %v18776_v32  ;;  %12712 = vmatprep.subr.mxu0 %v22071_v62  ;;  %v22076_v32 = vld [vmem:[#allocation156_spill] sm:$0xff]  ;;  %v22077_v62 = vld [vmem:[#allocation159_spill] sm:$0xff] }
 0xa81   :  { %12864 = vmatprep.subr.mxu1 %v22031_v36  ;;  %12715 = vmatpush1.msra.mxu0 %v22072_v43  ;;  %v22078_v43 = vld [vmem:[#allocation162_spill] sm:$0xff] }
 0xa82   :  { %12866 = vmatpush1.msra.mxu1 %v22033_v8  ;;  %12718 = vmatprep.subr.mxu0 %v22073_v55  ;;  %v22079_v55 = vld [vmem:[#allocation165_spill] sm:$0xff] }
 0xa83   :  { %12868 = vmatprep.subr.mxu1 %v22035_v41  ;;  %12721 = vmatpush1.msra.mxu0 %v22074_v49  ;;  %v22080_v49 = vld [vmem:[#allocation168_spill] sm:$0xff] }
 0xa84   :  { %12870 = vmatpush1.msra.mxu1 %v22037_v60  ;;  %12724 = vmatprep.subr.mxu0 %v22075_v54  ;;  %v22081_v54 = vld [vmem:[#allocation172_spill] sm:$0xff] }
 0xa85   :  { %12872 = vmatprep.subr.mxu1 %v22039_v13  ;;  %12727 = vmatpush1.msra.mxu0 %v22076_v32  ;;  %v22082_v32 = vld [vmem:[#allocation174_spill] sm:$0xff] }
 0xa86   :  { %12874 = vmatpush1.msra.mxu1 %v22041_v23  ;;  %12730 = vmatprep.subr.mxu0 %v22077_v62  ;;  %v22083_v62 = vld [vmem:[#allocation177_spill] sm:$0xff] }
 0xa87   :  { %12876 = vmatprep.subr.mxu1 %v22043_v34  ;;  %12733 = vmatpush1.msra.mxu0 %v22078_v43  ;;  %v22084_v43 = vld [vmem:[#allocation181_spill] sm:$0xff] }
 0xa88   :  { %12878 = vmatpush1.msra.mxu1 %v22045_v11  ;;  %12736 = vmatprep.subr.mxu0 %v22079_v55  ;;  %v22085_v55 = vld [vmem:[#allocation187_spill] sm:$0xff] }
 0xa89   :  { %12880 = vmatprep.subr.mxu1 %v22047_v10  ;;  %12739 = vmatpush1.msra.mxu0 %v22080_v49  ;;  %v22086_v49 = vld [vmem:[#allocation190_spill] sm:$0xff] }
 0xa8a   :  { %12882 = vmatpush1.msra.mxu1 %v22049_v24  ;;  %12742 = vmatprep.subr.mxu0 %v22081_v54  ;;  %v22087_v54 = vld [vmem:[#allocation195_spill] sm:$0xff] }
 0xa8b   :  { %12884 = vmatprep.subr.mxu1 %v22051_v59  ;;  %12745 = vmatpush1.msra.mxu0 %v22082_v32  ;;  %v22088_v32 = vld [vmem:[#allocation204_spill] sm:$0xff] }
 0xa8c   :  { %12886 = vmatpush1.msra.mxu1 %v22053_v29  ;;  %12748 = vmatprep.subr.mxu0 %v22083_v62  ;;  %v22089_v62 = vld [vmem:[#allocation208_spill] sm:$0xff] }
 0xa8d   :  { %12888 = vmatprep.subr.mxu1 %v22055_v35  ;;  %12751 = vmatpush1.msra.mxu0 %v22084_v43  ;;  %v22090_v43 = vld [vmem:[#allocation211_spill] sm:$0xff] }
 0xa8e   :  { %12890 = vmatpush1.msra.mxu1 %v22057_v50  ;;  %12754 = vmatprep.subr.mxu0 %v22085_v55  ;;  %v22091_v55 = vld [vmem:[#allocation214_spill] sm:$0xff] }
 0xa8f   :  { %12892 = vmatprep.subr.mxu1 %v22059_v61  ;;  %12757 = vmatpush1.msra.mxu0 %v22086_v49  ;;  %v22092_v49 = vld [vmem:[#allocation218_spill] sm:$0xff] }
 0xa90   :  { %12894 = vmatpush1.msra.mxu1 %v22061_v56  ;;  %12760 = vmatprep.subr.mxu0 %v22087_v54  ;;  %v22093_v54 = vld [vmem:[#allocation221_spill] sm:$0xff] }
 0xa91   :  { %12896 = vmatprep.subr.mxu1 %v22063_v40  ;;  %12763 = vmatpush1.msra.mxu0 %v22088_v32  ;;  %v22094_v32 = vld [vmem:[#allocation225_spill] sm:$0xff] }
 0xa92   :  { %12898 = vmatpush1.msra.mxu1 %v22064_v14  ;;  %12766 = vmatprep.subr.mxu0 %v22089_v62  ;;  %v22134_v62 = vld [vmem:[#allocation54_spill] sm:$0xff] }
 0xa93   :  { %12900 = vmatprep.subr.mxu1 %v22065_v48  ;;  %12769 = vmatpush1.msra.mxu0 %v22090_v43  ;;  %v22095_v43 = vld [vmem:[#allocation229_spill] sm:$0xff] }
 0xa94   :  { %12902 = vmatpush1.msra.mxu1 %v22066_v2  ;;  %12772 = vmatprep.subr.mxu0 %v22091_v55  ;;  %v22096_v55 = vld [vmem:[#allocation232_spill] sm:$0xff] }
 0xa95   :  { %12904 = vmatprep.subr.mxu1 %v22067_v6  ;;  %12775 = vmatpush1.msra.mxu0 %v22092_v49  ;;  %v22097_v49 = vld [vmem:[#allocation235_spill] sm:$0xff] }
 0xa96   :  { %12906 = vmatpush1.msra.mxu1 %v22068_v5  ;;  %12778 = vmatprep.subr.mxu0 %v22093_v54  ;;  %v22098_v54 = vld [vmem:[#allocation238_spill] sm:$0xff] }
 0xa97   :  { %12908 = vmatprep.subr.mxu1 %v22069_v0  ;;  %12781 = vmatpush1.msra.mxu0 %v22094_v32  ;;  %v22099_v32 = vld [vmem:[#allocation242_spill] sm:$0xff] }
 0xa98   :  { %12910 = vmatpush1.msra.mxu1 %v22070_v22  ;;  %12943 = vmatprep.mubr.f32.mxu1 %v20373_v28 }
 0xa99   :  { %12784 = vmatprep.subr.mxu0 %v22095_v43  ;;  %12947 = vmatmul.mubr.f32.vlgmr.msra.gmra.mxu1 %v18768_v58  ;;  %v22100_v43 = vld [vmem:[#allocation245_spill] sm:$0xff]  ;;  %v22101_v58 = vld [vmem:[#allocation248_spill] sm:$0xff] }
 0xa9a   :  { %13122 = vmatprep.subr.mxu1 %v20835_v31  ;;  %12787 = vmatpush1.msra.mxu0 %v22096_v55  ;;  %v22102_v55 = vld [vmem:[#allocation251_spill] sm:$0xff] }
 0xa9b   :  { %13124 = vmatpush1.msra.mxu1 %v20837_v26  ;;  %12790 = vmatprep.subr.mxu0 %v22097_v49  ;;  %v22132_v49 = vld [vmem:[#allocation51_spill] sm:$0xff] }
 0xa9c   :  { %13126 = vmatprep.subr.mxu1 %v20839_v39  ;;  %12793 = vmatpush1.msra.mxu0 %v22098_v54  ;;  %v22103_v54 = vld [vmem:[#allocation148_spill] sm:$0xff] }
 0xa9d   :  { %13128 = vmatpush1.msra.mxu1 %v20841_v63  ;;  %12796 = vmatprep.subr.mxu0 %v22099_v32  ;;  %v22104_v32 = vld [vmem:[#allocation155_spill] sm:$0xff] }
 0xa9e   :  { %13130 = vmatprep.subr.mxu1 %v22023_v27  ;;  %12799 = vmatpush1.msra.mxu0 %v22100_v43  ;;  %v22105_v43 = vld [vmem:[#allocation158_spill] sm:$0xff] }
 0xa9f   :  { %13132 = vmatpush1.msra.mxu1 %v22025_v4  ;;  %12802 = vmatprep.subr.mxu0 %v22101_v58  ;;  %v22106_v58 = vld [vmem:[#allocation161_spill] sm:$0xff] }
 0xaa0   :  { %13134 = vmatprep.subr.mxu1 %v22027_v30  ;;  %12805 = vmatpush1.msra.mxu0 %v22102_v55  ;;  %v22107_v55 = vld [vmem:[#allocation164_spill] sm:$0xff] }
 0xaa1   :  { %12838 = vmatprep.mubr.f32.mxu0 %v20373_v28  ;;  %13136 = vmatpush1.msra.mxu1 %v22029_v37 }
 0xaa2   :  { %12841 = vmatmul.mubr.f32.vlgmr.msra.gmra.mxu0 %v18761_v42  ;;  %12956 = vmatprep.subr.mxu0 %v22103_v54  ;;  %v22108_v42 = vld [vmem:[#allocation167_spill] sm:$0xff] }
 0xaa3   :  { %13138 = vmatprep.subr.mxu1 %v22031_v36  ;;  %12960 = vmatpush1.msra.mxu0 %v22104_v32  ;;  %v22109_v54 = vld [vmem:[#allocation171_spill] sm:$0xff]  ;;  %v22110_v32 = vld [vmem:[#allocation173_spill] sm:$0xff] }
 0xaa4   :  { %13140 = vmatpush1.msra.mxu1 %v22033_v8  ;;  %12964 = vmatprep.subr.mxu0 %v22105_v43  ;;  %v22111_v43 = vld [vmem:[#allocation176_spill] sm:$0xff] }
 0xaa5   :  { %13142 = vmatprep.subr.mxu1 %v22035_v41  ;;  %12968 = vmatpush1.msra.mxu0 %v22106_v58  ;;  %v22112_v58 = vld [vmem:[#allocation180_spill] sm:$0xff] }
 0xaa6   :  { %13144 = vmatpush1.msra.mxu1 %v22037_v60  ;;  %12972 = vmatprep.subr.mxu0 %v22107_v55  ;;  %v22113_v55 = vld [vmem:[#allocation183_spill] sm:$0xff] }
 0xaa7   :  { %13146 = vmatprep.subr.mxu1 %v22039_v13  ;;  %12976 = vmatpush1.msra.mxu0 %v22108_v42  ;;  %v22114_v42 = vld [vmem:[#allocation186_spill] sm:$0xff] }
 0xaa8   :  { %13148 = vmatpush1.msra.mxu1 %v22041_v23  ;;  %12980 = vmatprep.subr.mxu0 %v22109_v54  ;;  %v22115_v54 = vld [vmem:[#allocation189_spill] sm:$0xff] }
 0xaa9   :  { %13150 = vmatprep.subr.mxu1 %v22043_v34  ;;  %12984 = vmatpush1.msra.mxu0 %v22110_v32  ;;  %v22116_v32 = vld [vmem:[#allocation192_spill] sm:$0xff] }
 0xaaa   :  { %13152 = vmatpush1.msra.mxu1 %v22045_v11  ;;  %12988 = vmatprep.subr.mxu0 %v22111_v43  ;;  %v22117_v43 = vld [vmem:[#allocation198_spill] sm:$0xff] }
 0xaab   :  { %13154 = vmatprep.subr.mxu1 %v22047_v10  ;;  %12992 = vmatpush1.msra.mxu0 %v22112_v58  ;;  %v22118_v58 = vld [vmem:[#allocation201_spill] sm:$0xff] }
 0xaac   :  { %13156 = vmatpush1.msra.mxu1 %v22049_v24  ;;  %12996 = vmatprep.subr.mxu0 %v22113_v55  ;;  %v22119_v55 = vld [vmem:[#allocation207_spill] sm:$0xff] }
 0xaad   :  { %13158 = vmatprep.subr.mxu1 %v22051_v59  ;;  %13000 = vmatpush1.msra.mxu0 %v22114_v42  ;;  %v22120_v42 = vld [vmem:[#allocation217_spill] sm:$0xff] }
 0xaae   :  { %13160 = vmatpush1.msra.mxu1 %v22053_v29  ;;  %13004 = vmatprep.subr.mxu0 %v22115_v54  ;;  %v22121_v54 = vld [vmem:[#allocation220_spill] sm:$0xff] }
 0xaaf   :  { %13162 = vmatprep.subr.mxu1 %v22055_v35  ;;  %13008 = vmatpush1.msra.mxu0 %v22116_v32  ;;  %v22122_v32 = vld [vmem:[#allocation224_spill] sm:$0xff] }
 0xab0   :  { %13164 = vmatpush1.msra.mxu1 %v22057_v50  ;;  %13012 = vmatprep.subr.mxu0 %v22117_v43  ;;  %v22123_v43 = vld [vmem:[#allocation228_spill] sm:$0xff] }
 0xab1   :  { %13166 = vmatprep.subr.mxu1 %v22059_v61  ;;  %13016 = vmatpush1.msra.mxu0 %v22118_v58  ;;  %v22124_v58 = vld [vmem:[#allocation231_spill] sm:$0xff] }
 0xab2   :  { %13168 = vmatpush1.msra.mxu1 %v22061_v56  ;;  %13020 = vmatprep.subr.mxu0 %v22119_v55  ;;  %v22125_v55 = vld [vmem:[#allocation234_spill] sm:$0xff] }
 0xab3   :  { %13170 = vmatprep.subr.mxu1 %v22063_v40  ;;  %13024 = vmatpush1.msra.mxu0 %v22120_v42  ;;  %v22126_v42 = vld [vmem:[#allocation237_spill] sm:$0xff] }
 0xab4   :  { %13172 = vmatpush1.msra.mxu1 %v22064_v14  ;;  %13028 = vmatprep.subr.mxu0 %v22121_v54  ;;  %v22130_v54 = vld [vmem:[#allocation42_spill] sm:$0xff] }
 0xab5   :  { %13174 = vmatprep.subr.mxu1 %v22065_v48  ;;  %13032 = vmatpush1.msra.mxu0 %v22122_v32  ;;  %v22127_v32 = vld [vmem:[#allocation241_spill] sm:$0xff] }
 0xab6   :  { %13176 = vmatpush1.msra.mxu1 %v22066_v2  ;;  %13036 = vmatprep.subr.mxu0 %v22123_v43  ;;  %v22128_v43 = vld [vmem:[#allocation244_spill] sm:$0xff] }
 0xab7   :  { %13178 = vmatprep.subr.mxu1 %v22067_v6  ;;  %13040 = vmatpush1.msra.mxu0 %v22124_v58  ;;  %v22129_v58 = vld [vmem:[#allocation247_spill] sm:$0xff] }
 0xab8   :  { %13180 = vmatpush1.msra.mxu1 %v22068_v5  ;;  %13044 = vmatprep.subr.mxu0 %v22125_v55  ;;  %v22131_v55 = vld [vmem:[#allocation250_spill] sm:$0xff]  ;;  %v22139_v5 = vld [vmem:[#allocation259_spill] sm:$0xff] }
 0xab9   :  { %13182 = vmatprep.subr.mxu1 %v22069_v0  ;;  %13048 = vmatpush1.msra.mxu0 %v22126_v42  ;;  %v22133_v42 = vld [vmem:[#allocation253_spill] sm:$0xff] }
 0xaba   :  { %13184 = vmatpush1.msra.mxu1 %v22070_v22  ;;  %13217 = vmatprep.mubr.f32.mxu1 %v20373_v28  ;;  %v22135_v22 = vld [vmem:[#allocation255_spill] sm:$0xff]  ;;  %v22137_v0 = vld [vmem:[#allocation257_spill] sm:$0xff] }
 0xabb   :  { %13052 = vmatprep.subr.mxu0 %v22127_v32  ;;  %13219 = vmatmul.mubr.f32.vlgmr.msra.gmra.mxu1 %v18758_v47  ;;  %v22136_v32 = vld [vmem:[#allocation57_spill] sm:$0xff] }
 0xabc   :  { %13056 = vmatpush1.msra.mxu0 %v22128_v43  ;;  %13113 = vmatprep.mubr.f32.mxu0 %v20373_v28  ;;  %v22138_v43 = vld [vmem:[#allocation60_spill] sm:$0xff] }
 0xabd   :  { %13060 = vmatprep.subr.mxu0 %v22129_v58  ;;  %13375 = vmatprep.subr.mxu1 %v22130_v54  ;;  %v22140_v58 = vld [vmem:[#allocation63_spill] sm:$0xff]  ;;  %v22141_v54 = vld [vmem:[#allocation66_spill] sm:$0xff] }
 0xabe   :  { %13064 = vmatpush1.msra.mxu0 %v22131_v55  ;;  %13381 = vmatpush1.msra.mxu1 %v22132_v49  ;;  %v22142_v49 = vld [vmem:[#allocation69_spill] sm:$0xff] }
 0xabf   :  { %13068 = vmatprep.subr.mxu0 %v22133_v42  ;;  %13387 = vmatprep.subr.mxu1 %v22134_v62  ;;  %v22143_v62 = vld [vmem:[#allocation72_spill] sm:$0xff]  ;;  %v22177_v42 = vld [vmem:[#allocation14_spill] sm:$0xff] }
 0xac0   :  { %13072 = vmatpush1.msra.mxu0 %v22135_v22  ;;  %13393 = vmatpush1.msra.mxu1 %v22136_v32  ;;  %v22144_v32 = vld [vmem:[#allocation75_spill] sm:$0xff]  ;;  %v22175_v22 = vld [vmem:[#allocation108_spill] sm:$0xff] }
 0xac1   :  { %13076 = vmatprep.subr.mxu0 %v22137_v0  ;;  %13399 = vmatprep.subr.mxu1 %v22138_v43  ;;  %v22145_v43 = vld [vmem:[#allocation78_spill] sm:$0xff] }
 0xac2   :  { %13080 = vmatpush1.msra.mxu0 %v22139_v5  ;;  %13405 = vmatpush1.msra.mxu1 %v22140_v58  ;;  %v22146_v58 = vld [vmem:[#allocation82_spill] sm:$0xff]  ;;  %v22168_v5 = vld [vmem:[#allocation139_spill] sm:$0xff] }
 0xac3   :  { %13115 = vmatmul.mubr.f32.vlgmr.msra.gmra.mxu0 %v18758_v47  ;;  %13411 = vmatprep.subr.mxu1 %v22141_v54  ;;  %v22147_v47 = vld [vmem:[#allocation85_spill] sm:$0xff]  ;;  %v22148_v54 = vld [vmem:[#allocation88_spill] sm:$0xff]  ;;  %v22173_v0 = vld [vmem:[#allocation102_spill] sm:$0xff] }
 0xac4   :  { %13417 = vmatpush1.msra.mxu1 %v22142_v49  ;;  %13263 = vmatprep.subr.mxu0 %v20787_v18  ;;  %v22149_v49 = vld [vmem:[#allocation95_spill] sm:$0xff] }
 0xac5   :  { %13423 = vmatprep.subr.mxu1 %v22143_v62  ;;  %13265 = vmatpush1.msra.mxu0 %v20675_v15  ;;  %v22150_v62 = vld [vmem:[#allocation99_spill] sm:$0xff] }
 0xac6   :  { %13429 = vmatpush1.msra.mxu1 %v22144_v32  ;;  %13267 = vmatprep.subr.mxu0 %v20677_v46  ;;  %v22151_v32 = vld [vmem:[#allocation112_spill] sm:$0xff] }
 0xac7   :  { %13435 = vmatprep.subr.mxu1 %v22145_v43  ;;  %13269 = vmatpush1.msra.mxu0 %v20679_v51  ;;  %v22152_v43 = vld [vmem:[#allocation115_spill] sm:$0xff] }
 0xac8   :  { %13441 = vmatpush1.msra.mxu1 %v22146_v58  ;;  %13271 = vmatprep.subr.mxu0 %v20681_v38  ;;  %v22153_v58 = vld [vmem:[#allocation118_spill] sm:$0xff] }
 0xac9   :  { %13447 = vmatprep.subr.mxu1 %v22147_v47  ;;  %13273 = vmatpush1.msra.mxu0 %v20683_v17  ;;  %v22154_v47 = vld [vmem:[#allocation121_spill] sm:$0xff] }
 0xaca   :  { %13453 = vmatpush1.msra.mxu1 %v22148_v54  ;;  %13275 = vmatprep.subr.mxu0 %v20685_v12  ;;  %v22155_v54 = vld [vmem:[#allocation124_spill] sm:$0xff] }
 0xacb   :  { %13459 = vmatprep.subr.mxu1 %v22149_v49  ;;  %13277 = vmatpush1.msra.mxu0 %v20687_v20  ;;  %v22156_v49 = vld [vmem:[#allocation126_spill] sm:$0xff] }
 0xacc   :  { %13465 = vmatpush1.msra.mxu1 %v22150_v62  ;;  %13279 = vmatprep.subr.mxu0 %v20689_v16  ;;  %v22157_v62 = vld [vmem:[#allocation128_spill] sm:$0xff] }
 0xacd   :  { %13471 = vmatprep.subr.mxu1 %v22151_v32  ;;  %13281 = vmatpush1.msra.mxu0 %v20691_v25  ;;  %v22158_v32 = vld [vmem:[#allocation130_spill] sm:$0xff] }
 0xace   :  { %13477 = vmatpush1.msra.mxu1 %v22152_v43  ;;  %13283 = vmatprep.subr.mxu0 %v20693_v19  ;;  %v22159_v43 = vld [vmem:[#allocation132_spill] sm:$0xff] }
 0xacf   :  { %13483 = vmatprep.subr.mxu1 %v22153_v58  ;;  %13285 = vmatpush1.msra.mxu0 %v20745_v57  ;;  %v22160_v58 = vld [vmem:[#allocation133_spill] sm:$0xff] }
 0xad0   :  { %13489 = vmatpush1.msra.mxu1 %v22154_v47  ;;  %13287 = vmatprep.subr.mxu0 %v20747_v45  ;;  %v22161_v47 = vld [vmem:[#allocation134_spill] sm:$0xff] }
 0xad1   :  { %13495 = vmatprep.subr.mxu1 %v22155_v54  ;;  %13289 = vmatpush1.msra.mxu0 %v20749_v21  ;;  %v22162_v54 = vld [vmem:[#allocation135_spill] sm:$0xff] }
 0xad2   :  { %13501 = vmatpush1.msra.mxu1 %v22156_v49  ;;  %13291 = vmatprep.subr.mxu0 %v20751_v33  ;;  %v22163_v49 = vld [vmem:[#allocation136_spill] sm:$0xff] }
 0xad3   :  { %13507 = vmatprep.subr.mxu1 %v22157_v62  ;;  %13293 = vmatpush1.msra.mxu0 %v20753_v1  ;;  %v22164_v62 = vld [vmem:[#allocation137_spill] sm:$0xff]  ;;  %v11850_v2 = vpop.f32.mrf.mxu1 }
 0xad4   :  { %13513 = vmatpush1.msra.mxu1 %v22158_v32  ;;  %13295 = vmatprep.subr.mxu0 %v20755_v9  ;;  %v22165_v32 = vld [vmem:[#allocation81_spill] sm:$0xff] }
 0xad5   :  { %13519 = vmatprep.subr.mxu1 %v22159_v43  ;;  %13297 = vmatpush1.msra.mxu0 %v20757_v53  ;;  %v22166_v43 = vld [vmem:[#allocation138_spill] sm:$0xff]  ;;  %v11852_v14 = vpop.f32.mrf.mxu1 }
 0xad6   :  { %13525 = vmatpush1.msra.mxu1 %v22160_v58  ;;  %13299 = vmatprep.subr.mxu0 %v20759_v7  ;;  %v22167_v58 = vld [vmem:[#allocation84_spill] sm:$0xff] }
 0xad7   :  { %13531 = vmatprep.subr.mxu1 %v22161_v47  ;;  %13301 = vmatpush1.msra.mxu0 %v20761_v44  ;;  %v22169_v47 = vld [vmem:[#allocation87_spill] sm:$0xff] }
 0xad8   :  { %13537 = vmatpush1.msra.mxu1 %v22162_v54  ;;  %13303 = vmatprep.subr.mxu0 %v20763_v3  ;;  %v22170_v54 = vld [vmem:[#allocation91_spill] sm:$0xff] }
 0xad9   :  { %13543 = vmatprep.subr.mxu1 %v22163_v49  ;;  %13305 = vmatpush1.msra.mxu0 %v20765_v52  ;;  %v22171_v49 = vld [vmem:[#allocation94_spill] sm:$0xff] }
 0xada   :  { %13549 = vmatpush1.msra.mxu1 %v22164_v62  ;;  %13307 = vmatprep.subr.mxu0 %v22165_v32  ;;  %v22172_v62 = vld [vmem:[#allocation98_spill] sm:$0xff] }
 0xadb   :  { %13555 = vmatprep.subr.mxu1 %v22166_v43  ;;  %13309 = vmatpush1.msra.mxu0 %v22167_v58  ;;  %v22174_v43 = vld [vmem:[#allocation105_spill] sm:$0xff]  ;;  %v11618_v55 = vpop.f32.mrf.mxu0 }
 0xadc   :  { %13561 = vmatpush1.msra.mxu1 %v22168_v5  ;;  %13311 = vmatprep.subr.mxu0 %v22169_v47  ;;  %v22176_v5 = vld [vmem:[#allocation111_spill] sm:$0xff]  ;;  %v11851_v35 = vadd.f32 %v11850_v2, %v11618_v55 }
 0xadd   :  { %13594 = vmatprep.mubr.f32.mxu1 %v20373_v28  ;;  %13740 = vmatprep.subr.mxu1 %v20787_v18  ;;  %v11620_v6 = vpop.f32.mrf.mxu0 }
 0xade   :  { %13313 = vmatpush1.msra.mxu0 %v22170_v54  ;;  %13358 = vmatprep.mubr.f32.mxu0 %v20373_v28  ;;  %v11853_v56 = vadd.f32 %v11852_v14, %v11620_v6 }
 0xadf   :  { %13315 = vmatprep.subr.mxu0 %v22171_v49 }
 0xae0   :  { %13317 = vmatpush1.msra.mxu0 %v22172_v62 }
 0xae1   :  { %13319 = vmatprep.subr.mxu0 %v22173_v0 }
 0xae2   :  { %13321 = vmatpush1.msra.mxu0 %v22174_v43 }
 0xae3   :  { %13323 = vmatprep.subr.mxu0 %v22175_v22 }
 0xae4   :  { %13325 = vmatpush1.msra.mxu0 %v22176_v5 }
 0xae5   :  { %13604 = vmatprep.subr.mxu0 %v22177_v42 }
 0xaf3   :  { %v12093_v61 = vpop.f32.mrf.mxu1 }
 0xaf5   :  { %v12095_v24 = vpop.f32.mrf.mxu1 }
 0xafc   :  { %v11987_v48 = vpop.f32.mrf.mxu0 }
 0xafd   :  { %v11988_v59 = vadd.f32 %v11987_v48, %v11851_v35  ;;  %v22178_v48 = vld [vmem:[#allocation13_spill] sm:$0xff] }
 0xafe   :  { %v11989_v40 = vpop.f32.mrf.mxu0 }
 0xaff   :  { %v11990_v29 = vadd.f32 %v11989_v40, %v11853_v56  ;;  %v12094_v23 = vadd.f32 %v12093_v61, %v11988_v59  ;;  %v22179_v61 = vld [vmem:[#allocation15_spill] sm:$0xff] }
 0xb01   :  { %v12096_v11 = vadd.f32 %v12095_v24, %v11990_v29 }
 0xb15   :  { %v12365_v34 = vpop.f32.mrf.mxu1 }
 0xb17   :  { %v12367_v41 = vpop.f32.mrf.mxu1 }
 0xb1e   :  { %v12261_v50 = vpop.f32.mrf.mxu0 }
 0xb1f   :  { %v12262_v42 = vadd.f32 %v12261_v50, %v12094_v23 }
 0xb20   :  { %v12263_v10 = vpop.f32.mrf.mxu0 }
 0xb21   :  { %v12264_v13 = vadd.f32 %v12263_v10, %v12096_v11  ;;  %v12366_v37 = vadd.f32 %v12365_v34, %v12262_v42  ;;  %v22180_v42 = vld [vmem:[#allocation16_spill] sm:$0xff] }
 0xb23   :  { %v12368_v8 = vadd.f32 %v12367_v41, %v12264_v13  ;;  %v13229_v14 = vrot.slane %v12366_v37, 2 }
 0xb25   :  { %v13230_v6 = vrot.slane %v12368_v8, 2  ;;  %v13237_v59 = vadd.f32 %v13229_v14, %v22179_v61 }
 0xb27   :  { %v13238_v40 = vadd.f32 %v13230_v6, %v22178_v48 }
 0xb29   :  { %15112 = vtanh.f32 %v13238_v40 }
 0xb2a   :  { %15114 = vtanh.f32 %v13237_v59  ;;  %v22182_v59 = vld [vmem:[#allocation32_spill] sm:$0xff] }
 0xb36   :  { %v15113_v6 = vpop.eup %15112 }
 0xb37   :  { %v12705_v30 = vpop.f32.mrf.mxu1  ;;  %v15115_v14 = vpop.eup %15114 }
 0xb39   :  { %v12707_v55 = vpop.f32.mrf.mxu1 }
 0xb40   :  { %v12473_v60 = vpop.f32.mrf.mxu0 }
 0xb41   :  { %v12706_v27 = vadd.f32 %v12705_v30, %v12473_v60 }
 0xb42   :  { %v12475_v36 = vpop.f32.mrf.mxu0 }
 0xb43   :  { %v12708_v56 = vadd.f32 %v12707_v55, %v12475_v36  ;;  %v13247_v55 = vmul.f32 0.5, %v15113_v6 }
 0xb59   :  { %v12948_v29 = vpop.f32.mrf.mxu1 }
 0xb5b   :  { %v12950_v10 = vpop.f32.mrf.mxu1 }
 0xb62   :  { %v12842_v4 = vpop.f32.mrf.mxu0 }
 0xb63   :  { %v12843_v35 = vadd.f32 %v12842_v4, %v12706_v27 }
 0xb64   :  { %v12844_v2 = vpop.f32.mrf.mxu0 }
 0xb65   :  { %v12845_v24 = vadd.f32 %v12844_v2, %v12708_v56  ;;  %v12949_v50 = vadd.f32 %v12948_v29, %v12843_v35  ;;  %v22181_v2 = vld [vmem:[#allocation17_spill] sm:$0xff]  ;;  %v13245_v56 = vmul.f32 0.5, %v15115_v14  ;;  %v13248_v35 = vadd.f32 0.5, %v13247_v55  ;;  %v22183_v14 = vld [vmem:[#allocation18_spill] sm:$0xff] }
 0xb66   :  { %v22184_v55 = vld [vmem:[#allocation21_spill] sm:$0xff] }
 0xb67   :  { %v12951_v34 = vadd.f32 %v12950_v10, %v12845_v24  ;;  %v13246_v29 = vadd.f32 0.5, %v13245_v56  ;;  %v13252_v24 = vrot.slane %v22182_v59, 7  ;;  %v22186_v56 = vld [vmem:[#allocation25_spill] sm:$0xff]  ;;  %v22189_v59 = vld [vmem:[#allocation34_spill] sm:$0xff] }
 0xb69   :  { %v13254_v10 = vmul.f32 %v13252_v24, %v13248_v35  ;;  %v22187_v35 = vld [vmem:[#allocation28_spill] sm:$0xff]  ;;  %v22190_v24 = vld [vmem:[#allocation37_spill] sm:$0xff] }
 0xb7b   :  { %v13220_v8 = vpop.f32.mrf.mxu1 }
 0xb7d   :  { %v13222_v37 = vpop.f32.mrf.mxu1 }
 0xb83   :  { %v13116_v11 = vpop.f32.mrf.mxu0 }
 0xb84   :  { %v13117_v23 = vadd.f32 %v13116_v11, %v12949_v50 }
 0xb85   :  { %v13118_v41 = vpop.f32.mrf.mxu0 }
 0xb86   :  { %v13221_v60 = vadd.f32 %v13220_v8, %v13117_v23  ;;  %v13119_v30 = vadd.f32 %v13118_v41, %v12951_v34 }
 0xb88   :  { %v13231_v13 = vrot.slane %v13221_v60, 2  ;;  %v13223_v4 = vadd.f32 %v13222_v37, %v13119_v30 }
 0xb8a   :  { %v13239_v36 = vadd.f32 %v13231_v13, %v22180_v42  ;;  %v13232_v27 = vrot.slane %v13223_v4, 2 }
 0xb8c   :  { %15116 = vtanh.f32 %v13239_v36  ;;  %v13240_v40 = vadd.f32 %v13232_v27, %v22181_v2 }
 0xb8e   :  { %15118 = vtanh.f32 %v13240_v40  ;;  %v22185_v40 = vld [vmem:[#allocation23_spill] sm:$0xff] }
 0xb99   :  { %v15117_v50 = vpop.eup %15116 }
 0xb9a   :  { %v13255_v11 = vmul.f32 %v15117_v50, %v13246_v29  ;;  %v22188_v29 = vld [vmem:[#allocation31_spill] sm:$0xff]  ;;  %v22191_v50 = vld [vmem:[#allocation40_spill] sm:$0xff] }
 0xb9b   :  { %v15119_v34 = vpop.eup %15118 }
 0xb9c   :  { %v19183_v23 = vadd.f32 %v13255_v11, %v13254_v10  ;;  %v13249_v8 = vmul.f32 0.5, %v15119_v34  ;;  %v22192_v10 = vld [vmem:[#allocation44_spill] sm:$0xff]  ;;  %v22193_v11 = vld [vmem:[#allocation46_spill] sm:$0xff]  ;;  %v22194_v34 = vld [vmem:[#allocation49_spill] sm:$0xff] }
 0xb9e   :  { %15120 = vtanh.f32 %v19183_v23  ;;  %v13250_v41 = vadd.f32 0.5, %v13249_v8  ;;  %v22195_v8 = vld [vmem:[#allocation53_spill] sm:$0xff] }
 0xbab   :  { %v15121_v60 = vpop.eup %15120 }
 0xbac   :  { %v13258_v30 = vmul.f32 %v15121_v60, %v13250_v41  ;;  %v22196_v41 = vld [vmem:[#allocation59_spill] sm:$0xff]  ;;  %v22197_v60 = vld [vmem:[#allocation62_spill] sm:$0xff] }
 0xbae   :  { %v13260_v13 = vrot.slane %v13258_v30, 6  ;;  %v22198_v30 = vld [vmem:[#allocation67_spill] sm:$0xff] }
 0xbb0   :  { %v19186_v37 = vand.u32 4294901760, %v13260_v13 }
 0xbb2   :  { %v19189_v36 = vsub.f32 %v13260_v13, %v19186_v37  ;;  %13596 = vmatmul.mubr.f32.vlgmr.msra.gmra.mxu1 %v19186_v37  ;;  %v22199_v13 = vld [vmem:[#allocation76_spill] sm:$0xff] }
 0xbb3   :  { %13742 = vmatpush1.msra.mxu1 %v20675_v15  ;;  %13835 = vmatprep.mubr.f32.mxu1 %v20373_v28 }
 0xbb4   :  { %13744 = vmatprep.subr.mxu1 %v20677_v46  ;;  %v19196_v4 = vand.u32 4294901760, %v19189_v36 }
 0xbb5   :  { %13746 = vmatpush1.msra.mxu1 %v20679_v51 }
 0xbb6   :  { %13748 = vmatprep.subr.mxu1 %v20681_v38  ;;  %v13362_v27 = vsub.f32 %v19189_v36, %v19196_v4 }
 0xbb7   :  { %13750 = vmatpush1.msra.mxu1 %v20683_v17 }
 0xbb8   :  { %13752 = vmatprep.subr.mxu1 %v20685_v12  ;;  %v19204_v6 = vand.u32 4294901760, %v13362_v27  ;;  %v22200_v27 = vld [vmem:[#allocation80_spill] sm:$0xff] }
 0xbb9   :  { %13754 = vmatpush1.msra.mxu1 %v20687_v20 }
 0xbba   :  { %13756 = vmatprep.subr.mxu1 %v20689_v16  ;;  %13364 = vmatmul.mubr.f32.vlgmr.msra.gmra.mxu0 %v19204_v6 }
 0xbbb   :  { %13607 = vmatpush1.msra.mxu0 %v22183_v14  ;;  %13758 = vmatpush1.msra.mxu1 %v20691_v25  ;;  %v22201_v14 = vld [vmem:[#allocation83_spill] sm:$0xff] }
 0xbbc   :  { %13610 = vmatprep.subr.mxu0 %v22184_v55  ;;  %13760 = vmatprep.subr.mxu1 %v20693_v19  ;;  %v22202_v55 = vld [vmem:[#allocation86_spill] sm:$0xff] }
 0xbbd   :  { %13613 = vmatpush1.msra.mxu0 %v22185_v40  ;;  %13762 = vmatpush1.msra.mxu1 %v20745_v57  ;;  %v22203_v40 = vld [vmem:[#allocation90_spill] sm:$0xff] }
 0xbbe   :  { %13616 = vmatprep.subr.mxu0 %v22186_v56  ;;  %13764 = vmatprep.subr.mxu1 %v20747_v45  ;;  %v22204_v56 = vld [vmem:[#allocation93_spill] sm:$0xff] }
 0xbbf   :  { %13619 = vmatpush1.msra.mxu0 %v22187_v35  ;;  %13766 = vmatpush1.msra.mxu1 %v20749_v21  ;;  %v22205_v35 = vld [vmem:[#allocation97_spill] sm:$0xff] }
 0xbc0   :  { %13622 = vmatprep.subr.mxu0 %v22188_v29  ;;  %13768 = vmatprep.subr.mxu1 %v20751_v33  ;;  %v22206_v29 = vld [vmem:[#allocation101_spill] sm:$0xff] }
 0xbc1   :  { %13625 = vmatpush1.msra.mxu0 %v22189_v59  ;;  %13770 = vmatpush1.msra.mxu1 %v20753_v1  ;;  %v22207_v59 = vld [vmem:[#allocation104_spill] sm:$0xff] }
 0xbc2   :  { %13628 = vmatprep.subr.mxu0 %v22190_v24  ;;  %13772 = vmatprep.subr.mxu1 %v20755_v9  ;;  %v22208_v24 = vld [vmem:[#allocation107_spill] sm:$0xff] }
 0xbc3   :  { %13631 = vmatpush1.msra.mxu0 %v22191_v50  ;;  %13774 = vmatpush1.msra.mxu1 %v20757_v53  ;;  %v22209_v50 = vld [vmem:[#allocation110_spill] sm:$0xff] }
 0xbc4   :  { %13634 = vmatprep.subr.mxu0 %v22192_v10  ;;  %13776 = vmatprep.subr.mxu1 %v20759_v7  ;;  %v22210_v10 = vld [vmem:[#allocation114_spill] sm:$0xff] }
 0xbc5   :  { %13637 = vmatpush1.msra.mxu0 %v22193_v11  ;;  %13778 = vmatpush1.msra.mxu1 %v20761_v44  ;;  %v22211_v11 = vld [vmem:[#allocation117_spill] sm:$0xff] }
 0xbc6   :  { %13640 = vmatprep.subr.mxu0 %v22194_v34  ;;  %13780 = vmatprep.subr.mxu1 %v20763_v3  ;;  %v22241_v34 = vld [vmem:[#allocation179_spill] sm:$0xff] }
 0xbc7   :  { %13643 = vmatpush1.msra.mxu0 %v22195_v8  ;;  %13782 = vmatpush1.msra.mxu1 %v20765_v52  ;;  %v22243_v8 = vld [vmem:[#allocation182_spill] sm:$0xff] }
 0xbc8   :  { %13646 = vmatprep.subr.mxu0 %v22196_v41  ;;  %13784 = vmatprep.subr.mxu1 %v22165_v32  ;;  %v22245_v41 = vld [vmem:[#allocation185_spill] sm:$0xff] }
 0xbc9   :  { %13649 = vmatpush1.msra.mxu0 %v22197_v60  ;;  %13786 = vmatpush1.msra.mxu1 %v22167_v58  ;;  %v22247_v60 = vld [vmem:[#allocation188_spill] sm:$0xff] }
 0xbca   :  { %13652 = vmatprep.subr.mxu0 %v22198_v30  ;;  %13788 = vmatprep.subr.mxu1 %v22169_v47  ;;  %v22248_v30 = vld [vmem:[#allocation127_spill] sm:$0xff] }
 0xbcb   :  { %13655 = vmatpush1.msra.mxu0 %v22199_v13  ;;  %13790 = vmatpush1.msra.mxu1 %v22170_v54  ;;  %v22249_v13 = vld [vmem:[#allocation191_spill] sm:$0xff] }
 0xbcc   :  { %13658 = vmatprep.subr.mxu0 %v22200_v27  ;;  %13792 = vmatprep.subr.mxu1 %v22171_v49  ;;  %v22250_v27 = vld [vmem:[#allocation129_spill] sm:$0xff] }
 0xbcd   :  { %13661 = vmatpush1.msra.mxu0 %v22201_v14  ;;  %13794 = vmatpush1.msra.mxu1 %v22172_v62  ;;  %v22251_v14 = vld [vmem:[#allocation194_spill] sm:$0xff] }
 0xbce   :  { %13664 = vmatprep.subr.mxu0 %v22202_v55  ;;  %13796 = vmatprep.subr.mxu1 %v22173_v0  ;;  %v22252_v55 = vld [vmem:[#allocation131_spill] sm:$0xff] }
 0xbcf   :  { %13667 = vmatpush1.msra.mxu0 %v22203_v40  ;;  %13798 = vmatpush1.msra.mxu1 %v22174_v43  ;;  %v22253_v40 = vld [vmem:[#allocation197_spill] sm:$0xff] }
 0xbd0   :  { %13670 = vmatprep.subr.mxu0 %v22204_v56  ;;  %13800 = vmatprep.subr.mxu1 %v22175_v22  ;;  %v22254_v56 = vld [vmem:[#allocation200_spill] sm:$0xff] }
 0xbd1   :  { %13673 = vmatpush1.msra.mxu0 %v22205_v35  ;;  %13802 = vmatpush1.msra.mxu1 %v22176_v5  ;;  %v22255_v35 = vld [vmem:[#allocation203_spill] sm:$0xff] }
 0xbd2   :  { %13676 = vmatprep.subr.mxu0 %v22206_v29  ;;  %13839 = vmatmul.mubr.f32.vlgmr.msra.gmra.mxu1 %v19196_v4  ;;  %v22256_v29 = vld [vmem:[#allocation206_spill] sm:$0xff] }
 0xbd3   :  { %14014 = vmatprep.subr.mxu1 %v20787_v18  ;;  %13679 = vmatpush1.msra.mxu0 %v22207_v59  ;;  %v22212_v18 = vld [vmem:[#allocation120_spill] sm:$0xff]  ;;  %v22257_v59 = vld [vmem:[#allocation210_spill] sm:$0xff] }
 0xbd4   :  { %14016 = vmatpush1.msra.mxu1 %v20675_v15  ;;  %13682 = vmatprep.subr.mxu0 %v22208_v24  ;;  %v22213_v15 = vld [vmem:[#allocation123_spill] sm:$0xff]  ;;  %v22258_v24 = vld [vmem:[#allocation145_spill] sm:$0xff] }
 0xbd5   :  { %14018 = vmatprep.subr.mxu1 %v20677_v46  ;;  %13685 = vmatpush1.msra.mxu0 %v22209_v50  ;;  %v22217_v46 = vld [vmem:[#allocation33_spill] sm:$0xff] }
 0xbd6   :  { %14020 = vmatpush1.msra.mxu1 %v20679_v51  ;;  %13688 = vmatprep.subr.mxu0 %v22210_v10  ;;  %v22214_v51 = vld [vmem:[#allocation20_spill] sm:$0xff]  ;;  %v22259_v50 = vld [vmem:[#allocation213_spill] sm:$0xff]  ;;  %v22260_v10 = vld [vmem:[#allocation147_spill] sm:$0xff] }
 0xbd7   :  { %14022 = vmatprep.subr.mxu1 %v20681_v38  ;;  %13691 = vmatpush1.msra.mxu0 %v22211_v11  ;;  %v22215_v38 = vld [vmem:[#allocation27_spill] sm:$0xff]  ;;  %v22261_v11 = vld [vmem:[#allocation216_spill] sm:$0xff] }
 0xbd8   :  { %14024 = vmatpush1.msra.mxu1 %v20683_v17  ;;  %13694 = vmatprep.subr.mxu0 %v22212_v18  ;;  %v22216_v17 = vld [vmem:[#allocation30_spill] sm:$0xff] }
 0xbd9   :  { %14026 = vmatprep.subr.mxu1 %v20685_v12  ;;  %13697 = vmatpush1.msra.mxu0 %v22213_v15  ;;  %v22218_v12 = vld [vmem:[#allocation36_spill] sm:$0xff]  ;;  %v22262_v18 = vld [vmem:[#allocation150_spill] sm:$0xff]  ;;  %v22263_v15 = vld [vmem:[#allocation223_spill] sm:$0xff] }
 0xbda   :  { %13730 = vmatprep.mubr.f32.mxu0 %v20373_v28  ;;  %14028 = vmatpush1.msra.mxu1 %v20687_v20  ;;  %v22219_v20 = vld [vmem:[#allocation39_spill] sm:$0xff] }
 0xbdb   :  { %13733 = vmatmul.mubr.f32.vlgmr.msra.gmra.mxu0 %v19189_v36  ;;  %13848 = vmatprep.subr.mxu0 %v22214_v51  ;;  %v22264_v51 = vld [vmem:[#allocation152_spill] sm:$0xff] }
 0xbdc   :  { %14030 = vmatprep.subr.mxu1 %v20689_v16  ;;  %13852 = vmatpush1.msra.mxu0 %v22215_v38  ;;  %v22220_v16 = vld [vmem:[#allocation43_spill] sm:$0xff] }
 0xbdd   :  { %14032 = vmatpush1.msra.mxu1 %v20691_v25  ;;  %13856 = vmatprep.subr.mxu0 %v22216_v17  ;;  %v22221_v25 = vld [vmem:[#allocation45_spill] sm:$0xff]  ;;  %v22265_v38 = vld [vmem:[#allocation227_spill] sm:$0xff]  ;;  %v22266_v17 = vld [vmem:[#allocation154_spill] sm:$0xff] }
 0xbde   :  { %14034 = vmatprep.subr.mxu1 %v20693_v19  ;;  %13860 = vmatpush1.msra.mxu0 %v22217_v46  ;;  %v22222_v19 = vld [vmem:[#allocation48_spill] sm:$0xff] }
 0xbdf   :  { %14036 = vmatpush1.msra.mxu1 %v20745_v57  ;;  %13864 = vmatprep.subr.mxu0 %v22218_v12  ;;  %v22223_v57 = vld [vmem:[#allocation52_spill] sm:$0xff]  ;;  %v22268_v12 = vld [vmem:[#allocation157_spill] sm:$0xff] }
 0xbe0   :  { %14038 = vmatprep.subr.mxu1 %v20747_v45  ;;  %13868 = vmatpush1.msra.mxu0 %v22219_v20  ;;  %v22224_v45 = vld [vmem:[#allocation55_spill] sm:$0xff]  ;;  %v22267_v46 = vld [vmem:[#allocation240_spill] sm:$0xff] }
 0xbe1   :  { %14040 = vmatpush1.msra.mxu1 %v20749_v21  ;;  %13872 = vmatprep.subr.mxu0 %v22220_v16  ;;  %v22225_v21 = vld [vmem:[#allocation58_spill] sm:$0xff]  ;;  %v22269_v20 = vld [vmem:[#allocation243_spill] sm:$0xff]  ;;  %v22270_v16 = vld [vmem:[#allocation160_spill] sm:$0xff] }
 0xbe2   :  { %14042 = vmatprep.subr.mxu1 %v20751_v33  ;;  %13876 = vmatpush1.msra.mxu0 %v22221_v25  ;;  %v22226_v33 = vld [vmem:[#allocation61_spill] sm:$0xff]  ;;  %v22271_v25 = vld [vmem:[#allocation246_spill] sm:$0xff] }
 0xbe3   :  { %14044 = vmatpush1.msra.mxu1 %v20753_v1  ;;  %13880 = vmatprep.subr.mxu0 %v22222_v19  ;;  %v22227_v1 = vld [vmem:[#allocation64_spill] sm:$0xff]  ;;  %v22272_v19 = vld [vmem:[#allocation163_spill] sm:$0xff] }
 0xbe4   :  { %14046 = vmatprep.subr.mxu1 %v20755_v9  ;;  %13884 = vmatpush1.msra.mxu0 %v22223_v57  ;;  %v22228_v9 = vld [vmem:[#allocation70_spill] sm:$0xff]  ;;  %v22273_v57 = vld [vmem:[#allocation249_spill] sm:$0xff] }
 0xbe5   :  { %14048 = vmatpush1.msra.mxu1 %v20757_v53  ;;  %13888 = vmatprep.subr.mxu0 %v22224_v45  ;;  %v22229_v53 = vld [vmem:[#allocation73_spill] sm:$0xff]  ;;  %v22274_v45 = vld [vmem:[#allocation166_spill] sm:$0xff] }
 0xbe6   :  { %14050 = vmatprep.subr.mxu1 %v20759_v7  ;;  %13892 = vmatpush1.msra.mxu0 %v22225_v21  ;;  %v22230_v7 = vld [vmem:[#allocation79_spill] sm:$0xff]  ;;  %v22275_v21 = vld [vmem:[#allocation252_spill] sm:$0xff] }
 0xbe7   :  { %14052 = vmatpush1.msra.mxu1 %v20761_v44  ;;  %13896 = vmatprep.subr.mxu0 %v22226_v33  ;;  %v22231_v44 = vld [vmem:[#allocation89_spill] sm:$0xff] }
 0xbe8   :  { %14054 = vmatprep.subr.mxu1 %v20763_v3  ;;  %13900 = vmatpush1.msra.mxu0 %v22227_v1  ;;  %v22232_v3 = vld [vmem:[#allocation92_spill] sm:$0xff]  ;;  %v22276_v33 = vld [vmem:[#allocation169_spill] sm:$0xff]  ;;  %v22277_v1 = vld [vmem:[#allocation254_spill] sm:$0xff] }
 0xbe9   :  { %14056 = vmatpush1.msra.mxu1 %v20765_v52  ;;  %13904 = vmatprep.subr.mxu0 %v22228_v9  ;;  %v22233_v52 = vld [vmem:[#allocation96_spill] sm:$0xff]  ;;  %v22278_v9 = vld [vmem:[#allocation175_spill] sm:$0xff] }
 0xbea   :  { %14058 = vmatprep.subr.mxu1 %v22165_v32  ;;  %13908 = vmatpush1.msra.mxu0 %v22229_v53  ;;  %v22234_v32 = vld [vmem:[#allocation100_spill] sm:$0xff] }
 0xbeb   :  { %14060 = vmatpush1.msra.mxu1 %v22167_v58  ;;  %13912 = vmatprep.subr.mxu0 %v22230_v7  ;;  %v22235_v58 = vld [vmem:[#allocation103_spill] sm:$0xff]  ;;  %v22279_v53 = vld [vmem:[#allocation256_spill] sm:$0xff]  ;;  %v22280_v7 = vld [vmem:[#allocation178_spill] sm:$0xff] }
 0xbec   :  { %14062 = vmatprep.subr.mxu1 %v22169_v47  ;;  %13916 = vmatpush1.msra.mxu0 %v22231_v44  ;;  %v22236_v47 = vld [vmem:[#allocation106_spill] sm:$0xff] }
 0xbed   :  { %14064 = vmatpush1.msra.mxu1 %v22170_v54  ;;  %13920 = vmatprep.subr.mxu0 %v22232_v3  ;;  %v22237_v54 = vld [vmem:[#allocation109_spill] sm:$0xff]  ;;  %v22281_v44 = vld [vmem:[#allocation258_spill] sm:$0xff]  ;;  %v22282_v3 = vld [vmem:[#allocation184_spill] sm:$0xff] }
 0xbee   :  { %14066 = vmatprep.subr.mxu1 %v22171_v49  ;;  %13924 = vmatpush1.msra.mxu0 %v22233_v52  ;;  %v22238_v49 = vld [vmem:[#allocation113_spill] sm:$0xff]  ;;  %v22283_v52 = vld [vmem:[#allocation260_spill] sm:$0xff] }
 0xbef   :  { %14068 = vmatpush1.msra.mxu1 %v22172_v62  ;;  %13928 = vmatprep.subr.mxu0 %v22234_v32  ;;  %v22239_v62 = vld [vmem:[#allocation170_spill] sm:$0xff]  ;;  %v22284_v32 = vld [vmem:[#allocation193_spill] sm:$0xff] }
 0xbf0   :  { %14070 = vmatprep.subr.mxu1 %v22173_v0  ;;  %13932 = vmatpush1.msra.mxu0 %v22235_v58  ;;  %v22240_v0 = vld [vmem:[#allocation116_spill] sm:$0xff]  ;;  %v22285_v58 = vld [vmem:[#allocation261_spill] sm:$0xff] }
 0xbf1   :  { %14072 = vmatpush1.msra.mxu1 %v22174_v43  ;;  %13936 = vmatprep.subr.mxu0 %v22236_v47  ;;  %v22242_v43 = vld [vmem:[#allocation119_spill] sm:$0xff]  ;;  %v22286_v47 = vld [vmem:[#allocation196_spill] sm:$0xff] }
 0xbf2   :  { %14074 = vmatprep.subr.mxu1 %v22175_v22  ;;  %13940 = vmatpush1.msra.mxu0 %v22237_v54  ;;  %v22244_v22 = vld [vmem:[#allocation122_spill] sm:$0xff] }
 0xbf3   :  { %14076 = vmatpush1.msra.mxu1 %v22176_v5  ;;  %14109 = vmatprep.mubr.f32.mxu1 %v20373_v28  ;;  %v22246_v5 = vld [vmem:[#allocation125_spill] sm:$0xff]  ;;  %v22287_v54 = vld [vmem:[#allocation262_spill] sm:$0xff] }
 0xbf4   :  { %13944 = vmatprep.subr.mxu0 %v22238_v49  ;;  %14111 = vmatmul.mubr.f32.vlgmr.msra.gmra.mxu1 %v19186_v37  ;;  %v22288_v49 = vld [vmem:[#allocation199_spill] sm:$0xff] }
 0xbf5   :  { %14230 = vmatprep.subr.mxu1 %v22239_v62  ;;  %13948 = vmatpush1.msra.mxu0 %v22240_v0  ;;  %v22289_v62 = vld [vmem:[#allocation263_spill] sm:$0xff]  ;;  %v22290_v0 = vld [vmem:[#allocation202_spill] sm:$0xff] }
 0xbf6   :  { %14236 = vmatpush1.msra.mxu1 %v22241_v34  ;;  %13952 = vmatprep.subr.mxu0 %v22242_v43  ;;  %v22291_v34 = vld [vmem:[#allocation264_spill] sm:$0xff]  ;;  %v22292_v43 = vld [vmem:[#allocation205_spill] sm:$0xff] }
 0xbf7   :  { %14242 = vmatprep.subr.mxu1 %v22243_v8  ;;  %13956 = vmatpush1.msra.mxu0 %v22244_v22  ;;  %v22293_v8 = vld [vmem:[#allocation265_spill] sm:$0xff] }
 0xbf8   :  { %14248 = vmatpush1.msra.mxu1 %v22245_v41  ;;  %13960 = vmatprep.subr.mxu0 %v22246_v5  ;;  %v22294_v22 = vld [vmem:[#allocation209_spill] sm:$0xff]  ;;  %v22295_v41 = vld [vmem:[#allocation266_spill] sm:$0xff]  ;;  %v22296_v5 = vld [vmem:[#allocation212_spill] sm:$0xff] }
 0xbf9   :  { %14254 = vmatprep.subr.mxu1 %v22247_v60  ;;  %13964 = vmatpush1.msra.mxu0 %v22248_v30  ;;  %v22297_v60 = vld [vmem:[#allocation267_spill] sm:$0xff] }
 0xbfa   :  { %14260 = vmatpush1.msra.mxu1 %v22249_v13  ;;  %13968 = vmatprep.subr.mxu0 %v22250_v27  ;;  %v22298_v30 = vld [vmem:[#allocation215_spill] sm:$0xff]  ;;  %v22300_v27 = vld [vmem:[#allocation222_spill] sm:$0xff] }
 0xbfb   :  { %14266 = vmatprep.subr.mxu1 %v22251_v14  ;;  %13972 = vmatpush1.msra.mxu0 %v22252_v55  ;;  %v22299_v13 = vld [vmem:[#allocation219_spill] sm:$0xff]  ;;  %v22301_v14 = vld [vmem:[#allocation226_spill] sm:$0xff] }
 0xbfc   :  { %14005 = vmatprep.mubr.f32.mxu0 %v20373_v28  ;;  %14272 = vmatpush1.msra.mxu1 %v22253_v40  ;;  %v22302_v55 = vld [vmem:[#allocation230_spill] sm:$0xff]  ;;  %v22303_v40 = vld [vmem:[#allocation233_spill] sm:$0xff] }
 0xbfd   :  { %14007 = vmatmul.mubr.f32.vlgmr.msra.gmra.mxu0 %v19186_v37  ;;  %14118 = vmatprep.subr.mxu0 %v20835_v31 }
 0xbfe   :  { %14278 = vmatprep.subr.mxu1 %v22254_v56  ;;  %14120 = vmatpush1.msra.mxu0 %v20837_v26  ;;  %v22304_v56 = vld [vmem:[#allocation236_spill] sm:$0xff] }
 0xbff   :  { %14284 = vmatpush1.msra.mxu1 %v22255_v35  ;;  %14122 = vmatprep.subr.mxu0 %v20839_v39  ;;  %v22305_v35 = vld [vmem:[#allocation239_spill] sm:$0xff] }
 0xc00   :  { %14290 = vmatprep.subr.mxu1 %v22256_v29  ;;  %14124 = vmatpush1.msra.mxu0 %v20841_v63  ;;  %v22306_v29 = vld [vmem:[#allocation142_spill] sm:$0xff] }
 0xc01   :  { %14296 = vmatpush1.msra.mxu1 %v22257_v59  ;;  %14126 = vmatprep.subr.mxu0 %v22258_v24  ;;  %v22307_v59 = vld [vmem:[#allocation146_spill] sm:$0xff] }
 0xc02   :  { %14302 = vmatprep.subr.mxu1 %v22259_v50  ;;  %14128 = vmatpush1.msra.mxu0 %v22260_v10  ;;  %v22308_v50 = vld [vmem:[#allocation149_spill] sm:$0xff] }
 0xc03   :  { %14308 = vmatpush1.msra.mxu1 %v22261_v11  ;;  %14130 = vmatprep.subr.mxu0 %v22262_v18  ;;  %v22309_v11 = vld [vmem:[#allocation151_spill] sm:$0xff] }
 0xc04   :  { %14314 = vmatprep.subr.mxu1 %v22263_v15  ;;  %14132 = vmatpush1.msra.mxu0 %v22264_v51  ;;  %v22310_v15 = vld [vmem:[#allocation153_spill] sm:$0xff] }
 0xc05   :  { %14320 = vmatpush1.msra.mxu1 %v22265_v38  ;;  %14134 = vmatprep.subr.mxu0 %v22266_v17  ;;  %v22312_v38 = vld [vmem:[#allocation159_spill] sm:$0xff] }
 0xc06   :  { %14326 = vmatprep.subr.mxu1 %v22267_v46  ;;  %14136 = vmatpush1.msra.mxu0 %v22268_v12  ;;  %v22313_v46 = vld [vmem:[#allocation162_spill] sm:$0xff] }
 0xc07   :  { %14332 = vmatpush1.msra.mxu1 %v22269_v20  ;;  %14138 = vmatprep.subr.mxu0 %v22270_v16  ;;  %v22314_v20 = vld [vmem:[#allocation165_spill] sm:$0xff] }
 0xc08   :  { %14338 = vmatprep.subr.mxu1 %v22271_v25  ;;  %14140 = vmatpush1.msra.mxu0 %v22272_v19  ;;  %v22315_v25 = vld [vmem:[#allocation168_spill] sm:$0xff] }
 0xc09   :  { %14344 = vmatpush1.msra.mxu1 %v22273_v57  ;;  %14142 = vmatprep.subr.mxu0 %v22274_v45  ;;  %v22316_v57 = vld [vmem:[#allocation172_spill] sm:$0xff] }
 0xc0a   :  { %14350 = vmatprep.subr.mxu1 %v22275_v21  ;;  %14144 = vmatpush1.msra.mxu0 %v22276_v33  ;;  %v22317_v21 = vld [vmem:[#allocation174_spill] sm:$0xff] }
 0xc0b   :  { %14356 = vmatpush1.msra.mxu1 %v22277_v1  ;;  %14146 = vmatprep.subr.mxu0 %v22278_v9  ;;  %v22318_v1 = vld [vmem:[#allocation177_spill] sm:$0xff] }
 0xc0c   :  { %14362 = vmatprep.subr.mxu1 %v22279_v53  ;;  %14148 = vmatpush1.msra.mxu0 %v22280_v7  ;;  %v22319_v53 = vld [vmem:[#allocation181_spill] sm:$0xff] }
 0xc0d   :  { %14368 = vmatpush1.msra.mxu1 %v22281_v44  ;;  %14150 = vmatprep.subr.mxu0 %v22282_v3  ;;  %v22320_v44 = vld [vmem:[#allocation187_spill] sm:$0xff] }
 0xc0e   :  { %14374 = vmatprep.subr.mxu1 %v22283_v52  ;;  %14152 = vmatpush1.msra.mxu0 %v22284_v32  ;;  %v22321_v52 = vld [vmem:[#allocation190_spill] sm:$0xff] }
 0xc0f   :  { %14380 = vmatpush1.msra.mxu1 %v22285_v58  ;;  %14154 = vmatprep.subr.mxu0 %v22286_v47  ;;  %v22322_v58 = vld [vmem:[#allocation195_spill] sm:$0xff] }
 0xc10   :  { %14386 = vmatprep.subr.mxu1 %v22287_v54  ;;  %14156 = vmatpush1.msra.mxu0 %v22288_v49  ;;  %v22323_v54 = vld [vmem:[#allocation204_spill] sm:$0xff] }
 0xc11   :  { %14392 = vmatpush1.msra.mxu1 %v22289_v62  ;;  %14158 = vmatprep.subr.mxu0 %v22290_v0  ;;  %v22324_v62 = vld [vmem:[#allocation208_spill] sm:$0xff] }
 0xc12   :  { %14398 = vmatprep.subr.mxu1 %v22291_v34  ;;  %14160 = vmatpush1.msra.mxu0 %v22292_v43  ;;  %v22325_v34 = vld [vmem:[#allocation211_spill] sm:$0xff] }
 0xc13   :  { %14404 = vmatpush1.msra.mxu1 %v22293_v8  ;;  %14162 = vmatprep.subr.mxu0 %v22294_v22  ;;  %v22326_v8 = vld [vmem:[#allocation214_spill] sm:$0xff] }
 0xc14   :  { %14410 = vmatprep.subr.mxu1 %v22295_v41  ;;  %14164 = vmatpush1.msra.mxu0 %v22296_v5  ;;  %v22327_v41 = vld [vmem:[#allocation218_spill] sm:$0xff] }
 0xc15   :  { %14416 = vmatpush1.msra.mxu1 %v22297_v60  ;;  %14449 = vmatprep.mubr.f32.mxu1 %v20373_v28  ;;  %v22328_v60 = vld [vmem:[#allocation221_spill] sm:$0xff] }
 0xc16   :  { %14166 = vmatprep.subr.mxu0 %v22298_v30  ;;  %14451 = vmatmul.mubr.f32.vlgmr.msra.gmra.mxu1 %v19186_v37 }
 0xc17   :  { %14595 = vmatprep.subr.mxu1 %v20835_v31  ;;  %14168 = vmatpush1.msra.mxu0 %v22299_v13 }
 0xc18   :  { %14597 = vmatpush1.msra.mxu1 %v20837_v26  ;;  %14170 = vmatprep.subr.mxu0 %v22300_v27 }
 0xc19   :  { %14599 = vmatprep.subr.mxu1 %v20839_v39  ;;  %14172 = vmatpush1.msra.mxu0 %v22301_v14 }
 0xc1a   :  { %14601 = vmatpush1.msra.mxu1 %v20841_v63  ;;  %14174 = vmatprep.subr.mxu0 %v22302_v55 }
 0xc1b   :  { %14603 = vmatprep.subr.mxu1 %v22258_v24  ;;  %14176 = vmatpush1.msra.mxu0 %v22303_v40 }
 0xc1c   :  { %14605 = vmatpush1.msra.mxu1 %v22260_v10  ;;  %14178 = vmatprep.subr.mxu0 %v22304_v56 }
 0xc1d   :  { %14607 = vmatprep.subr.mxu1 %v22262_v18  ;;  %14180 = vmatpush1.msra.mxu0 %v22305_v35 }
 0xc1e   :  { %14213 = vmatprep.mubr.f32.mxu0 %v20373_v28  ;;  %14609 = vmatpush1.msra.mxu1 %v22264_v51 }
 0xc1f   :  { %14219 = vmatmul.mubr.f32.vlgmr.msra.gmra.mxu0 %v19204_v6  ;;  %14459 = vmatprep.subr.mxu0 %v22306_v29  ;;  %v22311_v6 = vld [vmem:[#allocation156_spill] sm:$0xff]  ;;  %v22329_v29 = vld [vmem:[#allocation225_spill] sm:$0xff] }
 0xc20   :  { %14611 = vmatprep.subr.mxu1 %v22266_v17  ;;  %14462 = vmatpush1.msra.mxu0 %v22307_v59  ;;  %v22330_v59 = vld [vmem:[#allocation229_spill] sm:$0xff] }
 0xc21   :  { %14613 = vmatpush1.msra.mxu1 %v22268_v12  ;;  %14465 = vmatprep.subr.mxu0 %v22308_v50  ;;  %v22331_v50 = vld [vmem:[#allocation232_spill] sm:$0xff] }
 0xc22   :  { %14615 = vmatprep.subr.mxu1 %v22270_v16  ;;  %14468 = vmatpush1.msra.mxu0 %v22309_v11  ;;  %v22332_v11 = vld [vmem:[#allocation235_spill] sm:$0xff] }
 0xc23   :  { %14617 = vmatpush1.msra.mxu1 %v22272_v19  ;;  %14471 = vmatprep.subr.mxu0 %v22310_v15  ;;  %v22333_v15 = vld [vmem:[#allocation238_spill] sm:$0xff] }
 0xc24   :  { %14619 = vmatprep.subr.mxu1 %v22274_v45  ;;  %14474 = vmatpush1.msra.mxu0 %v22311_v6  ;;  %v22334_v6 = vld [vmem:[#allocation242_spill] sm:$0xff] }
 0xc25   :  { %14621 = vmatpush1.msra.mxu1 %v22276_v33  ;;  %14477 = vmatprep.subr.mxu0 %v22312_v38  ;;  %v22335_v38 = vld [vmem:[#allocation245_spill] sm:$0xff] }
 0xc26   :  { %14623 = vmatprep.subr.mxu1 %v22278_v9  ;;  %14480 = vmatpush1.msra.mxu0 %v22313_v46 }
 0xc27   :  { %14625 = vmatpush1.msra.mxu1 %v22280_v7  ;;  %14483 = vmatprep.subr.mxu0 %v22314_v20 }
 0xc28   :  { %14627 = vmatprep.subr.mxu1 %v22282_v3  ;;  %14486 = vmatpush1.msra.mxu0 %v22315_v25 }
 0xc29   :  { %14629 = vmatpush1.msra.mxu1 %v22284_v32  ;;  %14489 = vmatprep.subr.mxu0 %v22316_v57 }
 0xc2a   :  { %14631 = vmatprep.subr.mxu1 %v22286_v47  ;;  %14492 = vmatpush1.msra.mxu0 %v22317_v21 }
 0xc2b   :  { %14633 = vmatpush1.msra.mxu1 %v22288_v49  ;;  %14495 = vmatprep.subr.mxu0 %v22318_v1 }
 0xc2c   :  { %14635 = vmatprep.subr.mxu1 %v22290_v0  ;;  %14498 = vmatpush1.msra.mxu0 %v22319_v53 }
 0xc2d   :  { %14637 = vmatpush1.msra.mxu1 %v22292_v43  ;;  %14501 = vmatprep.subr.mxu0 %v22320_v44 }
 0xc2e   :  { %14639 = vmatprep.subr.mxu1 %v22294_v22  ;;  %14504 = vmatpush1.msra.mxu0 %v22321_v52 }
 0xc2f   :  { %14641 = vmatpush1.msra.mxu1 %v22296_v5  ;;  %14507 = vmatprep.subr.mxu0 %v22322_v58 }
 0xc30   :  { %14643 = vmatprep.subr.mxu1 %v22298_v30  ;;  %14510 = vmatpush1.msra.mxu0 %v22323_v54 }
 0xc31   :  { %14645 = vmatpush1.msra.mxu1 %v22299_v13  ;;  %14513 = vmatprep.subr.mxu0 %v22324_v62 }
 0xc32   :  { %14647 = vmatprep.subr.mxu1 %v22300_v27  ;;  %14516 = vmatpush1.msra.mxu0 %v22325_v34 }
 0xc33   :  { %14649 = vmatpush1.msra.mxu1 %v22301_v14  ;;  %14519 = vmatprep.subr.mxu0 %v22326_v8 }
 0xc34   :  { %14651 = vmatprep.subr.mxu1 %v22302_v55  ;;  %14522 = vmatpush1.msra.mxu0 %v22327_v41 }
 0xc35   :  { %14653 = vmatpush1.msra.mxu1 %v22303_v40  ;;  %14525 = vmatprep.subr.mxu0 %v22328_v60 }
 0xc36   :  { %14655 = vmatprep.subr.mxu1 %v22304_v56  ;;  %14528 = vmatpush1.msra.mxu0 %v22329_v29 }
 0xc37   :  { %14657 = vmatpush1.msra.mxu1 %v22305_v35  ;;  %14690 = vmatprep.mubr.f32.mxu1 %v20373_v28 }
 0xc38   :  { %14531 = vmatprep.subr.mxu0 %v22330_v59  ;;  %14694 = vmatmul.mubr.f32.vlgmr.msra.gmra.mxu1 %v19196_v4  ;;  %v22340_v4 = vld [vmem:[#allocation158_spill] sm:$0xff] }
 0xc39   :  { %14869 = vmatprep.subr.mxu1 %v20835_v31  ;;  %14534 = vmatpush1.msra.mxu0 %v22331_v50  ;;  %v22336_v31 = vld [vmem:[#allocation248_spill] sm:$0xff] }
 0xc3a   :  { %14871 = vmatpush1.msra.mxu1 %v20837_v26  ;;  %14537 = vmatprep.subr.mxu0 %v22332_v11  ;;  %v22337_v26 = vld [vmem:[#allocation251_spill] sm:$0xff] }
 0xc3b   :  { %14873 = vmatprep.subr.mxu1 %v20839_v39  ;;  %14540 = vmatpush1.msra.mxu0 %v22333_v15  ;;  %v22338_v39 = vld [vmem:[#allocation148_spill] sm:$0xff] }
 0xc3c   :  { %14875 = vmatpush1.msra.mxu1 %v20841_v63  ;;  %14543 = vmatprep.subr.mxu0 %v22334_v6  ;;  %v22339_v63 = vld [vmem:[#allocation155_spill] sm:$0xff] }
 0xc3d   :  { %14877 = vmatprep.subr.mxu1 %v22258_v24  ;;  %14546 = vmatpush1.msra.mxu0 %v22335_v38  ;;  %v22341_v24 = vld [vmem:[#allocation161_spill] sm:$0xff] }
 0xc3e   :  { %14879 = vmatpush1.msra.mxu1 %v22260_v10  ;;  %14549 = vmatprep.subr.mxu0 %v22336_v31  ;;  %v22342_v10 = vld [vmem:[#allocation164_spill] sm:$0xff] }
 0xc3f   :  { %14881 = vmatprep.subr.mxu1 %v22262_v18  ;;  %14552 = vmatpush1.msra.mxu0 %v22337_v26  ;;  %v22344_v18 = vld [vmem:[#allocation171_spill] sm:$0xff] }
 0xc40   :  { %14585 = vmatprep.mubr.f32.mxu0 %v20373_v28  ;;  %14883 = vmatpush1.msra.mxu1 %v22264_v51  ;;  %v22345_v51 = vld [vmem:[#allocation173_spill] sm:$0xff] }
 0xc41   :  { %14588 = vmatmul.mubr.f32.vlgmr.msra.gmra.mxu0 %v19189_v36  ;;  %14703 = vmatprep.subr.mxu0 %v22338_v39  ;;  %v22343_v36 = vld [vmem:[#allocation167_spill] sm:$0xff] }
 0xc42   :  { %14885 = vmatprep.subr.mxu1 %v22266_v17  ;;  %14707 = vmatpush1.msra.mxu0 %v22339_v63  ;;  %v22346_v17 = vld [vmem:[#allocation176_spill] sm:$0xff] }
 0xc43   :  { %14887 = vmatpush1.msra.mxu1 %v22268_v12  ;;  %14711 = vmatprep.subr.mxu0 %v22340_v4  ;;  %v22347_v12 = vld [vmem:[#allocation180_spill] sm:$0xff] }
 0xc44   :  { %14889 = vmatprep.subr.mxu1 %v22270_v16  ;;  %14715 = vmatpush1.msra.mxu0 %v22341_v24  ;;  %v22348_v16 = vld [vmem:[#allocation183_spill] sm:$0xff] }
 0xc45   :  { %14891 = vmatpush1.msra.mxu1 %v22272_v19  ;;  %14719 = vmatprep.subr.mxu0 %v22342_v10  ;;  %v22349_v19 = vld [vmem:[#allocation186_spill] sm:$0xff] }
 0xc46   :  { %14893 = vmatprep.subr.mxu1 %v22274_v45  ;;  %14723 = vmatpush1.msra.mxu0 %v22343_v36  ;;  %v22350_v45 = vld [vmem:[#allocation189_spill] sm:$0xff] }
 0xc47   :  { %14895 = vmatpush1.msra.mxu1 %v22276_v33  ;;  %14727 = vmatprep.subr.mxu0 %v22344_v18  ;;  %v22351_v33 = vld [vmem:[#allocation192_spill] sm:$0xff] }
 0xc48   :  { %14897 = vmatprep.subr.mxu1 %v22278_v9  ;;  %14731 = vmatpush1.msra.mxu0 %v22345_v51  ;;  %v22352_v9 = vld [vmem:[#allocation198_spill] sm:$0xff] }
 0xc49   :  { %14899 = vmatpush1.msra.mxu1 %v22280_v7  ;;  %14735 = vmatprep.subr.mxu0 %v22346_v17  ;;  %v22353_v7 = vld [vmem:[#allocation201_spill] sm:$0xff] }
 0xc4a   :  { %14901 = vmatprep.subr.mxu1 %v22282_v3  ;;  %14739 = vmatpush1.msra.mxu0 %v22347_v12  ;;  %v22354_v3 = vld [vmem:[#allocation207_spill] sm:$0xff] }
 0xc4b   :  { %14903 = vmatpush1.msra.mxu1 %v22284_v32  ;;  %14743 = vmatprep.subr.mxu0 %v22348_v16  ;;  %v22355_v32 = vld [vmem:[#allocation217_spill] sm:$0xff] }
 0xc4c   :  { %14905 = vmatprep.subr.mxu1 %v22286_v47  ;;  %14747 = vmatpush1.msra.mxu0 %v22349_v19  ;;  %v22356_v47 = vld [vmem:[#allocation220_spill] sm:$0xff] }
 0xc4d   :  { %14907 = vmatpush1.msra.mxu1 %v22288_v49  ;;  %14751 = vmatprep.subr.mxu0 %v22350_v45  ;;  %v22357_v49 = vld [vmem:[#allocation224_spill] sm:$0xff] }
 0xc4e   :  { %14909 = vmatprep.subr.mxu1 %v22290_v0  ;;  %14755 = vmatpush1.msra.mxu0 %v22351_v33  ;;  %v22358_v0 = vld [vmem:[#allocation228_spill] sm:$0xff] }
 0xc4f   :  { %14911 = vmatpush1.msra.mxu1 %v22292_v43  ;;  %14759 = vmatprep.subr.mxu0 %v22352_v9  ;;  %v22359_v43 = vld [vmem:[#allocation231_spill] sm:$0xff] }
 0xc50   :  { %14913 = vmatprep.subr.mxu1 %v22294_v22  ;;  %14763 = vmatpush1.msra.mxu0 %v22353_v7  ;;  %v22360_v22 = vld [vmem:[#allocation234_spill] sm:$0xff] }
 0xc51   :  { %14915 = vmatpush1.msra.mxu1 %v22296_v5  ;;  %14767 = vmatprep.subr.mxu0 %v22354_v3  ;;  %v22361_v5 = vld [vmem:[#allocation237_spill] sm:$0xff] }
 0xc52   :  { %14917 = vmatprep.subr.mxu1 %v22298_v30  ;;  %14771 = vmatpush1.msra.mxu0 %v22355_v32  ;;  %v22362_v30 = vld [vmem:[#allocation241_spill] sm:$0xff] }
 0xc53   :  { %14919 = vmatpush1.msra.mxu1 %v22299_v13  ;;  %14775 = vmatprep.subr.mxu0 %v22356_v47  ;;  %v22363_v13 = vld [vmem:[#allocation244_spill] sm:$0xff] }
 0xc54   :  { %14921 = vmatprep.subr.mxu1 %v22300_v27  ;;  %14779 = vmatpush1.msra.mxu0 %v22357_v49  ;;  %v22364_v27 = vld [vmem:[#allocation247_spill] sm:$0xff] }
 0xc55   :  { %14923 = vmatpush1.msra.mxu1 %v22301_v14  ;;  %14783 = vmatprep.subr.mxu0 %v22358_v0  ;;  %v22365_v14 = vld [vmem:[#allocation250_spill] sm:$0xff] }
 0xc56   :  { %14925 = vmatprep.subr.mxu1 %v22302_v55  ;;  %14787 = vmatpush1.msra.mxu0 %v22359_v43  ;;  %v22366_v55 = vld [vmem:[#allocation253_spill] sm:$0xff] }
 0xc57   :  { %14927 = vmatpush1.msra.mxu1 %v22303_v40  ;;  %14791 = vmatprep.subr.mxu0 %v22360_v22  ;;  %v22367_v40 = vld [vmem:[#allocation255_spill] sm:$0xff] }
 0xc58   :  { %14929 = vmatprep.subr.mxu1 %v22304_v56  ;;  %14795 = vmatpush1.msra.mxu0 %v22361_v5  ;;  %v22368_v56 = vld [vmem:[#allocation257_spill] sm:$0xff] }
 0xc59   :  { %14931 = vmatpush1.msra.mxu1 %v22305_v35  ;;  %14964 = vmatprep.mubr.f32.mxu1 %v20373_v28  ;;  %v22369_v35 = vld [vmem:[#allocation259_spill] sm:$0xff] }
 0xc5a   :  { %14799 = vmatprep.subr.mxu0 %v22362_v30  ;;  %14966 = vmatmul.mubr.f32.vlgmr.msra.gmra.mxu1 %v19186_v37 }
 0xc5b   :  { %14803 = vmatpush1.msra.mxu0 %v22363_v13  ;;  %14860 = vmatprep.mubr.f32.mxu0 %v20373_v28 }
 0xc5c   :  { %14807 = vmatprep.subr.mxu0 %v22364_v27 }
 0xc5d   :  { %14811 = vmatpush1.msra.mxu0 %v22365_v14 }
 0xc5e   :  { %14815 = vmatprep.subr.mxu0 %v22366_v55 }
 0xc5f   :  { %14819 = vmatpush1.msra.mxu0 %v22367_v40  ;;  %v14999_v40 = vrot.slane %v19183_v23, 7 }
 0xc60   :  { %14823 = vmatprep.subr.mxu0 %v22368_v56 }
 0xc61   :  { %14827 = vmatpush1.msra.mxu0 %v22369_v35 }
 0xc62   :  { %14862 = vmatmul.mubr.f32.vlgmr.msra.gmra.mxu0 %v19186_v37 }
 0xc72   :  { %v13597_v25 = vpop.f32.mrf.mxu1 }
 0xc74   :  { %v13599_v21 = vpop.f32.mrf.mxu1 }
 0xc7a   :  { %v13365_v46 = vpop.f32.mrf.mxu0 }
 0xc7b   :  { %v13598_v52 = vadd.f32 %v13597_v25, %v13365_v46 }
 0xc7c   :  { %v13367_v20 = vpop.f32.mrf.mxu0 }
 0xc7d   :  { %v13600_v1 = vadd.f32 %v13599_v21, %v13367_v20 }
 0xc92   :  { %v13840_v53 = vpop.f32.mrf.mxu1 }
 0xc94   :  { %v13842_v62 = vpop.f32.mrf.mxu1 }
 0xc9b   :  { %v13734_v57 = vpop.f32.mrf.mxu0 }
 0xc9c   :  { %v13735_v54 = vadd.f32 %v13734_v57, %v13598_v52 }
 0xc9d   :  { %v13736_v28 = vpop.f32.mrf.mxu0 }
 0xc9e   :  { %v13737_v58 = vadd.f32 %v13736_v28, %v13600_v1  ;;  %v13841_v60 = vadd.f32 %v13840_v53, %v13735_v54  ;;  %v15044_v28 = vld [vmem:[%s19553_s4] ss:$0 sm:$0xff] }
 0xca0   :  { %v13843_v8 = vadd.f32 %v13842_v62, %v13737_v58 }
 0xcb4   :  { %v14112_v41 = vpop.f32.mrf.mxu1 }
 0xcb6   :  { %v14114_v50 = vpop.f32.mrf.mxu1 }
 0xcbd   :  { %v14008_v44 = vpop.f32.mrf.mxu0 }
 0xcbe   :  { %v14009_v37 = vadd.f32 %v14008_v44, %v13841_v60  ;;  %v15045_v44 = vld [vmem:[#allocation2] ss:$0 sm:$0xff] }
 0xcbf   :  { %v14010_v34 = vpop.f32.mrf.mxu0 }
 0xcc0   :  { %v14011_v29 = vadd.f32 %v14010_v34, %v13843_v8  ;;  %v14113_v6 = vadd.f32 %v14112_v41, %v14009_v37 }
 0xcc2   :  { %v14115_v11 = vadd.f32 %v14114_v50, %v14011_v29  ;;  %v14976_v39 = vrot.slane %v14113_v6, 1 }
 0xcc4   :  { %v14977_v26 = vrot.slane %v14115_v11, 1  ;;  %v14984_v17 = vadd.f32 %v14976_v39, %v22179_v61 }
 0xcc6   :  { %v14985_v10 = vadd.f32 %v14977_v26, %v22178_v48 }
 0xcc8   :  { %15122 = vtanh.f32 %v14985_v10 }
 0xcc9   :  { %15124 = vtanh.f32 %v14984_v17 }
 0xcd5   :  { %v15123_v61 = vpop.eup %15122 }
 0xcd6   :  { %v14452_v38 = vpop.f32.mrf.mxu1  ;;  %v15125_v5 = vpop.eup %15124  ;;  %v14994_v30 = vmul.f32 0.5, %v15123_v61 }
 0xcd7   :  { %v14992_v27 = vmul.f32 0.5, %v15125_v5 }
 0xcd8   :  { %v14454_v4 = vpop.f32.mrf.mxu1  ;;  %v14995_v14 = vadd.f32 0.5, %v14994_v30 }
 0xcd9   :  { %v14993_v55 = vadd.f32 0.5, %v14992_v27 }
 0xcda   :  { %v15001_v35 = vmul.f32 %v14999_v40, %v14995_v14 }
 0xcdf   :  { %v14220_v59 = vpop.f32.mrf.mxu0 }
 0xce0   :  { %v14453_v63 = vadd.f32 %v14452_v38, %v14220_v59 }
 0xce1   :  { %v14222_v15 = vpop.f32.mrf.mxu0 }
 0xce2   :  { %v14455_v36 = vadd.f32 %v14454_v4, %v14222_v15 }
 0xcf8   :  { %v14695_v51 = vpop.f32.mrf.mxu1 }
 0xcfa   :  { %v14697_v19 = vpop.f32.mrf.mxu1 }
 0xd01   :  { %v14589_v31 = vpop.f32.mrf.mxu0 }
 0xd02   :  { %v14590_v18 = vadd.f32 %v14589_v31, %v14453_v63 }
 0xd03   :  { %v14591_v24 = vpop.f32.mrf.mxu0 }
 0xd04   :  { %v14592_v12 = vadd.f32 %v14591_v24, %v14455_v36  ;;  %v14696_v16 = vadd.f32 %v14695_v51, %v14590_v18 }
 0xd06   :  { %v14698_v9 = vadd.f32 %v14697_v19, %v14592_v12 }
 0xd1a   :  { %v14967_v7 = vpop.f32.mrf.mxu1 }
 0xd1c   :  { %v14969_v0 = vpop.f32.mrf.mxu1 }
 0xd22   :  { %v14863_v45 = vpop.f32.mrf.mxu0 }
 0xd23   :  { %v14864_v33 = vadd.f32 %v14863_v45, %v14696_v16 }
 0xd24   :  { %v14865_v3 = vpop.f32.mrf.mxu0 }
 0xd25   :  { %v14968_v32 = vadd.f32 %v14967_v7, %v14864_v33  ;;  %v14866_v47 = vadd.f32 %v14865_v3, %v14698_v9 }
 0xd27   :  { %v14978_v49 = vrot.slane %v14968_v32, 1  ;;  %v14970_v43 = vadd.f32 %v14969_v0, %v14866_v47 }
 0xd29   :  { %v14986_v48 = vadd.f32 %v14978_v49, %v22180_v42  ;;  %v14979_v22 = vrot.slane %v14970_v43, 1 }
 0xd2b   :  { %15126 = vtanh.f32 %v14986_v48  ;;  %v14987_v13 = vadd.f32 %v14979_v22, %v22181_v2 }
 0xd2d   :  { %15128 = vtanh.f32 %v14987_v13 }
 0xd38   :  { %v15127_v56 = vpop.eup %15126 }
 0xd39   :  { %v15002_v46 = vmul.f32 %v15127_v56, %v14993_v55 }
 0xd3a   :  { %v15129_v42 = vpop.eup %15128 }
 0xd3b   :  { %v15003_v20 = vadd.f32 %v15002_v46, %v15001_v35  ;;  %v14996_v25 = vmul.f32 0.5, %v15129_v42 }
 0xd3d   :  { %15130 = vtanh.f32 %v15003_v20  ;;  %v14997_v57 = vadd.f32 0.5, %v14996_v25 }
 0xd4a   :  { %v15131_v21 = vpop.eup %15130 }
 0xd4b   :  { %v15005_v2 = vmul.f32 %v15131_v21, %v14997_v57 }
 0xd4d   :  { %v15013_v1 = vmul.f32 %v15044_v28, %v15005_v2 }
 0xd4f   :  { %v15015_v53 = vsel %vm15014_vm1, %v15013_v1, 0.0 }
 0xd50   :  { %15016 = vadd.xlane.f32.xlu0 %v15015_v53 }
 0xdd9   :  { %v15017_v23 = vpop.xlane.xlu0 %15016 }
 0xdda   :  { %v15025_v52 = vadd.f32 %v15045_v44, %v15017_v23 }
 0xddc   :  { %15027 = vst.msk [vmem:[#allocation8 - $0x7] sm:$0x80] %vm15026_vm2, %v15025_v52 }
 0xddd   :  { %15183 = shalt.err (!%p15180_p0)
}
 0xdde   :  { %15037 = dma.vmem_to_hbm [thread:$0]  %s15035_s13, 16, %s19555_s6, [#allocation5]  }
 0xddf   :  { %15196 = dma.done.wait [#allocation5], 16  }
 0xde0   :  { %15197 = vsyncadd [#allocation5], 4294967280 }
 0xde1   :  { %15041 = vsyncpa [#allocation4], 1 }
 0xde2   :  { %15042 = vsyncpa [#allocation7], 1 }
 0xde3   :  { %15043 = vsyncpa [#allocation5], 1 }

</bundles_post_ra>
